<compile_context>
chip_gen: v7x
topology: tpu7x:2x2x1
jax: 0.10.0
libtpu: 0.0.40
codegen_flags: <defaults>
</compile_context>

<pallas_src>
import functools
import math

import jax
import jax.numpy as jnp
from jax.experimental import pallas as pl
from jax.experimental.pallas import tpu as pltpu

F32 = jnp.float32
BF16 = jnp.bfloat16
LN_EPS = 1e-5
VMEM = pl.BlockSpec(memory_space=pltpu.MemorySpace.VMEM)


# ---------------------------------------------------------------------------
# In-kernel helpers (pure functions on VMEM values)
# ---------------------------------------------------------------------------
def _mm(x, w, b=None):
    """bf16 matmul on the MXU with f32 accumulation; optional f32 bias."""
    y = jnp.dot(x.astype(BF16), w, preferred_element_type=jnp.float32)
    if b is not None:
        y = y + b
    return y


def _ln(x, g, b):
    """LayerNorm over the last dim (PyTorch semantics, biased variance)."""
    mu = jnp.mean(x, axis=-1, keepdims=True)
    var = jnp.mean(jnp.square(x - mu), axis=-1, keepdims=True)
    return (x - mu) * jax.lax.rsqrt(var + LN_EPS) * g + b


def _softmax_last(s):
    """Numerically-stable softmax along the last dim; EUP reciprocal."""
    s = s - jnp.max(s, axis=-1, keepdims=True)
    p = jnp.exp(s)
    return p * pl.reciprocal(jnp.sum(p, axis=-1, keepdims=True), approx=True)


def _enc_layer(x2, B, S, d, n_head, wqkv, wo, w1, w2, vec):
    """One post-norm TransformerEncoderLayer on a (B*S, d) f32 activation.

    vec rows: 0 bqkv(3d) | 1 bo(d) | 2 ln1_g | 3 ln1_b | 4 b1(ff) | 5 b2(d)
              6 ln2_g | 7 ln2_b
    """
    dh = d // n_head
    scale = 1.0 / math.sqrt(dh)
    bqkv, bo = vec[0:1, :3 * d], vec[1:2, :d]
    ln1_g, ln1_b = vec[2:3, :d], vec[3:4, :d]
    b1, b2 = vec[4:5, :], vec[5:6, :d]
    ln2_g, ln2_b = vec[6:7, :d], vec[7:8, :d]

    # Fused Q/K/V projection; cast activations to bf16 once.
    qkv = _mm(x2, wqkv, bqkv).reshape(B, S, 3 * d)
    qkvb = qkv.astype(BF16)

    # Batch the attention across heads: stack heads along the batch axis
    # (axis-0 concat of static lane slices), then one score einsum and one
    # PV einsum for all B*H head-instances.
    q = jnp.concatenate(
        [qkvb[:, :, h * dh:(h + 1) * dh] for h in range(n_head)], axis=0)
    k = jnp.concatenate(
        [qkvb[:, :, d + h * dh:d + (h + 1) * dh] for h in range(n_head)], axis=0)
    v = jnp.concatenate(
        [qkvb[:, :, 2 * d + h * dh:2 * d + (h + 1) * dh] for h in range(n_head)],
        axis=0)                                                    # (H*B, S, dh)

    s = jnp.einsum("bqd,bkd->bqk", q, k,
                   preferred_element_type=jnp.float32) * scale     # (H*B, S, S)
    p = _softmax_last(s).astype(BF16)
    oh = jnp.einsum("bqk,bkd->bqd", p, v,
                    preferred_element_type=jnp.float32)            # (H*B, S, dh)

    # Re-concatenate heads along lanes -> single (d,d) Wo matmul.
    o = jnp.concatenate([oh[h * B:(h + 1) * B] for h in range(n_head)],
                        axis=-1).reshape(B * S, d)
    attn = _mm(o, wo, bo)

    x2 = _ln(x2 + attn, ln1_g, ln1_b)
    hid = jnp.maximum(_mm(x2, w1, b1), 0.0)
    x2 = _ln(x2 + _mm(hid, w2, b2), ln2_g, ln2_b)
    return x2


# ---------------------------------------------------------------------------
# The single fused kernel
# ---------------------------------------------------------------------------
def _value_net_kernel(box_ref, patch_ref, box_pw_ref, cont_pw_ref, misc_ref,
                      enc_wqkv_ref, enc_wo_ref, enc_w1_ref, enc_w2_ref,
                      enc_vec_ref, dec_sa_ref, dec_ca_ref, dec_w1_ref,
                      dec_w2_ref, dec_vec_ref, head_w1_ref, o_ref, *,
                      box_layers, cont_layers, dec_layers,
                      box_n_head, cont_n_head, dec_n_head, num_patches):
    B, Sb, _ = box_ref.shape
    Sc = patch_ref.shape[1]
    d = box_pw_ref.shape[1]
    np_ = num_patches
    misc = misc_ref[...]                                   # (np_+5, d) f32

    # misc rows: [0:np_) pos_emb | np_ box_proj_b | np_+1 cont_proj_b |
    #            np_+2 value_token | np_+3 head biases (b1[:d/2], b2 at [d/2]) |
    #            np_+4 head w2 row ([:d/2])

    def enc_branch(x3, pw, proj_b, pos, layer_lo, n_layers, n_head):
        b_, s_, f_ = x3.shape
        x2 = _mm(x3.reshape(b_ * s_, f_), pw, proj_b)      # token projection
        if pos is not None:
            x2 = (x2.reshape(b_, s_, d) + pos).reshape(b_ * s_, d)
        for li in range(n_layers):
            l = layer_lo + li
            x2 = _enc_layer(x2, b_, s_, d, n_head,
                            enc_wqkv_ref[l], enc_wo_ref[l],
                            enc_w1_ref[l], enc_w2_ref[l], enc_vec_ref[l])
        return x2.reshape(b_, s_, d)

    # --- BoxEncoder branch ---
    box_tok = enc_branch(box_ref[...], box_pw_ref[...], misc[np_:np_ + 1, :],
                         None, 0, box_layers, box_n_head)
    # --- ContainerEncoder branch (+ learned positional embedding) ---
    # TODO(synk): on v7x the two independent encoder branches could be sharded
    # across the 2 TensorCores via pl.core_map; kept serial for portability.
    cont_tok = enc_branch(patch_ref[...], cont_pw_ref[...],
                          misc[np_ + 1:np_ + 2, :], misc[:np_, :],
                          box_layers, cont_layers, cont_n_head)

    # --- Decoder (memory concat in-kernel) ---
    Sm = Sb + Sc
    memory = jnp.concatenate([box_tok, cont_tok], axis=1)   # (B, Sm, d)
    mem2 = memory.reshape(B * Sm, d)
    t = jnp.broadcast_to(misc[np_ + 2:np_ + 3, :], (B, d))  # value token (B, d)

    dh = d // dec_n_head
    scale = 1.0 / math.sqrt(dh)
    for l in range(dec_layers):
        vec = dec_vec_ref[l]                                 # (13, ff)
        sa_w = dec_sa_ref[l]                                 # (d, 2d): [Wv|Wo]
        ca_w = dec_ca_ref[l]                                 # (d, 4d): [Wq|Wk|Wv|Wo]
        w1l, w2l = dec_w1_ref[l], dec_w2_ref[l]
        sa_bv, sa_bo = vec[0:1, :d], vec[1:2, :d]
        ln1_g, ln1_b = vec[2:3, :d], vec[3:4, :d]
        ca_bq, ca_bkv, ca_bo = vec[4:5, :d], vec[5:6, :2 * d], vec[6:7, :d]
        ln2_g, ln2_b = vec[7:8, :d], vec[8:9, :d]
        b1, b2 = vec[9:10, :], vec[10:11, :d]
        ln3_g, ln3_b = vec[11:12, :d], vec[12:13, :d]

        # Self-attention of a single query/key token: softmax over one key is
        # identity, so it reduces exactly to V-projection then output projection.
        # TODO(synk): this shortcut is only valid for decoder target length 1.
        sa = _mm(_mm(t, sa_w[:, :d], sa_bv), sa_w[:, d:], sa_bo)
        t = _ln(t + sa, ln1_g, ln1_b)

        # Cross-attention, Sq = 1.  Projections on the MXU (K/V fused into one
        # N=2d matmul); scores + weighted V-sum on the VPU/XLU (broadcast
        # multiply + reductions) to avoid M=1 per-head MXU pushes.
        q = _mm(t, ca_w[:, :d], ca_bq)                       # (B, d)
        kv = _mm(mem2, ca_w[:, d:3 * d], ca_bkv).reshape(B, Sm, 2 * d)
        k, v = kv[:, :, :d], kv[:, :, d:]
        qk = q[:, None, :] * k                               # (B, Sm, d)
        score_cols = [jnp.sum(qk[:, :, h * dh:(h + 1) * dh], axis=-1,
                              keepdims=True) for h in range(dec_n_head)]
        s = jnp.concatenate(score_cols, axis=-1) * scale     # (B, Sm, H)
        s = s - jnp.max(s, axis=1, keepdims=True)
        p = jnp.exp(s)
        p = p * pl.reciprocal(jnp.sum(p, axis=1, keepdims=True), approx=True)
        head_outs = [jnp.sum(p[:, :, h:h + 1] * v[:, :, h * dh:(h + 1) * dh],
                             axis=1) for h in range(dec_n_head)]
        o = jnp.concatenate(head_outs, axis=-1)               # (B, d)
        t = _ln(t + _mm(o, ca_w[:, 3 * d:], ca_bo), ln2_g, ln2_b)

        # Feed-forward.
        hid = jnp.maximum(_mm(t, w1l, b1), 0.0)
        t = _ln(t + _mm(hid, w2l, b2), ln3_g, ln3_b)

    # --- MLP head: (d -> d/2 -> 1); the final N=1 projection is a VPU dot ---
    d2 = d // 2
    h1 = jnp.maximum(_mm(t, head_w1_ref[...], misc[np_ + 3:np_ + 4, :d2]), 0.0)
    w2row = misc[np_ + 4:np_ + 5, :d2]                        # (1, d/2)
    b2s = misc[np_ + 3:np_ + 4, d2:d2 + 1]                    # (1, 1)
    val = jnp.sum(h1 * w2row, axis=-1, keepdims=True) + b2s   # (B, 1)
    o_ref[...] = val.astype(o_ref.dtype)


# ---------------------------------------------------------------------------
# Parameter init (xavier-uniform for weights, zeros for biases) with packing.
# Matmul weights in bf16; biases / LN params / pos-emb / token rows in f32.
# ---------------------------------------------------------------------------
def _xavier(key, shape):
    fan_in, fan_out = shape[0], shape[-1]
    bound = math.sqrt(6.0 / (fan_in + fan_out))
    return jax.random.uniform(key, shape, F32, -bound, bound)


def init_params(key, cfg):
    d, ff = cfg["d_model"], cfg["dim_feedforward"]
    Fb = cfg["box_feat"]
    ph, pw = cfg["patch_h"], cfg["patch_w"]
    Fp = cfg["feature_dim"] * ph * pw
    n_patches = (cfg["orig_h"] // ph) * (cfg["orig_w"] // pw)
    Lb, Lc, Ld = cfg["box_layers"], cfg["cont_layers"], cfg["dec_layers"]
    Le = Lb + Lc
    keys = jax.random.split(key, 8)

    # Encoder layer stacks (box layers first, then container layers).
    def enc_layer_mats(k):
        ks = jax.random.split(k, 6)
        wqkv = jnp.concatenate([_xavier(ks[0], (d, d)), _xavier(ks[1], (d, d)),
                                _xavier(ks[2], (d, d))], axis=1)
        return (wqkv, _xavier(ks[3], (d, d)),
                _xavier(ks[4], (d, ff)), _xavier(ks[5], (ff, d)))

    emats = [enc_layer_mats(k) for k in jax.random.split(keys[0], Le)]
    enc_wqkv = jnp.stack([m[0] for m in emats]).astype(BF16)
    enc_wo = jnp.stack([m[1] for m in emats]).astype(BF16)
    enc_w1 = jnp.stack([m[2] for m in emats]).astype(BF16)
    enc_w2 = jnp.stack([m[3] for m in emats]).astype(BF16)
    evec = jnp.zeros((8, ff), F32).at[2, :d].set(1.0).at[6, :d].set(1.0)
    enc_vec = jnp.tile(evec[None], (Le, 1, 1))

    # Decoder layer stacks.
    def dec_layer_mats(k):
        ks = jax.random.split(k, 8)
        sa = jnp.concatenate([_xavier(ks[0], (d, d)), _xavier(ks[1], (d, d))],
                             axis=1)
        ca = jnp.concatenate([_xavier(ks[2], (d, d)), _xavier(ks[3], (d, d)),
                              _xavier(ks[4], (d, d)), _xavier(ks[5], (d, d))],
                             axis=1)
        return (sa, ca, _xavier(ks[6], (d, ff)), _xavier(ks[7], (ff, d)))

    dmats = [dec_layer_mats(k) for k in jax.random.split(keys[1], Ld)]
    dec_sa_w = jnp.stack([m[0] for m in dmats]).astype(BF16)
    dec_ca_w = jnp.stack([m[1] for m in dmats]).astype(BF16)
    dec_w1 = jnp.stack([m[2] for m in dmats]).astype(BF16)
    dec_w2 = jnp.stack([m[3] for m in dmats]).astype(BF16)
    dvec = (jnp.zeros((13, ff), F32)
            .at[2, :d].set(1.0).at[7, :d].set(1.0).at[11, :d].set(1.0))
    dec_vec = jnp.tile(dvec[None], (Ld, 1, 1))

    # Packed misc array: pos-emb, proj biases, value token, head biases, w2 row.
    misc = jnp.zeros((n_patches + 5, d), F32)
    misc = misc.at[:n_patches].set(_xavier(keys[2], (n_patches, d)))
    misc = misc.at[n_patches + 2].set(_xavier(keys[3], (1, d))[0])
    misc = misc.at[n_patches + 4, :d // 2].set(
        _xavier(keys[4], (d // 2, 1))[:, 0])

    return dict(
        box_proj_w=_xavier(keys[5], (Fb, d)).astype(BF16),
        cont_proj_w=_xavier(keys[6], (Fp, d)).astype(BF16),
        misc=misc,
        enc_wqkv=enc_wqkv, enc_wo=enc_wo, enc_w1=enc_w1, enc_w2=enc_w2,
        enc_vec=enc_vec,
        dec_sa_w=dec_sa_w, dec_ca_w=dec_ca_w, dec_w1=dec_w1, dec_w2=dec_w2,
        dec_vec=dec_vec,
        head_w1=_xavier(keys[7], (d, d // 2)).astype(BF16),
    )


# ---------------------------------------------------------------------------
# ValueNetwork forward: ONE fused pallas_call
# ---------------------------------------------------------------------------
def value_network_forward(params, container_state, box_state, cfg):
    B, C, H, W = container_state.shape
    ph, pw = cfg["patch_h"], cfg["patch_w"]
    nh, nw = H // ph, W // pw
    # TODO(synk): patchify stays as tiny XLA glue; folding it in would need
    # in-kernel slicing of a non-lane-aligned NCHW ref (W=20).
    patches = (container_state.reshape(B, C, nh, ph, nw, pw)
               .transpose(0, 2, 4, 1, 3, 5)
               .reshape(B, nh * nw, C * ph * pw))

    kernel = functools.partial(
        _value_net_kernel,
        box_layers=cfg["box_layers"], cont_layers=cfg["cont_layers"],
        dec_layers=cfg["dec_layers"], box_n_head=cfg["box_n_head"],
        cont_n_head=cfg["cont_n_head"], dec_n_head=cfg["dec_n_head"],
        num_patches=nh * nw)

    inputs = (box_state, patches,
              params["box_proj_w"], params["cont_proj_w"], params["misc"],
              params["enc_wqkv"], params["enc_wo"], params["enc_w1"],
              params["enc_w2"], params["enc_vec"],
              params["dec_sa_w"], params["dec_ca_w"], params["dec_w1"],
              params["dec_w2"], params["dec_vec"],
              params["head_w1"])

    out = pl.pallas_call(
        kernel,
        out_shape=jax.ShapeDtypeStruct((B, 1), F32),
        in_specs=[VMEM] * len(inputs),
        out_specs=VMEM,
    )(*inputs)
    return out.reshape(B)


if __name__ == "__main__":
    cfg = dict(
        d_model=128, dim_feedforward=512,
        box_n_head=4, box_layers=2, box_feat=6,
        cont_n_head=4, cont_layers=2, feature_dim=7,
        orig_h=20, orig_w=20, patch_h=10, patch_w=10,
        dec_n_head=8, dec_layers=1,
    )
    key = jax.random.PRNGKey(0)
    kp, kc, kb = jax.random.split(key, 3)

    params = init_params(kp, cfg)

    B = 2
    container_state = jax.random.normal(
        kc, (B, cfg["feature_dim"], cfg["orig_h"], cfg["orig_w"]), F32)  # NCHW
    box_state = jax.random.normal(kb, (B, 8, cfg["box_feat"]), F32)

    fwd = jax.jit(functools.partial(value_network_forward, cfg=cfg))
    value = fwd(params, container_state, box_state)
    value = jax.block_until_ready(value)

    assert value.shape == (B,)
    assert bool(jnp.all(jnp.isfinite(value)))
    print("KERNEL_OK")
</pallas_src>

<mosaic_0001>
module attributes {stable_mosaic.version = 11 : i64} {
  func.func @_value_net_kernel(%arg0: memref<2x8x6xf32, #tpu.memory_space<vmem>>, %arg1: memref<2x4x700xf32, #tpu.memory_space<vmem>>, %arg2: memref<6x128xbf16, #tpu.memory_space<vmem>>, %arg3: memref<700x128xbf16, #tpu.memory_space<vmem>>, %arg4: memref<9x128xf32, #tpu.memory_space<vmem>>, %arg5: memref<4x128x384xbf16, #tpu.memory_space<vmem>>, %arg6: memref<4x128x128xbf16, #tpu.memory_space<vmem>>, %arg7: memref<4x128x512xbf16, #tpu.memory_space<vmem>>, %arg8: memref<4x512x128xbf16, #tpu.memory_space<vmem>>, %arg9: memref<4x8x512xf32, #tpu.memory_space<vmem>>, %arg10: memref<1x128x256xbf16, #tpu.memory_space<vmem>>, %arg11: memref<1x128x512xbf16, #tpu.memory_space<vmem>>, %arg12: memref<1x128x512xbf16, #tpu.memory_space<vmem>>, %arg13: memref<1x512x128xbf16, #tpu.memory_space<vmem>>, %arg14: memref<1x13x512xf32, #tpu.memory_space<vmem>>, %arg15: memref<128x64xbf16, #tpu.memory_space<vmem>>, %arg16: memref<2x1xf32, #tpu.memory_space<vmem>>) attributes {dimension_semantics = [], scalar_prefetch = 0 : i64, scratch_operands = 0 : i64, tpu.core_type = #tpu.core_type<tc>} {
    %c0 = arith.constant 0 : index
    %c0_0 = arith.constant 0 : index
    %0 = vector.load %arg4[%c0, %c0_0] : memref<9x128xf32, #tpu.memory_space<vmem>>, vector<9x128xf32>
    %c0_1 = arith.constant 0 : index
    %c0_2 = arith.constant 0 : index
    %c0_3 = arith.constant 0 : index
    %1 = vector.load %arg0[%c0_1, %c0_2, %c0_3] : memref<2x8x6xf32, #tpu.memory_space<vmem>>, vector<2x8x6xf32>
    %c0_4 = arith.constant 0 : index
    %c0_5 = arith.constant 0 : index
    %2 = vector.load %arg2[%c0_4, %c0_5] : memref<6x128xbf16, #tpu.memory_space<vmem>>, vector<6x128xbf16>
    %3 = vector.extract_strided_slice %0 {offsets = [4, 0], sizes = [1, 128], strides = [1, 1]} : vector<9x128xf32> to vector<1x128xf32>
    %4 = vector.shape_cast %1 : vector<2x8x6xf32> to vector<16x6xf32>
    %5 = arith.truncf %4 : vector<16x6xf32> to vector<16x6xbf16>
    %cst = arith.constant dense<0.000000e+00> : vector<16x128xf32>
    %6 = tpu.matmul %5, %2, %cst {dimension_numbers = #tpu.dot_dimension_numbers<[1], [0], [0], [1], [0, 0, 1, 1], [], []>} : vector<16x6xbf16>, vector<6x128xbf16>, vector<16x128xf32> -> vector<16x128xf32>
    %7 = vector.broadcast %3 : vector<1x128xf32> to vector<16x128xf32>
    %8 = arith.addf %6, %7 : vector<16x128xf32>
    %c0_6 = arith.constant 0 : index
    %c0_7 = arith.constant 0 : index
    %c0_8 = arith.constant 0 : index
    %9 = vector.load %arg5[%c0_6, %c0_7, %c0_8] : memref<4x128x384xbf16, #tpu.memory_space<vmem>>, vector<1x128x384xbf16>
    %10 = vector.shape_cast %9 : vector<1x128x384xbf16> to vector<128x384xbf16>
    %c0_9 = arith.constant 0 : index
    %c0_10 = arith.constant 0 : index
    %c0_11 = arith.constant 0 : index
    %11 = vector.load %arg6[%c0_9, %c0_10, %c0_11] : memref<4x128x128xbf16, #tpu.memory_space<vmem>>, vector<1x128x128xbf16>
    %12 = vector.shape_cast %11 : vector<1x128x128xbf16> to vector<128x128xbf16>
    %c0_12 = arith.constant 0 : index
    %c0_13 = arith.constant 0 : index
    %c0_14 = arith.constant 0 : index
    %13 = vector.load %arg7[%c0_12, %c0_13, %c0_14] : memref<4x128x512xbf16, #tpu.memory_space<vmem>>, vector<1x128x512xbf16>
    %14 = vector.shape_cast %13 : vector<1x128x512xbf16> to vector<128x512xbf16>
    %c0_15 = arith.constant 0 : index
    %c0_16 = arith.constant 0 : index
    %c0_17 = arith.constant 0 : index
    %15 = vector.load %arg8[%c0_15, %c0_16, %c0_17] : memref<4x512x128xbf16, #tpu.memory_space<vmem>>, vector<1x512x128xbf16>
    %16 = vector.shape_cast %15 : vector<1x512x128xbf16> to vector<512x128xbf16>
    %c0_18 = arith.constant 0 : index
    %c0_19 = arith.constant 0 : index
    %c0_20 = arith.constant 0 : index
    %17 = vector.load %arg9[%c0_18, %c0_19, %c0_20] : memref<4x8x512xf32, #tpu.memory_space<vmem>>, vector<1x8x512xf32>
    %18 = vector.shape_cast %17 : vector<1x8x512xf32> to vector<8x512xf32>
    %19 = vector.extract_strided_slice %18 {offsets = [0, 0], sizes = [1, 384], strides = [1, 1]} : vector<8x512xf32> to vector<1x384xf32>
    %20 = vector.extract_strided_slice %18 {offsets = [1, 0], sizes = [1, 128], strides = [1, 1]} : vector<8x512xf32> to vector<1x128xf32>
    %21 = vector.extract_strided_slice %18 {offsets = [2, 0], sizes = [1, 128], strides = [1, 1]} : vector<8x512xf32> to vector<1x128xf32>
    %22 = vector.extract_strided_slice %18 {offsets = [3, 0], sizes = [1, 128], strides = [1, 1]} : vector<8x512xf32> to vector<1x128xf32>
    %23 = vector.extract_strided_slice %18 {offsets = [4, 0], sizes = [1, 512], strides = [1, 1]} : vector<8x512xf32> to vector<1x512xf32>
    %24 = vector.extract_strided_slice %18 {offsets = [5, 0], sizes = [1, 128], strides = [1, 1]} : vector<8x512xf32> to vector<1x128xf32>
    %25 = vector.extract_strided_slice %18 {offsets = [6, 0], sizes = [1, 128], strides = [1, 1]} : vector<8x512xf32> to vector<1x128xf32>
    %26 = vector.extract_strided_slice %18 {offsets = [7, 0], sizes = [1, 128], strides = [1, 1]} : vector<8x512xf32> to vector<1x128xf32>
    %27 = arith.truncf %8 : vector<16x128xf32> to vector<16x128xbf16>
    %cst_21 = arith.constant dense<0.000000e+00> : vector<16x384xf32>
    %28 = tpu.matmul %27, %10, %cst_21 {dimension_numbers = #tpu.dot_dimension_numbers<[1], [0], [0], [1], [0, 0, 1, 1], [], []>} : vector<16x128xbf16>, vector<128x384xbf16>, vector<16x384xf32> -> vector<16x384xf32>
    %29 = vector.broadcast %19 : vector<1x384xf32> to vector<16x384xf32>
    %30 = arith.addf %28, %29 : vector<16x384xf32>
    %31 = vector.shape_cast %30 : vector<16x384xf32> to vector<2x8x384xf32>
    %32 = arith.truncf %31 : vector<2x8x384xf32> to vector<2x8x384xbf16>
    %33 = vector.extract_strided_slice %32 {offsets = [0, 0, 0], sizes = [2, 8, 32], strides = [1, 1, 1]} : vector<2x8x384xbf16> to vector<2x8x32xbf16>
    %34 = vector.extract_strided_slice %32 {offsets = [0, 0, 32], sizes = [2, 8, 32], strides = [1, 1, 1]} : vector<2x8x384xbf16> to vector<2x8x32xbf16>
    %35 = vector.extract_strided_slice %32 {offsets = [0, 0, 64], sizes = [2, 8, 32], strides = [1, 1, 1]} : vector<2x8x384xbf16> to vector<2x8x32xbf16>
    %36 = vector.extract_strided_slice %32 {offsets = [0, 0, 96], sizes = [2, 8, 32], strides = [1, 1, 1]} : vector<2x8x384xbf16> to vector<2x8x32xbf16>
    %37 = tpu.concatenate %33, %34, %35, %36 in 0 : vector<2x8x32xbf16>, vector<2x8x32xbf16>, vector<2x8x32xbf16>, vector<2x8x32xbf16> -> vector<8x8x32xbf16>
    %38 = vector.extract_strided_slice %32 {offsets = [0, 0, 128], sizes = [2, 8, 32], strides = [1, 1, 1]} : vector<2x8x384xbf16> to vector<2x8x32xbf16>
    %39 = vector.extract_strided_slice %32 {offsets = [0, 0, 160], sizes = [2, 8, 32], strides = [1, 1, 1]} : vector<2x8x384xbf16> to vector<2x8x32xbf16>
    %40 = vector.extract_strided_slice %32 {offsets = [0, 0, 192], sizes = [2, 8, 32], strides = [1, 1, 1]} : vector<2x8x384xbf16> to vector<2x8x32xbf16>
    %41 = vector.extract_strided_slice %32 {offsets = [0, 0, 224], sizes = [2, 8, 32], strides = [1, 1, 1]} : vector<2x8x384xbf16> to vector<2x8x32xbf16>
    %42 = tpu.concatenate %38, %39, %40, %41 in 0 : vector<2x8x32xbf16>, vector<2x8x32xbf16>, vector<2x8x32xbf16>, vector<2x8x32xbf16> -> vector<8x8x32xbf16>
    %43 = vector.extract_strided_slice %32 {offsets = [0, 0, 256], sizes = [2, 8, 32], strides = [1, 1, 1]} : vector<2x8x384xbf16> to vector<2x8x32xbf16>
    %44 = vector.extract_strided_slice %32 {offsets = [0, 0, 288], sizes = [2, 8, 32], strides = [1, 1, 1]} : vector<2x8x384xbf16> to vector<2x8x32xbf16>
    %45 = vector.extract_strided_slice %32 {offsets = [0, 0, 320], sizes = [2, 8, 32], strides = [1, 1, 1]} : vector<2x8x384xbf16> to vector<2x8x32xbf16>
    %46 = vector.extract_strided_slice %32 {offsets = [0, 0, 352], sizes = [2, 8, 32], strides = [1, 1, 1]} : vector<2x8x384xbf16> to vector<2x8x32xbf16>
    %47 = tpu.concatenate %43, %44, %45, %46 in 0 : vector<2x8x32xbf16>, vector<2x8x32xbf16>, vector<2x8x32xbf16>, vector<2x8x32xbf16> -> vector<8x8x32xbf16>
    "tpu.trace_start"() <{level = 10 : i32, message = "bqd,bkd->bqk"}> : () -> ()
    %cst_22 = arith.constant dense<0.000000e+00> : vector<8x8x8xf32>
    %48 = tpu.matmul %37, %42, %cst_22 {dimension_numbers = #tpu.dot_dimension_numbers<[2], [2], [1], [1], [0, 0, 0, 1, 1, 1], [0], [0]>} : vector<8x8x32xbf16>, vector<8x8x32xbf16>, vector<8x8x8xf32> -> vector<8x8x8xf32>
    "tpu.trace_stop"() : () -> ()
    %cst_23 = arith.constant 0.176776692 : f32
    %49 = vector.broadcast %cst_23 : f32 to vector<8x8x8xf32>
    %50 = arith.mulf %48, %49 : vector<8x8x8xf32>
    %cst_24 = arith.constant dense<0xFF800000> : vector<8x8xf32>
    %51 = vector.multi_reduction <maximumf>, %50, %cst_24 [2] : vector<8x8x8xf32> to vector<8x8xf32>
    %52 = vector.shape_cast %51 : vector<8x8xf32> to vector<8x8x1xf32>
    %53 = vector.broadcast %52 : vector<8x8x1xf32> to vector<8x8x8xf32>
    %54 = arith.subf %50, %53 : vector<8x8x8xf32>
    %55 = math.exp %54 : vector<8x8x8xf32>
    %cst_25 = arith.constant dense<0.000000e+00> : vector<8x8xf32>
    %56 = vector.multi_reduction <add>, %55, %cst_25 [2] : vector<8x8x8xf32> to vector<8x8xf32>
    %57 = vector.shape_cast %56 : vector<8x8xf32> to vector<8x8x1xf32>
    %58 = tpu.reciprocal %57 {approx = true} : vector<8x8x1xf32> -> vector<8x8x1xf32>
    %59 = vector.broadcast %58 : vector<8x8x1xf32> to vector<8x8x8xf32>
    %60 = arith.mulf %55, %59 : vector<8x8x8xf32>
    %61 = arith.truncf %60 : vector<8x8x8xf32> to vector<8x8x8xbf16>
    "tpu.trace_start"() <{level = 10 : i32, message = "bqk,bkd->bqd"}> : () -> ()
    %cst_26 = arith.constant dense<0.000000e+00> : vector<8x8x32xf32>
    %62 = tpu.matmul %61, %47, %cst_26 {dimension_numbers = #tpu.dot_dimension_numbers<[2], [1], [1], [2], [0, 0, 0, 1, 1, 2], [0], [0]>} : vector<8x8x8xbf16>, vector<8x8x32xbf16>, vector<8x8x32xf32> -> vector<8x8x32xf32>
    "tpu.trace_stop"() : () -> ()
    %63 = vector.extract_strided_slice %62 {offsets = [0, 0, 0], sizes = [2, 8, 32], strides = [1, 1, 1]} : vector<8x8x32xf32> to vector<2x8x32xf32>
    %64 = vector.extract_strided_slice %62 {offsets = [2, 0, 0], sizes = [2, 8, 32], strides = [1, 1, 1]} : vector<8x8x32xf32> to vector<2x8x32xf32>
    %65 = vector.extract_strided_slice %62 {offsets = [4, 0, 0], sizes = [2, 8, 32], strides = [1, 1, 1]} : vector<8x8x32xf32> to vector<2x8x32xf32>
    %66 = vector.extract_strided_slice %62 {offsets = [6, 0, 0], sizes = [2, 8, 32], strides = [1, 1, 1]} : vector<8x8x32xf32> to vector<2x8x32xf32>
    %67 = tpu.concatenate %63, %64, %65, %66 in 2 : vector<2x8x32xf32>, vector<2x8x32xf32>, vector<2x8x32xf32>, vector<2x8x32xf32> -> vector<2x8x128xf32>
    %68 = vector.shape_cast %67 : vector<2x8x128xf32> to vector<16x128xf32>
    %69 = arith.truncf %68 : vector<16x128xf32> to vector<16x128xbf16>
    %cst_27 = arith.constant dense<0.000000e+00> : vector<16x128xf32>
    %70 = tpu.matmul %69, %12, %cst_27 {dimension_numbers = #tpu.dot_dimension_numbers<[1], [0], [0], [1], [0, 0, 1, 1], [], []>} : vector<16x128xbf16>, vector<128x128xbf16>, vector<16x128xf32> -> vector<16x128xf32>
    %71 = vector.broadcast %20 : vector<1x128xf32> to vector<16x128xf32>
    %72 = arith.addf %70, %71 : vector<16x128xf32>
    %73 = arith.addf %8, %72 : vector<16x128xf32>
    %cst_28 = arith.constant dense<0.000000e+00> : vector<16xf32>
    %74 = vector.multi_reduction <add>, %73, %cst_28 [1] : vector<16x128xf32> to vector<16xf32>
    %75 = vector.shape_cast %74 : vector<16xf32> to vector<16x1xf32>
    %cst_29 = arith.constant 1.280000e+02 : f32
    %76 = vector.broadcast %cst_29 : f32 to vector<16x1xf32>
    %77 = arith.divf %75, %76 : vector<16x1xf32>
    %78 = vector.broadcast %77 : vector<16x1xf32> to vector<16x128xf32>
    %79 = arith.subf %73, %78 : vector<16x128xf32>
    %80 = arith.mulf %79, %79 : vector<16x128xf32>
    %cst_30 = arith.constant dense<0.000000e+00> : vector<16xf32>
    %81 = vector.multi_reduction <add>, %80, %cst_30 [1] : vector<16x128xf32> to vector<16xf32>
    %82 = vector.shape_cast %81 : vector<16xf32> to vector<16x1xf32>
    %cst_31 = arith.constant 1.280000e+02 : f32
    %83 = vector.broadcast %cst_31 : f32 to vector<16x1xf32>
    %84 = arith.divf %82, %83 : vector<16x1xf32>
    %85 = vector.broadcast %77 : vector<16x1xf32> to vector<16x128xf32>
    %86 = arith.subf %73, %85 : vector<16x128xf32>
    %cst_32 = arith.constant 9.99999974E-6 : f32
    %87 = vector.broadcast %cst_32 : f32 to vector<16x1xf32>
    %88 = arith.addf %84, %87 : vector<16x1xf32>
    %89 = math.rsqrt %88 : vector<16x1xf32>
    %90 = vector.broadcast %89 : vector<16x1xf32> to vector<16x128xf32>
    %91 = arith.mulf %86, %90 : vector<16x128xf32>
    %92 = vector.broadcast %21 : vector<1x128xf32> to vector<16x128xf32>
    %93 = arith.mulf %91, %92 : vector<16x128xf32>
    %94 = vector.broadcast %22 : vector<1x128xf32> to vector<16x128xf32>
    %95 = arith.addf %93, %94 : vector<16x128xf32>
    %96 = arith.truncf %95 : vector<16x128xf32> to vector<16x128xbf16>
    %cst_33 = arith.constant dense<0.000000e+00> : vector<16x512xf32>
    %97 = tpu.matmul %96, %14, %cst_33 {dimension_numbers = #tpu.dot_dimension_numbers<[1], [0], [0], [1], [0, 0, 1, 1], [], []>} : vector<16x128xbf16>, vector<128x512xbf16>, vector<16x512xf32> -> vector<16x512xf32>
    %98 = vector.broadcast %23 : vector<1x512xf32> to vector<16x512xf32>
    %99 = arith.addf %97, %98 : vector<16x512xf32>
    %cst_34 = arith.constant 0.000000e+00 : f32
    %100 = vector.broadcast %cst_34 : f32 to vector<16x512xf32>
    %101 = arith.maximumf %99, %100 : vector<16x512xf32>
    %102 = arith.truncf %101 : vector<16x512xf32> to vector<16x512xbf16>
    %cst_35 = arith.constant dense<0.000000e+00> : vector<16x128xf32>
    %103 = tpu.matmul %102, %16, %cst_35 {dimension_numbers = #tpu.dot_dimension_numbers<[1], [0], [0], [1], [0, 0, 1, 1], [], []>} : vector<16x512xbf16>, vector<512x128xbf16>, vector<16x128xf32> -> vector<16x128xf32>
    %104 = vector.broadcast %24 : vector<1x128xf32> to vector<16x128xf32>
    %105 = arith.addf %103, %104 : vector<16x128xf32>
    %106 = arith.addf %95, %105 : vector<16x128xf32>
    %cst_36 = arith.constant dense<0.000000e+00> : vector<16xf32>
    %107 = vector.multi_reduction <add>, %106, %cst_36 [1] : vector<16x128xf32> to vector<16xf32>
    %108 = vector.shape_cast %107 : vector<16xf32> to vector<16x1xf32>
    %cst_37 = arith.constant 1.280000e+02 : f32
    %109 = vector.broadcast %cst_37 : f32 to vector<16x1xf32>
    %110 = arith.divf %108, %109 : vector<16x1xf32>
    %111 = vector.broadcast %110 : vector<16x1xf32> to vector<16x128xf32>
    %112 = arith.subf %106, %111 : vector<16x128xf32>
    %113 = arith.mulf %112, %112 : vector<16x128xf32>
    %cst_38 = arith.constant dense<0.000000e+00> : vector<16xf32>
    %114 = vector.multi_reduction <add>, %113, %cst_38 [1] : vector<16x128xf32> to vector<16xf32>
    %115 = vector.shape_cast %114 : vector<16xf32> to vector<16x1xf32>
    %cst_39 = arith.constant 1.280000e+02 : f32
    %116 = vector.broadcast %cst_39 : f32 to vector<16x1xf32>
    %117 = arith.divf %115, %116 : vector<16x1xf32>
    %118 = vector.broadcast %110 : vector<16x1xf32> to vector<16x128xf32>
    %119 = arith.subf %106, %118 : vector<16x128xf32>
    %cst_40 = arith.constant 9.99999974E-6 : f32
    %120 = vector.broadcast %cst_40 : f32 to vector<16x1xf32>
    %121 = arith.addf %117, %120 : vector<16x1xf32>
    %122 = math.rsqrt %121 : vector<16x1xf32>
    %123 = vector.broadcast %122 : vector<16x1xf32> to vector<16x128xf32>
    %124 = arith.mulf %119, %123 : vector<16x128xf32>
    %125 = vector.broadcast %25 : vector<1x128xf32> to vector<16x128xf32>
    %126 = arith.mulf %124, %125 : vector<16x128xf32>
    %127 = vector.broadcast %26 : vector<1x128xf32> to vector<16x128xf32>
    %128 = arith.addf %126, %127 : vector<16x128xf32>
    %c1 = arith.constant 1 : index
    %c0_41 = arith.constant 0 : index
    %c0_42 = arith.constant 0 : index
    %129 = vector.load %arg5[%c1, %c0_41, %c0_42] : memref<4x128x384xbf16, #tpu.memory_space<vmem>>, vector<1x128x384xbf16>
    %130 = vector.shape_cast %129 : vector<1x128x384xbf16> to vector<128x384xbf16>
    %c1_43 = arith.constant 1 : index
    %c0_44 = arith.constant 0 : index
    %c0_45 = arith.constant 0 : index
    %131 = vector.load %arg6[%c1_43, %c0_44, %c0_45] : memref<4x128x128xbf16, #tpu.memory_space<vmem>>, vector<1x128x128xbf16>
    %132 = vector.shape_cast %131 : vector<1x128x128xbf16> to vector<128x128xbf16>
    %c1_46 = arith.constant 1 : index
    %c0_47 = arith.constant 0 : index
    %c0_48 = arith.constant 0 : index
    %133 = vector.load %arg7[%c1_46, %c0_47, %c0_48] : memref<4x128x512xbf16, #tpu.memory_space<vmem>>, vector<1x128x512xbf16>
    %134 = vector.shape_cast %133 : vector<1x128x512xbf16> to vector<128x512xbf16>
    %c1_49 = arith.constant 1 : index
    %c0_50 = arith.constant 0 : index
    %c0_51 = arith.constant 0 : index
    %135 = vector.load %arg8[%c1_49, %c0_50, %c0_51] : memref<4x512x128xbf16, #tpu.memory_space<vmem>>, vector<1x512x128xbf16>
    %136 = vector.shape_cast %135 : vector<1x512x128xbf16> to vector<512x128xbf16>
    %c1_52 = arith.constant 1 : index
    %c0_53 = arith.constant 0 : index
    %c0_54 = arith.constant 0 : index
    %137 = vector.load %arg9[%c1_52, %c0_53, %c0_54] : memref<4x8x512xf32, #tpu.memory_space<vmem>>, vector<1x8x512xf32>
    %138 = vector.shape_cast %137 : vector<1x8x512xf32> to vector<8x512xf32>
    %139 = vector.extract_strided_slice %138 {offsets = [0, 0], sizes = [1, 384], strides = [1, 1]} : vector<8x512xf32> to vector<1x384xf32>
    %140 = vector.extract_strided_slice %138 {offsets = [1, 0], sizes = [1, 128], strides = [1, 1]} : vector<8x512xf32> to vector<1x128xf32>
    %141 = vector.extract_strided_slice %138 {offsets = [2, 0], sizes = [1, 128], strides = [1, 1]} : vector<8x512xf32> to vector<1x128xf32>
    %142 = vector.extract_strided_slice %138 {offsets = [3, 0], sizes = [1, 128], strides = [1, 1]} : vector<8x512xf32> to vector<1x128xf32>
    %143 = vector.extract_strided_slice %138 {offsets = [4, 0], sizes = [1, 512], strides = [1, 1]} : vector<8x512xf32> to vector<1x512xf32>
    %144 = vector.extract_strided_slice %138 {offsets = [5, 0], sizes = [1, 128], strides = [1, 1]} : vector<8x512xf32> to vector<1x128xf32>
    %145 = vector.extract_strided_slice %138 {offsets = [6, 0], sizes = [1, 128], strides = [1, 1]} : vector<8x512xf32> to vector<1x128xf32>
    %146 = vector.extract_strided_slice %138 {offsets = [7, 0], sizes = [1, 128], strides = [1, 1]} : vector<8x512xf32> to vector<1x128xf32>
    %147 = arith.truncf %128 : vector<16x128xf32> to vector<16x128xbf16>
    %cst_55 = arith.constant dense<0.000000e+00> : vector<16x384xf32>
    %148 = tpu.matmul %147, %130, %cst_55 {dimension_numbers = #tpu.dot_dimension_numbers<[1], [0], [0], [1], [0, 0, 1, 1], [], []>} : vector<16x128xbf16>, vector<128x384xbf16>, vector<16x384xf32> -> vector<16x384xf32>
    %149 = vector.broadcast %139 : vector<1x384xf32> to vector<16x384xf32>
    %150 = arith.addf %148, %149 : vector<16x384xf32>
    %151 = vector.shape_cast %150 : vector<16x384xf32> to vector<2x8x384xf32>
    %152 = arith.truncf %151 : vector<2x8x384xf32> to vector<2x8x384xbf16>
    %153 = vector.extract_strided_slice %152 {offsets = [0, 0, 0], sizes = [2, 8, 32], strides = [1, 1, 1]} : vector<2x8x384xbf16> to vector<2x8x32xbf16>
    %154 = vector.extract_strided_slice %152 {offsets = [0, 0, 32], sizes = [2, 8, 32], strides = [1, 1, 1]} : vector<2x8x384xbf16> to vector<2x8x32xbf16>
    %155 = vector.extract_strided_slice %152 {offsets = [0, 0, 64], sizes = [2, 8, 32], strides = [1, 1, 1]} : vector<2x8x384xbf16> to vector<2x8x32xbf16>
    %156 = vector.extract_strided_slice %152 {offsets = [0, 0, 96], sizes = [2, 8, 32], strides = [1, 1, 1]} : vector<2x8x384xbf16> to vector<2x8x32xbf16>
    %157 = tpu.concatenate %153, %154, %155, %156 in 0 : vector<2x8x32xbf16>, vector<2x8x32xbf16>, vector<2x8x32xbf16>, vector<2x8x32xbf16> -> vector<8x8x32xbf16>
    %158 = vector.extract_strided_slice %152 {offsets = [0, 0, 128], sizes = [2, 8, 32], strides = [1, 1, 1]} : vector<2x8x384xbf16> to vector<2x8x32xbf16>
    %159 = vector.extract_strided_slice %152 {offsets = [0, 0, 160], sizes = [2, 8, 32], strides = [1, 1, 1]} : vector<2x8x384xbf16> to vector<2x8x32xbf16>
    %160 = vector.extract_strided_slice %152 {offsets = [0, 0, 192], sizes = [2, 8, 32], strides = [1, 1, 1]} : vector<2x8x384xbf16> to vector<2x8x32xbf16>
    %161 = vector.extract_strided_slice %152 {offsets = [0, 0, 224], sizes = [2, 8, 32], strides = [1, 1, 1]} : vector<2x8x384xbf16> to vector<2x8x32xbf16>
    %162 = tpu.concatenate %158, %159, %160, %161 in 0 : vector<2x8x32xbf16>, vector<2x8x32xbf16>, vector<2x8x32xbf16>, vector<2x8x32xbf16> -> vector<8x8x32xbf16>
    %163 = vector.extract_strided_slice %152 {offsets = [0, 0, 256], sizes = [2, 8, 32], strides = [1, 1, 1]} : vector<2x8x384xbf16> to vector<2x8x32xbf16>
    %164 = vector.extract_strided_slice %152 {offsets = [0, 0, 288], sizes = [2, 8, 32], strides = [1, 1, 1]} : vector<2x8x384xbf16> to vector<2x8x32xbf16>
    %165 = vector.extract_strided_slice %152 {offsets = [0, 0, 320], sizes = [2, 8, 32], strides = [1, 1, 1]} : vector<2x8x384xbf16> to vector<2x8x32xbf16>
    %166 = vector.extract_strided_slice %152 {offsets = [0, 0, 352], sizes = [2, 8, 32], strides = [1, 1, 1]} : vector<2x8x384xbf16> to vector<2x8x32xbf16>
    %167 = tpu.concatenate %163, %164, %165, %166 in 0 : vector<2x8x32xbf16>, vector<2x8x32xbf16>, vector<2x8x32xbf16>, vector<2x8x32xbf16> -> vector<8x8x32xbf16>
    "tpu.trace_start"() <{level = 10 : i32, message = "bqd,bkd->bqk"}> : () -> ()
    %cst_56 = arith.constant dense<0.000000e+00> : vector<8x8x8xf32>
    %168 = tpu.matmul %157, %162, %cst_56 {dimension_numbers = #tpu.dot_dimension_numbers<[2], [2], [1], [1], [0, 0, 0, 1, 1, 1], [0], [0]>} : vector<8x8x32xbf16>, vector<8x8x32xbf16>, vector<8x8x8xf32> -> vector<8x8x8xf32>
    "tpu.trace_stop"() : () -> ()
    %cst_57 = arith.constant 0.176776692 : f32
    %169 = vector.broadcast %cst_57 : f32 to vector<8x8x8xf32>
    %170 = arith.mulf %168, %169 : vector<8x8x8xf32>
    %cst_58 = arith.constant dense<0xFF800000> : vector<8x8xf32>
    %171 = vector.multi_reduction <maximumf>, %170, %cst_58 [2] : vector<8x8x8xf32> to vector<8x8xf32>
    %172 = vector.shape_cast %171 : vector<8x8xf32> to vector<8x8x1xf32>
    %173 = vector.broadcast %172 : vector<8x8x1xf32> to vector<8x8x8xf32>
    %174 = arith.subf %170, %173 : vector<8x8x8xf32>
    %175 = math.exp %174 : vector<8x8x8xf32>
    %cst_59 = arith.constant dense<0.000000e+00> : vector<8x8xf32>
    %176 = vector.multi_reduction <add>, %175, %cst_59 [2] : vector<8x8x8xf32> to vector<8x8xf32>
    %177 = vector.shape_cast %176 : vector<8x8xf32> to vector<8x8x1xf32>
    %178 = tpu.reciprocal %177 {approx = true} : vector<8x8x1xf32> -> vector<8x8x1xf32>
    %179 = vector.broadcast %178 : vector<8x8x1xf32> to vector<8x8x8xf32>
    %180 = arith.mulf %175, %179 : vector<8x8x8xf32>
    %181 = arith.truncf %180 : vector<8x8x8xf32> to vector<8x8x8xbf16>
    "tpu.trace_start"() <{level = 10 : i32, message = "bqk,bkd->bqd"}> : () -> ()
    %cst_60 = arith.constant dense<0.000000e+00> : vector<8x8x32xf32>
    %182 = tpu.matmul %181, %167, %cst_60 {dimension_numbers = #tpu.dot_dimension_numbers<[2], [1], [1], [2], [0, 0, 0, 1, 1, 2], [0], [0]>} : vector<8x8x8xbf16>, vector<8x8x32xbf16>, vector<8x8x32xf32> -> vector<8x8x32xf32>
    "tpu.trace_stop"() : () -> ()
    %183 = vector.extract_strided_slice %182 {offsets = [0, 0, 0], sizes = [2, 8, 32], strides = [1, 1, 1]} : vector<8x8x32xf32> to vector<2x8x32xf32>
    %184 = vector.extract_strided_slice %182 {offsets = [2, 0, 0], sizes = [2, 8, 32], strides = [1, 1, 1]} : vector<8x8x32xf32> to vector<2x8x32xf32>
    %185 = vector.extract_strided_slice %182 {offsets = [4, 0, 0], sizes = [2, 8, 32], strides = [1, 1, 1]} : vector<8x8x32xf32> to vector<2x8x32xf32>
    %186 = vector.extract_strided_slice %182 {offsets = [6, 0, 0], sizes = [2, 8, 32], strides = [1, 1, 1]} : vector<8x8x32xf32> to vector<2x8x32xf32>
    %187 = tpu.concatenate %183, %184, %185, %186 in 2 : vector<2x8x32xf32>, vector<2x8x32xf32>, vector<2x8x32xf32>, vector<2x8x32xf32> -> vector<2x8x128xf32>
    %188 = vector.shape_cast %187 : vector<2x8x128xf32> to vector<16x128xf32>
    %189 = arith.truncf %188 : vector<16x128xf32> to vector<16x128xbf16>
    %cst_61 = arith.constant dense<0.000000e+00> : vector<16x128xf32>
    %190 = tpu.matmul %189, %132, %cst_61 {dimension_numbers = #tpu.dot_dimension_numbers<[1], [0], [0], [1], [0, 0, 1, 1], [], []>} : vector<16x128xbf16>, vector<128x128xbf16>, vector<16x128xf32> -> vector<16x128xf32>
    %191 = vector.broadcast %140 : vector<1x128xf32> to vector<16x128xf32>
    %192 = arith.addf %190, %191 : vector<16x128xf32>
    %193 = arith.addf %128, %192 : vector<16x128xf32>
    %cst_62 = arith.constant dense<0.000000e+00> : vector<16xf32>
    %194 = vector.multi_reduction <add>, %193, %cst_62 [1] : vector<16x128xf32> to vector<16xf32>
    %195 = vector.shape_cast %194 : vector<16xf32> to vector<16x1xf32>
    %cst_63 = arith.constant 1.280000e+02 : f32
    %196 = vector.broadcast %cst_63 : f32 to vector<16x1xf32>
    %197 = arith.divf %195, %196 : vector<16x1xf32>
    %198 = vector.broadcast %197 : vector<16x1xf32> to vector<16x128xf32>
    %199 = arith.subf %193, %198 : vector<16x128xf32>
    %200 = arith.mulf %199, %199 : vector<16x128xf32>
    %cst_64 = arith.constant dense<0.000000e+00> : vector<16xf32>
    %201 = vector.multi_reduction <add>, %200, %cst_64 [1] : vector<16x128xf32> to vector<16xf32>
    %202 = vector.shape_cast %201 : vector<16xf32> to vector<16x1xf32>
    %cst_65 = arith.constant 1.280000e+02 : f32
    %203 = vector.broadcast %cst_65 : f32 to vector<16x1xf32>
    %204 = arith.divf %202, %203 : vector<16x1xf32>
    %205 = vector.broadcast %197 : vector<16x1xf32> to vector<16x128xf32>
    %206 = arith.subf %193, %205 : vector<16x128xf32>
    %cst_66 = arith.constant 9.99999974E-6 : f32
    %207 = vector.broadcast %cst_66 : f32 to vector<16x1xf32>
    %208 = arith.addf %204, %207 : vector<16x1xf32>
    %209 = math.rsqrt %208 : vector<16x1xf32>
    %210 = vector.broadcast %209 : vector<16x1xf32> to vector<16x128xf32>
    %211 = arith.mulf %206, %210 : vector<16x128xf32>
    %212 = vector.broadcast %141 : vector<1x128xf32> to vector<16x128xf32>
    %213 = arith.mulf %211, %212 : vector<16x128xf32>
    %214 = vector.broadcast %142 : vector<1x128xf32> to vector<16x128xf32>
    %215 = arith.addf %213, %214 : vector<16x128xf32>
    %216 = arith.truncf %215 : vector<16x128xf32> to vector<16x128xbf16>
    %cst_67 = arith.constant dense<0.000000e+00> : vector<16x512xf32>
    %217 = tpu.matmul %216, %134, %cst_67 {dimension_numbers = #tpu.dot_dimension_numbers<[1], [0], [0], [1], [0, 0, 1, 1], [], []>} : vector<16x128xbf16>, vector<128x512xbf16>, vector<16x512xf32> -> vector<16x512xf32>
    %218 = vector.broadcast %143 : vector<1x512xf32> to vector<16x512xf32>
    %219 = arith.addf %217, %218 : vector<16x512xf32>
    %cst_68 = arith.constant 0.000000e+00 : f32
    %220 = vector.broadcast %cst_68 : f32 to vector<16x512xf32>
    %221 = arith.maximumf %219, %220 : vector<16x512xf32>
    %222 = arith.truncf %221 : vector<16x512xf32> to vector<16x512xbf16>
    %cst_69 = arith.constant dense<0.000000e+00> : vector<16x128xf32>
    %223 = tpu.matmul %222, %136, %cst_69 {dimension_numbers = #tpu.dot_dimension_numbers<[1], [0], [0], [1], [0, 0, 1, 1], [], []>} : vector<16x512xbf16>, vector<512x128xbf16>, vector<16x128xf32> -> vector<16x128xf32>
    %224 = vector.broadcast %144 : vector<1x128xf32> to vector<16x128xf32>
    %225 = arith.addf %223, %224 : vector<16x128xf32>
    %226 = arith.addf %215, %225 : vector<16x128xf32>
    %cst_70 = arith.constant dense<0.000000e+00> : vector<16xf32>
    %227 = vector.multi_reduction <add>, %226, %cst_70 [1] : vector<16x128xf32> to vector<16xf32>
    %228 = vector.shape_cast %227 : vector<16xf32> to vector<16x1xf32>
    %cst_71 = arith.constant 1.280000e+02 : f32
    %229 = vector.broadcast %cst_71 : f32 to vector<16x1xf32>
    %230 = arith.divf %228, %229 : vector<16x1xf32>
    %231 = vector.broadcast %230 : vector<16x1xf32> to vector<16x128xf32>
    %232 = arith.subf %226, %231 : vector<16x128xf32>
    %233 = arith.mulf %232, %232 : vector<16x128xf32>
    %cst_72 = arith.constant dense<0.000000e+00> : vector<16xf32>
    %234 = vector.multi_reduction <add>, %233, %cst_72 [1] : vector<16x128xf32> to vector<16xf32>
    %235 = vector.shape_cast %234 : vector<16xf32> to vector<16x1xf32>
    %cst_73 = arith.constant 1.280000e+02 : f32
    %236 = vector.broadcast %cst_73 : f32 to vector<16x1xf32>
    %237 = arith.divf %235, %236 : vector<16x1xf32>
    %238 = vector.broadcast %230 : vector<16x1xf32> to vector<16x128xf32>
    %239 = arith.subf %226, %238 : vector<16x128xf32>
    %cst_74 = arith.constant 9.99999974E-6 : f32
    %240 = vector.broadcast %cst_74 : f32 to vector<16x1xf32>
    %241 = arith.addf %237, %240 : vector<16x1xf32>
    %242 = math.rsqrt %241 : vector<16x1xf32>
    %243 = vector.broadcast %242 : vector<16x1xf32> to vector<16x128xf32>
    %244 = arith.mulf %239, %243 : vector<16x128xf32>
    %245 = vector.broadcast %145 : vector<1x128xf32> to vector<16x128xf32>
    %246 = arith.mulf %244, %245 : vector<16x128xf32>
    %247 = vector.broadcast %146 : vector<1x128xf32> to vector<16x128xf32>
    %248 = arith.addf %246, %247 : vector<16x128xf32>
    %249 = vector.shape_cast %248 : vector<16x128xf32> to vector<2x8x128xf32>
    %c0_75 = arith.constant 0 : index
    %c0_76 = arith.constant 0 : index
    %c0_77 = arith.constant 0 : index
    %250 = vector.load %arg1[%c0_75, %c0_76, %c0_77] : memref<2x4x700xf32, #tpu.memory_space<vmem>>, vector<2x4x700xf32>
    %c0_78 = arith.constant 0 : index
    %c0_79 = arith.constant 0 : index
    %251 = vector.load %arg3[%c0_78, %c0_79] : memref<700x128xbf16, #tpu.memory_space<vmem>>, vector<700x128xbf16>
    %252 = vector.extract_strided_slice %0 {offsets = [5, 0], sizes = [1, 128], strides = [1, 1]} : vector<9x128xf32> to vector<1x128xf32>
    %253 = vector.extract_strided_slice %0 {offsets = [0, 0], sizes = [4, 128], strides = [1, 1]} : vector<9x128xf32> to vector<4x128xf32>
    %254 = vector.shape_cast %250 : vector<2x4x700xf32> to vector<8x700xf32>
    %255 = arith.truncf %254 : vector<8x700xf32> to vector<8x700xbf16>
    %cst_80 = arith.constant dense<0.000000e+00> : vector<8x128xf32>
    %256 = tpu.matmul %255, %251, %cst_80 {dimension_numbers = #tpu.dot_dimension_numbers<[1], [0], [0], [1], [0, 0, 1, 1], [], []>} : vector<8x700xbf16>, vector<700x128xbf16>, vector<8x128xf32> -> vector<8x128xf32>
    %257 = vector.broadcast %252 : vector<1x128xf32> to vector<8x128xf32>
    %258 = arith.addf %256, %257 : vector<8x128xf32>
    %259 = vector.shape_cast %258 : vector<8x128xf32> to vector<2x4x128xf32>
    %260 = vector.shape_cast %253 : vector<4x128xf32> to vector<1x4x128xf32>
    %261 = vector.broadcast %260 : vector<1x4x128xf32> to vector<2x4x128xf32>
    %262 = arith.addf %259, %261 : vector<2x4x128xf32>
    %263 = vector.shape_cast %262 : vector<2x4x128xf32> to vector<8x128xf32>
    %c2 = arith.constant 2 : index
    %c0_81 = arith.constant 0 : index
    %c0_82 = arith.constant 0 : index
    %264 = vector.load %arg5[%c2, %c0_81, %c0_82] : memref<4x128x384xbf16, #tpu.memory_space<vmem>>, vector<1x128x384xbf16>
    %265 = vector.shape_cast %264 : vector<1x128x384xbf16> to vector<128x384xbf16>
    %c2_83 = arith.constant 2 : index
    %c0_84 = arith.constant 0 : index
    %c0_85 = arith.constant 0 : index
    %266 = vector.load %arg6[%c2_83, %c0_84, %c0_85] : memref<4x128x128xbf16, #tpu.memory_space<vmem>>, vector<1x128x128xbf16>
    %267 = vector.shape_cast %266 : vector<1x128x128xbf16> to vector<128x128xbf16>
    %c2_86 = arith.constant 2 : index
    %c0_87 = arith.constant 0 : index
    %c0_88 = arith.constant 0 : index
    %268 = vector.load %arg7[%c2_86, %c0_87, %c0_88] : memref<4x128x512xbf16, #tpu.memory_space<vmem>>, vector<1x128x512xbf16>
    %269 = vector.shape_cast %268 : vector<1x128x512xbf16> to vector<128x512xbf16>
    %c2_89 = arith.constant 2 : index
    %c0_90 = arith.constant 0 : index
    %c0_91 = arith.constant 0 : index
    %270 = vector.load %arg8[%c2_89, %c0_90, %c0_91] : memref<4x512x128xbf16, #tpu.memory_space<vmem>>, vector<1x512x128xbf16>
    %271 = vector.shape_cast %270 : vector<1x512x128xbf16> to vector<512x128xbf16>
    %c2_92 = arith.constant 2 : index
    %c0_93 = arith.constant 0 : index
    %c0_94 = arith.constant 0 : index
    %272 = vector.load %arg9[%c2_92, %c0_93, %c0_94] : memref<4x8x512xf32, #tpu.memory_space<vmem>>, vector<1x8x512xf32>
    %273 = vector.shape_cast %272 : vector<1x8x512xf32> to vector<8x512xf32>
    %274 = vector.extract_strided_slice %273 {offsets = [0, 0], sizes = [1, 384], strides = [1, 1]} : vector<8x512xf32> to vector<1x384xf32>
    %275 = vector.extract_strided_slice %273 {offsets = [1, 0], sizes = [1, 128], strides = [1, 1]} : vector<8x512xf32> to vector<1x128xf32>
    %276 = vector.extract_strided_slice %273 {offsets = [2, 0], sizes = [1, 128], strides = [1, 1]} : vector<8x512xf32> to vector<1x128xf32>
    %277 = vector.extract_strided_slice %273 {offsets = [3, 0], sizes = [1, 128], strides = [1, 1]} : vector<8x512xf32> to vector<1x128xf32>
    %278 = vector.extract_strided_slice %273 {offsets = [4, 0], sizes = [1, 512], strides = [1, 1]} : vector<8x512xf32> to vector<1x512xf32>
    %279 = vector.extract_strided_slice %273 {offsets = [5, 0], sizes = [1, 128], strides = [1, 1]} : vector<8x512xf32> to vector<1x128xf32>
    %280 = vector.extract_strided_slice %273 {offsets = [6, 0], sizes = [1, 128], strides = [1, 1]} : vector<8x512xf32> to vector<1x128xf32>
    %281 = vector.extract_strided_slice %273 {offsets = [7, 0], sizes = [1, 128], strides = [1, 1]} : vector<8x512xf32> to vector<1x128xf32>
    %282 = arith.truncf %263 : vector<8x128xf32> to vector<8x128xbf16>
    %cst_95 = arith.constant dense<0.000000e+00> : vector<8x384xf32>
    %283 = tpu.matmul %282, %265, %cst_95 {dimension_numbers = #tpu.dot_dimension_numbers<[1], [0], [0], [1], [0, 0, 1, 1], [], []>} : vector<8x128xbf16>, vector<128x384xbf16>, vector<8x384xf32> -> vector<8x384xf32>
    %284 = vector.broadcast %274 : vector<1x384xf32> to vector<8x384xf32>
    %285 = arith.addf %283, %284 : vector<8x384xf32>
    %286 = vector.shape_cast %285 : vector<8x384xf32> to vector<2x4x384xf32>
    %287 = arith.truncf %286 : vector<2x4x384xf32> to vector<2x4x384xbf16>
    %288 = vector.extract_strided_slice %287 {offsets = [0, 0, 0], sizes = [2, 4, 32], strides = [1, 1, 1]} : vector<2x4x384xbf16> to vector<2x4x32xbf16>
    %289 = vector.extract_strided_slice %287 {offsets = [0, 0, 32], sizes = [2, 4, 32], strides = [1, 1, 1]} : vector<2x4x384xbf16> to vector<2x4x32xbf16>
    %290 = vector.extract_strided_slice %287 {offsets = [0, 0, 64], sizes = [2, 4, 32], strides = [1, 1, 1]} : vector<2x4x384xbf16> to vector<2x4x32xbf16>
    %291 = vector.extract_strided_slice %287 {offsets = [0, 0, 96], sizes = [2, 4, 32], strides = [1, 1, 1]} : vector<2x4x384xbf16> to vector<2x4x32xbf16>
    %292 = tpu.concatenate %288, %289, %290, %291 in 0 : vector<2x4x32xbf16>, vector<2x4x32xbf16>, vector<2x4x32xbf16>, vector<2x4x32xbf16> -> vector<8x4x32xbf16>
    %293 = vector.extract_strided_slice %287 {offsets = [0, 0, 128], sizes = [2, 4, 32], strides = [1, 1, 1]} : vector<2x4x384xbf16> to vector<2x4x32xbf16>
    %294 = vector.extract_strided_slice %287 {offsets = [0, 0, 160], sizes = [2, 4, 32], strides = [1, 1, 1]} : vector<2x4x384xbf16> to vector<2x4x32xbf16>
    %295 = vector.extract_strided_slice %287 {offsets = [0, 0, 192], sizes = [2, 4, 32], strides = [1, 1, 1]} : vector<2x4x384xbf16> to vector<2x4x32xbf16>
    %296 = vector.extract_strided_slice %287 {offsets = [0, 0, 224], sizes = [2, 4, 32], strides = [1, 1, 1]} : vector<2x4x384xbf16> to vector<2x4x32xbf16>
    %297 = tpu.concatenate %293, %294, %295, %296 in 0 : vector<2x4x32xbf16>, vector<2x4x32xbf16>, vector<2x4x32xbf16>, vector<2x4x32xbf16> -> vector<8x4x32xbf16>
    %298 = vector.extract_strided_slice %287 {offsets = [0, 0, 256], sizes = [2, 4, 32], strides = [1, 1, 1]} : vector<2x4x384xbf16> to vector<2x4x32xbf16>
    %299 = vector.extract_strided_slice %287 {offsets = [0, 0, 288], sizes = [2, 4, 32], strides = [1, 1, 1]} : vector<2x4x384xbf16> to vector<2x4x32xbf16>
    %300 = vector.extract_strided_slice %287 {offsets = [0, 0, 320], sizes = [2, 4, 32], strides = [1, 1, 1]} : vector<2x4x384xbf16> to vector<2x4x32xbf16>
    %301 = vector.extract_strided_slice %287 {offsets = [0, 0, 352], sizes = [2, 4, 32], strides = [1, 1, 1]} : vector<2x4x384xbf16> to vector<2x4x32xbf16>
    %302 = tpu.concatenate %298, %299, %300, %301 in 0 : vector<2x4x32xbf16>, vector<2x4x32xbf16>, vector<2x4x32xbf16>, vector<2x4x32xbf16> -> vector<8x4x32xbf16>
    "tpu.trace_start"() <{level = 10 : i32, message = "bqd,bkd->bqk"}> : () -> ()
    %cst_96 = arith.constant dense<0.000000e+00> : vector<8x4x4xf32>
    %303 = tpu.matmul %292, %297, %cst_96 {dimension_numbers = #tpu.dot_dimension_numbers<[2], [2], [1], [1], [0, 0, 0, 1, 1, 1], [0], [0]>} : vector<8x4x32xbf16>, vector<8x4x32xbf16>, vector<8x4x4xf32> -> vector<8x4x4xf32>
    "tpu.trace_stop"() : () -> ()
    %cst_97 = arith.constant 0.176776692 : f32
    %304 = vector.broadcast %cst_97 : f32 to vector<8x4x4xf32>
    %305 = arith.mulf %303, %304 : vector<8x4x4xf32>
    %cst_98 = arith.constant dense<0xFF800000> : vector<8x4xf32>
    %306 = vector.multi_reduction <maximumf>, %305, %cst_98 [2] : vector<8x4x4xf32> to vector<8x4xf32>
    %307 = vector.shape_cast %306 : vector<8x4xf32> to vector<8x4x1xf32>
    %308 = vector.broadcast %307 : vector<8x4x1xf32> to vector<8x4x4xf32>
    %309 = arith.subf %305, %308 : vector<8x4x4xf32>
    %310 = math.exp %309 : vector<8x4x4xf32>
    %cst_99 = arith.constant dense<0.000000e+00> : vector<8x4xf32>
    %311 = vector.multi_reduction <add>, %310, %cst_99 [2] : vector<8x4x4xf32> to vector<8x4xf32>
    %312 = vector.shape_cast %311 : vector<8x4xf32> to vector<8x4x1xf32>
    %313 = tpu.reciprocal %312 {approx = true} : vector<8x4x1xf32> -> vector<8x4x1xf32>
    %314 = vector.broadcast %313 : vector<8x4x1xf32> to vector<8x4x4xf32>
    %315 = arith.mulf %310, %314 : vector<8x4x4xf32>
    %316 = arith.truncf %315 : vector<8x4x4xf32> to vector<8x4x4xbf16>
    "tpu.trace_start"() <{level = 10 : i32, message = "bqk,bkd->bqd"}> : () -> ()
    %cst_100 = arith.constant dense<0.000000e+00> : vector<8x4x32xf32>
    %317 = tpu.matmul %316, %302, %cst_100 {dimension_numbers = #tpu.dot_dimension_numbers<[2], [1], [1], [2], [0, 0, 0, 1, 1, 2], [0], [0]>} : vector<8x4x4xbf16>, vector<8x4x32xbf16>, vector<8x4x32xf32> -> vector<8x4x32xf32>
    "tpu.trace_stop"() : () -> ()
    %318 = vector.extract_strided_slice %317 {offsets = [0, 0, 0], sizes = [2, 4, 32], strides = [1, 1, 1]} : vector<8x4x32xf32> to vector<2x4x32xf32>
    %319 = vector.extract_strided_slice %317 {offsets = [2, 0, 0], sizes = [2, 4, 32], strides = [1, 1, 1]} : vector<8x4x32xf32> to vector<2x4x32xf32>
    %320 = vector.extract_strided_slice %317 {offsets = [4, 0, 0], sizes = [2, 4, 32], strides = [1, 1, 1]} : vector<8x4x32xf32> to vector<2x4x32xf32>
    %321 = vector.extract_strided_slice %317 {offsets = [6, 0, 0], sizes = [2, 4, 32], strides = [1, 1, 1]} : vector<8x4x32xf32> to vector<2x4x32xf32>
    %322 = tpu.concatenate %318, %319, %320, %321 in 2 : vector<2x4x32xf32>, vector<2x4x32xf32>, vector<2x4x32xf32>, vector<2x4x32xf32> -> vector<2x4x128xf32>
    %323 = vector.shape_cast %322 : vector<2x4x128xf32> to vector<8x128xf32>
    %324 = arith.truncf %323 : vector<8x128xf32> to vector<8x128xbf16>
    %cst_101 = arith.constant dense<0.000000e+00> : vector<8x128xf32>
    %325 = tpu.matmul %324, %267, %cst_101 {dimension_numbers = #tpu.dot_dimension_numbers<[1], [0], [0], [1], [0, 0, 1, 1], [], []>} : vector<8x128xbf16>, vector<128x128xbf16>, vector<8x128xf32> -> vector<8x128xf32>
    %326 = vector.broadcast %275 : vector<1x128xf32> to vector<8x128xf32>
    %327 = arith.addf %325, %326 : vector<8x128xf32>
    %328 = arith.addf %263, %327 : vector<8x128xf32>
    %cst_102 = arith.constant dense<0.000000e+00> : vector<8xf32>
    %329 = vector.multi_reduction <add>, %328, %cst_102 [1] : vector<8x128xf32> to vector<8xf32>
    %330 = vector.shape_cast %329 : vector<8xf32> to vector<8x1xf32>
    %cst_103 = arith.constant 1.280000e+02 : f32
    %331 = vector.broadcast %cst_103 : f32 to vector<8x1xf32>
    %332 = arith.divf %330, %331 : vector<8x1xf32>
    %333 = vector.broadcast %332 : vector<8x1xf32> to vector<8x128xf32>
    %334 = arith.subf %328, %333 : vector<8x128xf32>
    %335 = arith.mulf %334, %334 : vector<8x128xf32>
    %cst_104 = arith.constant dense<0.000000e+00> : vector<8xf32>
    %336 = vector.multi_reduction <add>, %335, %cst_104 [1] : vector<8x128xf32> to vector<8xf32>
    %337 = vector.shape_cast %336 : vector<8xf32> to vector<8x1xf32>
    %cst_105 = arith.constant 1.280000e+02 : f32
    %338 = vector.broadcast %cst_105 : f32 to vector<8x1xf32>
    %339 = arith.divf %337, %338 : vector<8x1xf32>
    %340 = vector.broadcast %332 : vector<8x1xf32> to vector<8x128xf32>
    %341 = arith.subf %328, %340 : vector<8x128xf32>
    %cst_106 = arith.constant 9.99999974E-6 : f32
    %342 = vector.broadcast %cst_106 : f32 to vector<8x1xf32>
    %343 = arith.addf %339, %342 : vector<8x1xf32>
    %344 = math.rsqrt %343 : vector<8x1xf32>
    %345 = vector.broadcast %344 : vector<8x1xf32> to vector<8x128xf32>
    %346 = arith.mulf %341, %345 : vector<8x128xf32>
    %347 = vector.broadcast %276 : vector<1x128xf32> to vector<8x128xf32>
    %348 = arith.mulf %346, %347 : vector<8x128xf32>
    %349 = vector.broadcast %277 : vector<1x128xf32> to vector<8x128xf32>
    %350 = arith.addf %348, %349 : vector<8x128xf32>
    %351 = arith.truncf %350 : vector<8x128xf32> to vector<8x128xbf16>
    %cst_107 = arith.constant dense<0.000000e+00> : vector<8x512xf32>
    %352 = tpu.matmul %351, %269, %cst_107 {dimension_numbers = #tpu.dot_dimension_numbers<[1], [0], [0], [1], [0, 0, 1, 1], [], []>} : vector<8x128xbf16>, vector<128x512xbf16>, vector<8x512xf32> -> vector<8x512xf32>
    %353 = vector.broadcast %278 : vector<1x512xf32> to vector<8x512xf32>
    %354 = arith.addf %352, %353 : vector<8x512xf32>
    %cst_108 = arith.constant 0.000000e+00 : f32
    %355 = vector.broadcast %cst_108 : f32 to vector<8x512xf32>
    %356 = arith.maximumf %354, %355 : vector<8x512xf32>
    %357 = arith.truncf %356 : vector<8x512xf32> to vector<8x512xbf16>
    %cst_109 = arith.constant dense<0.000000e+00> : vector<8x128xf32>
    %358 = tpu.matmul %357, %271, %cst_109 {dimension_numbers = #tpu.dot_dimension_numbers<[1], [0], [0], [1], [0, 0, 1, 1], [], []>} : vector<8x512xbf16>, vector<512x128xbf16>, vector<8x128xf32> -> vector<8x128xf32>
    %359 = vector.broadcast %279 : vector<1x128xf32> to vector<8x128xf32>
    %360 = arith.addf %358, %359 : vector<8x128xf32>
    %361 = arith.addf %350, %360 : vector<8x128xf32>
    %cst_110 = arith.constant dense<0.000000e+00> : vector<8xf32>
    %362 = vector.multi_reduction <add>, %361, %cst_110 [1] : vector<8x128xf32> to vector<8xf32>
    %363 = vector.shape_cast %362 : vector<8xf32> to vector<8x1xf32>
    %cst_111 = arith.constant 1.280000e+02 : f32
    %364 = vector.broadcast %cst_111 : f32 to vector<8x1xf32>
    %365 = arith.divf %363, %364 : vector<8x1xf32>
    %366 = vector.broadcast %365 : vector<8x1xf32> to vector<8x128xf32>
    %367 = arith.subf %361, %366 : vector<8x128xf32>
    %368 = arith.mulf %367, %367 : vector<8x128xf32>
    %cst_112 = arith.constant dense<0.000000e+00> : vector<8xf32>
    %369 = vector.multi_reduction <add>, %368, %cst_112 [1] : vector<8x128xf32> to vector<8xf32>
    %370 = vector.shape_cast %369 : vector<8xf32> to vector<8x1xf32>
    %cst_113 = arith.constant 1.280000e+02 : f32
    %371 = vector.broadcast %cst_113 : f32 to vector<8x1xf32>
    %372 = arith.divf %370, %371 : vector<8x1xf32>
    %373 = vector.broadcast %365 : vector<8x1xf32> to vector<8x128xf32>
    %374 = arith.subf %361, %373 : vector<8x128xf32>
    %cst_114 = arith.constant 9.99999974E-6 : f32
    %375 = vector.broadcast %cst_114 : f32 to vector<8x1xf32>
    %376 = arith.addf %372, %375 : vector<8x1xf32>
    %377 = math.rsqrt %376 : vector<8x1xf32>
    %378 = vector.broadcast %377 : vector<8x1xf32> to vector<8x128xf32>
    %379 = arith.mulf %374, %378 : vector<8x128xf32>
    %380 = vector.broadcast %280 : vector<1x128xf32> to vector<8x128xf32>
    %381 = arith.mulf %379, %380 : vector<8x128xf32>
    %382 = vector.broadcast %281 : vector<1x128xf32> to vector<8x128xf32>
    %383 = arith.addf %381, %382 : vector<8x128xf32>
    %c3 = arith.constant 3 : index
    %c0_115 = arith.constant 0 : index
    %c0_116 = arith.constant 0 : index
    %384 = vector.load %arg5[%c3, %c0_115, %c0_116] : memref<4x128x384xbf16, #tpu.memory_space<vmem>>, vector<1x128x384xbf16>
    %385 = vector.shape_cast %384 : vector<1x128x384xbf16> to vector<128x384xbf16>
    %c3_117 = arith.constant 3 : index
    %c0_118 = arith.constant 0 : index
    %c0_119 = arith.constant 0 : index
    %386 = vector.load %arg6[%c3_117, %c0_118, %c0_119] : memref<4x128x128xbf16, #tpu.memory_space<vmem>>, vector<1x128x128xbf16>
    %387 = vector.shape_cast %386 : vector<1x128x128xbf16> to vector<128x128xbf16>
    %c3_120 = arith.constant 3 : index
    %c0_121 = arith.constant 0 : index
    %c0_122 = arith.constant 0 : index
    %388 = vector.load %arg7[%c3_120, %c0_121, %c0_122] : memref<4x128x512xbf16, #tpu.memory_space<vmem>>, vector<1x128x512xbf16>
    %389 = vector.shape_cast %388 : vector<1x128x512xbf16> to vector<128x512xbf16>
    %c3_123 = arith.constant 3 : index
    %c0_124 = arith.constant 0 : index
    %c0_125 = arith.constant 0 : index
    %390 = vector.load %arg8[%c3_123, %c0_124, %c0_125] : memref<4x512x128xbf16, #tpu.memory_space<vmem>>, vector<1x512x128xbf16>
    %391 = vector.shape_cast %390 : vector<1x512x128xbf16> to vector<512x128xbf16>
    %c3_126 = arith.constant 3 : index
    %c0_127 = arith.constant 0 : index
    %c0_128 = arith.constant 0 : index
    %392 = vector.load %arg9[%c3_126, %c0_127, %c0_128] : memref<4x8x512xf32, #tpu.memory_space<vmem>>, vector<1x8x512xf32>
    %393 = vector.shape_cast %392 : vector<1x8x512xf32> to vector<8x512xf32>
    %394 = vector.extract_strided_slice %393 {offsets = [0, 0], sizes = [1, 384], strides = [1, 1]} : vector<8x512xf32> to vector<1x384xf32>
    %395 = vector.extract_strided_slice %393 {offsets = [1, 0], sizes = [1, 128], strides = [1, 1]} : vector<8x512xf32> to vector<1x128xf32>
    %396 = vector.extract_strided_slice %393 {offsets = [2, 0], sizes = [1, 128], strides = [1, 1]} : vector<8x512xf32> to vector<1x128xf32>
    %397 = vector.extract_strided_slice %393 {offsets = [3, 0], sizes = [1, 128], strides = [1, 1]} : vector<8x512xf32> to vector<1x128xf32>
    %398 = vector.extract_strided_slice %393 {offsets = [4, 0], sizes = [1, 512], strides = [1, 1]} : vector<8x512xf32> to vector<1x512xf32>
    %399 = vector.extract_strided_slice %393 {offsets = [5, 0], sizes = [1, 128], strides = [1, 1]} : vector<8x512xf32> to vector<1x128xf32>
    %400 = vector.extract_strided_slice %393 {offsets = [6, 0], sizes = [1, 128], strides = [1, 1]} : vector<8x512xf32> to vector<1x128xf32>
    %401 = vector.extract_strided_slice %393 {offsets = [7, 0], sizes = [1, 128], strides = [1, 1]} : vector<8x512xf32> to vector<1x128xf32>
    %402 = arith.truncf %383 : vector<8x128xf32> to vector<8x128xbf16>
    %cst_129 = arith.constant dense<0.000000e+00> : vector<8x384xf32>
    %403 = tpu.matmul %402, %385, %cst_129 {dimension_numbers = #tpu.dot_dimension_numbers<[1], [0], [0], [1], [0, 0, 1, 1], [], []>} : vector<8x128xbf16>, vector<128x384xbf16>, vector<8x384xf32> -> vector<8x384xf32>
    %404 = vector.broadcast %394 : vector<1x384xf32> to vector<8x384xf32>
    %405 = arith.addf %403, %404 : vector<8x384xf32>
    %406 = vector.shape_cast %405 : vector<8x384xf32> to vector<2x4x384xf32>
    %407 = arith.truncf %406 : vector<2x4x384xf32> to vector<2x4x384xbf16>
    %408 = vector.extract_strided_slice %407 {offsets = [0, 0, 0], sizes = [2, 4, 32], strides = [1, 1, 1]} : vector<2x4x384xbf16> to vector<2x4x32xbf16>
    %409 = vector.extract_strided_slice %407 {offsets = [0, 0, 32], sizes = [2, 4, 32], strides = [1, 1, 1]} : vector<2x4x384xbf16> to vector<2x4x32xbf16>
    %410 = vector.extract_strided_slice %407 {offsets = [0, 0, 64], sizes = [2, 4, 32], strides = [1, 1, 1]} : vector<2x4x384xbf16> to vector<2x4x32xbf16>
    %411 = vector.extract_strided_slice %407 {offsets = [0, 0, 96], sizes = [2, 4, 32], strides = [1, 1, 1]} : vector<2x4x384xbf16> to vector<2x4x32xbf16>
    %412 = tpu.concatenate %408, %409, %410, %411 in 0 : vector<2x4x32xbf16>, vector<2x4x32xbf16>, vector<2x4x32xbf16>, vector<2x4x32xbf16> -> vector<8x4x32xbf16>
    %413 = vector.extract_strided_slice %407 {offsets = [0, 0, 128], sizes = [2, 4, 32], strides = [1, 1, 1]} : vector<2x4x384xbf16> to vector<2x4x32xbf16>
    %414 = vector.extract_strided_slice %407 {offsets = [0, 0, 160], sizes = [2, 4, 32], strides = [1, 1, 1]} : vector<2x4x384xbf16> to vector<2x4x32xbf16>
    %415 = vector.extract_strided_slice %407 {offsets = [0, 0, 192], sizes = [2, 4, 32], strides = [1, 1, 1]} : vector<2x4x384xbf16> to vector<2x4x32xbf16>
    %416 = vector.extract_strided_slice %407 {offsets = [0, 0, 224], sizes = [2, 4, 32], strides = [1, 1, 1]} : vector<2x4x384xbf16> to vector<2x4x32xbf16>
    %417 = tpu.concatenate %413, %414, %415, %416 in 0 : vector<2x4x32xbf16>, vector<2x4x32xbf16>, vector<2x4x32xbf16>, vector<2x4x32xbf16> -> vector<8x4x32xbf16>
    %418 = vector.extract_strided_slice %407 {offsets = [0, 0, 256], sizes = [2, 4, 32], strides = [1, 1, 1]} : vector<2x4x384xbf16> to vector<2x4x32xbf16>
    %419 = vector.extract_strided_slice %407 {offsets = [0, 0, 288], sizes = [2, 4, 32], strides = [1, 1, 1]} : vector<2x4x384xbf16> to vector<2x4x32xbf16>
    %420 = vector.extract_strided_slice %407 {offsets = [0, 0, 320], sizes = [2, 4, 32], strides = [1, 1, 1]} : vector<2x4x384xbf16> to vector<2x4x32xbf16>
    %421 = vector.extract_strided_slice %407 {offsets = [0, 0, 352], sizes = [2, 4, 32], strides = [1, 1, 1]} : vector<2x4x384xbf16> to vector<2x4x32xbf16>
    %422 = tpu.concatenate %418, %419, %420, %421 in 0 : vector<2x4x32xbf16>, vector<2x4x32xbf16>, vector<2x4x32xbf16>, vector<2x4x32xbf16> -> vector<8x4x32xbf16>
    "tpu.trace_start"() <{level = 10 : i32, message = "bqd,bkd->bqk"}> : () -> ()
    %cst_130 = arith.constant dense<0.000000e+00> : vector<8x4x4xf32>
    %423 = tpu.matmul %412, %417, %cst_130 {dimension_numbers = #tpu.dot_dimension_numbers<[2], [2], [1], [1], [0, 0, 0, 1, 1, 1], [0], [0]>} : vector<8x4x32xbf16>, vector<8x4x32xbf16>, vector<8x4x4xf32> -> vector<8x4x4xf32>
    "tpu.trace_stop"() : () -> ()
    %cst_131 = arith.constant 0.176776692 : f32
    %424 = vector.broadcast %cst_131 : f32 to vector<8x4x4xf32>
    %425 = arith.mulf %423, %424 : vector<8x4x4xf32>
    %cst_132 = arith.constant dense<0xFF800000> : vector<8x4xf32>
    %426 = vector.multi_reduction <maximumf>, %425, %cst_132 [2] : vector<8x4x4xf32> to vector<8x4xf32>
    %427 = vector.shape_cast %426 : vector<8x4xf32> to vector<8x4x1xf32>
    %428 = vector.broadcast %427 : vector<8x4x1xf32> to vector<8x4x4xf32>
    %429 = arith.subf %425, %428 : vector<8x4x4xf32>
    %430 = math.exp %429 : vector<8x4x4xf32>
    %cst_133 = arith.constant dense<0.000000e+00> : vector<8x4xf32>
    %431 = vector.multi_reduction <add>, %430, %cst_133 [2] : vector<8x4x4xf32> to vector<8x4xf32>
    %432 = vector.shape_cast %431 : vector<8x4xf32> to vector<8x4x1xf32>
    %433 = tpu.reciprocal %432 {approx = true} : vector<8x4x1xf32> -> vector<8x4x1xf32>
    %434 = vector.broadcast %433 : vector<8x4x1xf32> to vector<8x4x4xf32>
    %435 = arith.mulf %430, %434 : vector<8x4x4xf32>
    %436 = arith.truncf %435 : vector<8x4x4xf32> to vector<8x4x4xbf16>
    "tpu.trace_start"() <{level = 10 : i32, message = "bqk,bkd->bqd"}> : () -> ()
    %cst_134 = arith.constant dense<0.000000e+00> : vector<8x4x32xf32>
    %437 = tpu.matmul %436, %422, %cst_134 {dimension_numbers = #tpu.dot_dimension_numbers<[2], [1], [1], [2], [0, 0, 0, 1, 1, 2], [0], [0]>} : vector<8x4x4xbf16>, vector<8x4x32xbf16>, vector<8x4x32xf32> -> vector<8x4x32xf32>
    "tpu.trace_stop"() : () -> ()
    %438 = vector.extract_strided_slice %437 {offsets = [0, 0, 0], sizes = [2, 4, 32], strides = [1, 1, 1]} : vector<8x4x32xf32> to vector<2x4x32xf32>
    %439 = vector.extract_strided_slice %437 {offsets = [2, 0, 0], sizes = [2, 4, 32], strides = [1, 1, 1]} : vector<8x4x32xf32> to vector<2x4x32xf32>
    %440 = vector.extract_strided_slice %437 {offsets = [4, 0, 0], sizes = [2, 4, 32], strides = [1, 1, 1]} : vector<8x4x32xf32> to vector<2x4x32xf32>
    %441 = vector.extract_strided_slice %437 {offsets = [6, 0, 0], sizes = [2, 4, 32], strides = [1, 1, 1]} : vector<8x4x32xf32> to vector<2x4x32xf32>
    %442 = tpu.concatenate %438, %439, %440, %441 in 2 : vector<2x4x32xf32>, vector<2x4x32xf32>, vector<2x4x32xf32>, vector<2x4x32xf32> -> vector<2x4x128xf32>
    %443 = vector.shape_cast %442 : vector<2x4x128xf32> to vector<8x128xf32>
    %444 = arith.truncf %443 : vector<8x128xf32> to vector<8x128xbf16>
    %cst_135 = arith.constant dense<0.000000e+00> : vector<8x128xf32>
    %445 = tpu.matmul %444, %387, %cst_135 {dimension_numbers = #tpu.dot_dimension_numbers<[1], [0], [0], [1], [0, 0, 1, 1], [], []>} : vector<8x128xbf16>, vector<128x128xbf16>, vector<8x128xf32> -> vector<8x128xf32>
    %446 = vector.broadcast %395 : vector<1x128xf32> to vector<8x128xf32>
    %447 = arith.addf %445, %446 : vector<8x128xf32>
    %448 = arith.addf %383, %447 : vector<8x128xf32>
    %cst_136 = arith.constant dense<0.000000e+00> : vector<8xf32>
    %449 = vector.multi_reduction <add>, %448, %cst_136 [1] : vector<8x128xf32> to vector<8xf32>
    %450 = vector.shape_cast %449 : vector<8xf32> to vector<8x1xf32>
    %cst_137 = arith.constant 1.280000e+02 : f32
    %451 = vector.broadcast %cst_137 : f32 to vector<8x1xf32>
    %452 = arith.divf %450, %451 : vector<8x1xf32>
    %453 = vector.broadcast %452 : vector<8x1xf32> to vector<8x128xf32>
    %454 = arith.subf %448, %453 : vector<8x128xf32>
    %455 = arith.mulf %454, %454 : vector<8x128xf32>
    %cst_138 = arith.constant dense<0.000000e+00> : vector<8xf32>
    %456 = vector.multi_reduction <add>, %455, %cst_138 [1] : vector<8x128xf32> to vector<8xf32>
    %457 = vector.shape_cast %456 : vector<8xf32> to vector<8x1xf32>
    %cst_139 = arith.constant 1.280000e+02 : f32
    %458 = vector.broadcast %cst_139 : f32 to vector<8x1xf32>
    %459 = arith.divf %457, %458 : vector<8x1xf32>
    %460 = vector.broadcast %452 : vector<8x1xf32> to vector<8x128xf32>
    %461 = arith.subf %448, %460 : vector<8x128xf32>
    %cst_140 = arith.constant 9.99999974E-6 : f32
    %462 = vector.broadcast %cst_140 : f32 to vector<8x1xf32>
    %463 = arith.addf %459, %462 : vector<8x1xf32>
    %464 = math.rsqrt %463 : vector<8x1xf32>
    %465 = vector.broadcast %464 : vector<8x1xf32> to vector<8x128xf32>
    %466 = arith.mulf %461, %465 : vector<8x128xf32>
    %467 = vector.broadcast %396 : vector<1x128xf32> to vector<8x128xf32>
    %468 = arith.mulf %466, %467 : vector<8x128xf32>
    %469 = vector.broadcast %397 : vector<1x128xf32> to vector<8x128xf32>
    %470 = arith.addf %468, %469 : vector<8x128xf32>
    %471 = arith.truncf %470 : vector<8x128xf32> to vector<8x128xbf16>
    %cst_141 = arith.constant dense<0.000000e+00> : vector<8x512xf32>
    %472 = tpu.matmul %471, %389, %cst_141 {dimension_numbers = #tpu.dot_dimension_numbers<[1], [0], [0], [1], [0, 0, 1, 1], [], []>} : vector<8x128xbf16>, vector<128x512xbf16>, vector<8x512xf32> -> vector<8x512xf32>
    %473 = vector.broadcast %398 : vector<1x512xf32> to vector<8x512xf32>
    %474 = arith.addf %472, %473 : vector<8x512xf32>
    %cst_142 = arith.constant 0.000000e+00 : f32
    %475 = vector.broadcast %cst_142 : f32 to vector<8x512xf32>
    %476 = arith.maximumf %474, %475 : vector<8x512xf32>
    %477 = arith.truncf %476 : vector<8x512xf32> to vector<8x512xbf16>
    %cst_143 = arith.constant dense<0.000000e+00> : vector<8x128xf32>
    %478 = tpu.matmul %477, %391, %cst_143 {dimension_numbers = #tpu.dot_dimension_numbers<[1], [0], [0], [1], [0, 0, 1, 1], [], []>} : vector<8x512xbf16>, vector<512x128xbf16>, vector<8x128xf32> -> vector<8x128xf32>
    %479 = vector.broadcast %399 : vector<1x128xf32> to vector<8x128xf32>
    %480 = arith.addf %478, %479 : vector<8x128xf32>
    %481 = arith.addf %470, %480 : vector<8x128xf32>
    %cst_144 = arith.constant dense<0.000000e+00> : vector<8xf32>
    %482 = vector.multi_reduction <add>, %481, %cst_144 [1] : vector<8x128xf32> to vector<8xf32>
    %483 = vector.shape_cast %482 : vector<8xf32> to vector<8x1xf32>
    %cst_145 = arith.constant 1.280000e+02 : f32
    %484 = vector.broadcast %cst_145 : f32 to vector<8x1xf32>
    %485 = arith.divf %483, %484 : vector<8x1xf32>
    %486 = vector.broadcast %485 : vector<8x1xf32> to vector<8x128xf32>
    %487 = arith.subf %481, %486 : vector<8x128xf32>
    %488 = arith.mulf %487, %487 : vector<8x128xf32>
    %cst_146 = arith.constant dense<0.000000e+00> : vector<8xf32>
    %489 = vector.multi_reduction <add>, %488, %cst_146 [1] : vector<8x128xf32> to vector<8xf32>
    %490 = vector.shape_cast %489 : vector<8xf32> to vector<8x1xf32>
    %cst_147 = arith.constant 1.280000e+02 : f32
    %491 = vector.broadcast %cst_147 : f32 to vector<8x1xf32>
    %492 = arith.divf %490, %491 : vector<8x1xf32>
    %493 = vector.broadcast %485 : vector<8x1xf32> to vector<8x128xf32>
    %494 = arith.subf %481, %493 : vector<8x128xf32>
    %cst_148 = arith.constant 9.99999974E-6 : f32
    %495 = vector.broadcast %cst_148 : f32 to vector<8x1xf32>
    %496 = arith.addf %492, %495 : vector<8x1xf32>
    %497 = math.rsqrt %496 : vector<8x1xf32>
    %498 = vector.broadcast %497 : vector<8x1xf32> to vector<8x128xf32>
    %499 = arith.mulf %494, %498 : vector<8x128xf32>
    %500 = vector.broadcast %400 : vector<1x128xf32> to vector<8x128xf32>
    %501 = arith.mulf %499, %500 : vector<8x128xf32>
    %502 = vector.broadcast %401 : vector<1x128xf32> to vector<8x128xf32>
    %503 = arith.addf %501, %502 : vector<8x128xf32>
    %504 = vector.shape_cast %503 : vector<8x128xf32> to vector<2x4x128xf32>
    %505 = tpu.concatenate %249, %504 in 1 : vector<2x8x128xf32>, vector<2x4x128xf32> -> vector<2x12x128xf32>
    %506 = vector.shape_cast %505 : vector<2x12x128xf32> to vector<24x128xf32>
    %507 = vector.extract_strided_slice %0 {offsets = [6, 0], sizes = [1, 128], strides = [1, 1]} : vector<9x128xf32> to vector<1x128xf32>
    %508 = vector.shape_cast %507 : vector<1x128xf32> to vector<1x128xf32>
    %509 = vector.broadcast %508 : vector<1x128xf32> to vector<2x128xf32>
    %c0_149 = arith.constant 0 : index
    %c0_150 = arith.constant 0 : index
    %c0_151 = arith.constant 0 : index
    %510 = vector.load %arg14[%c0_149, %c0_150, %c0_151] : memref<1x13x512xf32, #tpu.memory_space<vmem>>, vector<1x13x512xf32>
    %511 = vector.shape_cast %510 : vector<1x13x512xf32> to vector<13x512xf32>
    %c0_152 = arith.constant 0 : index
    %c0_153 = arith.constant 0 : index
    %c0_154 = arith.constant 0 : index
    %512 = vector.load %arg10[%c0_152, %c0_153, %c0_154] : memref<1x128x256xbf16, #tpu.memory_space<vmem>>, vector<1x128x256xbf16>
    %513 = vector.shape_cast %512 : vector<1x128x256xbf16> to vector<128x256xbf16>
    %c0_155 = arith.constant 0 : index
    %c0_156 = arith.constant 0 : index
    %c0_157 = arith.constant 0 : index
    %514 = vector.load %arg11[%c0_155, %c0_156, %c0_157] : memref<1x128x512xbf16, #tpu.memory_space<vmem>>, vector<1x128x512xbf16>
    %515 = vector.shape_cast %514 : vector<1x128x512xbf16> to vector<128x512xbf16>
    %c0_158 = arith.constant 0 : index
    %c0_159 = arith.constant 0 : index
    %c0_160 = arith.constant 0 : index
    %516 = vector.load %arg12[%c0_158, %c0_159, %c0_160] : memref<1x128x512xbf16, #tpu.memory_space<vmem>>, vector<1x128x512xbf16>
    %517 = vector.shape_cast %516 : vector<1x128x512xbf16> to vector<128x512xbf16>
    %c0_161 = arith.constant 0 : index
    %c0_162 = arith.constant 0 : index
    %c0_163 = arith.constant 0 : index
    %518 = vector.load %arg13[%c0_161, %c0_162, %c0_163] : memref<1x512x128xbf16, #tpu.memory_space<vmem>>, vector<1x512x128xbf16>
    %519 = vector.shape_cast %518 : vector<1x512x128xbf16> to vector<512x128xbf16>
    %520 = vector.extract_strided_slice %511 {offsets = [0, 0], sizes = [1, 128], strides = [1, 1]} : vector<13x512xf32> to vector<1x128xf32>
    %521 = vector.extract_strided_slice %511 {offsets = [1, 0], sizes = [1, 128], strides = [1, 1]} : vector<13x512xf32> to vector<1x128xf32>
    %522 = vector.extract_strided_slice %511 {offsets = [2, 0], sizes = [1, 128], strides = [1, 1]} : vector<13x512xf32> to vector<1x128xf32>
    %523 = vector.extract_strided_slice %511 {offsets = [3, 0], sizes = [1, 128], strides = [1, 1]} : vector<13x512xf32> to vector<1x128xf32>
    %524 = vector.extract_strided_slice %511 {offsets = [4, 0], sizes = [1, 128], strides = [1, 1]} : vector<13x512xf32> to vector<1x128xf32>
    %525 = vector.extract_strided_slice %511 {offsets = [5, 0], sizes = [1, 256], strides = [1, 1]} : vector<13x512xf32> to vector<1x256xf32>
    %526 = vector.extract_strided_slice %511 {offsets = [6, 0], sizes = [1, 128], strides = [1, 1]} : vector<13x512xf32> to vector<1x128xf32>
    %527 = vector.extract_strided_slice %511 {offsets = [7, 0], sizes = [1, 128], strides = [1, 1]} : vector<13x512xf32> to vector<1x128xf32>
    %528 = vector.extract_strided_slice %511 {offsets = [8, 0], sizes = [1, 128], strides = [1, 1]} : vector<13x512xf32> to vector<1x128xf32>
    %529 = vector.extract_strided_slice %511 {offsets = [9, 0], sizes = [1, 512], strides = [1, 1]} : vector<13x512xf32> to vector<1x512xf32>
    %530 = vector.extract_strided_slice %511 {offsets = [10, 0], sizes = [1, 128], strides = [1, 1]} : vector<13x512xf32> to vector<1x128xf32>
    %531 = vector.extract_strided_slice %511 {offsets = [11, 0], sizes = [1, 128], strides = [1, 1]} : vector<13x512xf32> to vector<1x128xf32>
    %532 = vector.extract_strided_slice %511 {offsets = [12, 0], sizes = [1, 128], strides = [1, 1]} : vector<13x512xf32> to vector<1x128xf32>
    %533 = vector.extract_strided_slice %513 {offsets = [0, 0], sizes = [128, 128], strides = [1, 1]} : vector<128x256xbf16> to vector<128x128xbf16>
    %534 = arith.truncf %509 : vector<2x128xf32> to vector<2x128xbf16>
    %cst_164 = arith.constant dense<0.000000e+00> : vector<2x128xf32>
    %535 = tpu.matmul %534, %533, %cst_164 {dimension_numbers = #tpu.dot_dimension_numbers<[1], [0], [0], [1], [0, 0, 1, 1], [], []>} : vector<2x128xbf16>, vector<128x128xbf16>, vector<2x128xf32> -> vector<2x128xf32>
    %536 = vector.broadcast %520 : vector<1x128xf32> to vector<2x128xf32>
    %537 = arith.addf %535, %536 : vector<2x128xf32>
    %538 = vector.extract_strided_slice %513 {offsets = [0, 128], sizes = [128, 128], strides = [1, 1]} : vector<128x256xbf16> to vector<128x128xbf16>
    %539 = arith.truncf %537 : vector<2x128xf32> to vector<2x128xbf16>
    %cst_165 = arith.constant dense<0.000000e+00> : vector<2x128xf32>
    %540 = tpu.matmul %539, %538, %cst_165 {dimension_numbers = #tpu.dot_dimension_numbers<[1], [0], [0], [1], [0, 0, 1, 1], [], []>} : vector<2x128xbf16>, vector<128x128xbf16>, vector<2x128xf32> -> vector<2x128xf32>
    %541 = vector.broadcast %521 : vector<1x128xf32> to vector<2x128xf32>
    %542 = arith.addf %540, %541 : vector<2x128xf32>
    %543 = arith.addf %509, %542 : vector<2x128xf32>
    %cst_166 = arith.constant dense<0.000000e+00> : vector<2xf32>
    %544 = vector.multi_reduction <add>, %543, %cst_166 [1] : vector<2x128xf32> to vector<2xf32>
    %545 = vector.shape_cast %544 : vector<2xf32> to vector<2x1xf32>
    %cst_167 = arith.constant 1.280000e+02 : f32
    %546 = vector.broadcast %cst_167 : f32 to vector<2x1xf32>
    %547 = arith.divf %545, %546 : vector<2x1xf32>
    %548 = vector.broadcast %547 : vector<2x1xf32> to vector<2x128xf32>
    %549 = arith.subf %543, %548 : vector<2x128xf32>
    %550 = arith.mulf %549, %549 : vector<2x128xf32>
    %cst_168 = arith.constant dense<0.000000e+00> : vector<2xf32>
    %551 = vector.multi_reduction <add>, %550, %cst_168 [1] : vector<2x128xf32> to vector<2xf32>
    %552 = vector.shape_cast %551 : vector<2xf32> to vector<2x1xf32>
    %cst_169 = arith.constant 1.280000e+02 : f32
    %553 = vector.broadcast %cst_169 : f32 to vector<2x1xf32>
    %554 = arith.divf %552, %553 : vector<2x1xf32>
    %555 = vector.broadcast %547 : vector<2x1xf32> to vector<2x128xf32>
    %556 = arith.subf %543, %555 : vector<2x128xf32>
    %cst_170 = arith.constant 9.99999974E-6 : f32
    %557 = vector.broadcast %cst_170 : f32 to vector<2x1xf32>
    %558 = arith.addf %554, %557 : vector<2x1xf32>
    %559 = math.rsqrt %558 : vector<2x1xf32>
    %560 = vector.broadcast %559 : vector<2x1xf32> to vector<2x128xf32>
    %561 = arith.mulf %556, %560 : vector<2x128xf32>
    %562 = vector.broadcast %522 : vector<1x128xf32> to vector<2x128xf32>
    %563 = arith.mulf %561, %562 : vector<2x128xf32>
    %564 = vector.broadcast %523 : vector<1x128xf32> to vector<2x128xf32>
    %565 = arith.addf %563, %564 : vector<2x128xf32>
    %566 = vector.extract_strided_slice %515 {offsets = [0, 0], sizes = [128, 128], strides = [1, 1]} : vector<128x512xbf16> to vector<128x128xbf16>
    %567 = arith.truncf %565 : vector<2x128xf32> to vector<2x128xbf16>
    %cst_171 = arith.constant dense<0.000000e+00> : vector<2x128xf32>
    %568 = tpu.matmul %567, %566, %cst_171 {dimension_numbers = #tpu.dot_dimension_numbers<[1], [0], [0], [1], [0, 0, 1, 1], [], []>} : vector<2x128xbf16>, vector<128x128xbf16>, vector<2x128xf32> -> vector<2x128xf32>
    %569 = vector.broadcast %524 : vector<1x128xf32> to vector<2x128xf32>
    %570 = arith.addf %568, %569 : vector<2x128xf32>
    %571 = vector.extract_strided_slice %515 {offsets = [0, 128], sizes = [128, 256], strides = [1, 1]} : vector<128x512xbf16> to vector<128x256xbf16>
    %572 = arith.truncf %506 : vector<24x128xf32> to vector<24x128xbf16>
    %cst_172 = arith.constant dense<0.000000e+00> : vector<24x256xf32>
    %573 = tpu.matmul %572, %571, %cst_172 {dimension_numbers = #tpu.dot_dimension_numbers<[1], [0], [0], [1], [0, 0, 1, 1], [], []>} : vector<24x128xbf16>, vector<128x256xbf16>, vector<24x256xf32> -> vector<24x256xf32>
    %574 = vector.broadcast %525 : vector<1x256xf32> to vector<24x256xf32>
    %575 = arith.addf %573, %574 : vector<24x256xf32>
    %576 = vector.shape_cast %575 : vector<24x256xf32> to vector<2x12x256xf32>
    %577 = vector.extract_strided_slice %576 {offsets = [0, 0, 0], sizes = [2, 12, 128], strides = [1, 1, 1]} : vector<2x12x256xf32> to vector<2x12x128xf32>
    %578 = vector.extract_strided_slice %576 {offsets = [0, 0, 128], sizes = [2, 12, 128], strides = [1, 1, 1]} : vector<2x12x256xf32> to vector<2x12x128xf32>
    %579 = vector.shape_cast %570 : vector<2x128xf32> to vector<2x1x128xf32>
    %580 = vector.broadcast %579 : vector<2x1x128xf32> to vector<2x12x128xf32>
    %581 = arith.mulf %580, %577 : vector<2x12x128xf32>
    %582 = vector.extract_strided_slice %581 {offsets = [0, 0, 0], sizes = [2, 12, 16], strides = [1, 1, 1]} : vector<2x12x128xf32> to vector<2x12x16xf32>
    %cst_173 = arith.constant dense<0.000000e+00> : vector<2x12xf32>
    %583 = vector.multi_reduction <add>, %582, %cst_173 [2] : vector<2x12x16xf32> to vector<2x12xf32>
    %584 = vector.shape_cast %583 : vector<2x12xf32> to vector<2x12x1xf32>
    %585 = vector.extract_strided_slice %581 {offsets = [0, 0, 16], sizes = [2, 12, 16], strides = [1, 1, 1]} : vector<2x12x128xf32> to vector<2x12x16xf32>
    %cst_174 = arith.constant dense<0.000000e+00> : vector<2x12xf32>
    %586 = vector.multi_reduction <add>, %585, %cst_174 [2] : vector<2x12x16xf32> to vector<2x12xf32>
    %587 = vector.shape_cast %586 : vector<2x12xf32> to vector<2x12x1xf32>
    %588 = vector.extract_strided_slice %581 {offsets = [0, 0, 32], sizes = [2, 12, 16], strides = [1, 1, 1]} : vector<2x12x128xf32> to vector<2x12x16xf32>
    %cst_175 = arith.constant dense<0.000000e+00> : vector<2x12xf32>
    %589 = vector.multi_reduction <add>, %588, %cst_175 [2] : vector<2x12x16xf32> to vector<2x12xf32>
    %590 = vector.shape_cast %589 : vector<2x12xf32> to vector<2x12x1xf32>
    %591 = vector.extract_strided_slice %581 {offsets = [0, 0, 48], sizes = [2, 12, 16], strides = [1, 1, 1]} : vector<2x12x128xf32> to vector<2x12x16xf32>
    %cst_176 = arith.constant dense<0.000000e+00> : vector<2x12xf32>
    %592 = vector.multi_reduction <add>, %591, %cst_176 [2] : vector<2x12x16xf32> to vector<2x12xf32>
    %593 = vector.shape_cast %592 : vector<2x12xf32> to vector<2x12x1xf32>
    %594 = vector.extract_strided_slice %581 {offsets = [0, 0, 64], sizes = [2, 12, 16], strides = [1, 1, 1]} : vector<2x12x128xf32> to vector<2x12x16xf32>
    %cst_177 = arith.constant dense<0.000000e+00> : vector<2x12xf32>
    %595 = vector.multi_reduction <add>, %594, %cst_177 [2] : vector<2x12x16xf32> to vector<2x12xf32>
    %596 = vector.shape_cast %595 : vector<2x12xf32> to vector<2x12x1xf32>
    %597 = vector.extract_strided_slice %581 {offsets = [0, 0, 80], sizes = [2, 12, 16], strides = [1, 1, 1]} : vector<2x12x128xf32> to vector<2x12x16xf32>
    %cst_178 = arith.constant dense<0.000000e+00> : vector<2x12xf32>
    %598 = vector.multi_reduction <add>, %597, %cst_178 [2] : vector<2x12x16xf32> to vector<2x12xf32>
    %599 = vector.shape_cast %598 : vector<2x12xf32> to vector<2x12x1xf32>
    %600 = vector.extract_strided_slice %581 {offsets = [0, 0, 96], sizes = [2, 12, 16], strides = [1, 1, 1]} : vector<2x12x128xf32> to vector<2x12x16xf32>
    %cst_179 = arith.constant dense<0.000000e+00> : vector<2x12xf32>
    %601 = vector.multi_reduction <add>, %600, %cst_179 [2] : vector<2x12x16xf32> to vector<2x12xf32>
    %602 = vector.shape_cast %601 : vector<2x12xf32> to vector<2x12x1xf32>
    %603 = vector.extract_strided_slice %581 {offsets = [0, 0, 112], sizes = [2, 12, 16], strides = [1, 1, 1]} : vector<2x12x128xf32> to vector<2x12x16xf32>
    %cst_180 = arith.constant dense<0.000000e+00> : vector<2x12xf32>
    %604 = vector.multi_reduction <add>, %603, %cst_180 [2] : vector<2x12x16xf32> to vector<2x12xf32>
    %605 = vector.shape_cast %604 : vector<2x12xf32> to vector<2x12x1xf32>
    %606 = tpu.concatenate %584, %587, %590, %593, %596, %599, %602, %605 in 2 : vector<2x12x1xf32>, vector<2x12x1xf32>, vector<2x12x1xf32>, vector<2x12x1xf32>, vector<2x12x1xf32>, vector<2x12x1xf32>, vector<2x12x1xf32>, vector<2x12x1xf32> -> vector<2x12x8xf32>
    %cst_181 = arith.constant 2.500000e-01 : f32
    %607 = vector.broadcast %cst_181 : f32 to vector<2x12x8xf32>
    %608 = arith.mulf %606, %607 : vector<2x12x8xf32>
    %cst_182 = arith.constant dense<0xFF800000> : vector<2x8xf32>
    %609 = vector.multi_reduction <maximumf>, %608, %cst_182 [1] : vector<2x12x8xf32> to vector<2x8xf32>
    %610 = vector.shape_cast %609 : vector<2x8xf32> to vector<2x1x8xf32>
    %611 = vector.broadcast %610 : vector<2x1x8xf32> to vector<2x12x8xf32>
    %612 = arith.subf %608, %611 : vector<2x12x8xf32>
    %613 = math.exp %612 : vector<2x12x8xf32>
    %cst_183 = arith.constant dense<0.000000e+00> : vector<2x8xf32>
    %614 = vector.multi_reduction <add>, %613, %cst_183 [1] : vector<2x12x8xf32> to vector<2x8xf32>
    %615 = vector.shape_cast %614 : vector<2x8xf32> to vector<2x1x8xf32>
    %616 = tpu.reciprocal %615 {approx = true} : vector<2x1x8xf32> -> vector<2x1x8xf32>
    %617 = vector.broadcast %616 : vector<2x1x8xf32> to vector<2x12x8xf32>
    %618 = arith.mulf %613, %617 : vector<2x12x8xf32>
    %619 = vector.extract_strided_slice %618 {offsets = [0, 0, 0], sizes = [2, 12, 1], strides = [1, 1, 1]} : vector<2x12x8xf32> to vector<2x12x1xf32>
    %620 = vector.extract_strided_slice %578 {offsets = [0, 0, 0], sizes = [2, 12, 16], strides = [1, 1, 1]} : vector<2x12x128xf32> to vector<2x12x16xf32>
    %621 = vector.broadcast %619 : vector<2x12x1xf32> to vector<2x12x16xf32>
    %622 = arith.mulf %621, %620 : vector<2x12x16xf32>
    %cst_184 = arith.constant dense<0.000000e+00> : vector<2x16xf32>
    %623 = vector.multi_reduction <add>, %622, %cst_184 [1] : vector<2x12x16xf32> to vector<2x16xf32>
    %624 = vector.extract_strided_slice %618 {offsets = [0, 0, 1], sizes = [2, 12, 1], strides = [1, 1, 1]} : vector<2x12x8xf32> to vector<2x12x1xf32>
    %625 = vector.extract_strided_slice %578 {offsets = [0, 0, 16], sizes = [2, 12, 16], strides = [1, 1, 1]} : vector<2x12x128xf32> to vector<2x12x16xf32>
    %626 = vector.broadcast %624 : vector<2x12x1xf32> to vector<2x12x16xf32>
    %627 = arith.mulf %626, %625 : vector<2x12x16xf32>
    %cst_185 = arith.constant dense<0.000000e+00> : vector<2x16xf32>
    %628 = vector.multi_reduction <add>, %627, %cst_185 [1] : vector<2x12x16xf32> to vector<2x16xf32>
    %629 = vector.extract_strided_slice %618 {offsets = [0, 0, 2], sizes = [2, 12, 1], strides = [1, 1, 1]} : vector<2x12x8xf32> to vector<2x12x1xf32>
    %630 = vector.extract_strided_slice %578 {offsets = [0, 0, 32], sizes = [2, 12, 16], strides = [1, 1, 1]} : vector<2x12x128xf32> to vector<2x12x16xf32>
    %631 = vector.broadcast %629 : vector<2x12x1xf32> to vector<2x12x16xf32>
    %632 = arith.mulf %631, %630 : vector<2x12x16xf32>
    %cst_186 = arith.constant dense<0.000000e+00> : vector<2x16xf32>
    %633 = vector.multi_reduction <add>, %632, %cst_186 [1] : vector<2x12x16xf32> to vector<2x16xf32>
    %634 = vector.extract_strided_slice %618 {offsets = [0, 0, 3], sizes = [2, 12, 1], strides = [1, 1, 1]} : vector<2x12x8xf32> to vector<2x12x1xf32>
    %635 = vector.extract_strided_slice %578 {offsets = [0, 0, 48], sizes = [2, 12, 16], strides = [1, 1, 1]} : vector<2x12x128xf32> to vector<2x12x16xf32>
    %636 = vector.broadcast %634 : vector<2x12x1xf32> to vector<2x12x16xf32>
    %637 = arith.mulf %636, %635 : vector<2x12x16xf32>
    %cst_187 = arith.constant dense<0.000000e+00> : vector<2x16xf32>
    %638 = vector.multi_reduction <add>, %637, %cst_187 [1] : vector<2x12x16xf32> to vector<2x16xf32>
    %639 = vector.extract_strided_slice %618 {offsets = [0, 0, 4], sizes = [2, 12, 1], strides = [1, 1, 1]} : vector<2x12x8xf32> to vector<2x12x1xf32>
    %640 = vector.extract_strided_slice %578 {offsets = [0, 0, 64], sizes = [2, 12, 16], strides = [1, 1, 1]} : vector<2x12x128xf32> to vector<2x12x16xf32>
    %641 = vector.broadcast %639 : vector<2x12x1xf32> to vector<2x12x16xf32>
    %642 = arith.mulf %641, %640 : vector<2x12x16xf32>
    %cst_188 = arith.constant dense<0.000000e+00> : vector<2x16xf32>
    %643 = vector.multi_reduction <add>, %642, %cst_188 [1] : vector<2x12x16xf32> to vector<2x16xf32>
    %644 = vector.extract_strided_slice %618 {offsets = [0, 0, 5], sizes = [2, 12, 1], strides = [1, 1, 1]} : vector<2x12x8xf32> to vector<2x12x1xf32>
    %645 = vector.extract_strided_slice %578 {offsets = [0, 0, 80], sizes = [2, 12, 16], strides = [1, 1, 1]} : vector<2x12x128xf32> to vector<2x12x16xf32>
    %646 = vector.broadcast %644 : vector<2x12x1xf32> to vector<2x12x16xf32>
    %647 = arith.mulf %646, %645 : vector<2x12x16xf32>
    %cst_189 = arith.constant dense<0.000000e+00> : vector<2x16xf32>
    %648 = vector.multi_reduction <add>, %647, %cst_189 [1] : vector<2x12x16xf32> to vector<2x16xf32>
    %649 = vector.extract_strided_slice %618 {offsets = [0, 0, 6], sizes = [2, 12, 1], strides = [1, 1, 1]} : vector<2x12x8xf32> to vector<2x12x1xf32>
    %650 = vector.extract_strided_slice %578 {offsets = [0, 0, 96], sizes = [2, 12, 16], strides = [1, 1, 1]} : vector<2x12x128xf32> to vector<2x12x16xf32>
    %651 = vector.broadcast %649 : vector<2x12x1xf32> to vector<2x12x16xf32>
    %652 = arith.mulf %651, %650 : vector<2x12x16xf32>
    %cst_190 = arith.constant dense<0.000000e+00> : vector<2x16xf32>
    %653 = vector.multi_reduction <add>, %652, %cst_190 [1] : vector<2x12x16xf32> to vector<2x16xf32>
    %654 = vector.extract_strided_slice %618 {offsets = [0, 0, 7], sizes = [2, 12, 1], strides = [1, 1, 1]} : vector<2x12x8xf32> to vector<2x12x1xf32>
    %655 = vector.extract_strided_slice %578 {offsets = [0, 0, 112], sizes = [2, 12, 16], strides = [1, 1, 1]} : vector<2x12x128xf32> to vector<2x12x16xf32>
    %656 = vector.broadcast %654 : vector<2x12x1xf32> to vector<2x12x16xf32>
    %657 = arith.mulf %656, %655 : vector<2x12x16xf32>
    %cst_191 = arith.constant dense<0.000000e+00> : vector<2x16xf32>
    %658 = vector.multi_reduction <add>, %657, %cst_191 [1] : vector<2x12x16xf32> to vector<2x16xf32>
    %659 = tpu.concatenate %623, %628, %633, %638, %643, %648, %653, %658 in 1 : vector<2x16xf32>, vector<2x16xf32>, vector<2x16xf32>, vector<2x16xf32>, vector<2x16xf32>, vector<2x16xf32>, vector<2x16xf32>, vector<2x16xf32> -> vector<2x128xf32>
    %660 = vector.extract_strided_slice %515 {offsets = [0, 384], sizes = [128, 128], strides = [1, 1]} : vector<128x512xbf16> to vector<128x128xbf16>
    %661 = arith.truncf %659 : vector<2x128xf32> to vector<2x128xbf16>
    %cst_192 = arith.constant dense<0.000000e+00> : vector<2x128xf32>
    %662 = tpu.matmul %661, %660, %cst_192 {dimension_numbers = #tpu.dot_dimension_numbers<[1], [0], [0], [1], [0, 0, 1, 1], [], []>} : vector<2x128xbf16>, vector<128x128xbf16>, vector<2x128xf32> -> vector<2x128xf32>
    %663 = vector.broadcast %526 : vector<1x128xf32> to vector<2x128xf32>
    %664 = arith.addf %662, %663 : vector<2x128xf32>
    %665 = arith.addf %565, %664 : vector<2x128xf32>
    %cst_193 = arith.constant dense<0.000000e+00> : vector<2xf32>
    %666 = vector.multi_reduction <add>, %665, %cst_193 [1] : vector<2x128xf32> to vector<2xf32>
    %667 = vector.shape_cast %666 : vector<2xf32> to vector<2x1xf32>
    %cst_194 = arith.constant 1.280000e+02 : f32
    %668 = vector.broadcast %cst_194 : f32 to vector<2x1xf32>
    %669 = arith.divf %667, %668 : vector<2x1xf32>
    %670 = vector.broadcast %669 : vector<2x1xf32> to vector<2x128xf32>
    %671 = arith.subf %665, %670 : vector<2x128xf32>
    %672 = arith.mulf %671, %671 : vector<2x128xf32>
    %cst_195 = arith.constant dense<0.000000e+00> : vector<2xf32>
    %673 = vector.multi_reduction <add>, %672, %cst_195 [1] : vector<2x128xf32> to vector<2xf32>
    %674 = vector.shape_cast %673 : vector<2xf32> to vector<2x1xf32>
    %cst_196 = arith.constant 1.280000e+02 : f32
    %675 = vector.broadcast %cst_196 : f32 to vector<2x1xf32>
    %676 = arith.divf %674, %675 : vector<2x1xf32>
    %677 = vector.broadcast %669 : vector<2x1xf32> to vector<2x128xf32>
    %678 = arith.subf %665, %677 : vector<2x128xf32>
    %cst_197 = arith.constant 9.99999974E-6 : f32
    %679 = vector.broadcast %cst_197 : f32 to vector<2x1xf32>
    %680 = arith.addf %676, %679 : vector<2x1xf32>
    %681 = math.rsqrt %680 : vector<2x1xf32>
    %682 = vector.broadcast %681 : vector<2x1xf32> to vector<2x128xf32>
    %683 = arith.mulf %678, %682 : vector<2x128xf32>
    %684 = vector.broadcast %527 : vector<1x128xf32> to vector<2x128xf32>
    %685 = arith.mulf %683, %684 : vector<2x128xf32>
    %686 = vector.broadcast %528 : vector<1x128xf32> to vector<2x128xf32>
    %687 = arith.addf %685, %686 : vector<2x128xf32>
    %688 = arith.truncf %687 : vector<2x128xf32> to vector<2x128xbf16>
    %cst_198 = arith.constant dense<0.000000e+00> : vector<2x512xf32>
    %689 = tpu.matmul %688, %517, %cst_198 {dimension_numbers = #tpu.dot_dimension_numbers<[1], [0], [0], [1], [0, 0, 1, 1], [], []>} : vector<2x128xbf16>, vector<128x512xbf16>, vector<2x512xf32> -> vector<2x512xf32>
    %690 = vector.broadcast %529 : vector<1x512xf32> to vector<2x512xf32>
    %691 = arith.addf %689, %690 : vector<2x512xf32>
    %cst_199 = arith.constant 0.000000e+00 : f32
    %692 = vector.broadcast %cst_199 : f32 to vector<2x512xf32>
    %693 = arith.maximumf %691, %692 : vector<2x512xf32>
    %694 = arith.truncf %693 : vector<2x512xf32> to vector<2x512xbf16>
    %cst_200 = arith.constant dense<0.000000e+00> : vector<2x128xf32>
    %695 = tpu.matmul %694, %519, %cst_200 {dimension_numbers = #tpu.dot_dimension_numbers<[1], [0], [0], [1], [0, 0, 1, 1], [], []>} : vector<2x512xbf16>, vector<512x128xbf16>, vector<2x128xf32> -> vector<2x128xf32>
    %696 = vector.broadcast %530 : vector<1x128xf32> to vector<2x128xf32>
    %697 = arith.addf %695, %696 : vector<2x128xf32>
    %698 = arith.addf %687, %697 : vector<2x128xf32>
    %cst_201 = arith.constant dense<0.000000e+00> : vector<2xf32>
    %699 = vector.multi_reduction <add>, %698, %cst_201 [1] : vector<2x128xf32> to vector<2xf32>
    %700 = vector.shape_cast %699 : vector<2xf32> to vector<2x1xf32>
    %cst_202 = arith.constant 1.280000e+02 : f32
    %701 = vector.broadcast %cst_202 : f32 to vector<2x1xf32>
    %702 = arith.divf %700, %701 : vector<2x1xf32>
    %703 = vector.broadcast %702 : vector<2x1xf32> to vector<2x128xf32>
    %704 = arith.subf %698, %703 : vector<2x128xf32>
    %705 = arith.mulf %704, %704 : vector<2x128xf32>
    %cst_203 = arith.constant dense<0.000000e+00> : vector<2xf32>
    %706 = vector.multi_reduction <add>, %705, %cst_203 [1] : vector<2x128xf32> to vector<2xf32>
    %707 = vector.shape_cast %706 : vector<2xf32> to vector<2x1xf32>
    %cst_204 = arith.constant 1.280000e+02 : f32
    %708 = vector.broadcast %cst_204 : f32 to vector<2x1xf32>
    %709 = arith.divf %707, %708 : vector<2x1xf32>
    %710 = vector.broadcast %702 : vector<2x1xf32> to vector<2x128xf32>
    %711 = arith.subf %698, %710 : vector<2x128xf32>
    %cst_205 = arith.constant 9.99999974E-6 : f32
    %712 = vector.broadcast %cst_205 : f32 to vector<2x1xf32>
    %713 = arith.addf %709, %712 : vector<2x1xf32>
    %714 = math.rsqrt %713 : vector<2x1xf32>
    %715 = vector.broadcast %714 : vector<2x1xf32> to vector<2x128xf32>
    %716 = arith.mulf %711, %715 : vector<2x128xf32>
    %717 = vector.broadcast %531 : vector<1x128xf32> to vector<2x128xf32>
    %718 = arith.mulf %716, %717 : vector<2x128xf32>
    %719 = vector.broadcast %532 : vector<1x128xf32> to vector<2x128xf32>
    %720 = arith.addf %718, %719 : vector<2x128xf32>
    %c0_206 = arith.constant 0 : index
    %c0_207 = arith.constant 0 : index
    %721 = vector.load %arg15[%c0_206, %c0_207] : memref<128x64xbf16, #tpu.memory_space<vmem>>, vector<128x64xbf16>
    %722 = vector.extract_strided_slice %0 {offsets = [7, 0], sizes = [1, 64], strides = [1, 1]} : vector<9x128xf32> to vector<1x64xf32>
    %723 = arith.truncf %720 : vector<2x128xf32> to vector<2x128xbf16>
    %cst_208 = arith.constant dense<0.000000e+00> : vector<2x64xf32>
    %724 = tpu.matmul %723, %721, %cst_208 {dimension_numbers = #tpu.dot_dimension_numbers<[1], [0], [0], [1], [0, 0, 1, 1], [], []>} : vector<2x128xbf16>, vector<128x64xbf16>, vector<2x64xf32> -> vector<2x64xf32>
    %725 = vector.broadcast %722 : vector<1x64xf32> to vector<2x64xf32>
    %726 = arith.addf %724, %725 : vector<2x64xf32>
    %cst_209 = arith.constant 0.000000e+00 : f32
    %727 = vector.broadcast %cst_209 : f32 to vector<2x64xf32>
    %728 = arith.maximumf %726, %727 : vector<2x64xf32>
    %729 = vector.extract_strided_slice %0 {offsets = [8, 0], sizes = [1, 64], strides = [1, 1]} : vector<9x128xf32> to vector<1x64xf32>
    %730 = vector.extract_strided_slice %0 {offsets = [7, 64], sizes = [1, 1], strides = [1, 1]} : vector<9x128xf32> to vector<1x1xf32>
    %731 = vector.broadcast %729 : vector<1x64xf32> to vector<2x64xf32>
    %732 = arith.mulf %728, %731 : vector<2x64xf32>
    %cst_210 = arith.constant dense<0.000000e+00> : vector<2xf32>
    %733 = vector.multi_reduction <add>, %732, %cst_210 [1] : vector<2x64xf32> to vector<2xf32>
    %734 = vector.shape_cast %733 : vector<2xf32> to vector<2x1xf32>
    %735 = vector.broadcast %730 : vector<1x1xf32> to vector<2x1xf32>
    %736 = arith.addf %734, %735 : vector<2x1xf32>
    %c0_211 = arith.constant 0 : index
    %c0_212 = arith.constant 0 : index
    %737 = vector.load %arg16[%c0_211, %c0_212] : memref<2x1xf32, #tpu.memory_space<vmem>>, vector<2x1xf32>
    tpu.vector_store %arg16[%c0_211, %c0_212], %736 {strides = array<i32>} : memref<2x1xf32, #tpu.memory_space<vmem>>, vector<2x1xf32>,
    return
  }
}

</mosaic_0001>

<bundles_post_ra>
// kernel: value_network_forward.1
= control target key start
LH: loop header
LB: loop body
LE: loop exit
PB: predicated region body
PF: predicated region fallthrough
CT: control target
= control target key end

     0   :  { %s17597_s0 = inlined_call_operand.vmem [shape: f32[2,8,6], index: 0, kind: input, shape index: {}]   ;;  %s17598_s1 = inlined_call_operand.vmem [shape: f32[2,4,700], index: 1, kind: input, shape index: {}]   ;;  %s17599_s2 = inlined_call_operand.vmem [shape: bf16[6,128], index: 2, kind: input, shape index: {}]   ;;  %s17600_s3 = inlined_call_operand.vmem [shape: bf16[700,128], index: 3, kind: input, shape index: {}]   ;;  %s17601_s4 = inlined_call_operand.hbm [shape: f32[9,128], index: 4, kind: input, shape index: {}]   ;;  %s17602_s5 = inlined_call_operand.vmem [shape: bf16[4,128,384], index: 5, kind: input, shape index: {}]   ;;  %s17603_s6 = inlined_call_operand.vmem [shape: bf16[4,128,128], index: 6, kind: input, shape index: {}]   ;;  %s17604_s7 = inlined_call_operand.vmem [shape: bf16[4,128,512], index: 7, kind: input, shape index: {}]   ;;  %s17605_s8 = inlined_call_operand.vmem [shape: bf16[4,512,128], index: 8, kind: input, shape index: {}]   ;;  %s17606_s9 = inlined_call_operand.hbm [shape: f32[4,8,512], index: 9, kind: input, shape index: {}]   ;;  %s17607_s10 = inlined_call_operand.hbm [shape: bf16[1,128,256], index: 10, kind: input, shape index: {}]   ;;  %s17608_s11 = inlined_call_operand.hbm [shape: bf16[1,128,512], index: 11, kind: input, shape index: {}]   ;;  %s17609_s12 = inlined_call_operand.hbm [shape: bf16[1,128,512], index: 12, kind: input, shape index: {}]   ;;  %s17610_s13 = inlined_call_operand.hbm [shape: bf16[1,512,128], index: 13, kind: input, shape index: {}]   ;;  %s17611_s14 = inlined_call_operand.vmem [shape: f32[1,13,512], index: 14, kind: input, shape index: {}]   ;;  %s17612_s15 = inlined_call_operand.vmem [shape: bf16[128,64], index: 15, kind: input, shape index: {}]   ;;  %s17613_s16 = inlined_call_operand.vmem [shape: f32[2,1], index: 16, kind: output, shape index: {}]  }
   0x1   :  { %17618 = sst [smem:[#allocation16_spill]] %s17597_s0 }
   0x2   :  { %21 = vsyncpa [#allocation3], 0 }
   0x3   :  { %22 = vsyncpa [#allocation5], 0 }
   0x4   :  { %23 = vsyncpa [#allocation8], 0 }
   0x5   :  { %24 = vsyncpa [#allocation11], 0  ;;  %s14475_s21 = smov [#allocation4]   ;;  %s14335_s25 = scalar_lea.hbm %s17606_s9, 2048 }
   0x6   :  { %s58_s22 = sshll.u32 %s14475_s21, 4  ;;  %p14336_p0 = scmp.ne.s32.totalorder %s17606_s9, %s14335_s25  ;;  %s59_s22 = int_to_ptr.vmem [resolvable:$true] %s58_s22 }
   0x7   :  { %p14339_p1 = scmp.lt.u32.totalorder %s14335_s25, %s17606_s9 }
   0x9   :  { %p14341_p2 = pnand %p14339_p1, %p14336_p0 }
   0xb   :  { %14344 = shalt.err (!%p14341_p2)
}
   0xc   :  { %s14345_s30 = scalar_lea.vmem %s59_s22, 2048  ;;  %p14350_p4 = scmp.lt.s32.totalorder %s59_s22, %s59_s22 }
   0xd   :  { %p14346_p3 = scmp.ne.s32.totalorder %s59_s22, %s14345_s30  ;;  %p14351_p5 = scmp.lt.s32.totalorder %s14345_s30, %s14345_s30 }
   0xf   :  { %p14352_p6 = por %p14351_p5, %p14350_p4 }
  0x11   :  { %p14353_p7 = pnand %p14352_p6, %p14346_p3 }
  0x13   :  { %14356 = shalt.err (!%p14353_p7)
}
  0x14   :  { %s14476_s0 = smov 512   ;;  %s17615_s17 = smov 32  }
  0x15   :  { %64 = dma.hbm_to_vmem [thread:$0]  %s17606_s9, 2048, %s59_s22, [#allocation5], %s14476_s0, %s14476_s0, %s17615_s17  }
  0x16   :  { %s14478_s20 = smov [#allocation7]   ;;  %s14357_s25 = scalar_lea.hbm %s17608_s11, 4096 }
  0x17   :  { %s82_s21 = sshll.u32 %s14478_s20, 4  ;;  %p14358_p8 = scmp.ne.s32.totalorder %s17608_s11, %s14357_s25  ;;  %s83_s21 = int_to_ptr.vmem [resolvable:$true] %s82_s21 }
  0x18   :  { %p14361_p9 = scmp.lt.u32.totalorder %s14357_s25, %s17608_s11 }
  0x1a   :  { %p14363_p10 = pnand %p14361_p9, %p14358_p8 }
  0x1c   :  { %14366 = shalt.err (!%p14363_p10)
}
  0x1d   :  { %s14367_s30 = scalar_lea.vmem %s83_s21, 4096  ;;  %p14372_p12 = scmp.lt.s32.totalorder %s83_s21, %s83_s21 }
  0x1e   :  { %p14368_p11 = scmp.ne.s32.totalorder %s83_s21, %s14367_s30  ;;  %p14373_p13 = scmp.lt.s32.totalorder %s14367_s30, %s14367_s30 }
  0x20   :  { %p14374_p0 = por %p14373_p13, %p14372_p12 }
  0x22   :  { %p14375_p1 = pnand %p14374_p0, %p14368_p11 }
  0x24   :  { %14378 = shalt.err (!%p14375_p1)
}
  0x25   :  { %s17617_s9 = smov 256   ;;  %s14480_s22 = smov 16  }
  0x26   :  { %88 = dma.hbm_to_vmem [thread:$0]  %s17608_s11, 4096, %s83_s21, [#allocation8], %s17617_s9, %s17617_s9, %s14480_s22  }
  0x27   :  { %s14481_s19 = smov [#allocation2]   ;;  %s14379_s25 = scalar_lea.hbm %s17601_s4, 256 }
  0x28   :  { %s38_s20 = sshll.u32 %s14481_s19, 4  ;;  %p14380_p2 = scmp.ne.s32.totalorder %s17601_s4, %s14379_s25  ;;  %s39_s20 = int_to_ptr.vmem [resolvable:$true] %s38_s20 }
  0x29   :  { %p14383_p3 = scmp.lt.u32.totalorder %s14379_s25, %s17601_s4 }
  0x2b   :  { %p14385_p4 = pnand %p14383_p3, %p14380_p2 }
  0x2d   :  { %14388 = shalt.err (!%p14385_p4)
}
  0x2e   :  { %s14389_s30 = scalar_lea.vmem %s39_s20, 256  ;;  %p14394_p6 = scmp.lt.s32.totalorder %s39_s20, %s39_s20 }
  0x2f   :  { %p14390_p5 = scmp.ne.s32.totalorder %s39_s20, %s14389_s30  ;;  %p14395_p7 = scmp.lt.s32.totalorder %s14389_s30, %s14389_s30 }
  0x31   :  { %p14396_p8 = por %p14395_p7, %p14394_p6 }
  0x33   :  { %p14397_p9 = pnand %p14396_p8, %p14390_p5 }
  0x35   :  { %14400 = shalt.err (!%p14397_p9)
}
  0x36   :  { %s14482_s11 = smov 128   ;;  %s14483_s21 = smov 8  }
  0x37   :  { %44 = dma.hbm_to_vmem [thread:$0]  %s17601_s4, 256, %s39_s20, [#allocation3], %s14482_s11, %s14482_s11, %s14483_s21  }
  0x38   :  { %s14484_s19 = smov [#allocation6]   ;;  %s14485_s24 = smov [#allocation9]  }
  0x39   :  { %s70_s23 = sshll.u32 %s14484_s19, 4  ;;  %s94_s25 = sshll.u32 %s14485_s24, 4  ;;  %s71_s23 = int_to_ptr.vmem [resolvable:$true] %s70_s23  ;;  %s95_s25 = int_to_ptr.vmem [resolvable:$true] %s94_s25 }
  0x3a   :  { %s14401_s28 = scalar_lea.hbm %s17607_s10, 2048 }
  0x3b   :  { %p14402_p10 = scmp.ne.s32.totalorder %s17607_s10, %s14401_s28  ;;  %p14405_p11 = scmp.lt.u32.totalorder %s14401_s28, %s17607_s10 }
  0x3d   :  { %p14407_p12 = pnand %p14405_p11, %p14402_p10 }
  0x3f   :  { %14410 = shalt.err (!%p14407_p12)
}
  0x40   :  { %s14411_s4 = scalar_lea.vmem %s71_s23, 2048  ;;  %p14416_p0 = scmp.lt.s32.totalorder %s71_s23, %s71_s23 }
  0x41   :  { %p14412_p13 = scmp.ne.s32.totalorder %s71_s23, %s14411_s4  ;;  %p14417_p1 = scmp.lt.s32.totalorder %s14411_s4, %s14411_s4 }
  0x43   :  { %p14418_p2 = por %p14417_p1, %p14416_p0 }
  0x45   :  { %p14419_p3 = pnand %p14418_p2, %p14412_p13 }
  0x47   :  { %14422 = shalt.err (!%p14419_p3)
}
  0x48   :  { %76 = dma.hbm_to_vmem [thread:$0]  %s17607_s10, 2048, %s71_s23, [#allocation5], %s14482_s11, %s14482_s11, %s14483_s21  }
  0x49   :  { %s14423_s24 = scalar_lea.hbm %s17609_s12, 4096 }
  0x4a   :  { %p14424_p4 = scmp.ne.s32.totalorder %s17609_s12, %s14423_s24  ;;  %p14427_p5 = scmp.lt.u32.totalorder %s14423_s24, %s17609_s12 }
  0x4c   :  { %p14429_p6 = pnand %p14427_p5, %p14424_p4 }
  0x4e   :  { %14432 = shalt.err (!%p14429_p6)
}
  0x4f   :  { %s14433_s28 = scalar_lea.vmem %s95_s25, 4096  ;;  %p14438_p8 = scmp.lt.s32.totalorder %s95_s25, %s95_s25 }
  0x50   :  { %p14434_p7 = scmp.ne.s32.totalorder %s95_s25, %s14433_s28  ;;  %p14439_p9 = scmp.lt.s32.totalorder %s14433_s28, %s14433_s28 }
  0x52   :  { %p14440_p10 = por %p14439_p9, %p14438_p8 }
  0x54   :  { %p14441_p11 = pnand %p14440_p10, %p14434_p7 }
  0x56   :  { %14444 = shalt.err (!%p14441_p11)
}
  0x57   :  { %s17619_s10 = smov 256   ;;  %s14486_s23 = smov [#allocation10]  }
  0x58   :  { %100 = dma.hbm_to_vmem [thread:$0]  %s17609_s12, 4096, %s95_s25, [#allocation8], %s17619_s10, %s17619_s10, %s14480_s22  }
  0x59   :  { %s106_s29 = sshll.u32 %s14486_s23, 4  ;;  %s14445_s20 = scalar_lea.hbm %s17610_s13, 4096  ;;  %s107_s29 = int_to_ptr.vmem [resolvable:$true] %s106_s29 }
  0x5a   :  { %p14446_p12 = scmp.ne.s32.totalorder %s17610_s13, %s14445_s20  ;;  %p14449_p13 = scmp.lt.u32.totalorder %s14445_s20, %s17610_s13 }
  0x5c   :  { %p14451_p0 = pnand %p14449_p13, %p14446_p12 }
  0x5e   :  { %14454 = shalt.err (!%p14451_p0)
}
  0x5f   :  { %s14455_s17 = scalar_lea.vmem %s107_s29, 4096  ;;  %p14460_p2 = scmp.lt.s32.totalorder %s107_s29, %s107_s29 }
  0x60   :  { %p14456_p1 = scmp.ne.s32.totalorder %s107_s29, %s14455_s17  ;;  %p14461_p3 = scmp.lt.s32.totalorder %s14455_s17, %s14455_s17 }
  0x62   :  { %p14462_p4 = por %p14461_p3, %p14460_p2 }
  0x64   :  { %p14463_p5 = pnand %p14462_p4, %p14456_p1 }
  0x66   :  { %14466 = shalt.err (!%p14463_p5)
}
  0x67   :  { %s14487_s12 = smov 64   ;;  %s14488_s25 = smov 4  }
  0x68   :  { %112 = dma.hbm_to_vmem [thread:$0]  %s17610_s13, 4096, %s107_s29, [#allocation11], %s14487_s12, %s14487_s12, %s14488_s25  }
  0x69   :  { %14467 = dma.done.wait [#allocation3], 256  }
  0x6a   :  { %14468 = vsyncadd [#allocation3], 4294967040 }
  0x6b   :  { %14469 = dma.done.wait [#allocation5], 4096  }
  0x6c   :  { %14470 = vsyncadd [#allocation5], 4294963200 }
  0x6d   :  { %14471 = dma.done.wait [#allocation8], 8192  }
  0x6e   :  { %14472 = vsyncadd [#allocation8], 4294959104 }
  0x6f   :  { %14473 = dma.done.wait [#allocation11], 4096  }
  0x70   :  { %14474 = vsyncadd [#allocation11], 4294963200  ;;  %v14489_v0 = vmov 0.0   ;;  %vm14490_vm0 = vmmov 0   ;;  %vm150_vm1 = vcmask 1042432   ;;  %s17620_s11 = sld [smem:[#allocation16_spill]]  ;;  %v142_v31 = vlaneseq }
  0x71   :  { %12723 = vmatprep.subr.bf16.mxu0 %v14489_v0  ;;  %12725 = vmatprep.mubr.msk.bf16.mxu0 %vm14490_vm0, %v14489_v0  ;;  %v140_v1 = vld [vmem:[%s17599_s2] sm:$0x7]  ;;  %vm146_vm2 = vcmask 48128   ;;  %v13459_v6 = vld [vmem:[%s17602_s5 + $0x4] ss:$12 sps:$4 sm:$0xff]   ;;  %v14491_v30 = vmov 0  }
  0x72   :  { %v152_v4 = vsel %vm150_vm1, %v140_v1, 0  ;;  %v13461_v7 = vld [vmem:[%s17602_s5] ss:$12 sps:$4 sm:$0xff]   ;;  %484 = vmatprep.subr.bf16.mxu1 %v13459_v6  ;;  %v13462_v8 = vld [vmem:[%s17602_s5 + $0x8] ss:$12 sps:$4 sm:$0xff]   ;;  %516 = vmatprep.mubr.bf16.mxu1 %v14491_v30  ;;  %v14770_v32 = vshrl.u32 %v142_v31, 7 }
  0x73   :  { %12724 = vmatpush3.bf16.msra.mxu0 %v152_v4  ;;  %485 = vmatpush1.bf16.msra.mxu1 %v13461_v7  ;;  %v13463_v9 = vld [vmem:[%s17602_s5 + $0x1c] ss:$12 sps:$4 sm:$0xff]   ;;  %v13465_v10 = vld [vmem:[%s17602_s5 + $0x18] ss:$12 sps:$4 sm:$0xff]   ;;  %v13466_v11 = vld [vmem:[%s17602_s5 + $0x20] ss:$12 sps:$4 sm:$0xff]  }
  0x74   :  { %12729 = vmatprep.subr.bf16.mxu0 %v14489_v0  ;;  %486 = vmatprep.subr.bf16.mxu1 %v13463_v9  ;;  %v13467_v12 = vld [vmem:[%s17602_s5 + $0x34] ss:$12 sps:$4 sm:$0xff]   ;;  %v13469_v13 = vld [vmem:[%s17602_s5 + $0x30] ss:$12 sps:$4 sm:$0xff]   ;;  %v13471_v14 = vld [vmem:[%s17602_s5 + $0x4c] ss:$12 sps:$4 sm:$0xff]  }
  0x75   :  { %v13470_v15 = vld [vmem:[%s17602_s5 + $0x38] ss:$12 sps:$4 sm:$0xff]   ;;  %v13473_v16 = vld [vmem:[%s17602_s5 + $0x48] ss:$12 sps:$4 sm:$0xff]   ;;  %v13474_v18 = vld [vmem:[%s17602_s5 + $0x50] ss:$12 sps:$4 sm:$0xff]  }
  0x76   :  { %v138_v2 = vld [vmem:[%s17620_s11] sm:$0xff]  ;;  %v139_v3 = vld [vmem:[%s17620_s11 + $0x8] sm:$0xff]  ;;  %v13485_v25 = vld [vmem:[%s17602_s5 + $0x90] ss:$12 sps:$4 sm:$0xff]   ;;  %v14773_v34 = vsub.s32 4, %v14770_v32  ;;  %v14787_v43 = vsub.s32 0, %v14770_v32 }
  0x77   :  { %v141_v5 = vpack.c.bf16 %v139_v3, %v138_v2  ;;  %487 = vmatpush1.bf16.msra.mxu1 %v13465_v10  ;;  %v13475_v17 = vld [vmem:[%s17602_s5 + $0x64] ss:$12 sps:$4 sm:$0xff]   ;;  %v13477_v19 = vld [vmem:[%s17602_s5 + $0x60] ss:$12 sps:$4 sm:$0xff]   ;;  %v13478_v20 = vld [vmem:[%s17602_s5 + $0x68] ss:$12 sps:$4 sm:$0xff]  }
  0x78   :  { %488 = vmatprep.subr.bf16.mxu1 %v13467_v12  ;;  %v13479_v21 = vld [vmem:[%s17602_s5 + $0x7c] ss:$12 sps:$4 sm:$0xff]   ;;  %v13481_v22 = vld [vmem:[%s17602_s5 + $0x78] ss:$12 sps:$4 sm:$0xff]   ;;  %v13483_v23 = vld [vmem:[%s17602_s5 + $0x94] ss:$12 sps:$4 sm:$0xff]  }
  0x79   :  { %12726 = vmatmul.mubr.msk.bf16.vlgmr.msra.gmra.mrb[0].mxu0 %vm146_vm2, %v141_v5  ;;  %v13482_v24 = vld [vmem:[%s17602_s5 + $0x80] ss:$12 sps:$4 sm:$0xff]   ;;  %v13486_v26 = vld [vmem:[%s17602_s5 + $0x98] ss:$12 sps:$4 sm:$0xff]   ;;  %v13489_v28 = vld [vmem:[%s17602_s5 + $0xa8] ss:$12 sps:$4 sm:$0xff]  }
  0x7a   :  { %12730 = vmatpush3.bf16.msra.mxu0 %v13462_v8  ;;  %12745 = vmatprep.mubr.msk.bf16.mxu0 %vm14490_vm0, %v14489_v0  ;;  %v13487_v27 = vld [vmem:[%s17602_s5 + $0xac] ss:$12 sps:$4 sm:$0xff]   ;;  %v13490_v29 = vld [vmem:[%s17602_s5 + $0xb0] ss:$12 sps:$4 sm:$0xff]   ;;  %v136_v33 = vld [vmem:[#allocation2] sm:$0xff]  ;;  %vm616_vm3 = vcmask 261120  }
  0x7b   :  { %12731 = vmatprep.subr.bf16.mxu0 %v14489_v0  ;;  %489 = vmatpush1.bf16.msra.mxu1 %v13469_v13  ;;  %v145_v35 = vrot.slane %v136_v33, %v14773_v34  ;;  %v340_v44 = vld [vmem:[#allocation4 + $0x8] sm:$0xff]  ;;  %v14789_v45 = vld [vmem:[#allocation4] sm:$0xff]  ;;  %s14492_s24 = smov 96   ;;  %s17621_s17 = smov 32   ;;  %vm1093_vm4 = vcmask 1043456   ;;  %vm993_vm5 = vcmask 64512  }
  0x7c   :  { %490 = vmatprep.subr.bf16.mxu1 %v13471_v14  ;;  %v351_v46 = vrot.slane %v340_v44, %v14787_v43  ;;  %v347_v47 = vrot.slane %v14789_v45, %v14787_v43  ;;  %vm1485_vm6 = vcmask 523264   ;;  %vm1488_vm7 = vcmask 785408   ;;  %s14495_s20 = smov 112   ;;  %s14497_s2 = smov 80  }
  0x7d   :  { %vm4611_vm8 = vcmask 490496   ;;  %vm4615_vm9 = vcmask 1045504   ;;  %vm5661_vm10 = vcmask 1041408   ;;  %vm5560_vm11 = vcmask 27648   ;;  %s14498_s0 = smov 48  }
  0x7e   :  { %12732 = vmatpush3.bf16.msra.mxu0 %v13466_v11  ;;  %v14823_v11 = vld [vmem:[#allocation4 + $0x10] sm:$0xff]  ;;  %vm5657_vm12 = vcmask 31744   ;;  %vm9620_vm13 = vcmask 130048   ;;  %vm9624_vm14 = vcmask 125952   ;;  %vm9806_vm15 = vcmask 7168  }
  0x7f   :  { %12733 = vmatprep.subr.bf16.mxu0 %v14489_v0  ;;  %491 = vmatpush1.bf16.msra.mxu1 %v13473_v16  ;;  %v355_v14 = vrot.slane %v14823_v11, %v14787_v43  ;;  %vm9811_vm1 = vcmask 15360  }
  0x80   :  { %492 = vmatprep.subr.bf16.mxu1 %v13475_v17 }
  0x82   :  { %12734 = vmatpush3.bf16.msra.mxu0 %v13470_v15 }
  0x83   :  { %12735 = vmatprep.subr.bf16.mxu0 %v14489_v0  ;;  %493 = vmatpush1.bf16.msra.mxu1 %v13477_v19 }
  0x84   :  { %494 = vmatprep.subr.bf16.mxu1 %v13479_v21 }
  0x86   :  { %12736 = vmatpush3.bf16.msra.mxu0 %v13474_v18 }
  0x87   :  { %12737 = vmatprep.subr.bf16.mxu0 %v14489_v0  ;;  %495 = vmatpush1.bf16.msra.mxu1 %v13481_v22 }
  0x88   :  { %496 = vmatprep.subr.bf16.mxu1 %v13483_v23 }
  0x8a   :  { %12738 = vmatpush3.bf16.msra.mxu0 %v13478_v20 }
  0x8b   :  { %12739 = vmatprep.subr.bf16.mxu0 %v14489_v0  ;;  %497 = vmatpush1.bf16.msra.mxu1 %v13485_v25 }
  0x8c   :  { %498 = vmatprep.subr.bf16.mxu1 %v13487_v27 }
  0x8e   :  { %12740 = vmatpush3.bf16.msra.mxu0 %v13482_v24 }
  0x8f   :  { %12741 = vmatprep.subr.bf16.mxu0 %v14489_v0  ;;  %499 = vmatpush1.bf16.msra.mxu1 %v13489_v28 }
  0x90   :  { %12773 = vmatprep.subr.bf16.mxu1 %v14489_v0 }
  0x92   :  { %12742 = vmatpush3.bf16.msra.mxu0 %v13486_v26 }
  0x93   :  { %12743 = vmatprep.subr.bf16.mxu0 %v14489_v0 }
  0x96   :  { %12744 = vmatpush3.bf16.msra.mxu0 %v13490_v29 }
  0x97   :  { %12749 = vmatprep.subr.bf16.mxu0 %v14489_v0 }
 0x14c   :  { %v188_v36 = vpop.f32.mrb[0].mxu0 }
 0x14d   :  { %v12727_v37 = vpop.f32.mrb[1].mxu0  ;;  %v14776_v39 = vadd.f32 %v188_v36, %v145_v35 }
 0x14e   :  { %v191_v38 = vpop.f32.mrb[2].mxu0 }
 0x14f   :  { %v14778_v40 = vadd.f32 %v191_v38, %v145_v35  ;;  %v12728_v41 = vpop.f32.mrb[3].mxu0 }
 0x151   :  { %v343_v42 = vpack.c.bf16 %v14778_v40, %v14776_v39 }
 0x153   :  { %517 = vmatmul.mubr.bf16.vlgmr.msra.gmra.mrb[0].mxu1 %v343_v42  ;;  %12746 = vmatmul.mubr.bf16.vlgmr.msra.gmra.mrb[4].mxu0 %v343_v42 }
 0x154   :  { %12751 = vmatprep.mubr.msk.bf16.mxu0 %vm14490_vm0, %v14489_v0  ;;  %12775 = vmatprep.mubr.msk.bf16.mxu1 %vm14490_vm0, %v14489_v0 }
 0x226   :  { %v518_v48 = vpop.f32.mrb[0].mxu1  ;;  %v561_v49 = vpop.f32.mrb[4].mxu0 }
 0x227   :  { %v520_v50 = vpop.f32.mrb[1].mxu1  ;;  %v12747_v51 = vpop.f32.mrb[5].mxu0  ;;  %v519_v57 = vadd.f32 %v518_v48, %v347_v47  ;;  %v562_v17 = vadd.f32 %v561_v49, %v355_v14 }
 0x228   :  { %v521_v52 = vadd.f32 %v520_v50, %v351_v46  ;;  %v522_v53 = vpop.f32.mrb[2].mxu1  ;;  %v14794_v54 = vpop.f32.mrb[6].mxu0 }
 0x229   :  { %v524_v55 = vpop.f32.mrb[3].mxu1  ;;  %v12748_v56 = vpop.f32.mrb[7].mxu0  ;;  %v523_v60 = vadd.f32 %v522_v53, %v347_v47  ;;  %v568_v63 = vpack.c.bf16 %v519_v57, %v519_v57  ;;  %v14841_v20 = vpack.c.bf16 %v562_v17, %v562_v17  ;;  %v565_v23 = vadd.f32 %v14794_v54, %v355_v14 }
 0x22a   :  { %v569_v58 = vpack.c.bf16 %v521_v52, %v521_v52  ;;  %v525_v59 = vadd.f32 %v524_v55, %v351_v46 }
 0x22b   :  { %v571_v1 = vpack.c.bf16 %v523_v60, %v523_v60  ;;  %v1095_v25 = vsel %vm1093_vm4, %v14841_v20, 0  ;;  %v14855_v26 = vpack.c.bf16 %v565_v23, %v565_v23 }
 0x22c   :  { %v572_v61 = vpack.c.bf16 %v525_v59, %v525_v59  ;;  %590 = vrot.lane.b32.xlu0 %v569_v58, %s14492_s24  ;;  %v621_v62 = vsel %vm616_vm3, %v569_v58, 0 }
 0x22d   :  { %12750 = vmatpush3.bf16.xpose.msra.mxu0 %v621_v62  ;;  %v1141_v28 = vsel %vm1093_vm4, %v14855_v26, 0 }
 0x22e   :  { %592 = vrot.lane.b32.xlu1 %v572_v61, %s14492_s24  ;;  %12755 = vmatprep.subr.bf16.mxu0 %v14489_v0  ;;  %v667_v2 = vsel %vm616_vm3, %v572_v61, 0 }
 0x230   :  { %576 = vrot.lane.b32.xlu0 %v568_v63, %s14492_s24 }
 0x232   :  { %578 = vrot.lane.b32.xlu1 %v571_v1, %s14492_s24 }
 0x234   :  { %594 = vrot.lane.b32.xlu0 %v569_v58, %s14487_s12  ;;  %12752 = vmatmul.mubr.msk.bf16.vlgmr.msra.gmra.mrb[8].mxu0 %vm616_vm3, %v568_v63 }
 0x235   :  { %12756 = vmatpush3.bf16.xpose.msra.mxu0 %v667_v2  ;;  %12757 = vmatprep.mubr.msk.bf16.mxu0 %vm14490_vm0, %v14489_v0 }
 0x236   :  { %596 = vrot.lane.b32.xlu1 %v572_v61, %s14487_s12  ;;  %12761 = vmatprep.subr.bf16.mxu0 %v14489_v0 }
 0x238   :  { %580 = vrot.lane.b32.xlu0 %v568_v63, %s14487_s12 }
 0x23a   :  { %582 = vrot.lane.b32.xlu1 %v571_v1, %s14487_s12 }
 0x23c   :  { %598 = vrot.lane.b32.xlu0 %v569_v58, %s17621_s17  ;;  %12758 = vmatmul.mubr.msk.bf16.vlgmr.msra.gmra.mrb[12].mxu0 %vm616_vm3, %v571_v1 }
 0x23d   :  { %12763 = vmatprep.mubr.msk.bf16.mxu0 %vm14490_vm0, %v14489_v0 }
 0x23e   :  { %600 = vrot.lane.b32.xlu1 %v572_v61, %s17621_s17 }
 0x240   :  { %584 = vrot.lane.b32.xlu0 %v568_v63, %s17621_s17 }
 0x242   :  { %586 = vrot.lane.b32.xlu1 %v571_v1, %s17621_s17 }
 0x29e   :  { %v591_v3 = vpop.permute.xlu0 %590 }
 0x29f   :  { %v713_v4 = vsel %vm616_vm3, %v591_v3, 0 }
 0x2a0   :  { %v593_v5 = vpop.permute.xlu1 %592  ;;  %12762 = vmatpush3.bf16.xpose.msra.mxu0 %v713_v4 }
 0x2a1   :  { %12767 = vmatprep.subr.bf16.mxu0 %v14489_v0  ;;  %v759_v9 = vsel %vm616_vm3, %v593_v5, 0 }
 0x2a2   :  { %v577_v6 = vpop.permute.xlu0 %576 }
 0x2a4   :  { %v579_v7 = vpop.permute.xlu1 %578 }
 0x2a6   :  { %v595_v8 = vpop.permute.xlu0 %594 }
 0x2a7   :  { %v805_v10 = vsel %vm616_vm3, %v595_v8, 0  ;;  %12764 = vmatmul.mubr.msk.bf16.vlgmr.msra.gmra.mrb[16].mxu0 %vm616_vm3, %v577_v6 }
 0x2a8   :  { %v597_v12 = vpop.permute.xlu1 %596  ;;  %12768 = vmatpush3.bf16.xpose.msra.mxu0 %v759_v9  ;;  %12774 = vmatpush3.bf16.xpose.msra.mxu1 %v805_v10 }
 0x2a9   :  { %12769 = vmatprep.mubr.msk.bf16.mxu0 %vm14490_vm0, %v14489_v0  ;;  %12779 = vmatprep.subr.bf16.mxu0 %v14489_v0  ;;  %v851_v18 = vsel %vm616_vm3, %v597_v12, 0 }
 0x2aa   :  { %v581_v13 = vpop.permute.xlu0 %580  ;;  %12785 = vmatprep.subr.bf16.mxu1 %v14489_v0 }
 0x2ac   :  { %v583_v15 = vpop.permute.xlu1 %582 }
 0x2ae   :  { %v599_v16 = vpop.permute.xlu0 %598 }
 0x2af   :  { %v897_v19 = vsel %vm616_vm3, %v599_v16, 0  ;;  %12770 = vmatmul.mubr.msk.bf16.vlgmr.msra.gmra.mrb[20].mxu0 %vm616_vm3, %v579_v7  ;;  %12776 = vmatmul.mubr.msk.bf16.vlgmr.msra.gmra.mrb[4].mxu1 %vm616_vm3, %v581_v13 }
 0x2b0   :  { %12780 = vmatpush3.bf16.xpose.msra.mxu0 %v851_v18  ;;  %12786 = vmatpush3.bf16.xpose.msra.mxu1 %v897_v19  ;;  %v601_v21 = vpop.permute.xlu1 %600 }
 0x2b1   :  { %12781 = vmatprep.mubr.msk.bf16.mxu0 %vm14490_vm0, %v14489_v0  ;;  %12787 = vmatprep.mubr.msk.bf16.mxu1 %vm14490_vm0, %v14489_v0  ;;  %v943_v24 = vsel %vm616_vm3, %v601_v21, 0 }
 0x2b2   :  { %12791 = vmatprep.subr.bf16.mxu0 %v14489_v0  ;;  %12797 = vmatprep.subr.bf16.mxu1 %v14489_v0  ;;  %v585_v22 = vpop.permute.xlu0 %584 }
 0x2b4   :  { %v587_v27 = vpop.permute.xlu1 %586 }
 0x2b7   :  { %12782 = vmatmul.mubr.msk.bf16.vlgmr.msra.gmra.mrb[24].mxu0 %vm616_vm3, %v583_v15  ;;  %12788 = vmatmul.mubr.msk.bf16.vlgmr.msra.gmra.mrb[8].mxu1 %vm616_vm3, %v585_v22 }
 0x2b8   :  { %12792 = vmatpush3.bf16.xpose.msra.mxu0 %v943_v24  ;;  %12798 = vmatpush3.bf16.msra.mxu1 %v1095_v25 }
 0x2b9   :  { %12793 = vmatprep.mubr.msk.bf16.mxu0 %vm14490_vm0, %v14489_v0  ;;  %12803 = vmatprep.subr.bf16.mxu0 %v14489_v0 }
 0x2ba   :  { %12799 = vmatprep.mubr.msk.bf16.mxu1 %vm14490_vm0, %v14489_v0  ;;  %12809 = vmatprep.subr.bf16.mxu1 %v14489_v0 }
 0x2bf   :  { %12794 = vmatmul.mubr.msk.bf16.vlgmr.msra.gmra.mrb[28].mxu0 %vm616_vm3, %v587_v27 }
 0x2c0   :  { %12804 = vmatpush3.bf16.msra.mxu0 %v1141_v28  ;;  %12805 = vmatprep.mubr.msk.bf16.mxu0 %vm14490_vm0, %v14489_v0 }
 0x2c1   :  { %12815 = vmatprep.subr.bf16.mxu0 %v14489_v0 }
 0x307   :  { %v657_v29 = vpop.f32.mrb[8].mxu0 }
 0x308   :  { %v14863_v31 = vmul.f32 0.17677669, %v657_v29  ;;  %v12753_v33 = vpop.f32.mrb[9].mxu0 }
 0x309   :  { %v660_v35 = vpop.f32.mrb[10].mxu0 }
 0x30a   :  { %v12754_v36 = vpop.f32.mrb[11].mxu0  ;;  %v994_v37 = vsel %vm993_vm5, %v14863_v31, -inf }
 0x30b   :  { %995 = vmax.xlane.f32.xlu0 %v994_v37 }
 0x30f   :  { %v703_v38 = vpop.f32.mrb[12].mxu0 }
 0x310   :  { %v986_v41 = vmul.f32 0.17677669, %v703_v38  ;;  %v12759_v42 = vpop.f32.mrb[13].mxu0 }
 0x311   :  { %v706_v44 = vpop.f32.mrb[14].mxu0 }
 0x312   :  { %v12760_v46 = vpop.f32.mrb[15].mxu0  ;;  %v997_v47 = vsel %vm993_vm5, %v986_v41, -inf }
 0x313   :  { %998 = vmax.xlane.f32.xlu1 %v997_v47 }
 0x37a   :  { %v749_v48 = vpop.f32.mrb[16].mxu0 }
 0x37b   :  { %v987_v49 = vmul.f32 0.17677669, %v749_v48  ;;  %v12765_v50 = vpop.f32.mrb[17].mxu0 }
 0x37c   :  { %v752_v51 = vpop.f32.mrb[18].mxu0 }
 0x37d   :  { %v12766_v52 = vpop.f32.mrb[19].mxu0  ;;  %v1000_v53 = vsel %vm993_vm5, %v987_v49, -inf }
 0x37e   :  { %1001 = vmax.xlane.f32.xlu0 %v1000_v53 }
 0x382   :  { %v795_v54 = vpop.f32.mrb[20].mxu0  ;;  %v841_v55 = vpop.f32.mrb[4].mxu1 }
 0x383   :  { %v988_v56 = vmul.f32 0.17677669, %v795_v54  ;;  %v989_v57 = vmul.f32 0.17677669, %v841_v55  ;;  %v12771_v58 = vpop.f32.mrb[21].mxu0  ;;  %v12777_v59 = vpop.f32.mrb[5].mxu1 }
 0x384   :  { %v798_v60 = vpop.f32.mrb[22].mxu0  ;;  %v844_v61 = vpop.f32.mrb[6].mxu1 }
 0x385   :  { %v12772_v62 = vpop.f32.mrb[23].mxu0  ;;  %v12778_v63 = vpop.f32.mrb[7].mxu1  ;;  %v1006_v1 = vsel %vm993_vm5, %v989_v57, -inf  ;;  %v1003_v2 = vsel %vm993_vm5, %v988_v56, -inf }
 0x386   :  { %1007 = vmax.xlane.f32.xlu1 %v1006_v1  ;;  %1004 = vmax.xlane.f32.xlu0 %v1003_v2 }
 0x38a   :  { %v887_v3 = vpop.f32.mrb[24].mxu0  ;;  %v933_v4 = vpop.f32.mrb[8].mxu1 }
 0x38b   :  { %v14871_v5 = vmul.f32 0.17677669, %v887_v3  ;;  %v14873_v6 = vmul.f32 0.17677669, %v933_v4  ;;  %v12783_v7 = vpop.f32.mrb[25].mxu0  ;;  %v12789_v8 = vpop.f32.mrb[9].mxu1 }
 0x38c   :  { %v890_v9 = vpop.f32.mrb[26].mxu0  ;;  %v936_v10 = vpop.f32.mrb[10].mxu1 }
 0x38d   :  { %v12784_v12 = vpop.f32.mrb[27].mxu0  ;;  %v12790_v13 = vpop.f32.mrb[11].mxu1  ;;  %v1012_v14 = vsel %vm993_vm5, %v14873_v6, -inf  ;;  %v1009_v15 = vsel %vm993_vm5, %v14871_v5, -inf }
 0x38e   :  { %1013 = vmax.xlane.f32.xlu1 %v1012_v14  ;;  %1010 = vmax.xlane.f32.xlu0 %v1009_v15 }
 0x392   :  { %v979_v16 = vpop.f32.mrb[28].mxu0 }
 0x393   :  { %v992_v17 = vmul.f32 0.17677669, %v979_v16  ;;  %v12795_v18 = vpop.f32.mrb[29].mxu0 }
 0x394   :  { %v982_v19 = vpop.f32.mrb[30].mxu0 }
 0x395   :  { %v12796_v21 = vpop.f32.mrb[31].mxu0  ;;  %v1015_v22 = vsel %vm993_vm5, %v992_v17, -inf }
 0x396   :  { %1016 = vmax.xlane.f32.xlu0 %v1015_v22 }
 0x398   :  { %v996_v27 = vpop.xlane.xlu0 %995 }
 0x399   :  { %v1018_v28 = vsub.f32 %v14863_v31, %v996_v27 }
 0x39b   :  { %v1026_v35 = vmul.f32 1.442695, %v1018_v28 }
 0x39f   :  { %604 = vrot.lane.b32.xlu1 %v14841_v20, %s14492_s24 }
 0x3a0   :  { %v999_v23 = vpop.xlane.xlu1 %998 }
 0x3a1   :  { %v1019_v24 = vsub.f32 %v986_v41, %v999_v23 }
 0x3a3   :  { %v1028_v25 = vmul.f32 1.442695, %v1019_v24 }
 0x3a5   :  { %14152 = vpow2.f32 %v1028_v25 }
 0x3a6   :  { %14154 = vpow2.f32 %v1026_v35 }
 0x3af   :  { %v14153_v29 = vpop.eup %14152 }
 0x3b0   :  { %v1045_v33 = vsel %vm993_vm5, %v14153_v29, 0.0  ;;  %v14155_v36 = vpop.eup %14154 }
 0x3b1   :  { %1046 = vadd.xlane.f32.xlu0 %v1045_v33  ;;  %v1042_v37 = vsel %vm993_vm5, %v14155_v36, 0.0 }
 0x3c3   :  { %1043 = vadd.xlane.f32.xlu1 %v1042_v37 }
 0x40b   :  { %v1002_v38 = vpop.xlane.xlu0 %1001 }
 0x40c   :  { %v1020_v42 = vsub.f32 %v987_v49, %v1002_v38 }
 0x40e   :  { %v1030_v44 = vmul.f32 1.442695, %v1020_v42 }
 0x410   :  { %14156 = vpow2.f32 %v1030_v44 }
 0x413   :  { %v1008_v41 = vpop.xlane.xlu1 %1007  ;;  %v1005_v46 = vpop.xlane.xlu0 %1004 }
 0x414   :  { %v1022_v47 = vsub.f32 %v989_v57, %v1008_v41  ;;  %v1021_v48 = vsub.f32 %v988_v56, %v1005_v46 }
 0x416   :  { %v1034_v50 = vmul.f32 1.442695, %v1022_v47  ;;  %v1032_v31 = vmul.f32 1.442695, %v1021_v48 }
 0x418   :  { %14158 = vpow2.f32 %v1034_v50 }
 0x419   :  { %14160 = vpow2.f32 %v1032_v31 }
 0x41a   :  { %v14157_v51 = vpop.eup %14156 }
 0x41b   :  { %v1048_v52 = vsel %vm993_vm5, %v14157_v51, 0.0  ;;  %v1011_v56 = vpop.xlane.xlu0 %1010  ;;  %v1014_v59 = vpop.xlane.xlu1 %1013 }
 0x41c   :  { %1049 = vadd.xlane.f32.xlu1 %v1048_v52  ;;  %v1023_v60 = vsub.f32 %v14871_v5, %v1011_v56  ;;  %v1024_v61 = vsub.f32 %v14873_v6, %v1014_v59 }
 0x41e   :  { %v1036_v62 = vmul.f32 1.442695, %v1023_v60  ;;  %v1038_v3 = vmul.f32 1.442695, %v1024_v61 }
 0x41f   :  { %v605_v4 = vpop.permute.xlu1 %604 }
 0x420   :  { %v1187_v18 = vsel %vm1093_vm4, %v605_v4, 0 }
 0x422   :  { %v14886_v53 = vpop.eup %14158 }
 0x423   :  { %v14888_v54 = vpop.eup %14160  ;;  %v1054_v49 = vsel %vm993_vm5, %v14886_v53, 0.0  ;;  %v1017_v57 = vpop.xlane.xlu0 %1016 }
 0x424   :  { %1055 = vadd.xlane.f32.xlu1 %v1054_v49  ;;  %v1051_v55 = vsel %vm993_vm5, %v14888_v54, 0.0  ;;  %v1025_v63 = vsub.f32 %v992_v17, %v1017_v57 }
 0x425   :  { %1052 = vadd.xlane.f32.xlu0 %v1051_v55 }
 0x426   :  { %v1040_v7 = vmul.f32 1.442695, %v1025_v63 }
 0x435   :  { %608 = vrot.lane.b32.xlu1 %v14841_v20, %s14487_s12 }
 0x439   :  { %610 = vrot.lane.b32.xlu1 %v14855_v26, %s14487_s12 }
 0x43b   :  { %606 = vrot.lane.b32.xlu0 %v14855_v26, %s14492_s24 }
 0x43e   :  { %v1047_v58 = vpop.xlane.xlu0 %1046 }
 0x43f   :  { %14162 = vrcp.f32 %v1047_v58 }
 0x440   :  { %14164 = vpow2.f32 %v1036_v62 }
 0x441   :  { %14166 = vpow2.f32 %v1038_v3 }
 0x442   :  { %14168 = vpow2.f32 %v1040_v7 }
 0x449   :  { %v14163_v1 = vpop.eup %14162 }
 0x44a   :  { %v1075_v2 = vmul.f32 %v14163_v1, %v14153_v29  ;;  %v14905_v5 = vpop.eup %14164 }
 0x44b   :  { %v14907_v6 = vpop.eup %14166  ;;  %v1057_v10 = vsel %vm993_vm5, %v14905_v5, 0.0 }
 0x44c   :  { %v1083_v8 = vpack.c.bf16 %v1075_v2, %v1075_v2  ;;  %v14911_v12 = vpop.eup %14168  ;;  %v1060_v14 = vsel %vm993_vm5, %v14907_v6, 0.0 }
 0x44d   :  { %v1063_v16 = vsel %vm993_vm5, %v14911_v12, 0.0 }
 0x44e   :  { %12806 = vmatmul.mubr.msk.bf16.vlgmr.msra.gmra.mrb[32].mxu0 %vm993_vm5, %v1083_v8 }
 0x44f   :  { %12817 = vmatprep.mubr.msk.bf16.mxu0 %vm14490_vm0, %v14489_v0 }
 0x450   :  { %v1044_v9 = vpop.xlane.xlu1 %1043 }
 0x451   :  { %14170 = vrcp.f32 %v1044_v9  ;;  %v13491_v9 = vld [vmem:[%s17603_s6] sm:$0xff]  }
 0x45a   :  { %1058 = vadd.xlane.f32.xlu0 %v1057_v10  ;;  %v13492_v10 = vld [vmem:[%s17603_s6 + $0x8] sm:$0xff]  }
 0x45b   :  { %v14171_v13 = vpop.eup %14170 }
 0x45c   :  { %v1074_v15 = vmul.f32 %v14171_v13, %v14155_v36 }
 0x45d   :  { %1061 = vadd.xlane.f32.xlu1 %v1060_v14 }
 0x45e   :  { %1064 = vadd.xlane.f32.xlu0 %v1063_v16  ;;  %v1082_v17 = vpack.c.bf16 %v1074_v15, %v1074_v15 }
 0x460   :  { %12800 = vmatmul.mubr.msk.bf16.vlgmr.msra.gmra.mrb[12].mxu1 %vm993_vm5, %v1082_v17 }
 0x461   :  { %12810 = vmatpush3.bf16.msra.mxu1 %v1187_v18  ;;  %12811 = vmatprep.mubr.msk.bf16.mxu1 %vm14490_vm0, %v14489_v0 }
 0x462   :  { %12821 = vmatprep.subr.bf16.mxu1 %v14489_v0 }
 0x46e   :  { %614 = vrot.lane.b32.xlu1 %v14855_v26, %s17621_s17 }
 0x474   :  { %612 = vrot.lane.b32.xlu0 %v14841_v20, %s17621_s17 }
 0x4a9   :  { %v1050_v19 = vpop.xlane.xlu1 %1049 }
 0x4aa   :  { %14172 = vrcp.f32 %v1050_v19 }
 0x4b1   :  { %v1056_v21 = vpop.xlane.xlu1 %1055 }
 0x4b2   :  { %14174 = vrcp.f32 %v1056_v21  ;;  %v1053_v22 = vpop.xlane.xlu0 %1052 }
 0x4b3   :  { %14176 = vrcp.f32 %v1053_v22  ;;  %v13494_v22 = vld [vmem:[%s17603_s6 + $0x18] sm:$0xff]  }
 0x4b4   :  { %v14173_v23 = vpop.eup %14172 }
 0x4b5   :  { %v1076_v24 = vmul.f32 %v14173_v23, %v14157_v51  ;;  %v609_v25 = vpop.permute.xlu1 %608 }
 0x4b6   :  { %v607_v27 = vpop.permute.xlu0 %606  ;;  %v1279_v33 = vsel %vm1093_vm4, %v609_v25, 0  ;;  %v13496_v25 = vld [vmem:[%s17603_s6 + $0x28] sm:$0xff]  }
 0x4b7   :  { %v1233_v28 = vsel %vm1093_vm4, %v607_v27, 0  ;;  %v1084_v29 = vpack.c.bf16 %v1076_v24, %v1076_v24  ;;  %v13495_v24 = vld [vmem:[%s17603_s6 + $0x20] sm:$0xff]   ;;  %v13497_v27 = vld [vmem:[%s17603_s6 + $0x30] sm:$0xff]  }
 0x4b8   :  { %12816 = vmatpush3.bf16.msra.mxu0 %v1233_v28  ;;  %v13498_v28 = vld [vmem:[%s17603_s6 + $0x38] sm:$0xff]  }
 0x4b9   :  { %12812 = vmatmul.mubr.msk.bf16.vlgmr.msra.gmra.mrb[16].mxu1 %vm993_vm5, %v1084_v29  ;;  %12827 = vmatprep.subr.bf16.mxu0 %v14489_v0  ;;  %v611_v37 = vpop.permute.xlu1 %610 }
 0x4ba   :  { %12822 = vmatpush3.bf16.msra.mxu1 %v1279_v33  ;;  %12823 = vmatprep.mubr.msk.bf16.mxu1 %vm14490_vm0, %v14489_v0  ;;  %v1325_v44 = vsel %vm1093_vm4, %v611_v37, 0 }
 0x4bb   :  { %12833 = vmatprep.subr.bf16.mxu1 %v14489_v0 }
 0x4bc   :  { %v14175_v20 = vpop.eup %14174 }
 0x4bd   :  { %v14177_v26 = vpop.eup %14176  ;;  %v1078_v35 = vmul.f32 %v14175_v20, %v14886_v53 }
 0x4be   :  { %v1077_v36 = vmul.f32 %v14177_v26, %v14888_v54 }
 0x4bf   :  { %v1086_v38 = vpack.c.bf16 %v1078_v35, %v1078_v35 }
 0x4c0   :  { %v1085_v42 = vpack.c.bf16 %v1077_v36, %v1077_v36 }
 0x4c1   :  { %12824 = vmatmul.mubr.msk.bf16.vlgmr.msra.gmra.mrb[20].mxu1 %vm993_vm5, %v1086_v38 }
 0x4c2   :  { %12818 = vmatmul.mubr.msk.bf16.vlgmr.msra.gmra.mrb[36].mxu0 %vm993_vm5, %v1085_v42  ;;  %12835 = vmatprep.mubr.msk.bf16.mxu1 %vm14490_vm0, %v14489_v0 }
 0x4c3   :  { %12828 = vmatpush3.bf16.msra.mxu0 %v1325_v44  ;;  %12829 = vmatprep.mubr.msk.bf16.mxu0 %vm14490_vm0, %v14489_v0 }
 0x4c4   :  { %12839 = vmatprep.subr.bf16.mxu0 %v14489_v0 }
 0x4e7   :  { %v1059_v41 = vpop.xlane.xlu0 %1058 }
 0x4e8   :  { %14178 = vrcp.f32 %v1059_v41 }
 0x4ea   :  { %v1062_v46 = vpop.xlane.xlu1 %1061 }
 0x4eb   :  { %14180 = vrcp.f32 %v1062_v46  ;;  %v1065_v47 = vpop.xlane.xlu0 %1064 }
 0x4ec   :  { %14182 = vrcp.f32 %v1065_v47 }
 0x4ee   :  { %v615_v52 = vpop.permute.xlu1 %614 }
 0x4ef   :  { %v613_v48 = vpop.permute.xlu0 %612  ;;  %v1417_v56 = vsel %vm1093_vm4, %v615_v52, 0 }
 0x4f0   :  { %v1371_v50 = vsel %vm1093_vm4, %v613_v48, 0 }
 0x4f1   :  { %12834 = vmatpush3.bf16.msra.mxu1 %v1371_v50 }
 0x4f2   :  { %v14179_v31 = vpop.eup %14178  ;;  %12845 = vmatprep.subr.bf16.mxu1 %v14489_v0 }
 0x4f3   :  { %v1079_v51 = vmul.f32 %v14179_v31, %v14905_v5 }
 0x4f5   :  { %v14181_v53 = vpop.eup %14180  ;;  %v1087_v54 = vpack.c.bf16 %v1079_v51, %v1079_v51 }
 0x4f6   :  { %v14183_v49 = vpop.eup %14182  ;;  %v1080_v55 = vmul.f32 %v14181_v53, %v14907_v6 }
 0x4f7   :  { %12830 = vmatmul.mubr.msk.bf16.vlgmr.msra.gmra.mrb[40].mxu0 %vm993_vm5, %v1087_v54  ;;  %v1081_v58 = vmul.f32 %v14183_v49, %v14911_v12  ;;  %v13493_v12 = vld [vmem:[%s17603_s6 + $0x10] sm:$0xff]  }
 0x4f8   :  { %12840 = vmatpush3.bf16.msra.mxu0 %v1417_v56  ;;  %v1088_v57 = vpack.c.bf16 %v1080_v55, %v1080_v55  ;;  %12841 = vmatprep.mubr.msk.bf16.mxu0 %vm14490_vm0, %v14489_v0 }
 0x4f9   :  { %v1089_v59 = vpack.c.bf16 %v1081_v58, %v1081_v58 }
 0x4fa   :  { %12836 = vmatmul.mubr.msk.bf16.vlgmr.msra.gmra.mrb[24].mxu1 %vm993_vm5, %v1088_v57 }
 0x4fb   :  { %12861 = vmatprep.mubr.msk.bf16.mxu1 %vm14490_vm0, %v14489_v0  ;;  %12846 = vmatpush3.bf16.msra.mxu1 %v13491_v9 }
 0x4fc   :  { %12847 = vmatprep.subr.bf16.mxu1 %v14489_v0 }
 0x4ff   :  { %12842 = vmatmul.mubr.msk.bf16.vlgmr.msra.gmra.mrb[44].mxu0 %vm993_vm5, %v1089_v59  ;;  %12848 = vmatpush3.bf16.msra.mxu1 %v13492_v10 }
 0x500   :  { %1831 = vmatprep.mubr.bf16.mxu0 %v14491_v30  ;;  %12849 = vmatprep.subr.bf16.mxu1 %v14489_v0 }
 0x503   :  { %12850 = vmatpush3.bf16.msra.mxu1 %v13493_v12  ;;  %v13499_v12 = vld [vmem:[%s17604_s7] ss:$16 sps:$4 sm:$0xff]  }
 0x504   :  { %12851 = vmatprep.subr.bf16.mxu1 %v14489_v0 }
 0x507   :  { %12852 = vmatpush3.bf16.msra.mxu1 %v13494_v22 }
 0x508   :  { %12853 = vmatprep.subr.bf16.mxu1 %v14489_v0 }
 0x50b   :  { %12854 = vmatpush3.bf16.msra.mxu1 %v13495_v24 }
 0x50c   :  { %12855 = vmatprep.subr.bf16.mxu1 %v14489_v0 }
 0x50f   :  { %12856 = vmatpush3.bf16.msra.mxu1 %v13496_v25 }
 0x510   :  { %12857 = vmatprep.subr.bf16.mxu1 %v14489_v0 }
 0x513   :  { %12858 = vmatpush3.bf16.msra.mxu1 %v13497_v27 }
 0x514   :  { %12859 = vmatprep.subr.bf16.mxu1 %v14489_v0 }
 0x517   :  { %12860 = vmatpush3.bf16.msra.mxu1 %v13498_v28  ;;  %v13513_v28 = vld [vmem:[%s17604_s7 + $0x44] ss:$16 sps:$4 sm:$0xff]  }
 0x521   :  { %v14957_v60 = vpop.f32.mrb[32].mxu0 }
 0x522   :  { %v12807_v61 = vpop.f32.mrb[33].mxu0 }
 0x523   :  { %v1180_v62 = vpop.f32.mrb[34].mxu0 }
 0x524   :  { %v12808_v63 = vpop.f32.mrb[35].mxu0 }
 0x533   :  { %v14959_v1 = vpop.f32.mrb[12].mxu1 }
 0x534   :  { %v12801_v2 = vpop.f32.mrb[13].mxu1 }
 0x535   :  { %v1134_v3 = vpop.f32.mrb[14].mxu1 }
 0x536   :  { %v12802_v4 = vpop.f32.mrb[15].mxu1  ;;  %v15005_v3 = vsub.s32 1, %v14770_v32 }
 0x58c   :  { %v1223_v7 = vpop.f32.mrb[16].mxu1 }
 0x58d   :  { %v12813_v8 = vpop.f32.mrb[17].mxu1 }
 0x58e   :  { %v1226_v5 = vpop.f32.mrb[18].mxu1 }
 0x58f   :  { %v12814_v6 = vpop.f32.mrb[19].mxu1 }
 0x594   :  { %v1315_v13 = vpop.f32.mrb[20].mxu1 }
 0x595   :  { %v1269_v14 = vpop.f32.mrb[36].mxu0  ;;  %v12825_v15 = vpop.f32.mrb[21].mxu1 }
 0x596   :  { %v13404_v16 = vpack.i.bf16 %v1269_v14, %v1223_v7  ;;  %v12819_v17 = vpop.f32.mrb[37].mxu0  ;;  %v1318_v18 = vpop.f32.mrb[22].mxu1  ;;  %v13502_v14 = vld [vmem:[%s17604_s7 + $0x8] ss:$16 sps:$4 sm:$0xff]   ;;  %v13510_v15 = vld [vmem:[%s17604_s7 + $0x2c] ss:$16 sps:$4 sm:$0xff]  }
 0x597   :  { %v1272_v19 = vpop.f32.mrb[38].mxu0  ;;  %v12826_v21 = vpop.f32.mrb[23].mxu1  ;;  %v13508_v17 = vld [vmem:[%s17604_s7 + $0x28] ss:$16 sps:$4 sm:$0xff]  }
 0x598   :  { %13405 = vrot.lane.b32.xlu0 %v13404_v16, %s17621_s17  ;;  %v12820_v23 = vpop.f32.mrb[39].mxu0  ;;  %v13505_v16 = vld [vmem:[%s17604_s7 + $0x20] ss:$16 sps:$4 sm:$0xff]  }
 0x5ca   :  { %v1361_v29 = vpop.f32.mrb[40].mxu0 }
 0x5cb   :  { %v13409_v33 = vpack.i.bf16 %v1361_v29, %v1315_v13  ;;  %v12831_v20 = vpop.f32.mrb[41].mxu0  ;;  %v13501_v13 = vld [vmem:[%s17604_s7 + $0x4] ss:$16 sps:$4 sm:$0xff]   ;;  %v13516_v29 = vld [vmem:[%s17604_s7 + $0x4c] ss:$16 sps:$4 sm:$0xff]  }
 0x5cc   :  { %v1364_v26 = vpop.f32.mrb[42].mxu0  ;;  %1799 = vmatprep.subr.bf16.mxu0 %v13501_v13  ;;  %v13514_v20 = vld [vmem:[%s17604_s7 + $0x48] ss:$16 sps:$4 sm:$0xff]  }
 0x5cd   :  { %13410 = vrot.lane.b32.xlu1 %v13409_v33, %s14487_s12  ;;  %v12832_v35 = vpop.f32.mrb[43].mxu0  ;;  %v1407_v36 = vpop.f32.mrb[24].mxu1  ;;  %1800 = vmatpush1.bf16.msra.mxu0 %v13499_v12  ;;  %v13511_v33 = vld [vmem:[%s17604_s7 + $0x40] ss:$16 sps:$4 sm:$0xff]   ;;  %v13519_v26 = vld [vmem:[%s17604_s7 + $0x64] ss:$16 sps:$4 sm:$0xff]  }
 0x5ce   :  { %v12837_v37 = vpop.f32.mrb[25].mxu1  ;;  %v13522_v35 = vld [vmem:[%s17604_s7 + $0x6c] ss:$16 sps:$4 sm:$0xff]  }
 0x5cf   :  { %v1410_v38 = vpop.f32.mrb[26].mxu1  ;;  %v13520_v37 = vld [vmem:[%s17604_s7 + $0x68] ss:$16 sps:$4 sm:$0xff]  }
 0x5d0   :  { %v12838_v42 = vpop.f32.mrb[27].mxu1  ;;  %v13525_v38 = vld [vmem:[%s17604_s7 + $0x84] ss:$16 sps:$4 sm:$0xff]  }
 0x5d1   :  { %v13523_v42 = vld [vmem:[%s17604_s7 + $0x80] ss:$16 sps:$4 sm:$0xff]  }
 0x5d2   :  { %v1453_v44 = vpop.f32.mrb[44].mxu0 }
 0x5d3   :  { %v13414_v41 = vpack.i.bf16 %v1453_v44, %v1407_v36  ;;  %v12843_v46 = vpop.f32.mrb[45].mxu0  ;;  %v13517_v36 = vld [vmem:[%s17604_s7 + $0x60] ss:$16 sps:$4 sm:$0xff]   ;;  %v13526_v44 = vld [vmem:[%s17604_s7 + $0x88] ss:$16 sps:$4 sm:$0xff]  }
 0x5d4   :  { %v1456_v47 = vpop.f32.mrb[46].mxu0  ;;  %v13531_v46 = vld [vmem:[%s17604_s7 + $0xa4] ss:$16 sps:$4 sm:$0xff]  }
 0x5d5   :  { %13415 = vrot.lane.b32.xlu0 %v13414_v41, %s14492_s24  ;;  %v12844_v48 = vpop.f32.mrb[47].mxu0  ;;  %v13528_v41 = vld [vmem:[%s17604_s7 + $0x8c] ss:$16 sps:$4 sm:$0xff]  }
 0x5d6   :  { %v13534_v47 = vld [vmem:[%s17604_s7 + $0xac] ss:$16 sps:$4 sm:$0xff]   ;;  %v13529_v48 = vld [vmem:[%s17604_s7 + $0xa0] ss:$16 sps:$4 sm:$0xff]  }
 0x60a   :  { %v13406_v50 = vpop.permute.xlu0 %13405 }
 0x60b   :  { %v13408_v51 = vunpack.i.h.bf16 %v13406_v50  ;;  %v13407_v52 = vunpack.i.l.bf16 %v13406_v50  ;;  %v13532_v50 = vld [vmem:[%s17604_s7 + $0xa8] ss:$16 sps:$4 sm:$0xff]  }
 0x60d   :  { %v1484_v55 = vsel %vm616_vm3, %v14957_v60, %v13408_v51  ;;  %v1483_v56 = vsel %vm616_vm3, %v14959_v1, %v13407_v52  ;;  %v1495_v60 = vrot.slane %v14789_v45, %v15005_v3  ;;  %v13540_v51 = vld [vmem:[%s17604_s7 + $0xcc] ss:$16 sps:$4 sm:$0xff]   ;;  %v13535_v52 = vld [vmem:[%s17604_s7 + $0xc0] ss:$16 sps:$4 sm:$0xff]  }
 0x63f   :  { %v13411_v31 = vpop.permute.xlu1 %13410 }
 0x640   :  { %v13413_v53 = vunpack.i.h.bf16 %v13411_v31  ;;  %v13412_v54 = vunpack.i.l.bf16 %v13411_v31  ;;  %v13537_v31 = vld [vmem:[%s17604_s7 + $0xc4] ss:$16 sps:$4 sm:$0xff]  }
 0x642   :  { %v1487_v59 = vsel %vm1485_vm6, %v1484_v55, %v13413_v53  ;;  %v1486_v61 = vsel %vm1485_vm6, %v1483_v56, %v13412_v54  ;;  %v13538_v53 = vld [vmem:[%s17604_s7 + $0xc8] ss:$16 sps:$4 sm:$0xff]   ;;  %v13543_v54 = vld [vmem:[%s17604_s7 + $0xe4] ss:$16 sps:$4 sm:$0xff]   ;;  %v13541_v55 = vld [vmem:[%s17604_s7 + $0xe0] ss:$16 sps:$4 sm:$0xff]  }
 0x643   :  { %v13544_v56 = vld [vmem:[%s17604_s7 + $0xe8] ss:$16 sps:$4 sm:$0xff]  }
 0x647   :  { %v13416_v49 = vpop.permute.xlu0 %13415 }
 0x648   :  { %v13418_v57 = vunpack.i.h.bf16 %v13416_v49  ;;  %v13417_v58 = vunpack.i.l.bf16 %v13416_v49  ;;  %v13546_v49 = vld [vmem:[%s17604_s7 + $0xec] ss:$16 sps:$4 sm:$0xff]  }
 0x64a   :  { %v1490_v62 = vsel %vm1488_vm7, %v1487_v59, %v13418_v57  ;;  %v1489_v63 = vsel %vm1488_vm7, %v1486_v61, %v13417_v58  ;;  %v13547_v57 = vld [vmem:[%s17605_s8 + $0x40] sm:$0xff]  }
 0x64b   :  { %v1491_v2 = vpack.c.bf16 %v1490_v62, %v1489_v63  ;;  %v13548_v58 = vld [vmem:[%s17605_s8 + $0xc0] sm:$0xff]  }
 0x64d   :  { %12862 = vmatmul.mubr.bf16.vlgmr.msra.gmra.mrb[28].mxu1 %v1491_v2 }
 0x64e   :  { %1874 = vmatprep.mubr.bf16.mxu1 %v14491_v30 }
 0x720   :  { %v1578_v1 = vpop.f32.mrb[28].mxu1 }
 0x721   :  { %v1579_v4 = vadd.f32 %v1578_v1, %v1495_v60  ;;  %v12863_v7 = vpop.f32.mrb[29].mxu1  ;;  %v15122_v1 = vsub.s32 2, %v14770_v32 }
 0x722   :  { %v1581_v8 = vpop.f32.mrb[30].mxu1  ;;  %v15127_v7 = vsub.s32 3, %v14770_v32 }
 0x723   :  { %v1582_v9 = vadd.f32 %v1581_v8, %v1495_v60  ;;  %v12864_v5 = vpop.f32.mrb[31].mxu1  ;;  %v1585_v6 = vadd.f32 %v1579_v4, %v14776_v39  ;;  %v13504_v39 = vld [vmem:[%s17604_s7 + $0xc] ss:$16 sps:$4 sm:$0xff]   ;;  %v1613_v4 = vrot.slane %v14789_v45, %v15122_v1 }
 0x724   :  { %1842 = vmatprep.subr.bf16.mxu1 %v13504_v39  ;;  %v1619_v12 = vrot.slane %v14789_v45, %v15127_v7  ;;  %v13551_v45 = vld [vmem:[%s17605_s8 + $0x48] sm:$0xff]  }
 0x725   :  { %1587 = vadd.xlane.f32.xlu1 %v1585_v6  ;;  %v1586_v10 = vadd.f32 %v1582_v9, %v14778_v40  ;;  %v13507_v40 = vld [vmem:[%s17604_s7 + $0x24] ss:$16 sps:$4 sm:$0xff]   ;;  %1843 = vmatpush1.bf16.msra.mxu1 %v13502_v14 }
 0x726   :  { %1801 = vmatprep.subr.bf16.mxu0 %v13507_v40  ;;  %1844 = vmatprep.subr.bf16.mxu1 %v13510_v15  ;;  %v13549_v40 = vld [vmem:[%s17605_s8] sm:$0xff]  }
 0x727   :  { %1589 = vadd.xlane.f32.xlu0 %v1586_v10  ;;  %1802 = vmatpush1.bf16.msra.mxu0 %v13505_v16  ;;  %v13550_v15 = vld [vmem:[%s17605_s8 + $0x80] sm:$0xff]  }
 0x728   :  { %1803 = vmatprep.subr.bf16.mxu0 %v13513_v28  ;;  %v13561_v28 = vld [vmem:[%s17605_s8 + $0x18] sm:$0xff]  }
 0x729   :  { %1845 = vmatpush1.bf16.msra.mxu1 %v13508_v17  ;;  %v13552_v17 = vld [vmem:[%s17605_s8 + $0xc8] sm:$0xff]  }
 0x72a   :  { %1846 = vmatprep.subr.bf16.mxu1 %v13516_v29  ;;  %v13562_v29 = vld [vmem:[%s17605_s8 + $0x98] sm:$0xff]  }
 0x72b   :  { %1804 = vmatpush1.bf16.msra.mxu0 %v13511_v33  ;;  %v13563_v33 = vld [vmem:[%s17605_s8 + $0x60] sm:$0xff]  }
 0x72c   :  { %1805 = vmatprep.subr.bf16.mxu0 %v13519_v26  ;;  %v13565_v26 = vld [vmem:[%s17605_s8 + $0x20] sm:$0xff]  }
 0x72d   :  { %1847 = vmatpush1.bf16.msra.mxu1 %v13514_v20  ;;  %v13564_v20 = vld [vmem:[%s17605_s8 + $0xe0] sm:$0xff]  }
 0x72e   :  { %1848 = vmatprep.subr.bf16.mxu1 %v13522_v35  ;;  %v13566_v35 = vld [vmem:[%s17605_s8 + $0xa0] sm:$0xff]  }
 0x72f   :  { %1806 = vmatpush1.bf16.msra.mxu0 %v13517_v36  ;;  %v13567_v36 = vld [vmem:[%s17605_s8 + $0x68] sm:$0xff]  }
 0x730   :  { %1807 = vmatprep.subr.bf16.mxu0 %v13525_v38  ;;  %v13569_v38 = vld [vmem:[%s17605_s8 + $0x28] sm:$0xff]  }
 0x731   :  { %1849 = vmatpush1.bf16.msra.mxu1 %v13520_v37  ;;  %v13568_v37 = vld [vmem:[%s17605_s8 + $0xe8] sm:$0xff]  }
 0x732   :  { %1850 = vmatprep.subr.bf16.mxu1 %v13528_v41  ;;  %v13572_v41 = vld [vmem:[%s17605_s8 + $0xf0] sm:$0xff]  }
 0x733   :  { %1808 = vmatpush1.bf16.msra.mxu0 %v13523_v42  ;;  %v13570_v42 = vld [vmem:[%s17605_s8 + $0xa8] sm:$0xff]  }
 0x734   :  { %1809 = vmatprep.subr.bf16.mxu0 %v13531_v46  ;;  %v13573_v46 = vld [vmem:[%s17605_s8 + $0x30] sm:$0xff]  }
 0x735   :  { %1851 = vmatpush1.bf16.msra.mxu1 %v13526_v44  ;;  %v13571_v44 = vld [vmem:[%s17605_s8 + $0x70] sm:$0xff]  }
 0x736   :  { %1852 = vmatprep.subr.bf16.mxu1 %v13534_v47  ;;  %v13574_v47 = vld [vmem:[%s17605_s8 + $0xb0] sm:$0xff]  }
 0x737   :  { %1810 = vmatpush1.bf16.msra.mxu0 %v13529_v48  ;;  %v13575_v48 = vld [vmem:[%s17605_s8 + $0x78] sm:$0xff]  }
 0x738   :  { %1811 = vmatprep.subr.bf16.mxu0 %v13537_v31  ;;  %v13577_v31 = vld [vmem:[%s17605_s8 + $0x38] sm:$0xff]  }
 0x739   :  { %1853 = vmatpush1.bf16.msra.mxu1 %v13532_v50  ;;  %v13576_v50 = vld [vmem:[%s17605_s8 + $0xf8] sm:$0xff]  }
 0x73a   :  { %1854 = vmatprep.subr.bf16.mxu1 %v13540_v51  ;;  %v13578_v51 = vld [vmem:[%s17605_s8 + $0xb8] sm:$0xff]  }
 0x73b   :  { %1812 = vmatpush1.bf16.msra.mxu0 %v13535_v52  ;;  %v342_v52 = vld [vmem:[#allocation4 + $0x18] sm:$0xff] }
 0x73c   :  { %1813 = vmatprep.subr.bf16.mxu0 %v13543_v54 }
 0x73d   :  { %1855 = vmatpush1.bf16.msra.mxu1 %v13538_v53  ;;  %v15230_v53 = vld [vmem:[#allocation4] sm:$0xff] }
 0x73e   :  { %1856 = vmatprep.subr.bf16.mxu1 %v13546_v49  ;;  %v1626_v54 = vrot.slane %v15230_v53, %v14773_v34  ;;  %v1634_v49 = vrot.slane %v14823_v11, %v14773_v34 }
 0x73f   :  { %1814 = vmatpush1.bf16.msra.mxu0 %v13541_v55  ;;  %v14323_v55 = vld [vmem:[#allocation4 + $0x8] sm:$0xff] }
 0x740   :  { %12264 = vmatprep.subr.bf16.mxu0 %v13547_v57  ;;  %v1638_v57 = vrot.slane %v342_v52, %v14773_v34 }
 0x741   :  { %1857 = vmatpush1.bf16.msra.mxu1 %v13544_v56  ;;  %v1630_v56 = vrot.slane %v14323_v55, %v14773_v34  ;;  %v13582_v55 = vld [vmem:[%s17602_s5 + $0xc8] ss:$12 sps:$4 sm:$0xff]  }
 0x742   :  { %12286 = vmatprep.subr.bf16.mxu1 %v13548_v58 }
 0x7b2   :  { %v1588_v18 = vpop.xlane.xlu1 %1587 }
 0x7b3   :  { %v1592_v19 = vmul.f32 0.0078125, %v1588_v18  ;;  %v13553_v18 = vld [vmem:[%s17605_s8 + $0x8] sm:$0xff]  }
 0x7b4   :  { %v1590_v21 = vpop.xlane.xlu0 %1589 }
 0x7b5   :  { %v1593_v22 = vmul.f32 0.0078125, %v1590_v21  ;;  %v15035_v23 = vsub.f32 %v1585_v6, %v1592_v19  ;;  %v13554_v19 = vld [vmem:[%s17605_s8 + $0x88] sm:$0xff]   ;;  %v13555_v21 = vld [vmem:[%s17605_s8 + $0x50] sm:$0xff]  }
 0x7b7   :  { %v1596_v24 = vmul.f32 %v15035_v23, %v15035_v23  ;;  %v15039_v25 = vsub.f32 %v1586_v10, %v1593_v22  ;;  %v13556_v22 = vld [vmem:[%s17605_s8 + $0xd0] sm:$0xff]  }
 0x7b9   :  { %1598 = vadd.xlane.f32.xlu0 %v1596_v24  ;;  %v1597_v27 = vmul.f32 %v15039_v25, %v15039_v25  ;;  %v13558_v24 = vld [vmem:[%s17605_s8 + $0x90] sm:$0xff]  }
 0x7bb   :  { %1600 = vadd.xlane.f32.xlu1 %v1597_v27  ;;  %v13560_v27 = vld [vmem:[%s17605_s8 + $0xd8] sm:$0xff]  }
 0x846   :  { %v1599_v59 = vpop.xlane.xlu0 %1598 }
 0x847   :  { %v1602_v61 = vmul.f32 0.0078125, %v1599_v59 }
 0x848   :  { %v1601_v62 = vpop.xlane.xlu1 %1600 }
 0x849   :  { %v1604_v63 = vadd.f32 1e-05, %v1602_v61  ;;  %v1603_v2 = vmul.f32 0.0078125, %v1601_v62 }
 0x84b   :  { %14184 = vrsqrt.f32 %v1604_v63  ;;  %v1605_v60 = vadd.f32 1e-05, %v1603_v2 }
 0x84d   :  { %14186 = vrsqrt.f32 %v1605_v60 }
 0x855   :  { %v14185_v8 = vpop.eup %14184 }
 0x856   :  { %v1608_v9 = vmul.f32 %v14185_v8, %v15035_v23  ;;  %v13557_v23 = vld [vmem:[%s17605_s8 + $0x10] sm:$0xff]  }
 0x857   :  { %v14187_v5 = vpop.eup %14186 }
 0x858   :  { %v1609_v6 = vmul.f32 %v14187_v5, %v15039_v25  ;;  %v1614_v10 = vmul.f32 %v1613_v4, %v1608_v9  ;;  %v13559_v25 = vld [vmem:[%s17605_s8 + $0x58] sm:$0xff]  }
 0x85a   :  { %v1615_v13 = vmul.f32 %v1613_v4, %v1609_v6  ;;  %v15133_v14 = vadd.f32 %v1619_v12, %v1614_v10 }
 0x85c   :  { %v15135_v39 = vadd.f32 %v1619_v12, %v1615_v13 }
 0x85e   :  { %v1622_v16 = vpack.c.bf16 %v15135_v39, %v15133_v14 }
 0x860   :  { %1832 = vmatmul.mubr.bf16.vlgmr.msra.gmra.mrb[48].mxu0 %v1622_v16  ;;  %1875 = vmatmul.mubr.bf16.vlgmr.msra.gmra.mrb[32].mxu1 %v1622_v16 }
 0x861   :  { %12265 = vmatpush3.bf16.msra.mxu0 %v13549_v40  ;;  %12287 = vmatpush3.bf16.msra.mxu1 %v13550_v15 }
 0x862   :  { %12266 = vmatprep.subr.bf16.mxu0 %v13551_v45  ;;  %12288 = vmatprep.subr.bf16.mxu1 %v13552_v17 }
 0x865   :  { %12267 = vmatpush3.bf16.msra.mxu0 %v13553_v18  ;;  %12289 = vmatpush3.bf16.msra.mxu1 %v13554_v19 }
 0x866   :  { %12268 = vmatprep.subr.bf16.mxu0 %v13555_v21  ;;  %12290 = vmatprep.subr.bf16.mxu1 %v13556_v22 }
 0x869   :  { %12269 = vmatpush3.bf16.msra.mxu0 %v13557_v23  ;;  %12291 = vmatpush3.bf16.msra.mxu1 %v13558_v24 }
 0x86a   :  { %12270 = vmatprep.subr.bf16.mxu0 %v13559_v25  ;;  %12292 = vmatprep.subr.bf16.mxu1 %v13560_v27  ;;  %v15242_v27 = vsub.s32 5, %v14770_v32 }
 0x86d   :  { %12271 = vmatpush3.bf16.msra.mxu0 %v13561_v28  ;;  %12293 = vmatpush3.bf16.msra.mxu1 %v13562_v29 }
 0x86e   :  { %12272 = vmatprep.subr.bf16.mxu0 %v13563_v33  ;;  %12294 = vmatprep.subr.bf16.mxu1 %v13564_v20  ;;  %v1900_v33 = vrot.slane %v15230_v53, %v15242_v27 }
 0x871   :  { %12273 = vmatpush3.bf16.msra.mxu0 %v13565_v26  ;;  %12295 = vmatpush3.bf16.msra.mxu1 %v13566_v35 }
 0x872   :  { %12274 = vmatprep.subr.bf16.mxu0 %v13567_v36  ;;  %12296 = vmatprep.subr.bf16.mxu1 %v13568_v37 }
 0x875   :  { %12275 = vmatpush3.bf16.msra.mxu0 %v13569_v38  ;;  %12297 = vmatpush3.bf16.msra.mxu1 %v13570_v42 }
 0x876   :  { %12276 = vmatprep.subr.bf16.mxu0 %v13571_v44  ;;  %12298 = vmatprep.subr.bf16.mxu1 %v13572_v41 }
 0x879   :  { %12277 = vmatpush3.bf16.msra.mxu0 %v13573_v46  ;;  %12299 = vmatpush3.bf16.msra.mxu1 %v13574_v47 }
 0x87a   :  { %12278 = vmatprep.subr.bf16.mxu0 %v13575_v48  ;;  %12300 = vmatprep.subr.bf16.mxu1 %v13576_v50 }
 0x87d   :  { %12279 = vmatpush3.bf16.msra.mxu0 %v13577_v31  ;;  %12301 = vmatpush3.bf16.msra.mxu1 %v13578_v51 }
 0x87e   :  { %12865 = vmatprep.subr.bf16.mxu1 %v14489_v0 }
 0x933   :  { %v1833_v58 = vpop.f32.mrb[48].mxu0  ;;  %v1876_v59 = vpop.f32.mrb[32].mxu1 }
 0x934   :  { %v1834_v61 = vadd.f32 %v1833_v58, %v1626_v54  ;;  %v1877_v62 = vadd.f32 %v1876_v59, %v1634_v49  ;;  %v1835_v63 = vpop.f32.mrb[49].mxu0  ;;  %v1878_v2 = vpop.f32.mrb[33].mxu1 }
 0x935   :  { %v1836_v60 = vadd.f32 %v1835_v63, %v1630_v56  ;;  %v1879_v4 = vadd.f32 %v1878_v2, %v1638_v57  ;;  %v1837_v8 = vpop.f32.mrb[50].mxu0  ;;  %v1880_v9 = vpop.f32.mrb[34].mxu1 }
 0x936   :  { %v1838_v5 = vadd.f32 %v1837_v8, %v1626_v54  ;;  %v1881_v6 = vadd.f32 %v1880_v9, %v1634_v49  ;;  %v1839_v10 = vpop.f32.mrb[51].mxu0  ;;  %v1882_v12 = vpop.f32.mrb[35].mxu1  ;;  %v1885_v40 = vmax.f32 %v1834_v61, 0.0  ;;  %v1887_v15 = vmax.f32 %v1877_v62, 0.0  ;;  %v13579_v54 = vld [vmem:[%s17602_s5 + $0xc0] ss:$12 sps:$4 sm:$0xff]  }
 0x937   :  { %v1840_v11 = vadd.f32 %v1839_v10, %v1630_v56  ;;  %v1883_v13 = vadd.f32 %v1882_v12, %v1638_v57  ;;  %v1886_v17 = vmax.f32 %v1836_v60, 0.0  ;;  %v1888_v18 = vmax.f32 %v1879_v4, 0.0  ;;  %v13581_v49 = vld [vmem:[%s17602_s5 + $0xc4] ss:$12 sps:$4 sm:$0xff]   ;;  %v13589_v4 = vld [vmem:[%s17602_s5 + $0xf4] ss:$12 sps:$4 sm:$0xff]  }
 0x938   :  { %v1889_v16 = vmax.f32 %v1838_v5, 0.0  ;;  %v1891_v45 = vmax.f32 %v1881_v6, 0.0  ;;  %2505 = vmatprep.subr.bf16.mxu0 %v13581_v49  ;;  %v13583_v56 = vld [vmem:[%s17602_s5 + $0xd8] ss:$12 sps:$4 sm:$0xff]   ;;  %v13587_v8 = vld [vmem:[%s17602_s5 + $0xf0] ss:$12 sps:$4 sm:$0xff]  }
 0x939   :  { %v1890_v19 = vmax.f32 %v1840_v11, 0.0  ;;  %v1892_v21 = vmax.f32 %v1883_v13, 0.0  ;;  %v13590_v9 = vld [vmem:[%s17602_s5 + $0xf8] ss:$12 sps:$4 sm:$0xff]   ;;  %v13591_v6 = vld [vmem:[%s17602_s5 + $0x108] ss:$12 sps:$4 sm:$0xff]  }
 0x93a   :  { %v1893_v22 = vpack.c.bf16 %v1889_v16, %v1885_v40  ;;  %v1895_v23 = vpack.c.bf16 %v1891_v45, %v1887_v15  ;;  %v13593_v5 = vld [vmem:[%s17602_s5 + $0x10c] ss:$12 sps:$4 sm:$0xff]   ;;  %v13594_v10 = vld [vmem:[%s17602_s5 + $0x110] ss:$12 sps:$4 sm:$0xff]   ;;  %v13598_v13 = vld [vmem:[%s17602_s5 + $0x128] ss:$12 sps:$4 sm:$0xff]  }
 0x93b   :  { %v1894_v24 = vpack.c.bf16 %v1890_v19, %v1886_v17  ;;  %v1896_v25 = vpack.c.bf16 %v1892_v21, %v1888_v18  ;;  %v13597_v12 = vld [vmem:[%s17602_s5 + $0x124] ss:$12 sps:$4 sm:$0xff]   ;;  %v13595_v11 = vld [vmem:[%s17602_s5 + $0x120] ss:$12 sps:$4 sm:$0xff]   ;;  %v13601_v40 = vld [vmem:[%s17602_s5 + $0x13c] ss:$12 sps:$4 sm:$0xff]  }
 0x93c   :  { %v13599_v15 = vld [vmem:[%s17602_s5 + $0x138] ss:$12 sps:$4 sm:$0xff]   ;;  %v13602_v16 = vld [vmem:[%s17602_s5 + $0x140] ss:$12 sps:$4 sm:$0xff]   ;;  %v13603_v17 = vld [vmem:[%s17602_s5 + $0x150] ss:$12 sps:$4 sm:$0xff]  }
 0x93d   :  { %2125 = vmatprep.mubr.bf16.mxu0 %v1894_v24  ;;  %2166 = vmatprep.mubr.bf16.mxu1 %v1896_v25  ;;  %v13605_v45 = vld [vmem:[%s17602_s5 + $0x154] ss:$12 sps:$4 sm:$0xff]   ;;  %v13606_v18 = vld [vmem:[%s17602_s5 + $0x158] ss:$12 sps:$4 sm:$0xff]  }
 0x93e   :  { %2126 = vmatmul.mubr.bf16.vlgmr.msra.gmra.mrb[52].mxu0 %v1893_v22  ;;  %2167 = vmatmul.mubr.bf16.vlgmr.msra.gmra.mrb[36].mxu1 %v1895_v23  ;;  %v13609_v19 = vld [vmem:[%s17602_s5 + $0x16c] ss:$12 sps:$4 sm:$0xff]   ;;  %v13607_v21 = vld [vmem:[%s17602_s5 + $0x168] ss:$12 sps:$4 sm:$0xff]   ;;  %v13610_v22 = vld [vmem:[%s17602_s5 + $0x170] ss:$12 sps:$4 sm:$0xff]  }
 0x93f   :  { %2537 = vmatprep.mubr.bf16.mxu0 %v14491_v30  ;;  %12881 = vmatprep.mubr.msk.bf16.mxu1 %vm14490_vm0, %v14489_v0 }
 0x940   :  { %12866 = vmatpush3.bf16.msra.mxu1 %v13582_v55  ;;  %2506 = vmatpush1.bf16.msra.mxu0 %v13579_v54 }
 0x941   :  { %12867 = vmatprep.subr.bf16.mxu1 %v14489_v0 }
 0xa11   :  { %v12280_v28 = vpop.f32.mrb[52].mxu0  ;;  %v12302_v29 = vpop.f32.mrb[36].mxu1 }
 0xa12   :  { %v12281_v20 = vpop.f32.mrb[53].mxu0  ;;  %v12303_v26 = vpop.f32.mrb[37].mxu1 }
 0xa13   :  { %v12282_v35 = vadd.f32 %v12281_v20, %v12280_v28  ;;  %v12304_v36 = vadd.f32 %v12303_v26, %v12302_v29  ;;  %v12283_v37 = vpop.f32.mrb[54].mxu0  ;;  %v12305_v38 = vpop.f32.mrb[38].mxu1  ;;  %v15330_v20 = vsub.s32 6, %v14770_v32 }
 0xa14   :  { %v12284_v42 = vpop.f32.mrb[55].mxu0  ;;  %v12306_v44 = vpop.f32.mrb[39].mxu1 }
 0xa15   :  { %v2128_v41 = vadd.f32 %v12282_v35, %v1900_v33  ;;  %v12285_v46 = vadd.f32 %v12284_v42, %v12283_v37  ;;  %v12307_v47 = vadd.f32 %v12306_v44, %v12305_v38  ;;  %v2202_v26 = vrot.slane %v15230_v53, %v15330_v20 }
 0xa16   :  { %v15335_v35 = vsub.s32 7, %v14770_v32 }
 0xa17   :  { %v2169_v48 = vadd.f32 %v12304_v36, %v2128_v41  ;;  %v2131_v50 = vadd.f32 %v12285_v46, %v1900_v33 }
 0xa18   :  { %v2208_v41 = vrot.slane %v15230_v53, %v15335_v35 }
 0xa19   :  { %v2172_v31 = vadd.f32 %v12307_v47, %v2131_v50  ;;  %v2175_v51 = vadd.f32 %v2169_v48, %v15133_v14  ;;  %v13585_v14 = vld [vmem:[%s17602_s5 + $0xdc] ss:$12 sps:$4 sm:$0xff]  }
 0xa1a   :  { %2507 = vmatprep.subr.bf16.mxu0 %v13585_v14 }
 0xa1b   :  { %2177 = vadd.xlane.f32.xlu0 %v2175_v51  ;;  %v2176_v52 = vadd.f32 %v2172_v31, %v15135_v39  ;;  %v13586_v39 = vld [vmem:[%s17602_s5 + $0xe0] ss:$12 sps:$4 sm:$0xff]   ;;  %2508 = vmatpush1.bf16.msra.mxu0 %v13583_v56  ;;  %v15349_v31 = vld [vmem:[#allocation4 + $0x20] sm:$0xff] }
 0xa1c   :  { %12868 = vmatpush3.bf16.msra.mxu1 %v13586_v39  ;;  %2509 = vmatprep.subr.bf16.mxu0 %v13589_v4  ;;  %v2368_v53 = vrot.slane %v15349_v31, %v14787_v43 }
 0xa1d   :  { %2179 = vadd.xlane.f32.xlu1 %v2176_v52  ;;  %12869 = vmatprep.subr.bf16.mxu1 %v14489_v0 }
 0xa1f   :  { %2510 = vmatpush1.bf16.msra.mxu0 %v13587_v8 }
 0xa20   :  { %12870 = vmatpush3.bf16.msra.mxu1 %v13590_v9  ;;  %2511 = vmatprep.subr.bf16.mxu0 %v13593_v5 }
 0xa21   :  { %12871 = vmatprep.subr.bf16.mxu1 %v14489_v0 }
 0xa23   :  { %2512 = vmatpush1.bf16.msra.mxu0 %v13591_v6 }
 0xa24   :  { %12872 = vmatpush3.bf16.msra.mxu1 %v13594_v10  ;;  %2513 = vmatprep.subr.bf16.mxu0 %v13597_v12 }
 0xa25   :  { %12873 = vmatprep.subr.bf16.mxu1 %v14489_v0 }
 0xa27   :  { %2514 = vmatpush1.bf16.msra.mxu0 %v13595_v11 }
 0xa28   :  { %12874 = vmatpush3.bf16.msra.mxu1 %v13598_v13  ;;  %2515 = vmatprep.subr.bf16.mxu0 %v13601_v40 }
 0xa29   :  { %12875 = vmatprep.subr.bf16.mxu1 %v14489_v0 }
 0xa2b   :  { %2516 = vmatpush1.bf16.msra.mxu0 %v13599_v15 }
 0xa2c   :  { %12876 = vmatpush3.bf16.msra.mxu1 %v13602_v16  ;;  %2517 = vmatprep.subr.bf16.mxu0 %v13605_v45  ;;  %v15381_v16 = vld [vmem:[#allocation4 + $0x30] sm:$0xff] }
 0xa2d   :  { %12877 = vmatprep.subr.bf16.mxu1 %v14489_v0 }
 0xa2f   :  { %2518 = vmatpush1.bf16.msra.mxu0 %v13603_v17 }
 0xa30   :  { %12878 = vmatpush3.bf16.msra.mxu1 %v13606_v18  ;;  %2519 = vmatprep.subr.bf16.mxu0 %v13609_v19  ;;  %v2376_v19 = vrot.slane %v15381_v16, %v14787_v43 }
 0xa31   :  { %12879 = vmatprep.subr.bf16.mxu1 %v14489_v0 }
 0xa33   :  { %2520 = vmatpush1.bf16.msra.mxu0 %v13607_v21 }
 0xa34   :  { %12880 = vmatpush3.bf16.msra.mxu1 %v13610_v22  ;;  %12885 = vmatprep.subr.bf16.mxu0 %v14489_v0 }
 0xa35   :  { %12909 = vmatprep.subr.bf16.mxu1 %v14489_v0 }
 0xaa8   :  { %v2178_v57 = vpop.xlane.xlu0 %2177 }
 0xaa9   :  { %v2181_v58 = vmul.f32 0.0078125, %v2178_v57 }
 0xaaa   :  { %v2180_v59 = vpop.xlane.xlu1 %2179 }
 0xaab   :  { %v2182_v61 = vmul.f32 0.0078125, %v2180_v59  ;;  %v2183_v62 = vsub.f32 %v2175_v51, %v2181_v58  ;;  %v2361_v51 = vld [vmem:[#allocation4 + $0x28] sm:$0xff] }
 0xaad   :  { %v2185_v63 = vmul.f32 %v2183_v62, %v2183_v62  ;;  %v2184_v2 = vsub.f32 %v2176_v52, %v2182_v61  ;;  %v2372_v52 = vrot.slane %v2361_v51, %v14787_v43 }
 0xaaf   :  { %2187 = vadd.xlane.f32.xlu0 %v2185_v63  ;;  %v2186_v60 = vmul.f32 %v2184_v2, %v2184_v2 }
 0xab1   :  { %2189 = vadd.xlane.f32.xlu1 %v2186_v60 }
 0xb3c   :  { %v2188_v23 = vpop.xlane.xlu0 %2187 }
 0xb3d   :  { %v2191_v24 = vmul.f32 0.0078125, %v2188_v23 }
 0xb3e   :  { %v2190_v25 = vpop.xlane.xlu1 %2189 }
 0xb3f   :  { %v2193_v28 = vadd.f32 1e-05, %v2191_v24  ;;  %v2192_v29 = vmul.f32 0.0078125, %v2190_v25 }
 0xb41   :  { %14188 = vrsqrt.f32 %v2193_v28  ;;  %v2194_v33 = vadd.f32 1e-05, %v2192_v29 }
 0xb43   :  { %14190 = vrsqrt.f32 %v2194_v33 }
 0xb4b   :  { %v14189_v36 = vpop.eup %14188 }
 0xb4c   :  { %v2197_v37 = vmul.f32 %v14189_v36, %v2183_v62 }
 0xb4d   :  { %v14191_v38 = vpop.eup %14190 }
 0xb4e   :  { %v2198_v42 = vmul.f32 %v14191_v38, %v2184_v2  ;;  %v2203_v44 = vmul.f32 %v2202_v26, %v2197_v37 }
 0xb50   :  { %v2204_v46 = vmul.f32 %v2202_v26, %v2198_v42  ;;  %v15339_v47 = vadd.f32 %v2208_v41, %v2203_v44 }
 0xb52   :  { %v15341_v48 = vadd.f32 %v2208_v41, %v2204_v46 }
 0xb54   :  { %v2364_v50 = vpack.c.bf16 %v15341_v48, %v15339_v47 }
 0xb56   :  { %2538 = vmatmul.mubr.bf16.vlgmr.msra.gmra.mrb[56].mxu0 %v2364_v50  ;;  %12882 = vmatmul.mubr.bf16.vlgmr.msra.gmra.mrb[40].mxu1 %v2364_v50 }
 0xb57   :  { %12887 = vmatprep.mubr.msk.bf16.mxu0 %vm14490_vm0, %v14489_v0  ;;  %12911 = vmatprep.mubr.msk.bf16.mxu1 %vm14490_vm0, %v14489_v0 }
 0xc29   :  { %v2539_v54 = vpop.f32.mrb[56].mxu0  ;;  %v2582_v49 = vpop.f32.mrb[40].mxu1 }
 0xc2a   :  { %v2540_v55 = vadd.f32 %v2539_v54, %v2368_v53  ;;  %v2541_v14 = vpop.f32.mrb[57].mxu0  ;;  %v12883_v39 = vpop.f32.mrb[41].mxu1  ;;  %v2583_v22 = vadd.f32 %v2582_v49, %v2376_v19 }
 0xc2b   :  { %v2542_v56 = vadd.f32 %v2541_v14, %v2372_v52  ;;  %v2543_v57 = vpop.f32.mrb[58].mxu0  ;;  %v15354_v58 = vpop.f32.mrb[42].mxu1 }
 0xc2c   :  { %v2589_v59 = vpack.c.bf16 %v2540_v55, %v2540_v55  ;;  %v2545_v61 = vpop.f32.mrb[59].mxu0  ;;  %v12884_v62 = vpop.f32.mrb[43].mxu1  ;;  %v2544_v2 = vadd.f32 %v2543_v57, %v2368_v53  ;;  %v15400_v28 = vpack.c.bf16 %v2583_v22, %v2583_v22  ;;  %v2586_v36 = vadd.f32 %v15354_v58, %v2376_v19 }
 0xc2d   :  { %v2590_v63 = vpack.c.bf16 %v2542_v56, %v2542_v56  ;;  %v2546_v60 = vadd.f32 %v2545_v61, %v2372_v52 }
 0xc2e   :  { %2597 = vrot.lane.b32.xlu1 %v2589_v59, %s14492_s24  ;;  %v2592_v9 = vpack.c.bf16 %v2544_v2, %v2544_v2  ;;  %v3113_v26 = vsel %vm1093_vm4, %v15400_v28, 0  ;;  %v15415_v38 = vpack.c.bf16 %v2586_v36, %v2586_v36 }
 0xc2f   :  { %v2593_v4 = vpack.c.bf16 %v2546_v60, %v2546_v60  ;;  %2611 = vrot.lane.b32.xlu0 %v2590_v63, %s14492_s24  ;;  %v2641_v8 = vsel %vm616_vm3, %v2590_v63, 0 }
 0xc30   :  { %12886 = vmatpush3.bf16.xpose.msra.mxu0 %v2641_v8  ;;  %v3159_v44 = vsel %vm1093_vm4, %v15415_v38, 0 }
 0xc31   :  { %12891 = vmatprep.subr.bf16.mxu0 %v14489_v0  ;;  %v2687_v5 = vsel %vm616_vm3, %v2593_v4, 0 }
 0xc32   :  { %2613 = vrot.lane.b32.xlu1 %v2593_v4, %s14492_s24 }
 0xc33   :  { %2599 = vrot.lane.b32.xlu0 %v2592_v9, %s14492_s24 }
 0xc36   :  { %2615 = vrot.lane.b32.xlu1 %v2590_v63, %s14487_s12 }
 0xc37   :  { %2617 = vrot.lane.b32.xlu0 %v2593_v4, %s14487_s12  ;;  %12888 = vmatmul.mubr.msk.bf16.vlgmr.msra.gmra.mrb[60].mxu0 %vm616_vm3, %v2589_v59 }
 0xc38   :  { %12892 = vmatpush3.bf16.xpose.msra.mxu0 %v2687_v5  ;;  %12893 = vmatprep.mubr.msk.bf16.mxu0 %vm14490_vm0, %v14489_v0 }
 0xc39   :  { %12897 = vmatprep.subr.bf16.mxu0 %v14489_v0 }
 0xc3a   :  { %2601 = vrot.lane.b32.xlu1 %v2589_v59, %s14487_s12 }
 0xc3b   :  { %2603 = vrot.lane.b32.xlu0 %v2592_v9, %s14487_s12 }
 0xc3e   :  { %2619 = vrot.lane.b32.xlu1 %v2590_v63, %s17621_s17 }
 0xc3f   :  { %2621 = vrot.lane.b32.xlu0 %v2593_v4, %s17621_s17  ;;  %12894 = vmatmul.mubr.msk.bf16.vlgmr.msra.gmra.mrb[64].mxu0 %vm616_vm3, %v2592_v9 }
 0xc40   :  { %12899 = vmatprep.mubr.msk.bf16.mxu0 %vm14490_vm0, %v14489_v0 }
 0xc42   :  { %2605 = vrot.lane.b32.xlu1 %v2589_v59, %s17621_s17 }
 0xc43   :  { %2607 = vrot.lane.b32.xlu0 %v2592_v9, %s17621_s17 }
 0xca0   :  { %v2598_v6 = vpop.permute.xlu1 %2597 }
 0xca1   :  { %v2612_v10 = vpop.permute.xlu0 %2611 }
 0xca2   :  { %v2733_v12 = vsel %vm616_vm3, %v2612_v10, 0 }
 0xca3   :  { %12898 = vmatpush3.bf16.xpose.msra.mxu0 %v2733_v12 }
 0xca4   :  { %v2614_v11 = vpop.permute.xlu1 %2613  ;;  %12903 = vmatprep.subr.bf16.mxu0 %v14489_v0 }
 0xca5   :  { %v2600_v13 = vpop.permute.xlu0 %2599  ;;  %v2779_v45 = vsel %vm616_vm3, %v2614_v11, 0 }
 0xca8   :  { %v2616_v40 = vpop.permute.xlu1 %2615 }
 0xca9   :  { %v2825_v15 = vsel %vm616_vm3, %v2616_v40, 0  ;;  %v2618_v17 = vpop.permute.xlu0 %2617 }
 0xcaa   :  { %12900 = vmatmul.mubr.msk.bf16.vlgmr.msra.gmra.mrb[68].mxu0 %vm616_vm3, %v2598_v6  ;;  %12910 = vmatpush3.bf16.xpose.msra.mxu1 %v2825_v15  ;;  %v2871_v25 = vsel %vm616_vm3, %v2618_v17, 0 }
 0xcab   :  { %12904 = vmatpush3.bf16.xpose.msra.mxu0 %v2779_v45  ;;  %12905 = vmatprep.mubr.msk.bf16.mxu0 %vm14490_vm0, %v14489_v0 }
 0xcac   :  { %v2602_v18 = vpop.permute.xlu1 %2601  ;;  %12921 = vmatprep.subr.bf16.mxu1 %v14489_v0  ;;  %12915 = vmatprep.subr.bf16.mxu0 %v14489_v0 }
 0xcad   :  { %v2604_v23 = vpop.permute.xlu0 %2603 }
 0xcb0   :  { %v2620_v21 = vpop.permute.xlu1 %2619 }
 0xcb1   :  { %v2917_v24 = vsel %vm616_vm3, %v2620_v21, 0  ;;  %12912 = vmatmul.mubr.msk.bf16.vlgmr.msra.gmra.mrb[44].mxu1 %vm616_vm3, %v2602_v18  ;;  %v2622_v29 = vpop.permute.xlu0 %2621 }
 0xcb2   :  { %12906 = vmatmul.mubr.msk.bf16.vlgmr.msra.gmra.mrb[72].mxu0 %vm616_vm3, %v2600_v13  ;;  %12922 = vmatpush3.bf16.xpose.msra.mxu1 %v2917_v24  ;;  %v2963_v37 = vsel %vm616_vm3, %v2622_v29, 0 }
 0xcb3   :  { %12916 = vmatpush3.bf16.xpose.msra.mxu0 %v2871_v25  ;;  %12923 = vmatprep.mubr.msk.bf16.mxu1 %vm14490_vm0, %v14489_v0 }
 0xcb4   :  { %12917 = vmatprep.mubr.msk.bf16.mxu0 %vm14490_vm0, %v14489_v0  ;;  %12933 = vmatprep.subr.bf16.mxu1 %v14489_v0  ;;  %v2606_v33 = vpop.permute.xlu1 %2605 }
 0xcb5   :  { %12927 = vmatprep.subr.bf16.mxu0 %v14489_v0  ;;  %v2608_v42 = vpop.permute.xlu0 %2607 }
 0xcb9   :  { %12924 = vmatmul.mubr.msk.bf16.vlgmr.msra.gmra.mrb[48].mxu1 %vm616_vm3, %v2606_v33 }
 0xcba   :  { %12918 = vmatmul.mubr.msk.bf16.vlgmr.msra.gmra.mrb[76].mxu0 %vm616_vm3, %v2604_v23  ;;  %12934 = vmatpush3.bf16.msra.mxu1 %v3113_v26 }
 0xcbb   :  { %12928 = vmatpush3.bf16.xpose.msra.mxu0 %v2963_v37  ;;  %12929 = vmatprep.mubr.msk.bf16.mxu0 %vm14490_vm0, %v14489_v0 }
 0xcbc   :  { %12939 = vmatprep.subr.bf16.mxu0 %v14489_v0  ;;  %12935 = vmatprep.mubr.msk.bf16.mxu1 %vm14490_vm0, %v14489_v0 }
 0xcbd   :  { %12945 = vmatprep.subr.bf16.mxu1 %v14489_v0 }
 0xcc2   :  { %12930 = vmatmul.mubr.msk.bf16.vlgmr.msra.gmra.mrb[80].mxu0 %vm616_vm3, %v2608_v42 }
 0xcc3   :  { %12940 = vmatpush3.bf16.msra.mxu0 %v3159_v44  ;;  %12941 = vmatprep.mubr.msk.bf16.mxu0 %vm14490_vm0, %v14489_v0 }
 0xcc4   :  { %12951 = vmatprep.subr.bf16.mxu0 %v14489_v0 }
 0xd0a   :  { %v2677_v41 = vpop.f32.mrb[60].mxu0 }
 0xd0b   :  { %v3005_v46 = vmul.f32 0.17677669, %v2677_v41  ;;  %v12889_v50 = vpop.f32.mrb[61].mxu0 }
 0xd0c   :  { %v2680_v51 = vpop.f32.mrb[62].mxu0 }
 0xd0d   :  { %v12890_v53 = vpop.f32.mrb[63].mxu0  ;;  %v3013_v52 = vsel %vm993_vm5, %v3005_v46, -inf }
 0xd0e   :  { %3014 = vmax.xlane.f32.xlu1 %v3013_v52 }
 0xd12   :  { %v2723_v54 = vpop.f32.mrb[64].mxu0 }
 0xd13   :  { %v3006_v49 = vmul.f32 0.17677669, %v2723_v54  ;;  %v12895_v55 = vpop.f32.mrb[65].mxu0 }
 0xd14   :  { %v2726_v14 = vpop.f32.mrb[66].mxu0 }
 0xd15   :  { %v12896_v39 = vpop.f32.mrb[67].mxu0  ;;  %v3016_v56 = vsel %vm993_vm5, %v3006_v49, -inf }
 0xd16   :  { %3017 = vmax.xlane.f32.xlu0 %v3016_v56 }
 0xd7d   :  { %v2769_v57 = vpop.f32.mrb[68].mxu0 }
 0xd7e   :  { %v3007_v58 = vmul.f32 0.17677669, %v2769_v57  ;;  %v12901_v59 = vpop.f32.mrb[69].mxu0 }
 0xd7f   :  { %v2772_v61 = vpop.f32.mrb[70].mxu0 }
 0xd80   :  { %v12902_v62 = vpop.f32.mrb[71].mxu0  ;;  %v3019_v63 = vsel %vm993_vm5, %v3007_v58, -inf }
 0xd81   :  { %3020 = vmax.xlane.f32.xlu0 %v3019_v63 }
 0xd84   :  { %v2861_v2 = vpop.f32.mrb[44].mxu1 }
 0xd85   :  { %v15426_v60 = vmul.f32 0.17677669, %v2861_v2  ;;  %v2815_v4 = vpop.f32.mrb[72].mxu0  ;;  %v12913_v8 = vpop.f32.mrb[45].mxu1 }
 0xd86   :  { %v3008_v9 = vmul.f32 0.17677669, %v2815_v4  ;;  %v12907_v5 = vpop.f32.mrb[73].mxu0  ;;  %v2864_v6 = vpop.f32.mrb[46].mxu1 }
 0xd87   :  { %v2818_v10 = vpop.f32.mrb[74].mxu0  ;;  %v12914_v12 = vpop.f32.mrb[47].mxu1  ;;  %v3025_v11 = vsel %vm993_vm5, %v15426_v60, -inf }
 0xd88   :  { %3026 = vmax.xlane.f32.xlu0 %v3025_v11  ;;  %v12908_v13 = vpop.f32.mrb[75].mxu0  ;;  %v3022_v40 = vsel %vm993_vm5, %v3008_v9, -inf }
 0xd89   :  { %3023 = vmax.xlane.f32.xlu1 %v3022_v40 }
 0xd8c   :  { %v2953_v15 = vpop.f32.mrb[48].mxu1 }
 0xd8d   :  { %v15431_v45 = vmul.f32 0.17677669, %v2953_v15  ;;  %v2907_v17 = vpop.f32.mrb[76].mxu0  ;;  %v12925_v18 = vpop.f32.mrb[49].mxu1 }
 0xd8e   :  { %v3010_v19 = vmul.f32 0.17677669, %v2907_v17  ;;  %v12919_v21 = vpop.f32.mrb[77].mxu0  ;;  %v2956_v22 = vpop.f32.mrb[50].mxu1 }
 0xd8f   :  { %v2910_v23 = vpop.f32.mrb[78].mxu0  ;;  %v12926_v24 = vpop.f32.mrb[51].mxu1  ;;  %v3031_v25 = vsel %vm993_vm5, %v15431_v45, -inf }
 0xd90   :  { %3032 = vmax.xlane.f32.xlu0 %v3031_v25  ;;  %v12920_v29 = vpop.f32.mrb[79].mxu0  ;;  %v3028_v33 = vsel %vm993_vm5, %v3010_v19, -inf }
 0xd91   :  { %3029 = vmax.xlane.f32.xlu1 %v3028_v33 }
 0xd95   :  { %v2999_v26 = vpop.f32.mrb[80].mxu0 }
 0xd96   :  { %v3012_v36 = vmul.f32 0.17677669, %v2999_v26  ;;  %v12931_v37 = vpop.f32.mrb[81].mxu0 }
 0xd97   :  { %v3002_v42 = vpop.f32.mrb[82].mxu0 }
 0xd98   :  { %v12932_v44 = vpop.f32.mrb[83].mxu0  ;;  %v3034_v41 = vsel %vm993_vm5, %v3012_v36, -inf }
 0xd99   :  { %3035 = vmax.xlane.f32.xlu1 %v3034_v41 }
 0xd9b   :  { %v3015_v50 = vpop.xlane.xlu1 %3014 }
 0xd9c   :  { %v3037_v51 = vsub.f32 %v3005_v46, %v3015_v50 }
 0xd9e   :  { %v3045_v53 = vmul.f32 1.442695, %v3037_v51 }
 0xda0   :  { %14192 = vpow2.f32 %v3045_v53 }
 0xda3   :  { %v3018_v52 = vpop.xlane.xlu0 %3017 }
 0xda4   :  { %v3038_v54 = vsub.f32 %v3006_v49, %v3018_v52 }
 0xda6   :  { %2625 = vrot.lane.b32.xlu0 %v15400_v28, %s14492_s24  ;;  %v3047_v55 = vmul.f32 1.442695, %v3038_v54 }
 0xda8   :  { %14194 = vpow2.f32 %v3047_v55 }
 0xdaa   :  { %2627 = vrot.lane.b32.xlu1 %v15415_v38, %s14492_s24  ;;  %v14193_v14 = vpop.eup %14192 }
 0xdab   :  { %v3061_v39 = vsel %vm993_vm5, %v14193_v14, 0.0 }
 0xdb2   :  { %v15442_v56 = vpop.eup %14194 }
 0xdb3   :  { %v3064_v57 = vsel %vm993_vm5, %v15442_v56, 0.0 }
 0xdc5   :  { %3062 = vadd.xlane.f32.xlu0 %v3061_v39 }
 0xdce   :  { %3065 = vadd.xlane.f32.xlu1 %v3064_v57 }
 0xddf   :  { %2629 = vrot.lane.b32.xlu1 %v15400_v28, %s14487_s12 }
 0xe0e   :  { %v3021_v46 = vpop.xlane.xlu0 %3020 }
 0xe0f   :  { %v3039_v59 = vsub.f32 %v3007_v58, %v3021_v46 }
 0xe11   :  { %v3049_v61 = vmul.f32 1.442695, %v3039_v59 }
 0xe13   :  { %14196 = vpow2.f32 %v3049_v61 }
 0xe15   :  { %v3027_v18 = vpop.xlane.xlu0 %3026 }
 0xe16   :  { %v3024_v49 = vpop.xlane.xlu1 %3023 }
 0xe17   :  { %v3040_v62 = vsub.f32 %v3008_v9, %v3024_v49 }
 0xe19   :  { %v3051_v63 = vmul.f32 1.442695, %v3040_v62 }
 0xe1b   :  { %14198 = vpow2.f32 %v3051_v63 }
 0xe1d   :  { %v15448_v2 = vpop.eup %14196  ;;  %v3033_v21 = vpop.xlane.xlu0 %3032 }
 0xe1e   :  { %v3030_v4 = vpop.xlane.xlu1 %3029  ;;  %v3067_v8 = vsel %vm993_vm5, %v15448_v2, 0.0  ;;  %v3043_v23 = vsub.f32 %v15431_v45, %v3033_v21 }
 0xe1f   :  { %v3042_v5 = vsub.f32 %v3010_v19, %v3030_v4  ;;  %3068 = vadd.xlane.f32.xlu0 %v3067_v8  ;;  %v3041_v19 = vsub.f32 %v15426_v60, %v3027_v18 }
 0xe20   :  { %v3057_v24 = vmul.f32 1.442695, %v3043_v23 }
 0xe21   :  { %v3055_v6 = vmul.f32 1.442695, %v3042_v5  ;;  %v3053_v22 = vmul.f32 1.442695, %v3041_v19  ;;  %v2626_v25 = vpop.permute.xlu0 %2625 }
 0xe22   :  { %v3205_v41 = vsel %vm1093_vm4, %v2626_v25, 0 }
 0xe23   :  { %14200 = vpow2.f32 %v3055_v6 }
 0xe25   :  { %v15452_v10 = vpop.eup %14198 }
 0xe26   :  { %v3036_v12 = vpop.xlane.xlu1 %3035  ;;  %v3070_v58 = vsel %vm993_vm5, %v15452_v10, 0.0 }
 0xe27   :  { %v3044_v11 = vsub.f32 %v3012_v36, %v3036_v12  ;;  %3071 = vadd.xlane.f32.xlu1 %v3070_v58 }
 0xe29   :  { %v3059_v9 = vmul.f32 1.442695, %v3044_v11 }
 0xe2a   :  { %v2628_v60 = vpop.permute.xlu1 %2627 }
 0xe2b   :  { %14202 = vpow2.f32 %v3059_v9  ;;  %v3251_v52 = vsel %vm1093_vm4, %v2628_v60, 0 }
 0xe2c   :  { %14204 = vpow2.f32 %v3053_v22 }
 0xe2d   :  { %v15456_v13 = vpop.eup %14200  ;;  %14206 = vpow2.f32 %v3057_v24 }
 0xe2e   :  { %v3076_v40 = vsel %vm993_vm5, %v15456_v13, 0.0 }
 0xe2f   :  { %3077 = vadd.xlane.f32.xlu1 %v3076_v40 }
 0xe35   :  { %v15460_v15 = vpop.eup %14202  ;;  %2631 = vrot.lane.b32.xlu0 %v15415_v38, %s14487_s12 }
 0xe36   :  { %v3082_v17 = vsel %vm993_vm5, %v15460_v15, 0.0  ;;  %v15470_v29 = vpop.eup %14204 }
 0xe37   :  { %3083 = vadd.xlane.f32.xlu1 %v3082_v17  ;;  %v3073_v26 = vsel %vm993_vm5, %v15470_v29, 0.0  ;;  %v15474_v36 = vpop.eup %14206 }
 0xe38   :  { %v3079_v45 = vsel %vm993_vm5, %v15474_v36, 0.0 }
 0xe48   :  { %2633 = vrot.lane.b32.xlu1 %v15400_v28, %s17621_s17 }
 0xe52   :  { %v3063_v33 = vpop.xlane.xlu0 %3062 }
 0xe53   :  { %14208 = vrcp.f32 %v3063_v33 }
 0xe54   :  { %3074 = vadd.xlane.f32.xlu0 %v3073_v26 }
 0xe58   :  { %3080 = vadd.xlane.f32.xlu0 %v3079_v45 }
 0xe5b   :  { %v3066_v37 = vpop.xlane.xlu1 %3065 }
 0xe5c   :  { %14210 = vrcp.f32 %v3066_v37 }
 0xe5d   :  { %v14209_v28 = vpop.eup %14208 }
 0xe5e   :  { %v3093_v42 = vmul.f32 %v14209_v28, %v14193_v14 }
 0xe5f   :  { %v2630_v55 = vpop.permute.xlu1 %2629 }
 0xe60   :  { %v3101_v44 = vpack.c.bf16 %v3093_v42, %v3093_v42  ;;  %v3297_v46 = vsel %vm1093_vm4, %v2630_v55, 0 }
 0xe62   :  { %12936 = vmatmul.mubr.msk.bf16.vlgmr.msra.gmra.mrb[52].mxu1 %vm993_vm5, %v3101_v44 }
 0xe63   :  { %12946 = vmatpush3.bf16.msra.mxu1 %v3205_v41  ;;  %12947 = vmatprep.mubr.msk.bf16.mxu1 %vm14490_vm0, %v14489_v0  ;;  %v13612_v41 = vld [vmem:[%s17603_s6 + $0x48] sm:$0xff]  }
 0xe64   :  { %12957 = vmatprep.subr.bf16.mxu1 %v14489_v0 }
 0xe66   :  { %v14211_v50 = vpop.eup %14210 }
 0xe67   :  { %v3094_v51 = vmul.f32 %v14211_v50, %v15442_v56 }
 0xe69   :  { %v3102_v53 = vpack.c.bf16 %v3094_v51, %v3094_v51  ;;  %v13613_v51 = vld [vmem:[%s17603_s6 + $0x50] sm:$0xff]  }
 0xe6b   :  { %12942 = vmatmul.mubr.msk.bf16.vlgmr.msra.gmra.mrb[84].mxu0 %vm993_vm5, %v3102_v53 }
 0xe6c   :  { %12952 = vmatpush3.bf16.msra.mxu0 %v3251_v52  ;;  %12953 = vmatprep.mubr.msk.bf16.mxu0 %vm14490_vm0, %v14489_v0 }
 0xe6d   :  { %12963 = vmatprep.subr.bf16.mxu0 %v14489_v0 }
 0xe6e   :  { %2635 = vrot.lane.b32.xlu0 %v15415_v38, %s17621_s17 }
 0xeac   :  { %v3069_v54 = vpop.xlane.xlu0 %3068 }
 0xead   :  { %14212 = vrcp.f32 %v3069_v54 }
 0xeb0   :  { %v2632_v49 = vpop.permute.xlu0 %2631 }
 0xeb1   :  { %v3343_v63 = vsel %vm1093_vm4, %v2632_v49, 0  ;;  %v13617_v49 = vld [vmem:[%s17603_s6 + $0x70] sm:$0xff]  }
 0xeb4   :  { %v3072_v14 = vpop.xlane.xlu1 %3071 }
 0xeb5   :  { %14214 = vrcp.f32 %v3072_v14  ;;  %v13614_v14 = vld [vmem:[%s17603_s6 + $0x58] sm:$0xff]  }
 0xeb7   :  { %v14213_v39 = vpop.eup %14212 }
 0xeb8   :  { %v3095_v56 = vmul.f32 %v14213_v39, %v15448_v2 }
 0xeba   :  { %v3103_v57 = vpack.c.bf16 %v3095_v56, %v3095_v56  ;;  %v13615_v56 = vld [vmem:[%s17603_s6 + $0x60] sm:$0xff]  }
 0xebc   :  { %12948 = vmatmul.mubr.msk.bf16.vlgmr.msra.gmra.mrb[56].mxu1 %vm993_vm5, %v3103_v57  ;;  %v3078_v59 = vpop.xlane.xlu1 %3077 }
 0xebd   :  { %12958 = vmatpush3.bf16.msra.mxu1 %v3297_v46  ;;  %14216 = vrcp.f32 %v3078_v59  ;;  %12959 = vmatprep.mubr.msk.bf16.mxu1 %vm14490_vm0, %v14489_v0 }
 0xebe   :  { %12969 = vmatprep.subr.bf16.mxu1 %v14489_v0 }
 0xebf   :  { %v14215_v38 = vpop.eup %14214 }
 0xec0   :  { %v3096_v61 = vmul.f32 %v14215_v38, %v15452_v10 }
 0xec2   :  { %v3104_v62 = vpack.c.bf16 %v3096_v61, %v3096_v61  ;;  %v13616_v61 = vld [vmem:[%s17603_s6 + $0x68] sm:$0xff]  }
 0xec4   :  { %12954 = vmatmul.mubr.msk.bf16.vlgmr.msra.gmra.mrb[88].mxu0 %vm993_vm5, %v3104_v62  ;;  %v3084_v5 = vpop.xlane.xlu1 %3083 }
 0xec5   :  { %12964 = vmatpush3.bf16.msra.mxu0 %v3343_v63  ;;  %12965 = vmatprep.mubr.msk.bf16.mxu0 %vm14490_vm0, %v14489_v0  ;;  %14218 = vrcp.f32 %v3084_v5 }
 0xec6   :  { %12975 = vmatprep.subr.bf16.mxu0 %v14489_v0 }
 0xec7   :  { %v14217_v2 = vpop.eup %14216 }
 0xec8   :  { %v3098_v4 = vmul.f32 %v14217_v2, %v15456_v13  ;;  %v2634_v18 = vpop.permute.xlu1 %2633 }
 0xec9   :  { %v3389_v22 = vsel %vm1093_vm4, %v2634_v18, 0 }
 0xeca   :  { %v3106_v8 = vpack.c.bf16 %v3098_v4, %v3098_v4  ;;  %v13618_v4 = vld [vmem:[%s17603_s6 + $0x78] sm:$0xff]  }
 0xecc   :  { %12966 = vmatmul.mubr.msk.bf16.vlgmr.msra.gmra.mrb[92].mxu0 %vm993_vm5, %v3106_v8 }
 0xecd   :  { %12977 = vmatprep.mubr.msk.bf16.mxu0 %vm14490_vm0, %v14489_v0 }
 0xecf   :  { %v14219_v10 = vpop.eup %14218 }
 0xed0   :  { %v3100_v58 = vmul.f32 %v14219_v10, %v15460_v15 }
 0xed2   :  { %v3108_v40 = vpack.c.bf16 %v3100_v58, %v3100_v58 }
 0xee1   :  { %v3075_v6 = vpop.xlane.xlu0 %3074 }
 0xee2   :  { %14220 = vrcp.f32 %v3075_v6 }
 0xee5   :  { %v3081_v12 = vpop.xlane.xlu0 %3080 }
 0xee6   :  { %14222 = vrcp.f32 %v3081_v12 }
 0xee9   :  { %v2636_v11 = vpop.permute.xlu0 %2635 }
 0xeea   :  { %v3435_v9 = vsel %vm1093_vm4, %v2636_v11, 0  ;;  %vm9816_vm4 = vcmask 23552  }
 0xeeb   :  { %12976 = vmatpush3.bf16.msra.mxu0 %v3435_v9 }
 0xeec   :  { %v14221_v13 = vpop.eup %14220 }
 0xeed   :  { %v3097_v17 = vmul.f32 %v14221_v13, %v15470_v29 }
 0xeee   :  { %12978 = vmatmul.mubr.msk.bf16.vlgmr.msra.gmra.mrb[96].mxu0 %vm993_vm5, %v3108_v40 }
 0xeef   :  { %v3105_v19 = vpack.c.bf16 %v3097_v17, %v3097_v17  ;;  %3846 = vmatprep.mubr.bf16.mxu0 %v14491_v30 }
 0xef0   :  { %v14223_v21 = vpop.eup %14222 }
 0xef1   :  { %12960 = vmatmul.mubr.msk.bf16.vlgmr.msra.gmra.mrb[60].mxu1 %vm993_vm5, %v3105_v19  ;;  %v3099_v15 = vmul.f32 %v14223_v21, %v15474_v36  ;;  %v13611_v36 = vld [vmem:[%s17603_s6 + $0x40] sm:$0xff]  }
 0xef2   :  { %12970 = vmatpush3.bf16.msra.mxu1 %v3389_v22  ;;  %12971 = vmatprep.mubr.msk.bf16.mxu1 %vm14490_vm0, %v14489_v0 }
 0xef3   :  { %12981 = vmatprep.subr.bf16.mxu1 %v14489_v0  ;;  %v3107_v23 = vpack.c.bf16 %v3099_v15, %v3099_v15 }
 0xef9   :  { %12972 = vmatmul.mubr.msk.bf16.vlgmr.msra.gmra.mrb[64].mxu1 %vm993_vm5, %v3107_v23 }
 0xefa   :  { %12997 = vmatprep.mubr.msk.bf16.mxu1 %vm14490_vm0, %v14489_v0  ;;  %12982 = vmatpush3.bf16.msra.mxu1 %v13611_v36 }
 0xefb   :  { %12983 = vmatprep.subr.bf16.mxu1 %v14489_v0 }
 0xefe   :  { %12984 = vmatpush3.bf16.msra.mxu1 %v13612_v41 }
 0xeff   :  { %12985 = vmatprep.subr.bf16.mxu1 %v14489_v0 }
 0xf02   :  { %12986 = vmatpush3.bf16.msra.mxu1 %v13613_v51 }
 0xf03   :  { %12987 = vmatprep.subr.bf16.mxu1 %v14489_v0 }
 0xf06   :  { %12988 = vmatpush3.bf16.msra.mxu1 %v13614_v14  ;;  %v13619_v14 = vld [vmem:[%s17604_s7 + $0x100] ss:$16 sps:$4 sm:$0xff]  }
 0xf07   :  { %12989 = vmatprep.subr.bf16.mxu1 %v14489_v0 }
 0xf0a   :  { %12990 = vmatpush3.bf16.msra.mxu1 %v13615_v56  ;;  %v13622_v56 = vld [vmem:[%s17604_s7 + $0x108] ss:$16 sps:$4 sm:$0xff]  }
 0xf0b   :  { %12991 = vmatprep.subr.bf16.mxu1 %v14489_v0 }
 0xf0e   :  { %12992 = vmatpush3.bf16.msra.mxu1 %v13616_v61 }
 0xf0f   :  { %12993 = vmatprep.subr.bf16.mxu1 %v14489_v0 }
 0xf12   :  { %12994 = vmatpush3.bf16.msra.mxu1 %v13617_v49 }
 0xf13   :  { %12995 = vmatprep.subr.bf16.mxu1 %v14489_v0 }
 0xf16   :  { %12996 = vmatpush3.bf16.msra.mxu1 %v13618_v4 }
 0xf35   :  { %v15521_v24 = vpop.f32.mrb[52].mxu1 }
 0xf36   :  { %v12937_v25 = vpop.f32.mrb[53].mxu1 }
 0xf37   :  { %v3152_v29 = vpop.f32.mrb[54].mxu1 }
 0xf38   :  { %v12938_v33 = vpop.f32.mrb[55].mxu1 }
 0xf3e   :  { %v15523_v26 = vpop.f32.mrb[84].mxu0 }
 0xf3f   :  { %v12943_v60 = vpop.f32.mrb[85].mxu0 }
 0xf40   :  { %v3198_v45 = vpop.f32.mrb[86].mxu0 }
 0xf41   :  { %v12944_v37 = vpop.f32.mrb[87].mxu0 }
 0xf8f   :  { %v3241_v28 = vpop.f32.mrb[56].mxu1 }
 0xf90   :  { %v12949_v42 = vpop.f32.mrb[57].mxu1 }
 0xf91   :  { %v3244_v44 = vpop.f32.mrb[58].mxu1 }
 0xf92   :  { %v12950_v50 = vpop.f32.mrb[59].mxu1 }
 0xf97   :  { %v3287_v53 = vpop.f32.mrb[88].mxu0 }
 0xf98   :  { %v13419_v52 = vpack.i.bf16 %v3287_v53, %v3241_v28  ;;  %v12955_v54 = vpop.f32.mrb[89].mxu0 }
 0xf99   :  { %v3290_v55 = vpop.f32.mrb[90].mxu0 }
 0xf9a   :  { %13420 = vrot.lane.b32.xlu1 %v13419_v52, %s17621_s17  ;;  %v12956_v39 = vpop.f32.mrb[91].mxu0 }
 0xf9b   :  { %v13621_v39 = vld [vmem:[%s17604_s7 + $0x104] ss:$16 sps:$4 sm:$0xff]  }
 0xf9c   :  { %3814 = vmatprep.subr.bf16.mxu0 %v13621_v39 }
 0xf9d   :  { %3815 = vmatpush1.bf16.msra.mxu0 %v13619_v14 }
 0xf9f   :  { %v3379_v57 = vpop.f32.mrb[92].mxu0 }
 0xfa0   :  { %v12967_v46 = vpop.f32.mrb[93].mxu0 }
 0xfa1   :  { %v3382_v59 = vpop.f32.mrb[94].mxu0  ;;  %v13625_v46 = vld [vmem:[%s17604_s7 + $0x120] ss:$16 sps:$4 sm:$0xff]  }
 0xfa2   :  { %v12968_v38 = vpop.f32.mrb[95].mxu0  ;;  %v13628_v59 = vld [vmem:[%s17604_s7 + $0x128] ss:$16 sps:$4 sm:$0xff]  }
 0xfc1   :  { %v3471_v62 = vpop.f32.mrb[96].mxu0 }
 0xfc2   :  { %v12979_v63 = vpop.f32.mrb[97].mxu0 }
 0xfc3   :  { %v3474_v2 = vpop.f32.mrb[98].mxu0 }
 0xfc4   :  { %v3333_v8 = vpop.f32.mrb[60].mxu1  ;;  %v12980_v5 = vpop.f32.mrb[99].mxu0 }
 0xfc5   :  { %v13424_v6 = vpack.i.bf16 %v3379_v57, %v3333_v8  ;;  %v12961_v10 = vpop.f32.mrb[61].mxu1  ;;  %v13630_v57 = vld [vmem:[%s17604_s7 + $0x12c] ss:$16 sps:$4 sm:$0xff]   ;;  %v13633_v5 = vld [vmem:[%s17604_s7 + $0x144] ss:$16 sps:$4 sm:$0xff]  }
 0xfc6   :  { %v3336_v12 = vpop.f32.mrb[62].mxu1  ;;  %v13631_v10 = vld [vmem:[%s17604_s7 + $0x140] ss:$16 sps:$4 sm:$0xff]  }
 0xfc7   :  { %v12962_v58 = vpop.f32.mrb[63].mxu1  ;;  %13425 = vrot.lane.b32.xlu0 %v13424_v6, %s14487_s12  ;;  %v13636_v6 = vld [vmem:[%s17604_s7 + $0x14c] ss:$16 sps:$4 sm:$0xff]   ;;  %v13634_v12 = vld [vmem:[%s17604_s7 + $0x148] ss:$16 sps:$4 sm:$0xff]  }
 0xfc8   :  { %v13639_v58 = vld [vmem:[%s17604_s7 + $0x164] ss:$16 sps:$4 sm:$0xff]  }
 0xfcc   :  { %v3425_v11 = vpop.f32.mrb[64].mxu1 }
 0xfcd   :  { %v13429_v9 = vpack.i.bf16 %v3471_v62, %v3425_v11  ;;  %v12973_v13 = vpop.f32.mrb[65].mxu1  ;;  %v13642_v11 = vld [vmem:[%s17604_s7 + $0x16c] ss:$16 sps:$4 sm:$0xff]  }
 0xfce   :  { %v3428_v40 = vpop.f32.mrb[66].mxu1  ;;  %v13640_v13 = vld [vmem:[%s17604_s7 + $0x168] ss:$16 sps:$4 sm:$0xff]  }
 0xfcf   :  { %v12974_v17 = vpop.f32.mrb[67].mxu1  ;;  %13430 = vrot.lane.b32.xlu1 %v13429_v9, %s14492_s24  ;;  %v13637_v9 = vld [vmem:[%s17604_s7 + $0x160] ss:$16 sps:$4 sm:$0xff]   ;;  %v13645_v40 = vld [vmem:[%s17604_s7 + $0x184] ss:$16 sps:$4 sm:$0xff]  }
 0xfd0   :  { %v13643_v17 = vld [vmem:[%s17604_s7 + $0x180] ss:$16 sps:$4 sm:$0xff]  }
0x100c   :  { %v13421_v18 = vpop.permute.xlu1 %13420 }
0x100d   :  { %v13423_v21 = vunpack.i.h.bf16 %v13421_v18  ;;  %v13422_v22 = vunpack.i.l.bf16 %v13421_v18  ;;  %v13646_v18 = vld [vmem:[%s17604_s7 + $0x188] ss:$16 sps:$4 sm:$0xff]  }
0x100f   :  { %v3502_v29 = vsel %vm616_vm3, %v15523_v26, %v13423_v21  ;;  %v3501_v33 = vsel %vm616_vm3, %v15521_v24, %v13422_v22  ;;  %v3511_v26 = vrot.slane %v15349_v31, %v15005_v3  ;;  %v13651_v21 = vld [vmem:[%s17604_s7 + $0x1a4] ss:$16 sps:$4 sm:$0xff]   ;;  %v13654_v22 = vld [vmem:[%s17604_s7 + $0x1ac] ss:$16 sps:$4 sm:$0xff]  }
0x1039   :  { %v13426_v19 = vpop.permute.xlu0 %13425 }
0x103a   :  { %v13428_v15 = vunpack.i.h.bf16 %v13426_v19  ;;  %v13427_v23 = vunpack.i.l.bf16 %v13426_v19  ;;  %v13648_v19 = vld [vmem:[%s17604_s7 + $0x18c] ss:$16 sps:$4 sm:$0xff]  }
0x103c   :  { %v3504_v37 = vsel %vm1485_vm6, %v3502_v29, %v13428_v15  ;;  %v3503_v28 = vsel %vm1485_vm6, %v3501_v33, %v13427_v23  ;;  %v13649_v15 = vld [vmem:[%s17604_s7 + $0x1a0] ss:$16 sps:$4 sm:$0xff]   ;;  %v13652_v23 = vld [vmem:[%s17604_s7 + $0x1a8] ss:$16 sps:$4 sm:$0xff]   ;;  %v13660_v29 = vld [vmem:[%s17604_s7 + $0x1cc] ss:$16 sps:$4 sm:$0xff]  }
0x103d   :  { %v13655_v33 = vld [vmem:[%s17604_s7 + $0x1c0] ss:$16 sps:$4 sm:$0xff]  }
0x1041   :  { %v13431_v25 = vpop.permute.xlu1 %13430 }
0x1042   :  { %v13433_v60 = vunpack.i.h.bf16 %v13431_v25  ;;  %v13432_v45 = vunpack.i.l.bf16 %v13431_v25  ;;  %v13657_v25 = vld [vmem:[%s17604_s7 + $0x1c4] ss:$16 sps:$4 sm:$0xff]  }
0x1044   :  { %v3506_v36 = vsel %vm1488_vm7, %v3504_v37, %v13433_v60  ;;  %v3505_v42 = vsel %vm1488_vm7, %v3503_v28, %v13432_v45  ;;  %v13658_v60 = vld [vmem:[%s17604_s7 + $0x1c8] ss:$16 sps:$4 sm:$0xff]   ;;  %v13663_v45 = vld [vmem:[%s17604_s7 + $0x1e4] ss:$16 sps:$4 sm:$0xff]   ;;  %v13666_v37 = vld [vmem:[%s17604_s7 + $0x1ec] ss:$16 sps:$4 sm:$0xff]  }
0x1045   :  { %v3507_v44 = vpack.c.bf16 %v3506_v36, %v3505_v42  ;;  %v13661_v28 = vld [vmem:[%s17604_s7 + $0x1e0] ss:$16 sps:$4 sm:$0xff]   ;;  %v13664_v36 = vld [vmem:[%s17604_s7 + $0x1e8] ss:$16 sps:$4 sm:$0xff]  }
0x1046   :  { %v13667_v42 = vld [vmem:[%s17605_s8 + $0x140] sm:$0xff]  }
0x1047   :  { %12998 = vmatmul.mubr.bf16.vlgmr.msra.gmra.mrb[68].mxu1 %v3507_v44  ;;  %v13669_v44 = vld [vmem:[%s17605_s8 + $0x1c0] sm:$0xff]  }
0x1048   :  { %3889 = vmatprep.mubr.bf16.mxu1 %v14491_v30 }
0x111a   :  { %v3594_v41 = vpop.f32.mrb[68].mxu1 }
0x111b   :  { %v3595_v50 = vadd.f32 %v3594_v41, %v3511_v26  ;;  %v12999_v24 = vpop.f32.mrb[69].mxu1 }
0x111c   :  { %v3597_v51 = vpop.f32.mrb[70].mxu1 }
0x111d   :  { %v3598_v53 = vadd.f32 %v3597_v51, %v3511_v26  ;;  %v13000_v52 = vpop.f32.mrb[71].mxu1  ;;  %v3601_v54 = vadd.f32 %v3595_v50, %v15339_v47  ;;  %v13624_v47 = vld [vmem:[%s17604_s7 + $0x10c] ss:$16 sps:$4 sm:$0xff]  }
0x111e   :  { %3857 = vmatprep.subr.bf16.mxu1 %v13624_v47  ;;  %v3634_v47 = vrot.slane %v15349_v31, %v15127_v7 }
0x111f   :  { %3603 = vadd.xlane.f32.xlu0 %v3601_v54  ;;  %v3602_v55 = vadd.f32 %v3598_v53, %v15341_v48  ;;  %v13627_v48 = vld [vmem:[%s17604_s7 + $0x124] ss:$16 sps:$4 sm:$0xff]   ;;  %3858 = vmatpush1.bf16.msra.mxu1 %v13622_v56 }
0x1120   :  { %3816 = vmatprep.subr.bf16.mxu0 %v13627_v48  ;;  %3859 = vmatprep.subr.bf16.mxu1 %v13630_v57 }
0x1121   :  { %3605 = vadd.xlane.f32.xlu1 %v3602_v55  ;;  %3817 = vmatpush1.bf16.msra.mxu0 %v13625_v46 }
0x1122   :  { %3818 = vmatprep.subr.bf16.mxu0 %v13633_v5  ;;  %v13678_v5 = vld [vmem:[%s17605_s8 + $0x190] sm:$0xff]  }
0x1123   :  { %3860 = vmatpush1.bf16.msra.mxu1 %v13628_v59  ;;  %v13668_v59 = vld [vmem:[%s17605_s8 + $0x100] sm:$0xff]  }
0x1124   :  { %3861 = vmatprep.subr.bf16.mxu1 %v13636_v6  ;;  %v13679_v6 = vld [vmem:[%s17605_s8 + $0x158] sm:$0xff]  }
0x1125   :  { %3819 = vmatpush1.bf16.msra.mxu0 %v13631_v10  ;;  %v13681_v10 = vld [vmem:[%s17605_s8 + $0x1d8] sm:$0xff]  }
0x1126   :  { %3820 = vmatprep.subr.bf16.mxu0 %v13639_v58  ;;  %v13682_v58 = vld [vmem:[%s17605_s8 + $0x198] sm:$0xff]  }
0x1127   :  { %3862 = vmatpush1.bf16.msra.mxu1 %v13634_v12  ;;  %v13680_v12 = vld [vmem:[%s17605_s8 + $0x118] sm:$0xff]  }
0x1128   :  { %3863 = vmatprep.subr.bf16.mxu1 %v13642_v11  ;;  %v13683_v11 = vld [vmem:[%s17605_s8 + $0x160] sm:$0xff]  }
0x1129   :  { %3821 = vmatpush1.bf16.msra.mxu0 %v13637_v9  ;;  %v13685_v9 = vld [vmem:[%s17605_s8 + $0x1e0] sm:$0xff]  }
0x112a   :  { %3822 = vmatprep.subr.bf16.mxu0 %v13645_v40  ;;  %v13686_v40 = vld [vmem:[%s17605_s8 + $0x1a0] sm:$0xff]  }
0x112b   :  { %3864 = vmatpush1.bf16.msra.mxu1 %v13640_v13  ;;  %v13684_v13 = vld [vmem:[%s17605_s8 + $0x120] sm:$0xff]  }
0x112c   :  { %3865 = vmatprep.subr.bf16.mxu1 %v13648_v19  ;;  %v13688_v19 = vld [vmem:[%s17605_s8 + $0x128] sm:$0xff]  }
0x112d   :  { %3823 = vmatpush1.bf16.msra.mxu0 %v13643_v17  ;;  %v13687_v17 = vld [vmem:[%s17605_s8 + $0x168] sm:$0xff]  }
0x112e   :  { %3824 = vmatprep.subr.bf16.mxu0 %v13651_v21  ;;  %v13690_v21 = vld [vmem:[%s17605_s8 + $0x1a8] sm:$0xff]  }
0x112f   :  { %3866 = vmatpush1.bf16.msra.mxu1 %v13646_v18  ;;  %v13689_v18 = vld [vmem:[%s17605_s8 + $0x1e8] sm:$0xff]  }
0x1130   :  { %3867 = vmatprep.subr.bf16.mxu1 %v13654_v22  ;;  %v13691_v22 = vld [vmem:[%s17605_s8 + $0x170] sm:$0xff]  }
0x1131   :  { %3825 = vmatpush1.bf16.msra.mxu0 %v13649_v15  ;;  %v13692_v15 = vld [vmem:[%s17605_s8 + $0x130] sm:$0xff]  }
0x1132   :  { %3826 = vmatprep.subr.bf16.mxu0 %v13657_v25  ;;  %v13694_v25 = vld [vmem:[%s17605_s8 + $0x1b0] sm:$0xff]  }
0x1133   :  { %3868 = vmatpush1.bf16.msra.mxu1 %v13652_v23  ;;  %v13693_v23 = vld [vmem:[%s17605_s8 + $0x1f0] sm:$0xff]  }
0x1134   :  { %3869 = vmatprep.subr.bf16.mxu1 %v13660_v29  ;;  %v13695_v29 = vld [vmem:[%s17605_s8 + $0x178] sm:$0xff]  }
0x1135   :  { %3827 = vmatpush1.bf16.msra.mxu0 %v13655_v33  ;;  %v13696_v33 = vld [vmem:[%s17605_s8 + $0x138] sm:$0xff]  }
0x1136   :  { %3828 = vmatprep.subr.bf16.mxu0 %v13663_v45  ;;  %v13698_v45 = vld [vmem:[%s17605_s8 + $0x1b8] sm:$0xff]  }
0x1137   :  { %3870 = vmatpush1.bf16.msra.mxu1 %v13658_v60  ;;  %v13697_v60 = vld [vmem:[%s17605_s8 + $0x1f8] sm:$0xff]  }
0x1138   :  { %3871 = vmatprep.subr.bf16.mxu1 %v13666_v37  ;;  %v13699_v37 = vld [vmem:[%s17600_s3 + $0x40] sm:$0xff]  }
0x1139   :  { %3829 = vmatpush1.bf16.msra.mxu0 %v13661_v28  ;;  %v13701_v28 = vld [vmem:[%s17600_s3 + $0xc0] sm:$0xff]  }
0x113a   :  { %12358 = vmatprep.subr.bf16.mxu0 %v13667_v42  ;;  %v15790_v42 = vld [vmem:[#allocation4 + $0x20] sm:$0xff] }
0x113b   :  { %3872 = vmatpush1.bf16.msra.mxu1 %v13664_v36  ;;  %v2363_v36 = vld [vmem:[#allocation4 + $0x38] sm:$0xff] }
0x113c   :  { %12380 = vmatprep.subr.bf16.mxu1 %v13669_v44  ;;  %v3641_v44 = vrot.slane %v15790_v42, %v14773_v34 }
0x11ac   :  { %v3604_v38 = vpop.xlane.xlu0 %3603 }
0x11ad   :  { %v3607_v61 = vmul.f32 0.0078125, %v3604_v38  ;;  %v13670_v38 = vld [vmem:[%s17605_s8 + $0x180] sm:$0xff]  }
0x11ae   :  { %v3606_v49 = vpop.xlane.xlu1 %3605 }
0x11af   :  { %v3608_v62 = vmul.f32 0.0078125, %v3606_v49  ;;  %v15596_v63 = vsub.f32 %v3601_v54, %v3607_v61  ;;  %v13673_v49 = vld [vmem:[%s17605_s8 + $0x1c8] sm:$0xff]  }
0x11b1   :  { %v3611_v2 = vmul.f32 %v15596_v63, %v15596_v63  ;;  %v15600_v4 = vsub.f32 %v3602_v55, %v3608_v62  ;;  %v3628_v55 = vrot.slane %v15349_v31, %v15122_v1  ;;  %v13671_v31 = vld [vmem:[%s17605_s8 + $0x148] sm:$0xff]  }
0x11b2   :  { %v13672_v62 = vld [vmem:[%s17605_s8 + $0x108] sm:$0xff]  }
0x11b3   :  { %3613 = vadd.xlane.f32.xlu0 %v3611_v2  ;;  %v3612_v8 = vmul.f32 %v15600_v4, %v15600_v4  ;;  %v13675_v2 = vld [vmem:[%s17605_s8 + $0x150] sm:$0xff]  }
0x11b7   :  { %3615 = vadd.xlane.f32.xlu0 %v3612_v8  ;;  %v13676_v8 = vld [vmem:[%s17605_s8 + $0x110] sm:$0xff]  }
0x1240   :  { %v3614_v26 = vpop.xlane.xlu0 %3613 }
0x1241   :  { %v3617_v41 = vmul.f32 0.0078125, %v3614_v26  ;;  %v3649_v26 = vrot.slane %v15381_v16, %v14773_v34 }
0x1243   :  { %v3619_v50 = vadd.f32 1e-05, %v3617_v41  ;;  %v14325_v41 = vld [vmem:[#allocation4 + $0x28] sm:$0xff] }
0x1244   :  { %v3616_v24 = vpop.xlane.xlu0 %3615 }
0x1245   :  { %14224 = vrsqrt.f32 %v3619_v50  ;;  %v3618_v51 = vmul.f32 0.0078125, %v3616_v24  ;;  %v3645_v50 = vrot.slane %v14325_v41, %v14773_v34  ;;  %v3653_v24 = vrot.slane %v2363_v36, %v14773_v34  ;;  %v13712_v36 = vld [vmem:[%s17600_s3 + $0x18] sm:$0xff]   ;;  %v13717_v41 = vld [vmem:[%s17600_s3 + $0xe0] sm:$0xff]  }
0x1247   :  { %v3620_v53 = vadd.f32 1e-05, %v3618_v51 }
0x1249   :  { %14226 = vrsqrt.f32 %v3620_v53 }
0x124f   :  { %v14225_v52 = vpop.eup %14224 }
0x1250   :  { %v3623_v54 = vmul.f32 %v14225_v52, %v15596_v63  ;;  %v13674_v63 = vld [vmem:[%s17605_s8 + $0x188] sm:$0xff]  }
0x1252   :  { %v3629_v56 = vmul.f32 %v3628_v55, %v3623_v54 }
0x1253   :  { %v14227_v14 = vpop.eup %14226 }
0x1254   :  { %v3624_v39 = vmul.f32 %v14227_v14, %v15600_v4  ;;  %v15688_v57 = vadd.f32 %v3634_v47, %v3629_v56  ;;  %v13677_v4 = vld [vmem:[%s17605_s8 + $0x1d0] sm:$0xff]  }
0x1256   :  { %v3630_v48 = vmul.f32 %v3628_v55, %v3624_v39 }
0x1258   :  { %v15690_v46 = vadd.f32 %v3634_v47, %v3630_v48 }
0x125a   :  { %v3637_v61 = vpack.c.bf16 %v15690_v46, %v15688_v57 }
0x125c   :  { %3847 = vmatmul.mubr.bf16.vlgmr.msra.gmra.mrb[100].mxu0 %v3637_v61  ;;  %3890 = vmatmul.mubr.bf16.vlgmr.msra.gmra.mrb[72].mxu1 %v3637_v61 }
0x125d   :  { %12359 = vmatpush3.bf16.msra.mxu0 %v13668_v59  ;;  %12381 = vmatpush3.bf16.msra.mxu1 %v13670_v38 }
0x125e   :  { %12360 = vmatprep.subr.bf16.mxu0 %v13671_v31  ;;  %12382 = vmatprep.subr.bf16.mxu1 %v13673_v49 }
0x1261   :  { %12361 = vmatpush3.bf16.msra.mxu0 %v13672_v62  ;;  %12383 = vmatpush3.bf16.msra.mxu1 %v13674_v63 }
0x1262   :  { %12362 = vmatprep.subr.bf16.mxu0 %v13675_v2  ;;  %12384 = vmatprep.subr.bf16.mxu1 %v13677_v4 }
0x1265   :  { %12363 = vmatpush3.bf16.msra.mxu0 %v13676_v8  ;;  %12385 = vmatpush3.bf16.msra.mxu1 %v13678_v5  ;;  %v13732_v8 = vld [vmem:[%s17598_s1 + $0x4] ss:$24 sps:$4 sm:$0xff]  }
0x1266   :  { %12364 = vmatprep.subr.bf16.mxu0 %v13679_v6  ;;  %12386 = vmatprep.subr.bf16.mxu1 %v13681_v10 }
0x1269   :  { %12365 = vmatpush3.bf16.msra.mxu0 %v13680_v12  ;;  %12387 = vmatpush3.bf16.msra.mxu1 %v13682_v58  ;;  %v13736_v58 = vld [vmem:[%s17598_s1 + $0xc] ss:$24 sps:$4 sm:$0xff]  }
0x126a   :  { %12366 = vmatprep.subr.bf16.mxu0 %v13683_v11  ;;  %12388 = vmatprep.subr.bf16.mxu1 %v13685_v9 }
0x126d   :  { %12367 = vmatpush3.bf16.msra.mxu0 %v13684_v13  ;;  %12389 = vmatpush3.bf16.msra.mxu1 %v13686_v40 }
0x126e   :  { %12368 = vmatprep.subr.bf16.mxu0 %v13687_v17  ;;  %12390 = vmatprep.subr.bf16.mxu1 %v13689_v18  ;;  %v13700_v17 = vld [vmem:[%s17600_s3] sm:$0xff]  }
0x126f   :  { %v13702_v18 = vld [vmem:[%s17600_s3 + $0x80] sm:$0xff]  }
0x1271   :  { %12369 = vmatpush3.bf16.msra.mxu0 %v13688_v19  ;;  %12391 = vmatpush3.bf16.msra.mxu1 %v13690_v21  ;;  %v13703_v19 = vld [vmem:[%s17600_s3 + $0x48] sm:$0xff]  }
0x1272   :  { %12370 = vmatprep.subr.bf16.mxu0 %v13691_v22  ;;  %12392 = vmatprep.subr.bf16.mxu1 %v13693_v23  ;;  %v13705_v21 = vld [vmem:[%s17600_s3 + $0xc8] sm:$0xff]   ;;  %v4339_v22 = vpack.c.bf16 %v13732_v8, %v13732_v8  ;;  %v13739_v8 = vld [vmem:[%s17600_s3 + $0x110] sm:$0xff]  }
0x1273   :  { %v13704_v23 = vld [vmem:[%s17600_s3 + $0x8] sm:$0xff]  }
0x1275   :  { %12371 = vmatpush3.bf16.msra.mxu0 %v13692_v15  ;;  %12393 = vmatpush3.bf16.msra.mxu1 %v13694_v25  ;;  %v4341_v15 = vpack.c.bf16 %v13736_v58, %v13736_v58  ;;  %v13706_v25 = vld [vmem:[%s17600_s3 + $0x88] sm:$0xff]   ;;  %v13744_v58 = vld [vmem:[%s17600_s3 + $0x138] sm:$0xff]  }
0x1276   :  { %12372 = vmatprep.subr.bf16.mxu0 %v13695_v29  ;;  %12394 = vmatprep.subr.bf16.mxu1 %v13697_v60  ;;  %v13707_v29 = vld [vmem:[%s17600_s3 + $0x50] sm:$0xff]  }
0x1277   :  { %v13708_v60 = vld [vmem:[%s17600_s3 + $0x10] sm:$0xff]  }
0x1279   :  { %12373 = vmatpush3.bf16.msra.mxu0 %v13696_v33  ;;  %12395 = vmatpush3.bf16.msra.mxu1 %v13698_v45  ;;  %v13709_v33 = vld [vmem:[%s17600_s3 + $0xd0] sm:$0xff]  }
0x127a   :  { %12402 = vmatprep.subr.bf16.mxu0 %v13699_v37  ;;  %12424 = vmatprep.subr.bf16.mxu1 %v13701_v28  ;;  %v13710_v45 = vld [vmem:[%s17600_s3 + $0x90] sm:$0xff]   ;;  %v13711_v37 = vld [vmem:[%s17600_s3 + $0x58] sm:$0xff]  }
0x127b   :  { %v13713_v28 = vld [vmem:[%s17600_s3 + $0xd8] sm:$0xff]  }
0x132f   :  { %v3848_v51 = vpop.f32.mrb[100].mxu0  ;;  %v3891_v53 = vpop.f32.mrb[72].mxu1 }
0x1330   :  { %v3849_v52 = vadd.f32 %v3848_v51, %v3641_v44  ;;  %v3892_v54 = vadd.f32 %v3891_v53, %v3649_v26  ;;  %v3850_v55 = vpop.f32.mrb[101].mxu0  ;;  %v3893_v14 = vpop.f32.mrb[73].mxu1  ;;  %v13719_v51 = vld [vmem:[%s17600_s3 + $0x68] sm:$0xff]  }
0x1331   :  { %v3851_v39 = vadd.f32 %v3850_v55, %v3645_v50  ;;  %v3894_v56 = vadd.f32 %v3893_v14, %v3653_v24  ;;  %v3852_v47 = vpop.f32.mrb[102].mxu0  ;;  %v3895_v48 = vpop.f32.mrb[74].mxu1  ;;  %v13721_v53 = vld [vmem:[%s17600_s3 + $0xe8] sm:$0xff]   ;;  %v13723_v55 = vld [vmem:[%s17600_s3 + $0x70] sm:$0xff]  }
0x1332   :  { %v3853_v59 = vadd.f32 %v3852_v47, %v3641_v44  ;;  %v3896_v38 = vadd.f32 %v3895_v48, %v3649_v26  ;;  %v3854_v61 = vpop.f32.mrb[103].mxu0  ;;  %v3897_v31 = vpop.f32.mrb[75].mxu1  ;;  %v3900_v62 = vmax.f32 %v3849_v52, 0.0  ;;  %v3902_v63 = vmax.f32 %v3892_v54, 0.0  ;;  %v13714_v44 = vld [vmem:[%s17600_s3 + $0x98] sm:$0xff]   ;;  %v13715_v26 = vld [vmem:[%s17600_s3 + $0x60] sm:$0xff]  }
0x1333   :  { %v3855_v16 = vadd.f32 %v3854_v61, %v3645_v50  ;;  %v3898_v49 = vadd.f32 %v3897_v31, %v3653_v24  ;;  %v3901_v5 = vmax.f32 %v3851_v39, 0.0  ;;  %v3903_v6 = vmax.f32 %v3894_v56, 0.0  ;;  %v13716_v50 = vld [vmem:[%s17600_s3 + $0x20] sm:$0xff]   ;;  %v13720_v52 = vld [vmem:[%s17600_s3 + $0x28] sm:$0xff]   ;;  %v13725_v14 = vld [vmem:[%s17600_s3 + $0xf0] sm:$0xff]  }
0x1334   :  { %v3904_v2 = vmax.f32 %v3853_v59, 0.0  ;;  %v3906_v4 = vmax.f32 %v3896_v38, 0.0  ;;  %v13718_v24 = vld [vmem:[%s17600_s3 + $0xa0] sm:$0xff]   ;;  %v13722_v54 = vld [vmem:[%s17600_s3 + $0xa8] sm:$0xff]   ;;  %v13724_v39 = vld [vmem:[%s17600_s3 + $0x30] sm:$0xff]  }
0x1335   :  { %v3905_v10 = vmax.f32 %v3855_v16, 0.0  ;;  %v3907_v12 = vmax.f32 %v3898_v49, 0.0  ;;  %v13726_v56 = vld [vmem:[%s17600_s3 + $0xb0] sm:$0xff]   ;;  %v13727_v47 = vld [vmem:[%s17600_s3 + $0x78] sm:$0xff]   ;;  %v13734_v38 = vld [vmem:[%s17598_s1 + $0x8] ss:$24 sps:$4 sm:$0xff]  }
0x1336   :  { %v3908_v11 = vpack.c.bf16 %v3904_v2, %v3900_v62  ;;  %v3910_v9 = vpack.c.bf16 %v3906_v4, %v3902_v63  ;;  %v13729_v48 = vld [vmem:[%s17600_s3 + $0xf8] sm:$0xff]   ;;  %v13749_v16 = vld [vmem:[%s17598_s1 + $0x14] ss:$24 sps:$4 sm:$0xff]   ;;  %v4340_v62 = vpack.c.bf16 %v13734_v38, %v13734_v38  ;;  %v13737_v63 = vld [vmem:[%s17600_s3 + $0x100] sm:$0xff]  }
0x1337   :  { %v3909_v13 = vpack.c.bf16 %v3905_v10, %v3901_v5  ;;  %v3911_v40 = vpack.c.bf16 %v3907_v12, %v3903_v6  ;;  %v13730_v59 = vld [vmem:[%s17598_s1] ss:$24 sps:$4 sm:$0xff]   ;;  %v4343_v2 = vpack.c.bf16 %v13749_v16, %v13749_v16  ;;  %v13738_v4 = vld [vmem:[%s17600_s3 + $0x108] sm:$0xff]   ;;  %v13743_v12 = vld [vmem:[%s17600_s3 + $0x130] sm:$0xff]  }
0x1338   :  { %v13728_v61 = vld [vmem:[%s17600_s3 + $0x38] sm:$0xff]   ;;  %v4338_v49 = vpack.c.bf16 %v13730_v59, %v13730_v59  ;;  %v13741_v6 = vld [vmem:[%s17600_s3 + $0x120] sm:$0xff]   ;;  %v13742_v10 = vld [vmem:[%s17600_s3 + $0x128] sm:$0xff]  }
0x1339   :  { %4140 = vmatprep.mubr.bf16.mxu0 %v3909_v13  ;;  %4181 = vmatprep.mubr.bf16.mxu1 %v3911_v40  ;;  %v13733_v31 = vld [vmem:[%s17600_s3 + $0xb8] sm:$0xff]   ;;  %v13747_v13 = vld [vmem:[%s17600_s3 + $0x150] sm:$0xff]  }
0x133a   :  { %4141 = vmatmul.mubr.bf16.vlgmr.msra.gmra.mrb[104].mxu0 %v3908_v11  ;;  %4182 = vmatmul.mubr.bf16.vlgmr.msra.gmra.mrb[76].mxu1 %v3910_v9  ;;  %v13740_v5 = vld [vmem:[%s17600_s3 + $0x118] sm:$0xff]   ;;  %v13745_v11 = vld [vmem:[%s17600_s3 + $0x140] sm:$0xff]   ;;  %v13746_v9 = vld [vmem:[%s17600_s3 + $0x148] sm:$0xff]  }
0x133b   :  { %12403 = vmatpush3.bf16.msra.mxu0 %v13700_v17  ;;  %12425 = vmatpush3.bf16.msra.mxu1 %v13702_v18  ;;  %v13748_v40 = vld [vmem:[%s17600_s3 + $0x158] sm:$0x3f]   ;;  %v13751_v17 = vld [vmem:[%s17598_s1 + $0x10] ss:$24 sps:$4 sm:$0xff]  }
0x133c   :  { %12404 = vmatprep.subr.bf16.mxu0 %v13703_v19  ;;  %12426 = vmatprep.subr.bf16.mxu1 %v13705_v21  ;;  %v4617_v18 = vsel %vm4615_vm9, %v13748_v40, 0  ;;  %v4342_v19 = vpack.c.bf16 %v13751_v17, %v13751_v17  ;;  %v13752_v21 = vld [vmem:[%s17602_s5 + $0x180] ss:$12 sps:$4 sm:$0xff]   ;;  %vm9834_vm9 = vcmask 56320  }
0x133d   :  { %4651 = vmatprep.mubr.bf16.mxu0 %v4339_v22  ;;  %4691 = vmatprep.mubr.bf16.mxu1 %v4341_v15  ;;  %v13754_v22 = vld [vmem:[%s17602_s5 + $0x184] ss:$12 sps:$4 sm:$0xff]   ;;  %v13755_v15 = vld [vmem:[%s17602_s5 + $0x188] ss:$12 sps:$4 sm:$0xff]  }
0x133f   :  { %12405 = vmatpush3.bf16.msra.mxu0 %v13704_v23  ;;  %12427 = vmatpush3.bf16.msra.mxu1 %v13706_v25  ;;  %v13758_v23 = vld [vmem:[%s17602_s5 + $0x19c] ss:$12 sps:$4 sm:$0xff]   ;;  %v13759_v25 = vld [vmem:[%s17602_s5 + $0x1a0] ss:$12 sps:$4 sm:$0xff]  }
0x1340   :  { %12406 = vmatprep.subr.bf16.mxu0 %v13707_v29  ;;  %12428 = vmatprep.subr.bf16.mxu1 %v13709_v33  ;;  %v13756_v29 = vld [vmem:[%s17602_s5 + $0x198] ss:$12 sps:$4 sm:$0xff]   ;;  %v13762_v33 = vld [vmem:[%s17602_s5 + $0x1b4] ss:$12 sps:$4 sm:$0xff]  }
0x1343   :  { %12407 = vmatpush3.bf16.msra.mxu0 %v13708_v60  ;;  %12429 = vmatpush3.bf16.msra.mxu1 %v13710_v45  ;;  %v13763_v60 = vld [vmem:[%s17602_s5 + $0x1b8] ss:$12 sps:$4 sm:$0xff]   ;;  %v13760_v45 = vld [vmem:[%s17602_s5 + $0x1b0] ss:$12 sps:$4 sm:$0xff]  }
0x1344   :  { %12408 = vmatprep.subr.bf16.mxu0 %v13711_v37  ;;  %12430 = vmatprep.subr.bf16.mxu1 %v13713_v28  ;;  %v13766_v37 = vld [vmem:[%s17602_s5 + $0x1cc] ss:$12 sps:$4 sm:$0xff]   ;;  %v13767_v28 = vld [vmem:[%s17602_s5 + $0x1d0] ss:$12 sps:$4 sm:$0xff]  }
0x1347   :  { %12409 = vmatpush3.bf16.msra.mxu0 %v13712_v36  ;;  %12431 = vmatpush3.bf16.msra.mxu1 %v13714_v44  ;;  %v13764_v36 = vld [vmem:[%s17602_s5 + $0x1c8] ss:$12 sps:$4 sm:$0xff]   ;;  %v13770_v44 = vld [vmem:[%s17602_s5 + $0x1e4] ss:$12 sps:$4 sm:$0xff]  }
0x1348   :  { %12410 = vmatprep.subr.bf16.mxu0 %v13715_v26  ;;  %12432 = vmatprep.subr.bf16.mxu1 %v13717_v41  ;;  %v13771_v26 = vld [vmem:[%s17602_s5 + $0x1e8] ss:$12 sps:$4 sm:$0xff]   ;;  %v13768_v41 = vld [vmem:[%s17602_s5 + $0x1e0] ss:$12 sps:$4 sm:$0xff]  }
0x134b   :  { %12411 = vmatpush3.bf16.msra.mxu0 %v13716_v50  ;;  %12433 = vmatpush3.bf16.msra.mxu1 %v13718_v24  ;;  %v13774_v50 = vld [vmem:[%s17602_s5 + $0x1fc] ss:$12 sps:$4 sm:$0xff]   ;;  %v13772_v24 = vld [vmem:[%s17602_s5 + $0x1f8] ss:$12 sps:$4 sm:$0xff]  }
0x134c   :  { %12412 = vmatprep.subr.bf16.mxu0 %v13719_v51  ;;  %12434 = vmatprep.subr.bf16.mxu1 %v13721_v53  ;;  %v13775_v51 = vld [vmem:[%s17602_s5 + $0x200] ss:$12 sps:$4 sm:$0xff]  }
0x134d   :  { %v13778_v53 = vld [vmem:[%s17602_s5 + $0x214] ss:$12 sps:$4 sm:$0xff]  }
0x134f   :  { %12413 = vmatpush3.bf16.msra.mxu0 %v13720_v52  ;;  %12435 = vmatpush3.bf16.msra.mxu1 %v13722_v54  ;;  %v13776_v52 = vld [vmem:[%s17602_s5 + $0x210] ss:$12 sps:$4 sm:$0xff]   ;;  %v13779_v54 = vld [vmem:[%s17602_s5 + $0x218] ss:$12 sps:$4 sm:$0xff]  }
0x1350   :  { %12414 = vmatprep.subr.bf16.mxu0 %v13723_v55  ;;  %12436 = vmatprep.subr.bf16.mxu1 %v13725_v14  ;;  %v13782_v55 = vld [vmem:[%s17602_s5 + $0x22c] ss:$12 sps:$4 sm:$0xff]   ;;  %v13780_v14 = vld [vmem:[%s17602_s5 + $0x228] ss:$12 sps:$4 sm:$0xff]  }
0x1353   :  { %12415 = vmatpush3.bf16.msra.mxu0 %v13724_v39  ;;  %12437 = vmatpush3.bf16.msra.mxu1 %v13726_v56  ;;  %v13783_v39 = vld [vmem:[%s17602_s5 + $0x230] ss:$12 sps:$4 sm:$0xff]  }
0x1354   :  { %12416 = vmatprep.subr.bf16.mxu0 %v13727_v47  ;;  %12438 = vmatprep.subr.bf16.mxu1 %v13729_v48  ;;  %v3915_v48 = vrot.slane %v15790_v42, %v15242_v27 }
0x1357   :  { %12417 = vmatpush3.bf16.msra.mxu0 %v13728_v61  ;;  %12439 = vmatpush3.bf16.msra.mxu1 %v13733_v31 }
0x1358   :  { %4699 = vmatprep.subr.bf16.mxu0 %v14491_v30  ;;  %5042 = vmatprep.subr.bf16.mxu1 %v13754_v22 }
0x135a   :  { %4652 = vmatmul.mubr.bf16.vlgmr.msra.gmra.mrb[108].mxu0 %v4338_v49  ;;  %4692 = vmatmul.mubr.bf16.vlgmr.msra.gmra.mrb[80].mxu1 %v4340_v62 }
0x135b   :  { %4700 = vmatpush1.bf16.msra.mxu0 %v13737_v63  ;;  %11570 = vmatprep.mubr.msk.bf16.mxu0 %vm4611_vm8, %v4343_v2  ;;  %vm9825_vm8 = vcmask 39936  }
0x135c   :  { %4701 = vmatprep.subr.bf16.mxu0 %v14491_v30  ;;  %5074 = vmatprep.mubr.bf16.mxu1 %v14491_v30 }
0x135d   :  { %5043 = vmatpush1.bf16.msra.mxu1 %v13752_v21 }
0x135e   :  { %5044 = vmatprep.subr.bf16.mxu1 %v13758_v23 }
0x135f   :  { %4702 = vmatpush1.bf16.msra.mxu0 %v13738_v4 }
0x1360   :  { %4703 = vmatprep.subr.bf16.mxu0 %v14491_v30 }
0x1361   :  { %5045 = vmatpush1.bf16.msra.mxu1 %v13756_v29 }
0x1362   :  { %5046 = vmatprep.subr.bf16.mxu1 %v13762_v33 }
0x1363   :  { %4704 = vmatpush1.bf16.msra.mxu0 %v13739_v8 }
0x1364   :  { %4705 = vmatprep.subr.bf16.mxu0 %v14491_v30 }
0x1365   :  { %5047 = vmatpush1.bf16.msra.mxu1 %v13760_v45 }
0x1366   :  { %5048 = vmatprep.subr.bf16.mxu1 %v13766_v37 }
0x1367   :  { %4706 = vmatpush1.bf16.msra.mxu0 %v13740_v5 }
0x1368   :  { %4707 = vmatprep.subr.bf16.mxu0 %v14491_v30 }
0x1369   :  { %5049 = vmatpush1.bf16.msra.mxu1 %v13764_v36 }
0x136a   :  { %5050 = vmatprep.subr.bf16.mxu1 %v13770_v44 }
0x136b   :  { %4708 = vmatpush1.bf16.msra.mxu0 %v13741_v6 }
0x136c   :  { %4709 = vmatprep.subr.bf16.mxu0 %v14491_v30 }
0x136d   :  { %5051 = vmatpush1.bf16.msra.mxu1 %v13768_v41  ;;  %v16056_v41 = vld [vmem:[#allocation4 + $0x40] sm:$0xff] }
0x136e   :  { %5052 = vmatprep.subr.bf16.mxu1 %v13774_v50  ;;  %v4894_v50 = vld [vmem:[#allocation4 + $0x48] sm:$0xff] }
0x136f   :  { %4710 = vmatpush1.bf16.msra.mxu0 %v13742_v10 }
0x1370   :  { %4711 = vmatprep.subr.bf16.mxu0 %v14491_v30 }
0x1371   :  { %5053 = vmatpush1.bf16.msra.mxu1 %v13772_v24  ;;  %v4905_v24 = vrot.slane %v16056_v41, %v14787_v43 }
0x1372   :  { %5054 = vmatprep.subr.bf16.mxu1 %v13778_v53 }
0x1373   :  { %4712 = vmatpush1.bf16.msra.mxu0 %v13743_v12 }
0x1374   :  { %4713 = vmatprep.subr.bf16.mxu0 %v14491_v30 }
0x1375   :  { %5055 = vmatpush1.bf16.msra.mxu1 %v13776_v52 }
0x1376   :  { %5056 = vmatprep.subr.bf16.mxu1 %v13782_v55 }
0x1377   :  { %4714 = vmatpush1.bf16.msra.mxu0 %v13744_v58  ;;  %v14326_v58 = vld [vmem:[#allocation2] sm:$0xff] }
0x1378   :  { %4715 = vmatprep.subr.bf16.mxu0 %v14491_v30  ;;  %v4347_v42 = vrot.slane %v14326_v58, %v15242_v27 }
0x1379   :  { %5057 = vmatpush1.bf16.msra.mxu1 %v13780_v14 }
0x137a   :  { %13021 = vmatprep.subr.bf16.mxu1 %v14489_v0 }
0x137b   :  { %4716 = vmatpush1.bf16.msra.mxu0 %v13745_v11 }
0x137c   :  { %4717 = vmatprep.subr.bf16.mxu0 %v14491_v30 }
0x137f   :  { %4718 = vmatpush1.bf16.msra.mxu0 %v13746_v9 }
0x1380   :  { %4719 = vmatprep.subr.bf16.mxu0 %v14491_v30 }
0x1383   :  { %4720 = vmatpush1.bf16.msra.mxu0 %v13747_v13 }
0x1384   :  { %4721 = vmatprep.subr.bf16.mxu0 %v14491_v30 }
0x1387   :  { %4722 = vmatpush1.bf16.msra.mxu0 %v4617_v18 }
0x1388   :  { %13001 = vmatprep.subr.bf16.mxu0 %v14489_v0 }
0x138a   :  { %4732 = vmatmul.mubr.bf16.vlgmr.msra.gmra.mrb[112].mxu0 %v4342_v19 }
0x138b   :  { %13017 = vmatprep.mubr.msk.bf16.mxu0 %vm14490_vm0, %v14489_v0  ;;  %13002 = vmatpush3.bf16.msra.mxu0 %v13755_v15 }
0x138c   :  { %13003 = vmatprep.subr.bf16.mxu0 %v14489_v0 }
0x138f   :  { %13004 = vmatpush3.bf16.msra.mxu0 %v13759_v25 }
0x1390   :  { %13005 = vmatprep.subr.bf16.mxu0 %v14489_v0 }
0x1393   :  { %13006 = vmatpush3.bf16.msra.mxu0 %v13763_v60 }
0x1394   :  { %13007 = vmatprep.subr.bf16.mxu0 %v14489_v0 }
0x1397   :  { %13008 = vmatpush3.bf16.msra.mxu0 %v13767_v28 }
0x1398   :  { %13009 = vmatprep.subr.bf16.mxu0 %v14489_v0 }
0x139b   :  { %13010 = vmatpush3.bf16.msra.mxu0 %v13771_v26 }
0x139c   :  { %13011 = vmatprep.subr.bf16.mxu0 %v14489_v0 }
0x139f   :  { %13012 = vmatpush3.bf16.msra.mxu0 %v13775_v51  ;;  %v4909_v51 = vrot.slane %v4894_v50, %v14787_v43 }
0x13a0   :  { %13013 = vmatprep.subr.bf16.mxu0 %v14489_v0 }
0x13a3   :  { %13014 = vmatpush3.bf16.msra.mxu0 %v13779_v54 }
0x13a4   :  { %13015 = vmatprep.subr.bf16.mxu0 %v14489_v0 }
0x13a7   :  { %13016 = vmatpush3.bf16.msra.mxu0 %v13783_v39 }
0x13a8   :  { %13039 = vmatprep.subr.bf16.mxu0 %v14489_v0 }
0x140d   :  { %v12374_v56 = vpop.f32.mrb[104].mxu0  ;;  %v12396_v47 = vpop.f32.mrb[76].mxu1 }
0x140e   :  { %v12375_v59 = vpop.f32.mrb[105].mxu0  ;;  %v12397_v38 = vpop.f32.mrb[77].mxu1 }
0x140f   :  { %v12376_v61 = vadd.f32 %v12375_v59, %v12374_v56  ;;  %v12398_v31 = vadd.f32 %v12397_v38, %v12396_v47  ;;  %v12377_v16 = vpop.f32.mrb[106].mxu0  ;;  %v12399_v49 = vpop.f32.mrb[78].mxu1 }
0x1410   :  { %v12378_v62 = vpop.f32.mrb[107].mxu0  ;;  %v12400_v63 = vpop.f32.mrb[79].mxu1 }
0x1411   :  { %v4143_v2 = vadd.f32 %v12376_v61, %v3915_v48  ;;  %v12379_v4 = vadd.f32 %v12378_v62, %v12377_v16  ;;  %v12401_v8 = vadd.f32 %v12400_v63, %v12399_v49 }
0x1413   :  { %v16041_v5 = vadd.f32 %v12398_v31, %v4143_v2  ;;  %v4146_v6 = vadd.f32 %v12379_v4, %v3915_v48 }
0x1415   :  { %v16043_v10 = vadd.f32 %v12401_v8, %v4146_v6 }
0x142d   :  { %v12418_v12 = vpop.f32.mrb[108].mxu0  ;;  %v12440_v11 = vpop.f32.mrb[80].mxu1 }
0x142e   :  { %v12419_v9 = vpop.f32.mrb[109].mxu0  ;;  %v12441_v13 = vpop.f32.mrb[81].mxu1 }
0x142f   :  { %v12420_v40 = vadd.f32 %v12419_v9, %v12418_v12  ;;  %v12421_v17 = vpop.f32.mrb[110].mxu0  ;;  %v12442_v18 = vadd.f32 %v12441_v13, %v12440_v11  ;;  %v12443_v19 = vpop.f32.mrb[82].mxu1 }
0x1430   :  { %v12422_v21 = vpop.f32.mrb[111].mxu0  ;;  %v12444_v22 = vpop.f32.mrb[83].mxu1 }
0x1431   :  { %v4654_v15 = vadd.f32 %v12420_v40, %v4347_v42 }
0x1433   :  { %v4694_v23 = vadd.f32 %v12442_v18, %v4654_v15  ;;  %v16092_v18 = vld [vmem:[#allocation4 + $0x50] sm:$0xff] }
0x1434   :  { %v4913_v21 = vrot.slane %v16092_v18, %v14787_v43 }
0x145d   :  { %v4733_v25 = vpop.f32.mrb[112].mxu0 }
0x145e   :  { %v4734_v29 = vadd.f32 %v4733_v25, %v4694_v23  ;;  %v4735_v33 = vpop.f32.mrb[113].mxu0 }
0x145f   :  { %v4736_v60 = vpop.f32.mrb[114].mxu0 }
0x1460   :  { %v4740_v45 = vcombine.high %v4734_v29, %v4734_v29  ;;  %v4737_v37 = vpop.f32.mrb[115].mxu0  ;;  %v16046_v28 = vadd.f32 %v14326_v58, %v4734_v29 }
0x1462   :  { %v16048_v36 = vadd.f32 %v14326_v58, %v4740_v45 }
0x1464   :  { %v4899_v44 = vcombine.low %v16046_v28, %v16048_v36 }
0x1466   :  { %v4901_v26 = vpack.c.bf16 %v4899_v44, %v4899_v44 }
0x1468   :  { %5075 = vmatmul.mubr.bf16.vlgmr.msra.gmra.mrb[84].mxu1 %v4901_v26  ;;  %13018 = vmatmul.mubr.bf16.vlgmr.msra.gmra.mrb[116].mxu0 %v4901_v26 }
0x1469   :  { %13023 = vmatprep.mubr.msk.bf16.mxu1 %vm14490_vm0, %v14489_v0  ;;  %13041 = vmatprep.mubr.msk.bf16.mxu0 %vm14490_vm0, %v14489_v0 }
0x153b   :  { %v5076_v53 = vpop.f32.mrb[84].mxu1  ;;  %v16061_v52 = vpop.f32.mrb[116].mxu0 }
0x153c   :  { %v5077_v54 = vadd.f32 %v5076_v53, %v4905_v24  ;;  %v5078_v55 = vpop.f32.mrb[85].mxu1  ;;  %v13019_v14 = vpop.f32.mrb[117].mxu0  ;;  %v5118_v25 = vadd.f32 %v16061_v52, %v4913_v21 }
0x153d   :  { %v5079_v39 = vadd.f32 %v5078_v55, %v4909_v51  ;;  %v5080_v56 = vpop.f32.mrb[86].mxu1  ;;  %v5120_v47 = vpop.f32.mrb[118].mxu0 }
0x153e   :  { %v5081_v48 = vpop.f32.mrb[87].mxu1  ;;  %v13020_v59 = vpop.f32.mrb[119].mxu0  ;;  %v5128_v60 = vcombine.high %v5118_v25, %v5118_v25  ;;  %v16109_v45 = vpack.c.bf16 %v5118_v25, %v5118_v25 }
0x153f   :  { %v11740_v38 = vcombine.high %v5079_v39, %v5079_v39  ;;  %v11739_v61 = vcombine.low %v5079_v39, %v5079_v39  ;;  %v5126_v31 = vcombine.low %v5077_v54, %v5079_v39  ;;  %v5127_v16 = vcombine.high %v5077_v54, %v5079_v39 }
0x1540   :  { %v16116_v26 = vpack.c.bf16 %v5128_v60, %v5128_v60  ;;  %v5663_v50 = vsel %vm5661_vm10, %v16109_v45, 0 }
0x1541   :  { %v5140_v49 = vpack.c.bf16 %v11740_v38, %v11740_v38  ;;  %v5137_v62 = vpack.c.bf16 %v11739_v61, %v11739_v61  ;;  %v5136_v2 = vpack.c.bf16 %v5126_v31, %v5126_v31  ;;  %v5139_v4 = vpack.c.bf16 %v5127_v16, %v5127_v16 }
0x1542   :  { %v5709_v51 = vsel %vm5661_vm10, %v16116_v26, 0 }
0x1543   :  { %5160 = vrot.lane.b32.xlu0 %v5140_v49, %s14492_s24  ;;  %5158 = vrot.lane.b32.xlu1 %v5137_v62, %s14492_s24  ;;  %v5188_v63 = vsel %vm616_vm3, %v5137_v62, 0  ;;  %v5234_v8 = vsel %vm616_vm3, %v5140_v49, 0 }
0x1544   :  { %13022 = vmatpush3.bf16.xpose.msra.mxu1 %v5188_v63 }
0x1545   :  { %13027 = vmatprep.subr.bf16.mxu1 %v14489_v0 }
0x1547   :  { %5162 = vrot.lane.b32.xlu0 %v5137_v62, %s14487_s12  ;;  %5144 = vrot.lane.b32.xlu1 %v5136_v2, %s14492_s24 }
0x154b   :  { %5148 = vrot.lane.b32.xlu0 %v5136_v2, %s14487_s12  ;;  %5146 = vrot.lane.b32.xlu1 %v5139_v4, %s14492_s24 }
0x154c   :  { %13024 = vmatmul.mubr.msk.bf16.vlgmr.msra.gmra.mrb[88].mxu1 %vm616_vm3, %v5136_v2 }
0x154d   :  { %13028 = vmatpush3.bf16.xpose.msra.mxu1 %v5234_v8  ;;  %13029 = vmatprep.mubr.msk.bf16.mxu1 %vm14490_vm0, %v14489_v0 }
0x154e   :  { %13033 = vmatprep.subr.bf16.mxu1 %v14489_v0 }
0x154f   :  { %5166 = vrot.lane.b32.xlu0 %v5137_v62, %s17621_s17  ;;  %5164 = vrot.lane.b32.xlu1 %v5140_v49, %s14487_s12 }
0x1553   :  { %5152 = vrot.lane.b32.xlu0 %v5136_v2, %s17621_s17  ;;  %5150 = vrot.lane.b32.xlu1 %v5139_v4, %s14487_s12 }
0x1554   :  { %13030 = vmatmul.mubr.msk.bf16.vlgmr.msra.gmra.mrb[92].mxu1 %vm616_vm3, %v5139_v4 }
0x1555   :  { %13035 = vmatprep.mubr.msk.bf16.mxu1 %vm14490_vm0, %v14489_v0 }
0x1557   :  { %5168 = vrot.lane.b32.xlu1 %v5140_v49, %s17621_s17 }
0x155b   :  { %5154 = vrot.lane.b32.xlu1 %v5139_v4, %s17621_s17 }
0x15b5   :  { %v5161_v6 = vpop.permute.xlu0 %5160  ;;  %v5159_v12 = vpop.permute.xlu1 %5158 }
0x15b6   :  { %v5326_v58 = vsel %vm616_vm3, %v5161_v6, 0  ;;  %v5280_v42 = vsel %vm616_vm3, %v5159_v12, 0 }
0x15b7   :  { %13034 = vmatpush3.bf16.xpose.msra.mxu1 %v5280_v42  ;;  %13040 = vmatpush3.bf16.xpose.msra.mxu0 %v5326_v58 }
0x15b8   :  { %13045 = vmatprep.subr.bf16.mxu1 %v14489_v0  ;;  %13051 = vmatprep.subr.bf16.mxu0 %v14489_v0 }
0x15b9   :  { %v5163_v11 = vpop.permute.xlu0 %5162  ;;  %v5145_v9 = vpop.permute.xlu1 %5144 }
0x15ba   :  { %v5372_v17 = vsel %vm616_vm3, %v5163_v11, 0 }
0x15bd   :  { %v5149_v13 = vpop.permute.xlu0 %5148  ;;  %v5147_v40 = vpop.permute.xlu1 %5146 }
0x15be   :  { %13036 = vmatmul.mubr.msk.bf16.vlgmr.msra.gmra.mrb[96].mxu1 %vm616_vm3, %v5145_v9  ;;  %13042 = vmatmul.mubr.msk.bf16.vlgmr.msra.gmra.mrb[120].mxu0 %vm616_vm3, %v5147_v40 }
0x15bf   :  { %13046 = vmatpush3.bf16.xpose.msra.mxu1 %v5372_v17  ;;  %13047 = vmatprep.mubr.msk.bf16.mxu1 %vm14490_vm0, %v14489_v0 }
0x15c0   :  { %13057 = vmatprep.subr.bf16.mxu1 %v14489_v0  ;;  %13053 = vmatprep.mubr.msk.bf16.mxu0 %vm14490_vm0, %v14489_v0 }
0x15c1   :  { %v5165_v19 = vpop.permute.xlu1 %5164  ;;  %v5167_v15 = vpop.permute.xlu0 %5166 }
0x15c2   :  { %v5418_v22 = vsel %vm616_vm3, %v5165_v19, 0  ;;  %v5464_v29 = vsel %vm616_vm3, %v5167_v15, 0 }
0x15c3   :  { %13052 = vmatpush3.bf16.xpose.msra.mxu0 %v5418_v22 }
0x15c4   :  { %13063 = vmatprep.subr.bf16.mxu0 %v14489_v0 }
0x15c5   :  { %v5151_v23 = vpop.permute.xlu1 %5150  ;;  %v5153_v44 = vpop.permute.xlu0 %5152 }
0x15c6   :  { %13048 = vmatmul.mubr.msk.bf16.vlgmr.msra.gmra.mrb[100].mxu1 %vm616_vm3, %v5149_v13 }
0x15c7   :  { %13058 = vmatpush3.bf16.xpose.msra.mxu1 %v5464_v29  ;;  %13059 = vmatprep.mubr.msk.bf16.mxu1 %vm14490_vm0, %v14489_v0 }
0x15c8   :  { %13069 = vmatprep.subr.bf16.mxu1 %v14489_v0 }
0x15c9   :  { %v5169_v33 = vpop.permute.xlu1 %5168 }
0x15ca   :  { %v5510_v37 = vsel %vm616_vm3, %v5169_v33, 0  ;;  %13054 = vmatmul.mubr.msk.bf16.vlgmr.msra.gmra.mrb[124].mxu0 %vm616_vm3, %v5151_v23 }
0x15cb   :  { %13064 = vmatpush3.bf16.xpose.msra.mxu0 %v5510_v37  ;;  %13065 = vmatprep.mubr.msk.bf16.mxu0 %vm14490_vm0, %v14489_v0 }
0x15cc   :  { %13075 = vmatprep.subr.bf16.mxu0 %v14489_v0 }
0x15cd   :  { %v5155_v24 = vpop.permute.xlu1 %5154 }
0x15ce   :  { %13060 = vmatmul.mubr.msk.bf16.vlgmr.msra.gmra.mrb[104].mxu1 %vm616_vm3, %v5153_v44 }
0x15cf   :  { %13070 = vmatpush3.bf16.msra.mxu1 %v5663_v50  ;;  %13071 = vmatprep.mubr.msk.bf16.mxu1 %vm14490_vm0, %v14489_v0 }
0x15d0   :  { %13081 = vmatprep.subr.bf16.mxu1 %v14489_v0 }
0x15d2   :  { %13066 = vmatmul.mubr.msk.bf16.vlgmr.msra.gmra.mrb[128].mxu0 %vm616_vm3, %v5155_v24 }
0x15d3   :  { %13076 = vmatpush3.bf16.msra.mxu0 %v5709_v51  ;;  %13077 = vmatprep.mubr.msk.bf16.mxu0 %vm14490_vm0, %v14489_v0 }
0x15d4   :  { %13087 = vmatprep.subr.bf16.mxu0 %v14489_v0 }
0x161f   :  { %v5224_v53 = vpop.f32.mrb[88].mxu1 }
0x1620   :  { %v16130_v52 = vmul.f32 0.17677669, %v5224_v53  ;;  %v13025_v54 = vpop.f32.mrb[89].mxu1 }
0x1621   :  { %v5227_v55 = vpop.f32.mrb[90].mxu1 }
0x1622   :  { %v13026_v14 = vpop.f32.mrb[91].mxu1  ;;  %v5561_v39 = vsel %vm5560_vm11, %v16130_v52, -inf }
0x1623   :  { %5562 = vmax.xlane.f32.xlu0 %v5561_v39 }
0x1627   :  { %v5270_v56 = vpop.f32.mrb[92].mxu1 }
0x1628   :  { %v5553_v47 = vmul.f32 0.17677669, %v5270_v56  ;;  %v13031_v48 = vpop.f32.mrb[93].mxu1 }
0x1629   :  { %v5273_v59 = vpop.f32.mrb[94].mxu1 }
0x162a   :  { %v13032_v38 = vpop.f32.mrb[95].mxu1  ;;  %v5564_v61 = vsel %vm5560_vm11, %v5553_v47, -inf }
0x162b   :  { %5565 = vmax.xlane.f32.xlu1 %v5564_v61 }
0x1691   :  { %v5316_v31 = vpop.f32.mrb[96].mxu1  ;;  %v5362_v16 = vpop.f32.mrb[120].mxu0 }
0x1692   :  { %v5554_v49 = vmul.f32 0.17677669, %v5316_v31  ;;  %v13037_v62 = vpop.f32.mrb[97].mxu1  ;;  %v13043_v63 = vpop.f32.mrb[121].mxu0  ;;  %v5555_v8 = vmul.f32 0.17677669, %v5362_v16 }
0x1693   :  { %v5319_v2 = vpop.f32.mrb[98].mxu1  ;;  %v5365_v4 = vpop.f32.mrb[122].mxu0 }
0x1694   :  { %v13038_v6 = vpop.f32.mrb[99].mxu1  ;;  %v13044_v12 = vpop.f32.mrb[123].mxu0  ;;  %v5567_v58 = vsel %vm5560_vm11, %v5554_v49, -inf  ;;  %v5570_v42 = vsel %vm5560_vm11, %v5555_v8, -inf }
0x1695   :  { %5568 = vmax.xlane.f32.xlu0 %v5567_v58 }
0x1699   :  { %5571 = vmax.xlane.f32.xlu0 %v5570_v42  ;;  %v5408_v11 = vpop.f32.mrb[100].mxu1 }
0x169a   :  { %v16137_v9 = vmul.f32 0.17677669, %v5408_v11  ;;  %v13049_v13 = vpop.f32.mrb[101].mxu1 }
0x169b   :  { %v5411_v40 = vpop.f32.mrb[102].mxu1 }
0x169c   :  { %v13050_v17 = vpop.f32.mrb[103].mxu1  ;;  %v5573_v19 = vsel %vm5560_vm11, %v16137_v9, -inf }
0x169d   :  { %v5454_v21 = vpop.f32.mrb[124].mxu0  ;;  %5574 = vmax.xlane.f32.xlu1 %v5573_v19 }
0x169e   :  { %v5557_v22 = vmul.f32 0.17677669, %v5454_v21  ;;  %v13055_v15 = vpop.f32.mrb[125].mxu0 }
0x169f   :  { %v5457_v23 = vpop.f32.mrb[126].mxu0 }
0x16a0   :  { %v13056_v25 = vpop.f32.mrb[127].mxu0  ;;  %v5576_v29 = vsel %vm5560_vm11, %v5557_v22, -inf }
0x16a1   :  { %5577 = vmax.xlane.f32.xlu0 %v5576_v29  ;;  %v5500_v33 = vpop.f32.mrb[104].mxu1 }
0x16a2   :  { %v5558_v60 = vmul.f32 0.17677669, %v5500_v33  ;;  %v13061_v37 = vpop.f32.mrb[105].mxu1 }
0x16a3   :  { %v5503_v44 = vpop.f32.mrb[106].mxu1 }
0x16a4   :  { %v13062_v50 = vpop.f32.mrb[107].mxu1  ;;  %v5579_v24 = vsel %vm5560_vm11, %v5558_v60, -inf }
0x16a5   :  { %v5546_v51 = vpop.f32.mrb[128].mxu0  ;;  %5580 = vmax.xlane.f32.xlu1 %v5579_v24 }
0x16a6   :  { %v5559_v53 = vmul.f32 0.17677669, %v5546_v51  ;;  %v13067_v54 = vpop.f32.mrb[129].mxu0 }
0x16a7   :  { %v5549_v55 = vpop.f32.mrb[130].mxu0 }
0x16a8   :  { %v13068_v14 = vpop.f32.mrb[131].mxu0  ;;  %v5582_v39 = vsel %vm5560_vm11, %v5559_v53, -inf }
0x16a9   :  { %5583 = vmax.xlane.f32.xlu0 %v5582_v39 }
0x16b0   :  { %v5563_v38 = vpop.xlane.xlu0 %5562 }
0x16b1   :  { %v5585_v61 = vsub.f32 %v16130_v52, %v5563_v38 }
0x16b3   :  { %v5593_v16 = vmul.f32 1.442695, %v5585_v61 }
0x16b6   :  { %5172 = vrot.lane.b32.xlu1 %v16109_v45, %s14492_s24 }
0x16b8   :  { %v5566_v56 = vpop.xlane.xlu1 %5565 }
0x16b9   :  { %v5586_v48 = vsub.f32 %v5553_v47, %v5566_v56 }
0x16bb   :  { %v5595_v59 = vmul.f32 1.442695, %v5586_v48 }
0x16bd   :  { %14228 = vpow2.f32 %v5595_v59 }
0x16be   :  { %14230 = vpow2.f32 %v5593_v16 }
0x16c7   :  { %v14229_v31 = vpop.eup %14228 }
0x16c8   :  { %v5612_v62 = vsel %vm5560_vm11, %v14229_v31, 0.0  ;;  %v14231_v63 = vpop.eup %14230 }
0x16c9   :  { %5613 = vadd.xlane.f32.xlu0 %v5612_v62  ;;  %v5609_v2 = vsel %vm5560_vm11, %v14231_v63, 0.0 }
0x16da   :  { %5610 = vadd.xlane.f32.xlu1 %v5609_v2 }
0x1722   :  { %v5569_v4 = vpop.xlane.xlu0 %5568 }
0x1723   :  { %v5587_v6 = vsub.f32 %v5554_v49, %v5569_v4 }
0x1725   :  { %v5597_v12 = vmul.f32 1.442695, %v5587_v6 }
0x1726   :  { %v5572_v58 = vpop.xlane.xlu0 %5571 }
0x1727   :  { %14232 = vpow2.f32 %v5597_v12  ;;  %v5588_v47 = vsub.f32 %v5555_v8, %v5572_v58 }
0x1729   :  { %v5599_v42 = vmul.f32 1.442695, %v5588_v47 }
0x172a   :  { %v5575_v8 = vpop.xlane.xlu1 %5574 }
0x172b   :  { %14234 = vpow2.f32 %v5599_v42  ;;  %v5589_v19 = vsub.f32 %v16137_v9, %v5575_v8 }
0x172d   :  { %v5601_v25 = vmul.f32 1.442695, %v5589_v19 }
0x172e   :  { %v5578_v49 = vpop.xlane.xlu0 %5577 }
0x172f   :  { %v5590_v21 = vsub.f32 %v5557_v22, %v5578_v49 }
0x1731   :  { %v16149_v11 = vpop.eup %14232  ;;  %v5603_v33 = vmul.f32 1.442695, %v5590_v21 }
0x1732   :  { %v5615_v52 = vsel %vm5560_vm11, %v16149_v11, 0.0  ;;  %v5581_v15 = vpop.xlane.xlu1 %5580 }
0x1733   :  { %5616 = vadd.xlane.f32.xlu1 %v5615_v52  ;;  %v5591_v29 = vsub.f32 %v5558_v60, %v5581_v15 }
0x1735   :  { %v16153_v13 = vpop.eup %14234  ;;  %v5605_v44 = vmul.f32 1.442695, %v5591_v29 }
0x1736   :  { %v5618_v40 = vsel %vm5560_vm11, %v16153_v13, 0.0  ;;  %v5584_v17 = vpop.xlane.xlu0 %5583  ;;  %v5173_v54 = vpop.permute.xlu1 %5172 }
0x1737   :  { %5619 = vadd.xlane.f32.xlu0 %v5618_v40  ;;  %v5592_v37 = vsub.f32 %v5559_v53, %v5584_v17  ;;  %v5755_v16 = vsel %vm5661_vm10, %v5173_v54, 0 }
0x1739   :  { %v5607_v50 = vmul.f32 1.442695, %v5592_v37 }
0x1744   :  { %5176 = vrot.lane.b32.xlu1 %v16109_v45, %s14487_s12 }
0x1748   :  { %5178 = vrot.lane.b32.xlu1 %v16116_v26, %s14487_s12 }
0x174d   :  { %5174 = vrot.lane.b32.xlu0 %v16116_v26, %s14492_s24 }
0x1756   :  { %v5614_v23 = vpop.xlane.xlu0 %5613 }
0x1757   :  { %14236 = vrcp.f32 %v5614_v23 }
0x1758   :  { %14238 = vpow2.f32 %v5601_v25 }
0x1759   :  { %14240 = vpow2.f32 %v5603_v33 }
0x175a   :  { %14242 = vpow2.f32 %v5605_v44 }
0x175b   :  { %14244 = vpow2.f32 %v5607_v50 }
0x1761   :  { %v14237_v24 = vpop.eup %14236 }
0x1762   :  { %v5642_v51 = vmul.f32 %v14237_v24, %v14229_v31  ;;  %v16165_v9 = vpop.eup %14238 }
0x1763   :  { %v14241_v60 = vpop.eup %14240  ;;  %v5621_v39 = vsel %vm5560_vm11, %v16165_v9, 0.0 }
0x1764   :  { %v5650_v55 = vpack.c.bf16 %v5642_v51, %v5642_v51  ;;  %v16169_v53 = vpop.eup %14242  ;;  %v5624_v14 = vsel %vm5560_vm11, %v14241_v60, 0.0 }
0x1765   :  { %v16174_v56 = vpop.eup %14244  ;;  %v5627_v59 = vsel %vm5560_vm11, %v16169_v53, 0.0 }
0x1766   :  { %13078 = vmatmul.mubr.msk.bf16.vlgmr.msra.gmra.mrb[132].mxu0 %vm5657_vm12, %v5650_v55  ;;  %v5630_v48 = vsel %vm5560_vm11, %v16174_v56, 0.0 }
0x1767   :  { %v5611_v22 = vpop.xlane.xlu1 %5610  ;;  %13089 = vmatprep.mubr.msk.bf16.mxu0 %vm14490_vm0, %v14489_v0 }
0x1768   :  { %14246 = vrcp.f32 %v5611_v22 }
0x176c   :  { %5625 = vadd.xlane.f32.xlu0 %v5624_v14  ;;  %5622 = vadd.xlane.f32.xlu1 %v5621_v39 }
0x1770   :  { %5631 = vadd.xlane.f32.xlu0 %v5630_v48  ;;  %5628 = vadd.xlane.f32.xlu1 %v5627_v59 }
0x1772   :  { %v14247_v38 = vpop.eup %14246 }
0x1773   :  { %v5641_v61 = vmul.f32 %v14247_v38, %v14231_v63 }
0x1775   :  { %v5649_v31 = vpack.c.bf16 %v5641_v61, %v5641_v61  ;;  %v13784_v61 = vld [vmem:[%s17603_s6 + $0x80] sm:$0xff]  }
0x1777   :  { %13072 = vmatmul.mubr.msk.bf16.vlgmr.msra.gmra.mrb[108].mxu1 %vm5657_vm12, %v5649_v31  ;;  %v13785_v31 = vld [vmem:[%s17603_s6 + $0x88] sm:$0xff]  }
0x1778   :  { %13082 = vmatpush3.bf16.msra.mxu1 %v5755_v16  ;;  %13083 = vmatprep.mubr.msk.bf16.mxu1 %vm14490_vm0, %v14489_v0  ;;  %v13786_v16 = vld [vmem:[%s17603_s6 + $0x90] sm:$0xff]  }
0x1779   :  { %13093 = vmatprep.subr.bf16.mxu1 %v14489_v0 }
0x1781   :  { %5182 = vrot.lane.b32.xlu1 %v16116_v26, %s17621_s17 }
0x1786   :  { %5180 = vrot.lane.b32.xlu0 %v16109_v45, %s17621_s17 }
0x17c0   :  { %v5617_v62 = vpop.xlane.xlu1 %5616 }
0x17c1   :  { %14248 = vrcp.f32 %v5617_v62 }
0x17c4   :  { %v5620_v63 = vpop.xlane.xlu0 %5619  ;;  %v5177_v12 = vpop.permute.xlu1 %5176 }
0x17c5   :  { %14250 = vrcp.f32 %v5620_v63  ;;  %v5847_v26 = vsel %vm5661_vm10, %v5177_v12, 0 }
0x17c8   :  { %v5175_v2 = vpop.permute.xlu0 %5174  ;;  %v5179_v52 = vpop.permute.xlu1 %5178 }
0x17c9   :  { %v5801_v4 = vsel %vm5661_vm10, %v5175_v2, 0  ;;  %v5893_v49 = vsel %vm5661_vm10, %v5179_v52, 0  ;;  %v13790_v52 = vld [vmem:[%s17603_s6 + $0xb0] sm:$0xff]  }
0x17ca   :  { %13088 = vmatpush3.bf16.msra.mxu0 %v5801_v4  ;;  %v13787_v4 = vld [vmem:[%s17603_s6 + $0x98] sm:$0xff]  }
0x17cb   :  { %v14249_v6 = vpop.eup %14248  ;;  %13099 = vmatprep.subr.bf16.mxu0 %v14489_v0 }
0x17cc   :  { %v5643_v58 = vmul.f32 %v14249_v6, %v16149_v11 }
0x17ce   :  { %v5651_v47 = vpack.c.bf16 %v5643_v58, %v5643_v58 }
0x17cf   :  { %v14251_v42 = vpop.eup %14250 }
0x17d0   :  { %13084 = vmatmul.mubr.msk.bf16.vlgmr.msra.gmra.mrb[112].mxu1 %vm5657_vm12, %v5651_v47  ;;  %v5644_v45 = vmul.f32 %v14251_v42, %v16153_v13  ;;  %v13788_v42 = vld [vmem:[%s17603_s6 + $0xa0] sm:$0xff]  }
0x17d1   :  { %13094 = vmatpush3.bf16.msra.mxu1 %v5847_v26  ;;  %13095 = vmatprep.mubr.msk.bf16.mxu1 %vm14490_vm0, %v14489_v0 }
0x17d2   :  { %v5652_v40 = vpack.c.bf16 %v5644_v45, %v5644_v45  ;;  %13105 = vmatprep.subr.bf16.mxu1 %v14489_v0  ;;  %v13789_v45 = vld [vmem:[%s17603_s6 + $0xa8] sm:$0xff]  }
0x17d4   :  { %13090 = vmatmul.mubr.msk.bf16.vlgmr.msra.gmra.mrb[136].mxu0 %vm5657_vm12, %v5652_v40  ;;  %v13791_v40 = vld [vmem:[%s17603_s6 + $0xb8] sm:$0xff]  }
0x17d5   :  { %13100 = vmatpush3.bf16.msra.mxu0 %v5893_v49  ;;  %13101 = vmatprep.mubr.msk.bf16.mxu0 %vm14490_vm0, %v14489_v0 }
0x17d6   :  { %13111 = vmatprep.subr.bf16.mxu0 %v14489_v0 }
0x17f9   :  { %v5626_v11 = vpop.xlane.xlu0 %5625  ;;  %v5623_v13 = vpop.xlane.xlu1 %5622 }
0x17fa   :  { %14252 = vrcp.f32 %v5626_v11 }
0x17fb   :  { %14254 = vrcp.f32 %v5623_v13 }
0x17fd   :  { %v5632_v8 = vpop.xlane.xlu0 %5631  ;;  %v5629_v17 = vpop.xlane.xlu1 %5628 }
0x17fe   :  { %14256 = vrcp.f32 %v5632_v8 }
0x17ff   :  { %14258 = vrcp.f32 %v5629_v17 }
0x1801   :  { %v5183_v23 = vpop.permute.xlu1 %5182  ;;  %v5181_v29 = vpop.permute.xlu0 %5180 }
0x1802   :  { %v5985_v24 = vsel %vm5661_vm10, %v5183_v23, 0  ;;  %v5939_v51 = vsel %vm5661_vm10, %v5181_v29, 0 }
0x1804   :  { %v14253_v19 = vpop.eup %14252 }
0x1805   :  { %v14255_v21 = vpop.eup %14254  ;;  %v5646_v15 = vmul.f32 %v14253_v19, %v14241_v60 }
0x1806   :  { %v5645_v25 = vmul.f32 %v14255_v21, %v16165_v9 }
0x1807   :  { %v5654_v33 = vpack.c.bf16 %v5646_v15, %v5646_v15 }
0x1808   :  { %v14257_v37 = vpop.eup %14256  ;;  %v5653_v44 = vpack.c.bf16 %v5645_v25, %v5645_v25 }
0x1809   :  { %v14259_v50 = vpop.eup %14258  ;;  %13102 = vmatmul.mubr.msk.bf16.vlgmr.msra.gmra.mrb[140].mxu0 %vm5657_vm12, %v5654_v33  ;;  %v5648_v54 = vmul.f32 %v14257_v37, %v16174_v56 }
0x180a   :  { %13096 = vmatmul.mubr.msk.bf16.vlgmr.msra.gmra.mrb[116].mxu1 %vm5657_vm12, %v5653_v44  ;;  %13112 = vmatpush3.bf16.msra.mxu0 %v5985_v24  ;;  %v5647_v55 = vmul.f32 %v14259_v50, %v16169_v53 }
0x180b   :  { %13106 = vmatpush3.bf16.msra.mxu1 %v5939_v51  ;;  %13107 = vmatprep.mubr.msk.bf16.mxu1 %vm14490_vm0, %v14489_v0  ;;  %v5656_v9 = vpack.c.bf16 %v5648_v54, %v5648_v54 }
0x180c   :  { %13113 = vmatprep.mubr.msk.bf16.mxu0 %vm14490_vm0, %v14489_v0  ;;  %13117 = vmatprep.subr.bf16.mxu1 %v14489_v0  ;;  %v5655_v22 = vpack.c.bf16 %v5647_v55, %v5647_v55 }
0x1811   :  { %13114 = vmatmul.mubr.msk.bf16.vlgmr.msra.gmra.mrb[144].mxu0 %vm5657_vm12, %v5656_v9 }
0x1812   :  { %13108 = vmatmul.mubr.msk.bf16.vlgmr.msra.gmra.mrb[120].mxu1 %vm5657_vm12, %v5655_v22  ;;  %6446 = vmatprep.mubr.bf16.mxu0 %v14491_v30 }
0x1813   :  { %13133 = vmatprep.mubr.msk.bf16.mxu1 %vm14490_vm0, %v14489_v0  ;;  %13118 = vmatpush3.bf16.msra.mxu1 %v13784_v61 }
0x1814   :  { %13119 = vmatprep.subr.bf16.mxu1 %v14489_v0 }
0x1817   :  { %13120 = vmatpush3.bf16.msra.mxu1 %v13785_v31 }
0x1818   :  { %13121 = vmatprep.subr.bf16.mxu1 %v14489_v0 }
0x181b   :  { %13122 = vmatpush3.bf16.msra.mxu1 %v13786_v16 }
0x181c   :  { %13123 = vmatprep.subr.bf16.mxu1 %v14489_v0 }
0x181f   :  { %13124 = vmatpush3.bf16.msra.mxu1 %v13787_v4 }
0x1820   :  { %13125 = vmatprep.subr.bf16.mxu1 %v14489_v0 }
0x1823   :  { %13126 = vmatpush3.bf16.msra.mxu1 %v13788_v42  ;;  %v13792_v42 = vld [vmem:[%s17604_s7 + $0x200] ss:$16 sps:$4 sm:$0xff]  }
0x1824   :  { %13127 = vmatprep.subr.bf16.mxu1 %v14489_v0 }
0x1827   :  { %13128 = vmatpush3.bf16.msra.mxu1 %v13789_v45  ;;  %v13795_v45 = vld [vmem:[%s17604_s7 + $0x208] ss:$16 sps:$4 sm:$0xff]  }
0x1828   :  { %13129 = vmatprep.subr.bf16.mxu1 %v14489_v0 }
0x182b   :  { %13130 = vmatpush3.bf16.msra.mxu1 %v13790_v52  ;;  %v13803_v52 = vld [vmem:[%s17604_s7 + $0x22c] ss:$16 sps:$4 sm:$0xff]  }
0x182c   :  { %13131 = vmatprep.subr.bf16.mxu1 %v14489_v0 }
0x182f   :  { %13132 = vmatpush3.bf16.msra.mxu1 %v13791_v40  ;;  %v13798_v40 = vld [vmem:[%s17604_s7 + $0x220] ss:$16 sps:$4 sm:$0xff]  }
0x1839   :  { %v16220_v60 = vpop.f32.mrb[132].mxu0 }
0x183a   :  { %v13079_v14 = vpop.f32.mrb[133].mxu0 }
0x183b   :  { %v5748_v39 = vpop.f32.mrb[134].mxu0 }
0x183c   :  { %v13080_v56 = vpop.f32.mrb[135].mxu0 }
0x184a   :  { %v16222_v48 = vpop.f32.mrb[108].mxu1 }
0x184b   :  { %v13073_v53 = vpop.f32.mrb[109].mxu1 }
0x184c   :  { %v5702_v59 = vpop.f32.mrb[110].mxu1 }
0x184d   :  { %v13074_v38 = vpop.f32.mrb[111].mxu1 }
0x18a3   :  { %v5791_v62 = vpop.f32.mrb[112].mxu1 }
0x18a4   :  { %6029 = vrot.lane.b32.xlu0 %v5791_v62, %s17621_s17  ;;  %v13085_v63 = vpop.f32.mrb[113].mxu1 }
0x18a5   :  { %v5794_v2 = vpop.f32.mrb[114].mxu1 }
0x18a6   :  { %v13086_v6 = vpop.f32.mrb[115].mxu1 }
0x18a7   :  { %v5837_v12 = vpop.f32.mrb[136].mxu0 }
0x18a8   :  { %v13091_v58 = vpop.f32.mrb[137].mxu0  ;;  %6031 = vrot.lane.b32.xlu1 %v5837_v12, %s17621_s17 }
0x18a9   :  { %v5840_v47 = vpop.f32.mrb[138].mxu0 }
0x18aa   :  { %v13092_v26 = vpop.f32.mrb[139].mxu0 }
0x18ab   :  { %v13794_v26 = vld [vmem:[%s17604_s7 + $0x204] ss:$16 sps:$4 sm:$0xff]  }
0x18ac   :  { %6414 = vmatprep.subr.bf16.mxu0 %v13794_v26  ;;  %v13837_v26 = vld [vmem:[%s17604_s7 + $0x2e8] ss:$16 sps:$4 sm:$0xff]  }
0x18ad   :  { %6415 = vmatpush1.bf16.msra.mxu0 %v13792_v42  ;;  %v13834_v42 = vld [vmem:[%s17604_s7 + $0x2e0] ss:$16 sps:$4 sm:$0xff]  }
0x18dc   :  { %v5929_v49 = vpop.f32.mrb[140].mxu0 }
0x18dd   :  { %v5883_v11 = vpop.f32.mrb[116].mxu1  ;;  %6039 = vrot.lane.b32.xlu1 %v5929_v49, %s14487_s12  ;;  %v13103_v13 = vpop.f32.mrb[141].mxu0  ;;  %v13801_v49 = vld [vmem:[%s17604_s7 + $0x228] ss:$16 sps:$4 sm:$0xff]  }
0x18de   :  { %6037 = vrot.lane.b32.xlu0 %v5883_v11, %s14487_s12  ;;  %v13097_v8 = vpop.f32.mrb[117].mxu1  ;;  %v5932_v17 = vpop.f32.mrb[142].mxu0  ;;  %v14493_v11 = vmov 839922192  }
0x18df   :  { %v5886_v19 = vpop.f32.mrb[118].mxu1  ;;  %v13104_v21 = vpop.f32.mrb[143].mxu0  ;;  %v6168_v13 = vunpack.c.l.s4 %v14493_v11  ;;  %v14494_v8 = vmov 1985246804   ;;  %v6227_v11 = vrot.slane %v16056_v41, %v15127_v7 }
0x18e0   :  { %v13098_v15 = vpop.f32.mrb[119].mxu1  ;;  %v6175_v17 = vunpack.c.l.s4 %v14494_v8 }
0x18e1   :  { %v6169_v19 = vunpack.c.0.s8 %v6168_v13 }
0x18e2   :  { %v6176_v21 = vunpack.c.0.s8 %v6175_v17 }
0x18e3   :  { %v16299_v15 = vsub.s32 %v6169_v19, %v14770_v32 }
0x18e4   :  { %v6021_v23 = vpop.f32.mrb[144].mxu0 }
0x18e5   :  { %v5975_v25 = vpop.f32.mrb[120].mxu1  ;;  %6047 = vrot.lane.b32.xlu1 %v6021_v23, %s14492_s24  ;;  %v13115_v29 = vpop.f32.mrb[145].mxu0  ;;  %v16302_v23 = vsub.s32 %v6176_v21, %v14770_v32 }
0x18e6   :  { %6045 = vrot.lane.b32.xlu0 %v5975_v25, %s14492_s24  ;;  %v13109_v33 = vpop.f32.mrb[121].mxu1  ;;  %v6024_v37 = vpop.f32.mrb[146].mxu0 }
0x18e7   :  { %v5978_v44 = vpop.f32.mrb[122].mxu1  ;;  %v13116_v50 = vpop.f32.mrb[147].mxu0 }
0x18e8   :  { %v13110_v24 = vpop.f32.mrb[123].mxu1 }
0x1916   :  { %v6030_v54 = vpop.permute.xlu0 %6029 }
0x1917   :  { %v6051_v14 = vsel %vm616_vm3, %v16222_v48, %v6030_v54 }
0x191a   :  { %v6032_v51 = vpop.permute.xlu1 %6031 }
0x191b   :  { %v6052_v22 = vsel %vm616_vm3, %v16220_v60, %v6032_v51  ;;  %v6065_v60 = vrot.slane %v16056_v41, %v15005_v3 }
0x194f   :  { %v6040_v55 = vpop.permute.xlu1 %6039 }
0x1950   :  { %v6038_v9 = vpop.permute.xlu0 %6037  ;;  %v6054_v39 = vsel %vm1485_vm6, %v6052_v22, %v6040_v55  ;;  %v13806_v55 = vld [vmem:[%s17604_s7 + $0x244] ss:$16 sps:$4 sm:$0xff]   ;;  %v13804_v22 = vld [vmem:[%s17604_s7 + $0x240] ss:$16 sps:$4 sm:$0xff]  }
0x1951   :  { %v6053_v53 = vsel %vm1485_vm6, %v6051_v14, %v6038_v9  ;;  %v13809_v9 = vld [vmem:[%s17604_s7 + $0x24c] ss:$16 sps:$4 sm:$0xff]   ;;  %v13807_v14 = vld [vmem:[%s17604_s7 + $0x248] ss:$16 sps:$4 sm:$0xff]  }
0x1957   :  { %v6048_v56 = vpop.permute.xlu1 %6047 }
0x1958   :  { %v6056_v59 = vsel %vm1488_vm7, %v6054_v39, %v6048_v56  ;;  %v6046_v38 = vpop.permute.xlu0 %6045  ;;  %v13812_v39 = vld [vmem:[%s17604_s7 + $0x264] ss:$16 sps:$4 sm:$0xff]   ;;  %v13815_v56 = vld [vmem:[%s17604_s7 + $0x26c] ss:$16 sps:$4 sm:$0xff]  }
0x1959   :  { %v6055_v61 = vsel %vm1488_vm7, %v6053_v53, %v6046_v38  ;;  %v13810_v53 = vld [vmem:[%s17604_s7 + $0x260] ss:$16 sps:$4 sm:$0xff]   ;;  %v13818_v38 = vld [vmem:[%s17604_s7 + $0x284] ss:$16 sps:$4 sm:$0xff]  }
0x195a   :  { %v6059_v31 = vcombine.low %v6055_v61, %v6056_v59  ;;  %v13813_v59 = vld [vmem:[%s17604_s7 + $0x268] ss:$16 sps:$4 sm:$0xff]   ;;  %v13821_v61 = vld [vmem:[%s17604_s7 + $0x28c] ss:$16 sps:$4 sm:$0xff]  }
0x195c   :  { %v6061_v16 = vpack.c.bf16 %v6059_v31, %v6059_v31  ;;  %v13816_v31 = vld [vmem:[%s17604_s7 + $0x280] ss:$16 sps:$4 sm:$0xff]  }
0x195e   :  { %13134 = vmatmul.mubr.bf16.vlgmr.msra.gmra.mrb[124].mxu1 %v6061_v16  ;;  %v13819_v16 = vld [vmem:[%s17604_s7 + $0x288] ss:$16 sps:$4 sm:$0xff]  }
0x195f   :  { %6487 = vmatprep.mubr.bf16.mxu1 %v14491_v30 }
0x1a31   :  { %v6148_v62 = vpop.f32.mrb[124].mxu1 }
0x1a32   :  { %v6149_v48 = vadd.f32 %v6148_v62, %v6065_v60  ;;  %v13135_v63 = vpop.f32.mrb[125].mxu1  ;;  %v13824_v60 = vld [vmem:[%s17604_s7 + $0x2a4] ss:$16 sps:$4 sm:$0xff]   ;;  %v13827_v62 = vld [vmem:[%s17604_s7 + $0x2ac] ss:$16 sps:$4 sm:$0xff]  }
0x1a33   :  { %v6151_v2 = vpop.f32.mrb[126].mxu1  ;;  %v13825_v63 = vld [vmem:[%s17604_s7 + $0x2a8] ss:$16 sps:$4 sm:$0xff]  }
0x1a34   :  { %v6155_v4 = vcombine.high %v6149_v48, %v6149_v48  ;;  %v13136_v6 = vpop.f32.mrb[127].mxu1  ;;  %v6157_v12 = vadd.f32 %v6149_v48, %v16046_v28  ;;  %v13797_v28 = vld [vmem:[%s17604_s7 + $0x20c] ss:$16 sps:$4 sm:$0xff]   ;;  %v13822_v48 = vld [vmem:[%s17604_s7 + $0x2a0] ss:$16 sps:$4 sm:$0xff]  }
0x1a35   :  { %6455 = vmatprep.subr.bf16.mxu1 %v13797_v28  ;;  %v13830_v2 = vld [vmem:[%s17604_s7 + $0x2c4] ss:$16 sps:$4 sm:$0xff]   ;;  %v13828_v6 = vld [vmem:[%s17604_s7 + $0x2c0] ss:$16 sps:$4 sm:$0xff]  }
0x1a36   :  { %v6158_v58 = vadd.f32 %v6155_v4, %v16048_v36  ;;  %v13800_v36 = vld [vmem:[%s17604_s7 + $0x224] ss:$16 sps:$4 sm:$0xff]   ;;  %6456 = vmatpush1.bf16.msra.mxu1 %v13795_v45  ;;  %v13833_v4 = vld [vmem:[%s17604_s7 + $0x2cc] ss:$16 sps:$4 sm:$0xff]  }
0x1a37   :  { %6416 = vmatprep.subr.bf16.mxu0 %v13800_v36  ;;  %6457 = vmatprep.subr.bf16.mxu1 %v13803_v52  ;;  %v13840_v45 = vld [vmem:[%s17605_s8 + $0x240] sm:$0xff]  }
0x1a38   :  { %v6161_v47 = vcombine.low %v6157_v12, %v6158_v58  ;;  %6417 = vmatpush1.bf16.msra.mxu0 %v13798_v40  ;;  %v13841_v28 = vld [vmem:[%s17605_s8 + $0x2c0] sm:$0xff]  }
0x1a39   :  { %6418 = vmatprep.subr.bf16.mxu0 %v13806_v55 }
0x1a3a   :  { %6163 = vadd.xlane.f32.xlu0 %v6161_v47  ;;  %6458 = vmatpush1.bf16.msra.mxu1 %v13801_v49  ;;  %v13839_v47 = vld [vmem:[%s17604_s7 + $0x2ec] ss:$16 sps:$4 sm:$0xff]   ;;  %v6218_v49 = vrot.slane %v16056_v41, %v15122_v1 }
0x1a3b   :  { %6459 = vmatprep.subr.bf16.mxu1 %v13809_v9  ;;  %v13845_v9 = vld [vmem:[%s17605_s8 + $0x2c8] sm:$0xff]  }
0x1a3c   :  { %6419 = vmatpush1.bf16.msra.mxu0 %v13804_v22  ;;  %v6220_v19 = vcombine.high %v6218_v49, %v6218_v49  ;;  %v13846_v22 = vld [vmem:[%s17605_s8 + $0x208] sm:$0xff]  }
0x1a3d   :  { %6420 = vmatprep.subr.bf16.mxu0 %v13812_v39  ;;  %v13848_v39 = vld [vmem:[%s17605_s8 + $0x250] sm:$0xff]  }
0x1a3e   :  { %6460 = vmatpush1.bf16.msra.mxu1 %v13807_v14  ;;  %v13847_v14 = vld [vmem:[%s17605_s8 + $0x288] sm:$0xff]  }
0x1a3f   :  { %6461 = vmatprep.subr.bf16.mxu1 %v13815_v56  ;;  %v13849_v56 = vld [vmem:[%s17605_s8 + $0x2d0] sm:$0xff]  }
0x1a40   :  { %6421 = vmatpush1.bf16.msra.mxu0 %v13810_v53  ;;  %v13850_v53 = vld [vmem:[%s17605_s8 + $0x210] sm:$0xff]  }
0x1a41   :  { %6422 = vmatprep.subr.bf16.mxu0 %v13818_v38  ;;  %v13852_v38 = vld [vmem:[%s17605_s8 + $0x258] sm:$0xff]  }
0x1a42   :  { %6462 = vmatpush1.bf16.msra.mxu1 %v13813_v59  ;;  %v13851_v59 = vld [vmem:[%s17605_s8 + $0x290] sm:$0xff]  }
0x1a43   :  { %6463 = vmatprep.subr.bf16.mxu1 %v13821_v61  ;;  %v13853_v61 = vld [vmem:[%s17605_s8 + $0x2d8] sm:$0xff]  }
0x1a44   :  { %6423 = vmatpush1.bf16.msra.mxu0 %v13816_v31  ;;  %v13854_v31 = vld [vmem:[%s17605_s8 + $0x218] sm:$0xff]  }
0x1a45   :  { %6424 = vmatprep.subr.bf16.mxu0 %v13824_v60  ;;  %v13856_v60 = vld [vmem:[%s17605_s8 + $0x260] sm:$0xff]  }
0x1a46   :  { %6464 = vmatpush1.bf16.msra.mxu1 %v13819_v16  ;;  %v13855_v16 = vld [vmem:[%s17605_s8 + $0x298] sm:$0xff]  }
0x1a47   :  { %6465 = vmatprep.subr.bf16.mxu1 %v13827_v62  ;;  %v13857_v62 = vld [vmem:[%s17605_s8 + $0x2e0] sm:$0xff]  }
0x1a48   :  { %6425 = vmatpush1.bf16.msra.mxu0 %v13822_v48  ;;  %v13858_v48 = vld [vmem:[%s17605_s8 + $0x220] sm:$0xff]  }
0x1a49   :  { %6426 = vmatprep.subr.bf16.mxu0 %v13830_v2  ;;  %v13860_v2 = vld [vmem:[%s17605_s8 + $0x268] sm:$0xff]  }
0x1a4a   :  { %6466 = vmatpush1.bf16.msra.mxu1 %v13825_v63  ;;  %v13859_v63 = vld [vmem:[%s17605_s8 + $0x2a0] sm:$0xff]  }
0x1a4b   :  { %6467 = vmatprep.subr.bf16.mxu1 %v13833_v4  ;;  %v13861_v4 = vld [vmem:[%s17605_s8 + $0x2e8] sm:$0xff]  }
0x1a4c   :  { %6427 = vmatpush1.bf16.msra.mxu0 %v13828_v6  ;;  %v13862_v6 = vld [vmem:[%s17605_s8 + $0x228] sm:$0xff]  }
0x1ac7   :  { %v6164_v25 = vpop.xlane.xlu0 %6163 }
0x1ac8   :  { %v6165_v29 = vmul.f32 0.0078125, %v6164_v25 }
0x1aca   :  { %v6173_v33 = vrot.slane %v6165_v29, %v16299_v15  ;;  %v6180_v37 = vrot.slane %v6165_v29, %v16302_v23  ;;  %v6229_v29 = vcombine.high %v6227_v11, %v6227_v11 }
0x1acc   :  { %v16306_v44 = vsub.f32 %v6157_v12, %v6173_v33  ;;  %v16308_v50 = vsub.f32 %v6158_v58, %v6180_v37  ;;  %v13831_v12 = vld [vmem:[%s17604_s7 + $0x2c8] ss:$16 sps:$4 sm:$0xff]   ;;  %v13836_v58 = vld [vmem:[%s17604_s7 + $0x2e4] ss:$16 sps:$4 sm:$0xff]  }
0x1acd   :  { %6468 = vmatpush1.bf16.msra.mxu1 %v13831_v12  ;;  %6428 = vmatprep.subr.bf16.mxu0 %v13836_v58  ;;  %v13863_v12 = vld [vmem:[%s17605_s8 + $0x2a8] sm:$0xff]   ;;  %v13864_v58 = vld [vmem:[%s17605_s8 + $0x270] sm:$0xff]  }
0x1ace   :  { %v6185_v24 = vmul.f32 %v16306_v44, %v16306_v44  ;;  %v6186_v51 = vmul.f32 %v16308_v50, %v16308_v50  ;;  %6469 = vmatprep.subr.bf16.mxu1 %v13839_v47  ;;  %6429 = vmatpush1.bf16.msra.mxu0 %v13834_v42  ;;  %v13865_v47 = vld [vmem:[%s17605_s8 + $0x2f0] sm:$0xff]  }
0x1acf   :  { %12496 = vmatprep.subr.bf16.mxu0 %v13840_v45  ;;  %v13866_v42 = vld [vmem:[%s17605_s8 + $0x230] sm:$0xff]   ;;  %v13868_v45 = vld [vmem:[%s17605_s8 + $0x278] sm:$0xff]  }
0x1ad0   :  { %v6189_v54 = vcombine.low %v6185_v24, %v6186_v51 }
0x1ad1   :  { %6470 = vmatpush1.bf16.msra.mxu1 %v13837_v26  ;;  %v13867_v26 = vld [vmem:[%s17605_s8 + $0x2b0] sm:$0xff]  }
0x1ad2   :  { %6191 = vadd.xlane.f32.xlu1 %v6189_v54  ;;  %12518 = vmatprep.subr.bf16.mxu1 %v13841_v28  ;;  %v13842_v54 = vld [vmem:[%s17605_s8 + $0x200] sm:$0xff]   ;;  %v13869_v28 = vld [vmem:[%s17605_s8 + $0x2f8] sm:$0xff]  }
0x1b5f   :  { %v6192_v36 = vpop.xlane.xlu1 %6191 }
0x1b60   :  { %v6193_v52 = vmul.f32 0.0078125, %v6192_v36  ;;  %v13870_v36 = vld [vmem:[%s17605_s8 + $0x238] sm:$0xff]  }
0x1b62   :  { %v6194_v40 = vadd.f32 1e-05, %v6193_v52  ;;  %v13871_v52 = vld [vmem:[%s17605_s8 + $0x2b8] sm:$0xff]  }
0x1b64   :  { %14260 = vrsqrt.f32 %v6194_v40  ;;  %v4896_v40 = vld [vmem:[#allocation4 + $0x58] sm:$0xff] }
0x1b6e   :  { %v14261_v13 = vpop.eup %14260 }
0x1b6f   :  { %v6203_v8 = vrot.slane %v14261_v13, %v16299_v15  ;;  %v6210_v17 = vrot.slane %v14261_v13, %v16302_v23  ;;  %v6249_v13 = vrot.slane %v16092_v18, %v14773_v34 }
0x1b71   :  { %v6213_v21 = vmul.f32 %v6203_v8, %v16306_v44  ;;  %v6214_v25 = vmul.f32 %v6210_v17, %v16308_v50  ;;  %v13843_v44 = vld [vmem:[%s17605_s8 + $0x280] sm:$0xff]   ;;  %v13844_v50 = vld [vmem:[%s17605_s8 + $0x248] sm:$0xff]   ;;  %v14328_v8 = vld [vmem:[#allocation4 + $0x48] sm:$0xff] }
0x1b72   :  { %v6245_v17 = vrot.slane %v14328_v8, %v14773_v34 }
0x1b73   :  { %v6222_v33 = vmul.f32 %v6218_v49, %v6213_v21  ;;  %v6223_v37 = vmul.f32 %v6220_v19, %v6214_v25  ;;  %v16497_v49 = vld [vmem:[#allocation4 + $0x40] sm:$0xff]  ;;  %v6253_v19 = vrot.slane %v4896_v40, %v14773_v34 }
0x1b74   :  { %v13874_v40 = vld [vmem:[%s17602_s5 + $0x244] ss:$12 sps:$4 sm:$0xff]  }
0x1b75   :  { %v16400_v24 = vadd.f32 %v6227_v11, %v6222_v33  ;;  %v16402_v51 = vadd.f32 %v6229_v29, %v6223_v37  ;;  %v6241_v11 = vrot.slane %v16497_v49, %v14773_v34 }
0x1b77   :  { %v6235_v41 = vcombine.low %v16400_v24, %v16402_v51 }
0x1b79   :  { %v6237_v55 = vpack.c.bf16 %v6235_v41, %v6235_v41 }
0x1b7b   :  { %6447 = vmatmul.mubr.bf16.vlgmr.msra.gmra.mrb[148].mxu0 %v6237_v55  ;;  %6488 = vmatmul.mubr.bf16.vlgmr.msra.gmra.mrb[128].mxu1 %v6237_v55 }
0x1b7c   :  { %12497 = vmatpush3.bf16.msra.mxu0 %v13842_v54  ;;  %12519 = vmatpush3.bf16.msra.mxu1 %v13843_v44 }
0x1b7d   :  { %12498 = vmatprep.subr.bf16.mxu0 %v13844_v50  ;;  %12520 = vmatprep.subr.bf16.mxu1 %v13845_v9 }
0x1b80   :  { %12499 = vmatpush3.bf16.msra.mxu0 %v13846_v22  ;;  %12521 = vmatpush3.bf16.msra.mxu1 %v13847_v14 }
0x1b81   :  { %12500 = vmatprep.subr.bf16.mxu0 %v13848_v39  ;;  %12522 = vmatprep.subr.bf16.mxu1 %v13849_v56 }
0x1b84   :  { %12501 = vmatpush3.bf16.msra.mxu0 %v13850_v53  ;;  %12523 = vmatpush3.bf16.msra.mxu1 %v13851_v59 }
0x1b85   :  { %12502 = vmatprep.subr.bf16.mxu0 %v13852_v38  ;;  %12524 = vmatprep.subr.bf16.mxu1 %v13853_v61 }
0x1b88   :  { %12503 = vmatpush3.bf16.msra.mxu0 %v13854_v31  ;;  %12525 = vmatpush3.bf16.msra.mxu1 %v13855_v16 }
0x1b89   :  { %12504 = vmatprep.subr.bf16.mxu0 %v13856_v60  ;;  %12526 = vmatprep.subr.bf16.mxu1 %v13857_v62  ;;  %v6507_v60 = vrot.slane %v16497_v49, %v15242_v27 }
0x1b8c   :  { %12505 = vmatpush3.bf16.msra.mxu0 %v13858_v48  ;;  %12527 = vmatpush3.bf16.msra.mxu1 %v13859_v63 }
0x1b8d   :  { %12506 = vmatprep.subr.bf16.mxu0 %v13860_v2  ;;  %12528 = vmatprep.subr.bf16.mxu1 %v13861_v4 }
0x1b90   :  { %12507 = vmatpush3.bf16.msra.mxu0 %v13862_v6  ;;  %12529 = vmatpush3.bf16.msra.mxu1 %v13863_v12 }
0x1b91   :  { %12508 = vmatprep.subr.bf16.mxu0 %v13864_v58  ;;  %12530 = vmatprep.subr.bf16.mxu1 %v13865_v47 }
0x1b94   :  { %12509 = vmatpush3.bf16.msra.mxu0 %v13866_v42  ;;  %12531 = vmatpush3.bf16.msra.mxu1 %v13867_v26 }
0x1b95   :  { %12510 = vmatprep.subr.bf16.mxu0 %v13868_v45  ;;  %12532 = vmatprep.subr.bf16.mxu1 %v13869_v28 }
0x1b98   :  { %12511 = vmatpush3.bf16.msra.mxu0 %v13870_v36  ;;  %12533 = vmatpush3.bf16.msra.mxu1 %v13871_v52  ;;  %v13872_v52 = vld [vmem:[%s17602_s5 + $0x240] ss:$12 sps:$4 sm:$0xff]  }
0x1b99   :  { %13137 = vmatprep.subr.bf16.mxu1 %v14489_v0  ;;  %7157 = vmatprep.subr.bf16.mxu0 %v13874_v40 }
0x1c4e   :  { %v6448_v21 = vpop.f32.mrb[148].mxu0  ;;  %v6489_v25 = vpop.f32.mrb[128].mxu1 }
0x1c4f   :  { %v6449_v29 = vadd.f32 %v6448_v21, %v6241_v11  ;;  %v6490_v33 = vadd.f32 %v6489_v25, %v6249_v13  ;;  %v6450_v37 = vpop.f32.mrb[149].mxu0  ;;  %v6491_v41 = vpop.f32.mrb[129].mxu1  ;;  %v13875_v11 = vld [vmem:[%s17602_s5 + $0x248] ss:$12 sps:$4 sm:$0xff]  }
0x1c50   :  { %v6451_v54 = vadd.f32 %v6450_v37, %v6245_v17  ;;  %v6492_v44 = vadd.f32 %v6491_v41, %v6253_v19  ;;  %v6452_v55 = vpop.f32.mrb[150].mxu0  ;;  %v6493_v50 = vpop.f32.mrb[130].mxu1  ;;  %v13879_v41 = vld [vmem:[%s17602_s5 + $0x260] ss:$12 sps:$4 sm:$0xff]  }
0x1c51   :  { %v6496_v9 = vmax.f32 %v6449_v29, 0.0  ;;  %v6498_v22 = vmax.f32 %v6490_v33, 0.0  ;;  %v6453_v14 = vpop.f32.mrb[151].mxu0  ;;  %v6494_v39 = vpop.f32.mrb[131].mxu1  ;;  %v13883_v55 = vld [vmem:[%s17602_s5 + $0x278] ss:$12 sps:$4 sm:$0xff]  }
0x1c52   :  { %v6497_v18 = vmax.f32 %v6451_v54, 0.0  ;;  %v6499_v56 = vmax.f32 %v6492_v44, 0.0  ;;  %v13882_v54 = vld [vmem:[%s17602_s5 + $0x274] ss:$12 sps:$4 sm:$0xff]   ;;  %v13880_v44 = vld [vmem:[%s17602_s5 + $0x270] ss:$12 sps:$4 sm:$0xff]  }
0x1c53   :  { %v6500_v38 = vpack.c.bf16 %v6496_v9, %v6496_v9  ;;  %v6502_v61 = vpack.c.bf16 %v6498_v22, %v6498_v22  ;;  %v13886_v50 = vld [vmem:[%s17602_s5 + $0x28c] ss:$12 sps:$4 sm:$0xff]   ;;  %v13884_v9 = vld [vmem:[%s17602_s5 + $0x288] ss:$12 sps:$4 sm:$0xff]   ;;  %v13887_v22 = vld [vmem:[%s17602_s5 + $0x290] ss:$12 sps:$4 sm:$0xff]  }
0x1c54   :  { %v6501_v53 = vpack.c.bf16 %v6497_v18, %v6497_v18  ;;  %v6503_v59 = vpack.c.bf16 %v6499_v56, %v6499_v56  ;;  %v13890_v14 = vld [vmem:[%s17602_s5 + $0x2a4] ss:$12 sps:$4 sm:$0xff]   ;;  %v13888_v39 = vld [vmem:[%s17602_s5 + $0x2a0] ss:$12 sps:$4 sm:$0xff]   ;;  %v13891_v18 = vld [vmem:[%s17602_s5 + $0x2a8] ss:$12 sps:$4 sm:$0xff]  }
0x1c55   :  { %v13894_v56 = vld [vmem:[%s17602_s5 + $0x2bc] ss:$12 sps:$4 sm:$0xff]  }
0x1c56   :  { %6732 = vmatprep.mubr.bf16.mxu0 %v6501_v53  ;;  %6772 = vmatprep.mubr.bf16.mxu1 %v6503_v59  ;;  %v13892_v53 = vld [vmem:[%s17602_s5 + $0x2b8] ss:$12 sps:$4 sm:$0xff]   ;;  %v13895_v59 = vld [vmem:[%s17602_s5 + $0x2c0] ss:$12 sps:$4 sm:$0xff]  }
0x1c57   :  { %6733 = vmatmul.mubr.bf16.vlgmr.msra.gmra.mrb[152].mxu0 %v6500_v38  ;;  %6773 = vmatmul.mubr.bf16.vlgmr.msra.gmra.mrb[132].mxu1 %v6502_v61  ;;  %v13898_v38 = vld [vmem:[%s17602_s5 + $0x2d4] ss:$12 sps:$4 sm:$0xff]   ;;  %v13896_v61 = vld [vmem:[%s17602_s5 + $0x2d0] ss:$12 sps:$4 sm:$0xff]  }
0x1c58   :  { %7189 = vmatprep.mubr.bf16.mxu0 %v14491_v30  ;;  %13153 = vmatprep.mubr.msk.bf16.mxu1 %vm14490_vm0, %v14489_v0 }
0x1c59   :  { %13138 = vmatpush3.bf16.msra.mxu1 %v13875_v11  ;;  %7158 = vmatpush1.bf16.msra.mxu0 %v13872_v52 }
0x1c5a   :  { %13139 = vmatprep.subr.bf16.mxu1 %v14489_v0 }
0x1c5d   :  { %13140 = vmatpush3.bf16.msra.mxu1 %v13879_v41 }
0x1c5e   :  { %13141 = vmatprep.subr.bf16.mxu1 %v14489_v0 }
0x1c61   :  { %13142 = vmatpush3.bf16.msra.mxu1 %v13883_v55 }
0x1c62   :  { %13143 = vmatprep.subr.bf16.mxu1 %v14489_v0 }
0x1c65   :  { %13144 = vmatpush3.bf16.msra.mxu1 %v13887_v22 }
0x1c66   :  { %13145 = vmatprep.subr.bf16.mxu1 %v14489_v0 }
0x1c69   :  { %13146 = vmatpush3.bf16.msra.mxu1 %v13891_v18 }
0x1c6a   :  { %13147 = vmatprep.subr.bf16.mxu1 %v14489_v0 }
0x1c6d   :  { %13148 = vmatpush3.bf16.msra.mxu1 %v13895_v59 }
0x1c6e   :  { %13149 = vmatprep.subr.bf16.mxu1 %v14489_v0 }
0x1d2a   :  { %v12512_v31 = vpop.f32.mrb[152].mxu0  ;;  %v12534_v16 = vpop.f32.mrb[132].mxu1 }
0x1d2b   :  { %v12513_v62 = vpop.f32.mrb[153].mxu0  ;;  %v12535_v48 = vpop.f32.mrb[133].mxu1 }
0x1d2c   :  { %v12514_v63 = vadd.f32 %v12513_v62, %v12512_v31  ;;  %v12536_v2 = vadd.f32 %v12535_v48, %v12534_v16  ;;  %v12515_v4 = vpop.f32.mrb[154].mxu0  ;;  %v12537_v6 = vpop.f32.mrb[134].mxu1  ;;  %v13899_v31 = vld [vmem:[%s17602_s5 + $0x2d8] ss:$12 sps:$4 sm:$0xff]   ;;  %v13903_v62 = vld [vmem:[%s17602_s5 + $0x2f0] ss:$12 sps:$4 sm:$0xff]  }
0x1d2d   :  { %v12516_v12 = vpop.f32.mrb[155].mxu0  ;;  %v12538_v58 = vpop.f32.mrb[135].mxu1  ;;  %v13902_v16 = vld [vmem:[%s17602_s5 + $0x2ec] ss:$12 sps:$4 sm:$0xff]   ;;  %13150 = vmatpush3.bf16.msra.mxu1 %v13899_v31  ;;  %v6844_v4 = vrot.slane %v16497_v49, %v15330_v20  ;;  %v6853_v6 = vrot.slane %v16497_v49, %v15335_v35  ;;  %v16611_v49 = vld [vmem:[#allocation4 + $0x60] sm:$0xff] }
0x1d2e   :  { %v6735_v47 = vadd.f32 %v12514_v63, %v6507_v60  ;;  %v13900_v60 = vld [vmem:[%s17602_s5 + $0x2e8] ss:$12 sps:$4 sm:$0xff]   ;;  %13151 = vmatprep.subr.bf16.mxu1 %v14489_v0 }
0x1d30   :  { %v6775_v42 = vadd.f32 %v12536_v2, %v6735_v47 }
0x1d31   :  { %13152 = vmatpush3.bf16.msra.mxu1 %v13903_v62 }
0x1d32   :  { %v6781_v26 = vcombine.high %v6775_v42, %v6775_v42  ;;  %v6783_v45 = vadd.f32 %v6775_v42, %v16400_v24  ;;  %v13878_v24 = vld [vmem:[%s17602_s5 + $0x25c] ss:$12 sps:$4 sm:$0xff]   ;;  %13181 = vmatprep.subr.bf16.mxu1 %v14489_v0  ;;  %v6846_v42 = vcombine.high %v6844_v4, %v6844_v4 }
0x1d33   :  { %7159 = vmatprep.subr.bf16.mxu0 %v13878_v24 }
0x1d34   :  { %v6784_v28 = vadd.f32 %v6781_v26, %v16402_v51  ;;  %v13876_v51 = vld [vmem:[%s17602_s5 + $0x258] ss:$12 sps:$4 sm:$0xff]  }
0x1d35   :  { %7160 = vmatpush1.bf16.msra.mxu0 %v13876_v51 }
0x1d36   :  { %v6787_v36 = vcombine.low %v6783_v45, %v6784_v28  ;;  %7161 = vmatprep.subr.bf16.mxu0 %v13882_v54 }
0x1d38   :  { %6789 = vadd.xlane.f32.xlu0 %v6787_v36 }
0x1d39   :  { %7162 = vmatpush1.bf16.msra.mxu0 %v13880_v44 }
0x1d3a   :  { %7163 = vmatprep.subr.bf16.mxu0 %v13886_v50 }
0x1d3d   :  { %7164 = vmatpush1.bf16.msra.mxu0 %v13884_v9 }
0x1d3e   :  { %7165 = vmatprep.subr.bf16.mxu0 %v13890_v14 }
0x1d41   :  { %7166 = vmatpush1.bf16.msra.mxu0 %v13888_v39 }
0x1d42   :  { %7167 = vmatprep.subr.bf16.mxu0 %v13894_v56 }
0x1d45   :  { %7168 = vmatpush1.bf16.msra.mxu0 %v13892_v53 }
0x1d46   :  { %7169 = vmatprep.subr.bf16.mxu0 %v13898_v38 }
0x1d49   :  { %7170 = vmatpush1.bf16.msra.mxu0 %v13896_v61 }
0x1d4a   :  { %7171 = vmatprep.subr.bf16.mxu0 %v13902_v16 }
0x1d4d   :  { %7172 = vmatpush1.bf16.msra.mxu0 %v13900_v60 }
0x1d4e   :  { %13157 = vmatprep.subr.bf16.mxu0 %v14489_v0 }
0x1dc5   :  { %v6790_v13 = vpop.xlane.xlu0 %6789 }
0x1dc6   :  { %v6791_v8 = vmul.f32 0.0078125, %v6790_v13  ;;  %v7009_v13 = vld [vmem:[#allocation4 + $0x68] sm:$0xff] }
0x1dc8   :  { %v6799_v17 = vrot.slane %v6791_v8, %v16299_v15  ;;  %v6806_v19 = vrot.slane %v6791_v8, %v16302_v23  ;;  %v7020_v8 = vrot.slane %v16611_v49, %v14787_v43 }
0x1dca   :  { %v6809_v21 = vsub.f32 %v6783_v45, %v6799_v17  ;;  %v6810_v25 = vsub.f32 %v6784_v28, %v6806_v19  ;;  %v6855_v28 = vcombine.high %v6853_v6, %v6853_v6  ;;  %v7024_v17 = vrot.slane %v7009_v13, %v14787_v43 }
0x1dcc   :  { %v6811_v29 = vmul.f32 %v6809_v21, %v6809_v21  ;;  %v6812_v33 = vmul.f32 %v6810_v25, %v6810_v25 }
0x1dce   :  { %v6815_v37 = vcombine.low %v6811_v29, %v6812_v33 }
0x1dd0   :  { %6817 = vadd.xlane.f32.xlu0 %v6815_v37 }
0x1e5d   :  { %v6818_v48 = vpop.xlane.xlu0 %6817 }
0x1e5e   :  { %v6819_v63 = vmul.f32 0.0078125, %v6818_v48 }
0x1e60   :  { %v6820_v2 = vadd.f32 1e-05, %v6819_v63  ;;  %v16641_v63 = vld [vmem:[#allocation4 + $0x70] sm:$0xff] }
0x1e62   :  { %14262 = vrsqrt.f32 %v6820_v2 }
0x1e6c   :  { %v14263_v12 = vpop.eup %14262 }
0x1e6d   :  { %v6829_v58 = vrot.slane %v14263_v12, %v16299_v15  ;;  %v6836_v47 = vrot.slane %v14263_v12, %v16302_v23 }
0x1e6f   :  { %v6839_v26 = vmul.f32 %v6829_v58, %v6809_v21  ;;  %v6840_v45 = vmul.f32 %v6836_v47, %v6810_v25 }
0x1e71   :  { %v6848_v36 = vmul.f32 %v6844_v4, %v6839_v26  ;;  %v6849_v52 = vmul.f32 %v6846_v42, %v6840_v45 }
0x1e73   :  { %v16601_v40 = vadd.f32 %v6853_v6, %v6848_v36  ;;  %v16603_v11 = vadd.f32 %v6855_v28, %v6849_v52  ;;  %v7028_v6 = vrot.slane %v16641_v63, %v14787_v43 }
0x1e75   :  { %v7014_v24 = vcombine.low %v16601_v40, %v16603_v11 }
0x1e77   :  { %v7016_v51 = vpack.c.bf16 %v7014_v24, %v7014_v24 }
0x1e79   :  { %7190 = vmatmul.mubr.bf16.vlgmr.msra.gmra.mrb[156].mxu0 %v7016_v51  ;;  %13154 = vmatmul.mubr.bf16.vlgmr.msra.gmra.mrb[136].mxu1 %v7016_v51 }
0x1e7a   :  { %13159 = vmatprep.mubr.msk.bf16.mxu0 %vm14490_vm0, %v14489_v0  ;;  %13183 = vmatprep.mubr.msk.bf16.mxu1 %vm14490_vm0, %v14489_v0 }
0x1f4c   :  { %v7191_v19 = vpop.f32.mrb[156].mxu0  ;;  %v7232_v21 = vpop.f32.mrb[136].mxu1 }
0x1f4d   :  { %v7192_v25 = vadd.f32 %v7191_v19, %v7020_v8  ;;  %v7193_v29 = vpop.f32.mrb[157].mxu0  ;;  %v13155_v33 = vpop.f32.mrb[137].mxu1  ;;  %v7233_v42 = vadd.f32 %v7232_v21, %v7028_v6 }
0x1f4e   :  { %v7194_v37 = vadd.f32 %v7193_v29, %v7024_v17  ;;  %v7195_v41 = vpop.f32.mrb[158].mxu0  ;;  %v7235_v54 = vpop.f32.mrb[138].mxu1 }
0x1f4f   :  { %v7196_v44 = vpop.f32.mrb[159].mxu0  ;;  %v13156_v55 = vpop.f32.mrb[139].mxu1  ;;  %v16656_v28 = vpack.c.bf16 %v7233_v42, %v7233_v42  ;;  %v7243_v13 = vcombine.high %v7233_v42, %v7233_v42 }
0x1f50   :  { %v11997_v50 = vcombine.low %v7194_v37, %v7194_v37  ;;  %v7241_v9 = vcombine.low %v7192_v25, %v7194_v37  ;;  %v7242_v22 = vcombine.high %v7192_v25, %v7194_v37  ;;  %v11998_v18 = vcombine.high %v7194_v37, %v7194_v37 }
0x1f51   :  { %v7775_v24 = vsel %vm5661_vm10, %v16656_v28, 0  ;;  %v16674_v17 = vpack.c.bf16 %v7243_v13, %v7243_v13 }
0x1f52   :  { %v7252_v14 = vpack.c.bf16 %v11997_v50, %v11997_v50  ;;  %v7251_v39 = vpack.c.bf16 %v7241_v9, %v7241_v9  ;;  %v7255_v53 = vpack.c.bf16 %v11998_v18, %v11998_v18  ;;  %v7254_v59 = vpack.c.bf16 %v7242_v22, %v7242_v22 }
0x1f53   :  { %v7821_v21 = vsel %vm5661_vm10, %v16674_v17, 0 }
0x1f54   :  { %7273 = vrot.lane.b32.xlu1 %v7252_v14, %s14492_s24  ;;  %7259 = vrot.lane.b32.xlu0 %v7251_v39, %s14492_s24  ;;  %v7303_v56 = vsel %vm616_vm3, %v7252_v14, 0  ;;  %v7349_v38 = vsel %vm616_vm3, %v7255_v53, 0 }
0x1f55   :  { %13158 = vmatpush3.bf16.xpose.msra.mxu0 %v7303_v56 }
0x1f56   :  { %13163 = vmatprep.subr.bf16.mxu0 %v14489_v0 }
0x1f58   :  { %7275 = vrot.lane.b32.xlu1 %v7255_v53, %s14492_s24  ;;  %7277 = vrot.lane.b32.xlu0 %v7252_v14, %s14487_s12 }
0x1f5c   :  { %7261 = vrot.lane.b32.xlu1 %v7254_v59, %s14492_s24  ;;  %7263 = vrot.lane.b32.xlu0 %v7251_v39, %s14487_s12 }
0x1f5d   :  { %13160 = vmatmul.mubr.msk.bf16.vlgmr.msra.gmra.mrb[160].mxu0 %vm616_vm3, %v7251_v39 }
0x1f5e   :  { %13164 = vmatpush3.bf16.xpose.msra.mxu0 %v7349_v38  ;;  %13165 = vmatprep.mubr.msk.bf16.mxu0 %vm14490_vm0, %v14489_v0 }
0x1f5f   :  { %13169 = vmatprep.subr.bf16.mxu0 %v14489_v0 }
0x1f60   :  { %7279 = vrot.lane.b32.xlu1 %v7255_v53, %s14487_s12  ;;  %7281 = vrot.lane.b32.xlu0 %v7252_v14, %s17621_s17 }
0x1f64   :  { %7265 = vrot.lane.b32.xlu1 %v7254_v59, %s14487_s12  ;;  %7267 = vrot.lane.b32.xlu0 %v7251_v39, %s17621_s17 }
0x1f65   :  { %13166 = vmatmul.mubr.msk.bf16.vlgmr.msra.gmra.mrb[164].mxu0 %vm616_vm3, %v7254_v59 }
0x1f66   :  { %13171 = vmatprep.mubr.msk.bf16.mxu0 %vm14490_vm0, %v14489_v0 }
0x1f68   :  { %7283 = vrot.lane.b32.xlu1 %v7255_v53, %s17621_s17 }
0x1f6c   :  { %7269 = vrot.lane.b32.xlu1 %v7254_v59, %s17621_s17 }
0x1fc6   :  { %v7274_v61 = vpop.permute.xlu1 %7273  ;;  %v7260_v31 = vpop.permute.xlu0 %7259 }
0x1fc7   :  { %v7395_v16 = vsel %vm616_vm3, %v7274_v61, 0 }
0x1fc8   :  { %13170 = vmatpush3.bf16.xpose.msra.mxu0 %v7395_v16 }
0x1fc9   :  { %13175 = vmatprep.subr.bf16.mxu0 %v14489_v0 }
0x1fca   :  { %v7276_v60 = vpop.permute.xlu1 %7275  ;;  %v7278_v62 = vpop.permute.xlu0 %7277 }
0x1fcb   :  { %v7487_v48 = vsel %vm616_vm3, %v7278_v62, 0  ;;  %v7441_v12 = vsel %vm616_vm3, %v7276_v60, 0 }
0x1fcc   :  { %13182 = vmatpush3.bf16.xpose.msra.mxu1 %v7487_v48 }
0x1fcd   :  { %13193 = vmatprep.subr.bf16.mxu1 %v14489_v0 }
0x1fce   :  { %v7262_v2 = vpop.permute.xlu1 %7261  ;;  %v7264_v4 = vpop.permute.xlu0 %7263 }
0x1fcf   :  { %13172 = vmatmul.mubr.msk.bf16.vlgmr.msra.gmra.mrb[168].mxu0 %vm616_vm3, %v7260_v31 }
0x1fd0   :  { %13176 = vmatpush3.bf16.xpose.msra.mxu0 %v7441_v12  ;;  %13177 = vmatprep.mubr.msk.bf16.mxu0 %vm14490_vm0, %v14489_v0 }
0x1fd1   :  { %13187 = vmatprep.subr.bf16.mxu0 %v14489_v0 }
0x1fd2   :  { %v7280_v58 = vpop.permute.xlu1 %7279  ;;  %v7282_v47 = vpop.permute.xlu0 %7281 }
0x1fd3   :  { %v7579_v26 = vsel %vm616_vm3, %v7282_v47, 0  ;;  %13184 = vmatmul.mubr.msk.bf16.vlgmr.msra.gmra.mrb[140].mxu1 %vm616_vm3, %v7264_v4  ;;  %v7533_v36 = vsel %vm616_vm3, %v7280_v58, 0 }
0x1fd4   :  { %13194 = vmatpush3.bf16.xpose.msra.mxu1 %v7579_v26  ;;  %13195 = vmatprep.mubr.msk.bf16.mxu1 %vm14490_vm0, %v14489_v0 }
0x1fd5   :  { %13205 = vmatprep.subr.bf16.mxu1 %v14489_v0 }
0x1fd6   :  { %v7266_v45 = vpop.permute.xlu1 %7265  ;;  %v7268_v52 = vpop.permute.xlu0 %7267 }
0x1fd7   :  { %13178 = vmatmul.mubr.msk.bf16.vlgmr.msra.gmra.mrb[172].mxu0 %vm616_vm3, %v7262_v2 }
0x1fd8   :  { %13188 = vmatpush3.bf16.xpose.msra.mxu0 %v7533_v36  ;;  %13189 = vmatprep.mubr.msk.bf16.mxu0 %vm14490_vm0, %v14489_v0 }
0x1fd9   :  { %13199 = vmatprep.subr.bf16.mxu0 %v14489_v0 }
0x1fda   :  { %v7284_v51 = vpop.permute.xlu1 %7283 }
0x1fdb   :  { %13196 = vmatmul.mubr.msk.bf16.vlgmr.msra.gmra.mrb[144].mxu1 %vm616_vm3, %v7268_v52  ;;  %v7625_v8 = vsel %vm616_vm3, %v7284_v51, 0 }
0x1fdc   :  { %13206 = vmatpush3.bf16.msra.mxu1 %v7775_v24  ;;  %13207 = vmatprep.mubr.msk.bf16.mxu1 %vm14490_vm0, %v14489_v0 }
0x1fdd   :  { %13217 = vmatprep.subr.bf16.mxu1 %v14489_v0 }
0x1fde   :  { %v7270_v19 = vpop.permute.xlu1 %7269 }
0x1fdf   :  { %13190 = vmatmul.mubr.msk.bf16.vlgmr.msra.gmra.mrb[176].mxu0 %vm616_vm3, %v7266_v45 }
0x1fe0   :  { %13200 = vmatpush3.bf16.xpose.msra.mxu0 %v7625_v8  ;;  %13201 = vmatprep.mubr.msk.bf16.mxu0 %vm14490_vm0, %v14489_v0 }
0x1fe1   :  { %13211 = vmatprep.subr.bf16.mxu0 %v14489_v0 }
0x1fe7   :  { %13202 = vmatmul.mubr.msk.bf16.vlgmr.msra.gmra.mrb[180].mxu0 %vm616_vm3, %v7270_v19 }
0x1fe8   :  { %13212 = vmatpush3.bf16.msra.mxu0 %v7821_v21  ;;  %13213 = vmatprep.mubr.msk.bf16.mxu0 %vm14490_vm0, %v14489_v0 }
0x1fe9   :  { %13223 = vmatprep.subr.bf16.mxu0 %v14489_v0 }
0x2030   :  { %v7339_v25 = vpop.f32.mrb[160].mxu0 }
0x2031   :  { %v7667_v29 = vmul.f32 0.17677669, %v7339_v25  ;;  %v13161_v33 = vpop.f32.mrb[161].mxu0 }
0x2032   :  { %v7342_v37 = vpop.f32.mrb[162].mxu0 }
0x2033   :  { %v13162_v41 = vpop.f32.mrb[163].mxu0  ;;  %v7675_v54 = vsel %vm5560_vm11, %v7667_v29, -inf }
0x2034   :  { %7676 = vmax.xlane.f32.xlu0 %v7675_v54 }
0x2038   :  { %v7385_v44 = vpop.f32.mrb[164].mxu0 }
0x2039   :  { %v7668_v55 = vmul.f32 0.17677669, %v7385_v44  ;;  %v13167_v50 = vpop.f32.mrb[165].mxu0 }
0x203a   :  { %v7388_v9 = vpop.f32.mrb[166].mxu0 }
0x203b   :  { %v13168_v22 = vpop.f32.mrb[167].mxu0  ;;  %v7678_v14 = vsel %vm5560_vm11, %v7668_v55, -inf }
0x203c   :  { %7679 = vmax.xlane.f32.xlu1 %v7678_v14 }
0x20a2   :  { %v7431_v39 = vpop.f32.mrb[168].mxu0 }
0x20a3   :  { %v7669_v18 = vmul.f32 0.17677669, %v7431_v39  ;;  %v13173_v56 = vpop.f32.mrb[169].mxu0 }
0x20a4   :  { %v7434_v53 = vpop.f32.mrb[170].mxu0 }
0x20a5   :  { %v13174_v59 = vpop.f32.mrb[171].mxu0  ;;  %v7681_v38 = vsel %vm5560_vm11, %v7669_v18, -inf }
0x20a6   :  { %v7523_v61 = vpop.f32.mrb[140].mxu1  ;;  %7682 = vmax.xlane.f32.xlu0 %v7681_v38 }
0x20a7   :  { %v7671_v31 = vmul.f32 0.17677669, %v7523_v61  ;;  %v13185_v16 = vpop.f32.mrb[141].mxu1 }
0x20a8   :  { %v7526_v60 = vpop.f32.mrb[142].mxu1 }
0x20a9   :  { %v13186_v62 = vpop.f32.mrb[143].mxu1  ;;  %v7687_v48 = vsel %vm5560_vm11, %v7671_v31, -inf }
0x20aa   :  { %7688 = vmax.xlane.f32.xlu1 %v7687_v48  ;;  %v7477_v2 = vpop.f32.mrb[172].mxu0 }
0x20ab   :  { %v7670_v4 = vmul.f32 0.17677669, %v7477_v2  ;;  %v13179_v6 = vpop.f32.mrb[173].mxu0 }
0x20ac   :  { %v7480_v12 = vpop.f32.mrb[174].mxu0 }
0x20ad   :  { %v13180_v58 = vpop.f32.mrb[175].mxu0  ;;  %v7684_v47 = vsel %vm5560_vm11, %v7670_v4, -inf }
0x20ae   :  { %v7615_v42 = vpop.f32.mrb[144].mxu1  ;;  %7685 = vmax.xlane.f32.xlu0 %v7684_v47 }
0x20af   :  { %v16687_v26 = vmul.f32 0.17677669, %v7615_v42  ;;  %v13197_v45 = vpop.f32.mrb[145].mxu1 }
0x20b0   :  { %v7618_v36 = vpop.f32.mrb[146].mxu1 }
0x20b1   :  { %v13198_v52 = vpop.f32.mrb[147].mxu1  ;;  %v7693_v24 = vsel %vm5560_vm11, %v16687_v26, -inf }
0x20b2   :  { %7694 = vmax.xlane.f32.xlu1 %v7693_v24  ;;  %v7569_v51 = vpop.f32.mrb[176].mxu0 }
0x20b3   :  { %v7672_v13 = vmul.f32 0.17677669, %v7569_v51  ;;  %v13191_v8 = vpop.f32.mrb[177].mxu0 }
0x20b4   :  { %v7572_v19 = vpop.f32.mrb[178].mxu0 }
0x20b5   :  { %v13192_v21 = vpop.f32.mrb[179].mxu0  ;;  %v7690_v25 = vsel %vm5560_vm11, %v7672_v13, -inf }
0x20b6   :  { %7691 = vmax.xlane.f32.xlu0 %v7690_v25 }
0x20ba   :  { %v7661_v33 = vpop.f32.mrb[180].mxu0 }
0x20bb   :  { %v7674_v37 = vmul.f32 0.17677669, %v7661_v33  ;;  %v13203_v41 = vpop.f32.mrb[181].mxu0 }
0x20bc   :  { %v7664_v54 = vpop.f32.mrb[182].mxu0 }
0x20bd   :  { %v13204_v44 = vpop.f32.mrb[183].mxu0  ;;  %v7696_v50 = vsel %vm5560_vm11, %v7674_v37, -inf }
0x20be   :  { %7697 = vmax.xlane.f32.xlu0 %v7696_v50 }
0x20c1   :  { %v7677_v39 = vpop.xlane.xlu0 %7676 }
0x20c2   :  { %v7699_v56 = vsub.f32 %v7667_v29, %v7677_v39 }
0x20c3   :  { %7287 = vrot.lane.b32.xlu1 %v16656_v28, %s14492_s24 }
0x20c4   :  { %v7707_v53 = vmul.f32 1.442695, %v7699_v56 }
0x20c9   :  { %v7680_v9 = vpop.xlane.xlu1 %7679 }
0x20ca   :  { %v7700_v22 = vsub.f32 %v7668_v55, %v7680_v9 }
0x20cc   :  { %v7709_v14 = vmul.f32 1.442695, %v7700_v22 }
0x20ce   :  { %14264 = vpow2.f32 %v7709_v14 }
0x20cf   :  { %14266 = vpow2.f32 %v7707_v53 }
0x20d8   :  { %v14265_v59 = vpop.eup %14264 }
0x20d9   :  { %v7726_v38 = vsel %vm5560_vm11, %v14265_v59, 0.0  ;;  %v14267_v61 = vpop.eup %14266 }
0x20da   :  { %7727 = vadd.xlane.f32.xlu0 %v7726_v38  ;;  %v7723_v16 = vsel %vm5560_vm11, %v14267_v61, 0.0 }
0x20e7   :  { %7724 = vadd.xlane.f32.xlu1 %v7723_v16 }
0x2133   :  { %v7683_v60 = vpop.xlane.xlu0 %7682 }
0x2134   :  { %v7701_v62 = vsub.f32 %v7669_v18, %v7683_v60 }
0x2136   :  { %v7711_v48 = vmul.f32 1.442695, %v7701_v62 }
0x2137   :  { %v7689_v2 = vpop.xlane.xlu1 %7688 }
0x2138   :  { %14268 = vpow2.f32 %v7711_v48  ;;  %v7703_v55 = vsub.f32 %v7671_v31, %v7689_v2 }
0x213a   :  { %v7715_v6 = vmul.f32 1.442695, %v7703_v55 }
0x213b   :  { %v7686_v12 = vpop.xlane.xlu0 %7685 }
0x213c   :  { %14270 = vpow2.f32 %v7715_v6  ;;  %v7702_v29 = vsub.f32 %v7670_v4, %v7686_v12 }
0x213e   :  { %v7713_v58 = vmul.f32 1.442695, %v7702_v29 }
0x213f   :  { %v7695_v24 = vpop.xlane.xlu1 %7694 }
0x2140   :  { %14272 = vpow2.f32 %v7713_v58  ;;  %v7705_v8 = vsub.f32 %v16687_v26, %v7695_v24 }
0x2142   :  { %v14269_v47 = vpop.eup %14268  ;;  %v7719_v21 = vmul.f32 1.442695, %v7705_v8 }
0x2143   :  { %v7729_v42 = vsel %vm5560_vm11, %v14269_v47, 0.0  ;;  %v7692_v4 = vpop.xlane.xlu0 %7691  ;;  %v7288_v41 = vpop.permute.xlu1 %7287 }
0x2144   :  { %7730 = vadd.xlane.f32.xlu1 %v7729_v42  ;;  %v7704_v19 = vsub.f32 %v7672_v13, %v7692_v4  ;;  %v7867_v38 = vsel %vm5661_vm10, %v7288_v41, 0 }
0x2146   :  { %v16698_v45 = vpop.eup %14270  ;;  %v7717_v25 = vmul.f32 1.442695, %v7704_v19 }
0x2147   :  { %v7735_v36 = vsel %vm5560_vm11, %v16698_v45, 0.0 }
0x2148   :  { %7736 = vadd.xlane.f32.xlu1 %v7735_v36 }
0x214a   :  { %v16702_v18 = vpop.eup %14272 }
0x214b   :  { %v7732_v31 = vsel %vm5560_vm11, %v16702_v18, 0.0  ;;  %v7698_v52 = vpop.xlane.xlu0 %7697 }
0x214c   :  { %7733 = vadd.xlane.f32.xlu0 %v7732_v31  ;;  %v7706_v33 = vsub.f32 %v7674_v37, %v7698_v52 }
0x214e   :  { %v7721_v44 = vmul.f32 1.442695, %v7706_v33 }
0x2159   :  { %7291 = vrot.lane.b32.xlu1 %v16656_v28, %s14487_s12 }
0x215d   :  { %7293 = vrot.lane.b32.xlu1 %v16674_v17, %s14487_s12 }
0x2162   :  { %7289 = vrot.lane.b32.xlu0 %v16674_v17, %s14492_s24 }
0x2167   :  { %v7728_v51 = vpop.xlane.xlu0 %7727 }
0x2168   :  { %14274 = vrcp.f32 %v7728_v51 }
0x2169   :  { %14276 = vpow2.f32 %v7719_v21 }
0x216a   :  { %14278 = vpow2.f32 %v7717_v25 }
0x2172   :  { %v14275_v54 = vpop.eup %14274 }
0x2173   :  { %v7756_v50 = vmul.f32 %v14275_v54, %v14265_v59  ;;  %v16716_v26 = vpop.eup %14276 }
0x2174   :  { %v7725_v9 = vpop.xlane.xlu1 %7724  ;;  %v16718_v13 = vpop.eup %14278  ;;  %v7741_v14 = vsel %vm5560_vm11, %v16716_v26, 0.0 }
0x2175   :  { %14280 = vrcp.f32 %v7725_v9  ;;  %v7764_v22 = vpack.c.bf16 %v7756_v50, %v7756_v50  ;;  %v7738_v39 = vsel %vm5560_vm11, %v16718_v13, 0.0 }
0x2176   :  { %14282 = vpow2.f32 %v7721_v44 }
0x2177   :  { %13214 = vmatmul.mubr.msk.bf16.vlgmr.msra.gmra.mrb[184].mxu0 %vm5657_vm12, %v7764_v22 }
0x2178   :  { %13225 = vmatprep.mubr.msk.bf16.mxu0 %vm14490_vm0, %v14489_v0 }
0x217f   :  { %v14281_v37 = vpop.eup %14280 }
0x2180   :  { %v7755_v56 = vmul.f32 %v14281_v37, %v14267_v61  ;;  %v16724_v53 = vpop.eup %14282 }
0x2181   :  { %7742 = vadd.xlane.f32.xlu1 %v7741_v14  ;;  %7739 = vadd.xlane.f32.xlu0 %v7738_v39  ;;  %v7744_v16 = vsel %vm5560_vm11, %v16724_v53, 0.0  ;;  %vm9844_vm11 = vcmask 60416  }
0x2182   :  { %v7763_v59 = vpack.c.bf16 %v7755_v56, %v7755_v56 }
0x2184   :  { %13208 = vmatmul.mubr.msk.bf16.vlgmr.msra.gmra.mrb[148].mxu1 %vm5657_vm12, %v7763_v59 }
0x2185   :  { %13218 = vmatpush3.bf16.msra.mxu1 %v7867_v38  ;;  %7745 = vadd.xlane.f32.xlu0 %v7744_v16 }
0x2186   :  { %13219 = vmatprep.mubr.msk.bf16.mxu1 %vm14490_vm0, %v14489_v0  ;;  %13229 = vmatprep.subr.bf16.mxu1 %v14489_v0 }
0x2192   :  { %7297 = vrot.lane.b32.xlu1 %v16674_v17, %s17621_s17 }
0x219b   :  { %7295 = vrot.lane.b32.xlu0 %v16656_v28, %s17621_s17 }
0x21d1   :  { %v7731_v61 = vpop.xlane.xlu1 %7730 }
0x21d2   :  { %14284 = vrcp.f32 %v7731_v61  ;;  %v13904_v61 = vld [vmem:[%s17603_s6 + $0xc0] sm:$0xff]  }
0x21d5   :  { %v7737_v60 = vpop.xlane.xlu1 %7736 }
0x21d6   :  { %14286 = vrcp.f32 %v7737_v60 }
0x21d9   :  { %v7734_v62 = vpop.xlane.xlu0 %7733  ;;  %v7292_v6 = vpop.permute.xlu1 %7291 }
0x21da   :  { %14288 = vrcp.f32 %v7734_v62  ;;  %v7959_v17 = vsel %vm5661_vm10, %v7292_v6, 0  ;;  %v13907_v6 = vld [vmem:[%s17603_s6 + $0xd8] sm:$0xff]  }
0x21dc   :  { %v14285_v48 = vpop.eup %14284 }
0x21dd   :  { %v7290_v2 = vpop.permute.xlu0 %7289  ;;  %v7757_v55 = vmul.f32 %v14285_v48, %v14269_v47  ;;  %v7294_v36 = vpop.permute.xlu1 %7293 }
0x21de   :  { %v7913_v12 = vsel %vm5661_vm10, %v7290_v2, 0  ;;  %v8005_v52 = vsel %vm5661_vm10, %v7294_v36, 0  ;;  %v13906_v2 = vld [vmem:[%s17603_s6 + $0xd0] sm:$0xff]  }
0x21df   :  { %13224 = vmatpush3.bf16.msra.mxu0 %v7913_v12  ;;  %v7765_v29 = vpack.c.bf16 %v7757_v55, %v7757_v55 }
0x21e0   :  { %v14287_v58 = vpop.eup %14286  ;;  %13235 = vmatprep.subr.bf16.mxu0 %v14489_v0 }
0x21e1   :  { %13220 = vmatmul.mubr.msk.bf16.vlgmr.msra.gmra.mrb[152].mxu1 %vm5657_vm12, %v7765_v29  ;;  %v7759_v28 = vmul.f32 %v14287_v58, %v16698_v45 }
0x21e2   :  { %13230 = vmatpush3.bf16.msra.mxu1 %v7959_v17  ;;  %13231 = vmatprep.mubr.msk.bf16.mxu1 %vm14490_vm0, %v14489_v0 }
0x21e3   :  { %13241 = vmatprep.subr.bf16.mxu1 %v14489_v0  ;;  %v7767_v4 = vpack.c.bf16 %v7759_v28, %v7759_v28 }
0x21e4   :  { %v14289_v47 = vpop.eup %14288 }
0x21e5   :  { %v7758_v42 = vmul.f32 %v14289_v47, %v16702_v18 }
0x21e7   :  { %v7766_v31 = vpack.c.bf16 %v7758_v42, %v7758_v42  ;;  %v13908_v42 = vld [vmem:[%s17603_s6 + $0xe0] sm:$0xff]  }
0x21e9   :  { %13226 = vmatmul.mubr.msk.bf16.vlgmr.msra.gmra.mrb[188].mxu0 %vm5657_vm12, %v7766_v31  ;;  %13232 = vmatmul.mubr.msk.bf16.vlgmr.msra.gmra.mrb[156].mxu1 %vm5657_vm12, %v7767_v4  ;;  %v13909_v4 = vld [vmem:[%s17603_s6 + $0xe8] sm:$0xff]  }
0x21ea   :  { %13236 = vmatpush3.bf16.msra.mxu0 %v8005_v52  ;;  %13237 = vmatprep.mubr.msk.bf16.mxu0 %vm14490_vm0, %v14489_v0  ;;  %v13910_v52 = vld [vmem:[%s17603_s6 + $0xf0] sm:$0xff]  }
0x21eb   :  { %13243 = vmatprep.mubr.msk.bf16.mxu1 %vm14490_vm0, %v14489_v0  ;;  %13247 = vmatprep.subr.bf16.mxu0 %v14489_v0 }
0x220e   :  { %v7743_v45 = vpop.xlane.xlu1 %7742  ;;  %v7740_v18 = vpop.xlane.xlu0 %7739 }
0x220f   :  { %14290 = vrcp.f32 %v7743_v45  ;;  %v13911_v45 = vld [vmem:[%s17603_s6 + $0xf8] sm:$0xff]  }
0x2210   :  { %14292 = vrcp.f32 %v7740_v18 }
0x2212   :  { %v7746_v24 = vpop.xlane.xlu0 %7745  ;;  %v7298_v41 = vpop.permute.xlu1 %7297 }
0x2213   :  { %14294 = vrcp.f32 %v7746_v24  ;;  %v8097_v9 = vsel %vm5661_vm10, %v7298_v41, 0 }
0x2216   :  { %v7296_v51 = vpop.permute.xlu0 %7295 }
0x2217   :  { %v8051_v8 = vsel %vm5661_vm10, %v7296_v51, 0 }
0x2218   :  { %13242 = vmatpush3.bf16.msra.mxu1 %v8051_v8 }
0x2219   :  { %v14291_v19 = vpop.eup %14290  ;;  %13253 = vmatprep.subr.bf16.mxu1 %v14489_v0 }
0x221a   :  { %v14293_v21 = vpop.eup %14292  ;;  %v7761_v25 = vmul.f32 %v14291_v19, %v16716_v26 }
0x221b   :  { %v7760_v33 = vmul.f32 %v14293_v21, %v16718_v13 }
0x221c   :  { %v7769_v54 = vpack.c.bf16 %v7761_v25, %v7761_v25 }
0x221d   :  { %v7768_v44 = vpack.c.bf16 %v7760_v33, %v7760_v33  ;;  %v14295_v50 = vpop.eup %14294 }
0x221e   :  { %13244 = vmatmul.mubr.msk.bf16.vlgmr.msra.gmra.mrb[160].mxu1 %vm5657_vm12, %v7769_v54  ;;  %v7762_v22 = vmul.f32 %v14295_v50, %v16724_v53  ;;  %v13905_v53 = vld [vmem:[%s17603_s6 + $0xc8] sm:$0xff]  }
0x221f   :  { %13238 = vmatmul.mubr.msk.bf16.vlgmr.msra.gmra.mrb[192].mxu0 %vm5657_vm12, %v7768_v44  ;;  %13269 = vmatprep.mubr.msk.bf16.mxu1 %vm14490_vm0, %v14489_v0 }
0x2220   :  { %13248 = vmatpush3.bf16.msra.mxu0 %v8097_v9  ;;  %13249 = vmatprep.mubr.msk.bf16.mxu0 %vm14490_vm0, %v14489_v0  ;;  %v7770_v26 = vpack.c.bf16 %v7762_v22, %v7762_v22 }
0x2221   :  { %13254 = vmatpush3.bf16.msra.mxu1 %v13904_v61 }
0x2222   :  { %13255 = vmatprep.subr.bf16.mxu1 %v14489_v0 }
0x2225   :  { %13256 = vmatpush3.bf16.msra.mxu1 %v13905_v53 }
0x2226   :  { %13257 = vmatprep.subr.bf16.mxu1 %v14489_v0 }
0x2227   :  { %13250 = vmatmul.mubr.msk.bf16.vlgmr.msra.gmra.mrb[196].mxu0 %vm5657_vm12, %v7770_v26 }
0x2228   :  { %8558 = vmatprep.mubr.bf16.mxu0 %v14491_v30 }
0x2229   :  { %13258 = vmatpush3.bf16.msra.mxu1 %v13906_v2 }
0x222a   :  { %13259 = vmatprep.subr.bf16.mxu1 %v14489_v0 }
0x222d   :  { %13260 = vmatpush3.bf16.msra.mxu1 %v13907_v6 }
0x222e   :  { %13261 = vmatprep.subr.bf16.mxu1 %v14489_v0 }
0x2231   :  { %13262 = vmatpush3.bf16.msra.mxu1 %v13908_v42  ;;  %v13914_v42 = vld [vmem:[%s17604_s7 + $0x304] ss:$16 sps:$4 sm:$0xff]  }
0x2232   :  { %13263 = vmatprep.subr.bf16.mxu1 %v14489_v0  ;;  %8526 = vmatprep.subr.bf16.mxu0 %v13914_v42  ;;  %v8339_v42 = vrot.slane %v16611_v49, %v15127_v7 }
0x2235   :  { %13264 = vmatpush3.bf16.msra.mxu1 %v13909_v4  ;;  %v13918_v4 = vld [vmem:[%s17604_s7 + $0x320] ss:$16 sps:$4 sm:$0xff]  }
0x2236   :  { %13265 = vmatprep.subr.bf16.mxu1 %v14489_v0 }
0x2239   :  { %13266 = vmatpush3.bf16.msra.mxu1 %v13910_v52  ;;  %v13921_v52 = vld [vmem:[%s17604_s7 + $0x328] ss:$16 sps:$4 sm:$0xff]  }
0x223a   :  { %13267 = vmatprep.subr.bf16.mxu1 %v14489_v0 }
0x223d   :  { %13268 = vmatpush3.bf16.msra.mxu1 %v13911_v45 }
0x224a   :  { %v16768_v13 = vpop.f32.mrb[184].mxu0 }
0x224b   :  { %v13215_v37 = vpop.f32.mrb[185].mxu0 }
0x224c   :  { %v7860_v14 = vpop.f32.mrb[186].mxu0 }
0x224d   :  { %v13216_v39 = vpop.f32.mrb[187].mxu0 }
0x2257   :  { %v16770_v56 = vpop.f32.mrb[148].mxu1 }
0x2258   :  { %v13209_v59 = vpop.f32.mrb[149].mxu1 }
0x2259   :  { %v7814_v38 = vpop.f32.mrb[150].mxu1 }
0x225a   :  { %v13210_v16 = vpop.f32.mrb[151].mxu1 }
0x22b4   :  { %v7903_v60 = vpop.f32.mrb[152].mxu1 }
0x22b5   :  { %v13221_v62 = vpop.f32.mrb[153].mxu1  ;;  %8141 = vrot.lane.b32.xlu0 %v7903_v60, %s17621_s17 }
0x22b6   :  { %v7906_v48 = vpop.f32.mrb[154].mxu1 }
0x22b7   :  { %v13222_v55 = vpop.f32.mrb[155].mxu1 }
0x22bc   :  { %v7949_v12 = vpop.f32.mrb[188].mxu0  ;;  %v7995_v29 = vpop.f32.mrb[156].mxu1 }
0x22bd   :  { %v13233_v58 = vpop.f32.mrb[157].mxu1  ;;  %8149 = vrot.lane.b32.xlu0 %v7995_v29, %s14487_s12  ;;  %8143 = vrot.lane.b32.xlu1 %v7949_v12, %s17621_s17  ;;  %v13227_v17 = vpop.f32.mrb[189].mxu0 }
0x22be   :  { %v7952_v28 = vpop.f32.mrb[190].mxu0  ;;  %v7998_v47 = vpop.f32.mrb[158].mxu1 }
0x22bf   :  { %v13228_v36 = vpop.f32.mrb[191].mxu0  ;;  %v13234_v31 = vpop.f32.mrb[159].mxu1  ;;  %v13912_v47 = vld [vmem:[%s17604_s7 + $0x300] ss:$16 sps:$4 sm:$0xff]  }
0x22c0   :  { %v13915_v36 = vld [vmem:[%s17604_s7 + $0x308] ss:$16 sps:$4 sm:$0xff]   ;;  %v13923_v31 = vld [vmem:[%s17604_s7 + $0x32c] ss:$16 sps:$4 sm:$0xff]   ;;  %8527 = vmatpush1.bf16.msra.mxu0 %v13912_v47  ;;  %v8330_v47 = vrot.slane %v16611_v49, %v15122_v1 }
0x22f1   :  { %v8087_v18 = vpop.f32.mrb[160].mxu1 }
0x22f2   :  { %v8041_v24 = vpop.f32.mrb[192].mxu0  ;;  %8157 = vrot.lane.b32.xlu0 %v8087_v18, %s14492_s24  ;;  %v13245_v51 = vpop.f32.mrb[161].mxu1 }
0x22f3   :  { %8151 = vrot.lane.b32.xlu1 %v8041_v24, %s14487_s12  ;;  %v13239_v8 = vpop.f32.mrb[193].mxu0  ;;  %v8090_v19 = vpop.f32.mrb[162].mxu1 }
0x22f4   :  { %v8044_v21 = vpop.f32.mrb[194].mxu0  ;;  %v13246_v25 = vpop.f32.mrb[163].mxu1 }
0x22f5   :  { %v13240_v33 = vpop.f32.mrb[195].mxu0 }
0x22fa   :  { %v8133_v41 = vpop.f32.mrb[196].mxu0 }
0x22fb   :  { %8159 = vrot.lane.b32.xlu1 %v8133_v41, %s14492_s24  ;;  %v13251_v54 = vpop.f32.mrb[197].mxu0  ;;  %v16858_v41 = vadd.f32 %v16043_v10, %v15690_v46  ;;  %v13932_v46 = vld [vmem:[%s17604_s7 + $0x364] ss:$16 sps:$4 sm:$0xff]   ;;  %v13935_v10 = vld [vmem:[%s17604_s7 + $0x36c] ss:$16 sps:$4 sm:$0xff]  }
0x22fc   :  { %v8136_v44 = vpop.f32.mrb[198].mxu0  ;;  %v13926_v54 = vld [vmem:[%s17604_s7 + $0x344] ss:$16 sps:$4 sm:$0xff]  }
0x22fd   :  { %v13252_v50 = vpop.f32.mrb[199].mxu0  ;;  %v13929_v44 = vld [vmem:[%s17604_s7 + $0x34c] ss:$16 sps:$4 sm:$0xff]  }
0x22fe   :  { %v13924_v50 = vld [vmem:[%s17604_s7 + $0x340] ss:$16 sps:$4 sm:$0xff]  }
0x2327   :  { %v8142_v9 = vpop.permute.xlu0 %8141 }
0x2328   :  { %v8163_v39 = vsel %vm616_vm3, %v16770_v56, %v8142_v9  ;;  %v8177_v56 = vrot.slane %v16611_v49, %v15005_v3  ;;  %v13927_v9 = vld [vmem:[%s17604_s7 + $0x348] ss:$16 sps:$4 sm:$0xff]  }
0x232f   :  { %v8144_v22 = vpop.permute.xlu1 %8143  ;;  %v8150_v26 = vpop.permute.xlu0 %8149 }
0x2330   :  { %v8164_v59 = vsel %vm616_vm3, %v16768_v13, %v8144_v22  ;;  %v8165_v38 = vsel %vm1485_vm6, %v8163_v39, %v8150_v26  ;;  %v13930_v22 = vld [vmem:[%s17604_s7 + $0x360] ss:$16 sps:$4 sm:$0xff]   ;;  %v13933_v26 = vld [vmem:[%s17604_s7 + $0x368] ss:$16 sps:$4 sm:$0xff]  }
0x2331   :  { %v13936_v39 = vld [vmem:[%s17604_s7 + $0x380] ss:$16 sps:$4 sm:$0xff]  }
0x2364   :  { %v8158_v14 = vpop.permute.xlu0 %8157 }
0x2365   :  { %v8152_v37 = vpop.permute.xlu1 %8151  ;;  %v8167_v53 = vsel %vm1488_vm7, %v8165_v38, %v8158_v14  ;;  %v13941_v14 = vld [vmem:[%s17604_s7 + $0x38c] ss:$16 sps:$4 sm:$0xff]   ;;  %v13944_v38 = vld [vmem:[%s17604_s7 + $0x3a4] ss:$16 sps:$4 sm:$0xff]  }
0x2366   :  { %v8166_v16 = vsel %vm1485_vm6, %v8164_v59, %v8152_v37  ;;  %v13938_v37 = vld [vmem:[%s17604_s7 + $0x384] ss:$16 sps:$4 sm:$0xff]   ;;  %v13939_v59 = vld [vmem:[%s17604_s7 + $0x388] ss:$16 sps:$4 sm:$0xff]  }
0x236d   :  { %v8160_v61 = vpop.permute.xlu1 %8159 }
0x236e   :  { %v8168_v60 = vsel %vm1488_vm7, %v8166_v16, %v8160_v61  ;;  %v13947_v16 = vld [vmem:[%s17604_s7 + $0x3ac] ss:$16 sps:$4 sm:$0xff]   ;;  %v13942_v61 = vld [vmem:[%s17604_s7 + $0x3a0] ss:$16 sps:$4 sm:$0xff]  }
0x236f   :  { %v8171_v62 = vcombine.low %v8167_v53, %v8168_v60  ;;  %v13945_v53 = vld [vmem:[%s17604_s7 + $0x3a8] ss:$16 sps:$4 sm:$0xff]   ;;  %v13950_v60 = vld [vmem:[%s17604_s7 + $0x3c4] ss:$16 sps:$4 sm:$0xff]  }
0x2371   :  { %v8173_v48 = vpack.c.bf16 %v8171_v62, %v8171_v62  ;;  %v13953_v62 = vld [vmem:[%s17604_s7 + $0x3cc] ss:$16 sps:$4 sm:$0xff]  }
0x2373   :  { %13270 = vmatmul.mubr.bf16.vlgmr.msra.gmra.mrb[164].mxu1 %v8173_v48  ;;  %v13948_v48 = vld [vmem:[%s17604_s7 + $0x3c0] ss:$16 sps:$4 sm:$0xff]  }
0x2374   :  { %8599 = vmatprep.mubr.bf16.mxu1 %v14491_v30 }
0x2446   :  { %v8260_v2 = vpop.f32.mrb[164].mxu1 }
0x2447   :  { %v8261_v55 = vadd.f32 %v8260_v2, %v8177_v56  ;;  %v13271_v13 = vpop.f32.mrb[165].mxu1  ;;  %v13951_v56 = vld [vmem:[%s17604_s7 + $0x3c8] ss:$16 sps:$4 sm:$0xff]   ;;  %v13956_v2 = vld [vmem:[%s17604_s7 + $0x3e4] ss:$16 sps:$4 sm:$0xff]  }
0x2448   :  { %v8263_v6 = vpop.f32.mrb[166].mxu1  ;;  %v13954_v13 = vld [vmem:[%s17604_s7 + $0x3e0] ss:$16 sps:$4 sm:$0xff]  }
0x2449   :  { %v8267_v12 = vcombine.high %v8261_v55, %v8261_v55  ;;  %v13272_v29 = vpop.f32.mrb[167].mxu1  ;;  %v8269_v58 = vadd.f32 %v8261_v55, %v16601_v40  ;;  %v13917_v40 = vld [vmem:[%s17604_s7 + $0x30c] ss:$16 sps:$4 sm:$0xff]   ;;  %v13957_v6 = vld [vmem:[%s17604_s7 + $0x3e8] ss:$16 sps:$4 sm:$0xff]  }
0x244a   :  { %8567 = vmatprep.subr.bf16.mxu1 %v13917_v40  ;;  %v13959_v55 = vld [vmem:[%s17604_s7 + $0x3ec] ss:$16 sps:$4 sm:$0xff]   ;;  %v13962_v29 = vld [vmem:[%s17605_s8 + $0x3c0] sm:$0xff]  }
0x244b   :  { %v8270_v17 = vadd.f32 %v8267_v12, %v16603_v11  ;;  %v13920_v11 = vld [vmem:[%s17604_s7 + $0x324] ss:$16 sps:$4 sm:$0xff]   ;;  %8568 = vmatpush1.bf16.msra.mxu1 %v13915_v36 }
0x244c   :  { %8528 = vmatprep.subr.bf16.mxu0 %v13920_v11  ;;  %8569 = vmatprep.subr.bf16.mxu1 %v13923_v31  ;;  %v13960_v12 = vld [vmem:[%s17605_s8 + $0x340] sm:$0xff]   ;;  %v8332_v31 = vcombine.high %v8330_v47, %v8330_v47 }
0x244d   :  { %v8273_v28 = vcombine.low %v8269_v58, %v8270_v17  ;;  %8529 = vmatpush1.bf16.msra.mxu0 %v13918_v4 }
0x244e   :  { %8530 = vmatprep.subr.bf16.mxu0 %v13926_v54  ;;  %v13966_v54 = vld [vmem:[%s17605_s8 + $0x3c8] sm:$0xff]  }
0x244f   :  { %8275 = vadd.xlane.f32.xlu0 %v8273_v28  ;;  %8570 = vmatpush1.bf16.msra.mxu1 %v13921_v52 }
0x2450   :  { %8571 = vmatprep.subr.bf16.mxu1 %v13929_v44  ;;  %v13965_v44 = vld [vmem:[%s17605_s8 + $0x308] sm:$0xff]  }
0x2451   :  { %8531 = vmatpush1.bf16.msra.mxu0 %v13924_v50  ;;  %v13967_v50 = vld [vmem:[%s17605_s8 + $0x388] sm:$0xff]  }
0x2452   :  { %8532 = vmatprep.subr.bf16.mxu0 %v13932_v46  ;;  %v13970_v46 = vld [vmem:[%s17605_s8 + $0x3d0] sm:$0xff]  }
0x2453   :  { %8572 = vmatpush1.bf16.msra.mxu1 %v13927_v9  ;;  %v13968_v9 = vld [vmem:[%s17605_s8 + $0x350] sm:$0xff]  }
0x2454   :  { %8573 = vmatprep.subr.bf16.mxu1 %v13935_v10  ;;  %v13969_v10 = vld [vmem:[%s17605_s8 + $0x310] sm:$0xff]  }
0x2455   :  { %8533 = vmatpush1.bf16.msra.mxu0 %v13930_v22  ;;  %v13971_v22 = vld [vmem:[%s17605_s8 + $0x390] sm:$0xff]  }
0x2456   :  { %8534 = vmatprep.subr.bf16.mxu0 %v13938_v37  ;;  %v13974_v37 = vld [vmem:[%s17605_s8 + $0x3d8] sm:$0xff]  }
0x2457   :  { %8574 = vmatpush1.bf16.msra.mxu1 %v13933_v26  ;;  %v13972_v26 = vld [vmem:[%s17605_s8 + $0x358] sm:$0xff]  }
0x2458   :  { %8575 = vmatprep.subr.bf16.mxu1 %v13941_v14  ;;  %v13973_v14 = vld [vmem:[%s17605_s8 + $0x318] sm:$0xff]  }
0x2459   :  { %8535 = vmatpush1.bf16.msra.mxu0 %v13936_v39  ;;  %v13975_v39 = vld [vmem:[%s17605_s8 + $0x398] sm:$0xff]  }
0x245a   :  { %8536 = vmatprep.subr.bf16.mxu0 %v13944_v38  ;;  %v13978_v38 = vld [vmem:[%s17605_s8 + $0x3e0] sm:$0xff]  }
0x245b   :  { %8576 = vmatpush1.bf16.msra.mxu1 %v13939_v59  ;;  %v13976_v59 = vld [vmem:[%s17605_s8 + $0x360] sm:$0xff]  }
0x245c   :  { %8577 = vmatprep.subr.bf16.mxu1 %v13947_v16  ;;  %v13977_v16 = vld [vmem:[%s17605_s8 + $0x320] sm:$0xff]  }
0x245d   :  { %8537 = vmatpush1.bf16.msra.mxu0 %v13942_v61  ;;  %v13979_v61 = vld [vmem:[%s17605_s8 + $0x3a0] sm:$0xff]  }
0x245e   :  { %8538 = vmatprep.subr.bf16.mxu0 %v13950_v60  ;;  %v13982_v60 = vld [vmem:[%s17605_s8 + $0x3e8] sm:$0xff]  }
0x245f   :  { %8578 = vmatpush1.bf16.msra.mxu1 %v13945_v53  ;;  %v13980_v53 = vld [vmem:[%s17605_s8 + $0x368] sm:$0xff]  }
0x2460   :  { %8579 = vmatprep.subr.bf16.mxu1 %v13953_v62  ;;  %v13981_v62 = vld [vmem:[%s17605_s8 + $0x328] sm:$0xff]  }
0x2461   :  { %8539 = vmatpush1.bf16.msra.mxu0 %v13948_v48  ;;  %v13983_v48 = vld [vmem:[%s17605_s8 + $0x3a8] sm:$0xff]  }
0x2462   :  { %8540 = vmatprep.subr.bf16.mxu0 %v13956_v2  ;;  %v13985_v2 = vld [vmem:[%s17605_s8 + $0x330] sm:$0xff]  }
0x2463   :  { %8580 = vmatpush1.bf16.msra.mxu1 %v13951_v56  ;;  %v13984_v56 = vld [vmem:[%s17605_s8 + $0x370] sm:$0xff]  }
0x2464   :  { %8581 = vmatprep.subr.bf16.mxu1 %v13959_v55  ;;  %v13986_v55 = vld [vmem:[%s17605_s8 + $0x3f0] sm:$0xff]  }
0x2465   :  { %8541 = vmatpush1.bf16.msra.mxu0 %v13954_v13  ;;  %v13987_v13 = vld [vmem:[%s17605_s8 + $0x3b0] sm:$0xff]  }
0x2466   :  { %12590 = vmatprep.subr.bf16.mxu0 %v13960_v12  ;;  %v13989_v12 = vld [vmem:[%s17605_s8 + $0x338] sm:$0xff]  }
0x2467   :  { %8582 = vmatpush1.bf16.msra.mxu1 %v13957_v6  ;;  %v13988_v6 = vld [vmem:[%s17605_s8 + $0x378] sm:$0xff]  }
0x2468   :  { %12612 = vmatprep.subr.bf16.mxu1 %v13962_v29  ;;  %v13990_v29 = vld [vmem:[%s17605_s8 + $0x3f8] sm:$0xff]  }
0x24dc   :  { %v8276_v45 = vpop.xlane.xlu0 %8275 }
0x24dd   :  { %v8277_v18 = vmul.f32 0.0078125, %v8276_v45  ;;  %v8341_v45 = vcombine.high %v8339_v42, %v8339_v42 }
0x24df   :  { %v8285_v24 = vrot.slane %v8277_v18, %v16299_v15  ;;  %v8292_v51 = vrot.slane %v8277_v18, %v16302_v23 }
0x24e1   :  { %v16848_v8 = vsub.f32 %v8269_v58, %v8285_v24  ;;  %v16850_v19 = vsub.f32 %v8270_v17, %v8292_v51 }
0x24e3   :  { %v8297_v21 = vmul.f32 %v16848_v8, %v16848_v8  ;;  %v8298_v25 = vmul.f32 %v16850_v19, %v16850_v19 }
0x24e5   :  { %v8301_v33 = vcombine.low %v8297_v21, %v8298_v25  ;;  %v13961_v25 = vld [vmem:[%s17605_s8 + $0x300] sm:$0xff]  }
0x24e7   :  { %8303 = vadd.xlane.f32.xlu1 %v8301_v33 }
0x24eb   :  { %4194 = vadd.xlane.f32.xlu1 %v16858_v41 }
0x2574   :  { %v8304_v58 = vpop.xlane.xlu1 %8303 }
0x2575   :  { %v8305_v17 = vmul.f32 0.0078125, %v8304_v58  ;;  %v13991_v58 = vld [vmem:[%s17605_s8 + $0x3b8] sm:$0xff]  }
0x2577   :  { %v8306_v28 = vadd.f32 1e-05, %v8305_v17  ;;  %v7011_v17 = vld [vmem:[#allocation4 + $0x78] sm:$0xff] }
0x2579   :  { %14296 = vrsqrt.f32 %v8306_v28  ;;  %v17045_v28 = vld [vmem:[#allocation4 + $0x60] sm:$0xff] }
0x2583   :  { %v14297_v36 = vpop.eup %14296 }
0x2584   :  { %v8315_v40 = vrot.slane %v14297_v36, %v16299_v15  ;;  %v8322_v11 = vrot.slane %v14297_v36, %v16302_v23  ;;  %v14330_v36 = vld [vmem:[#allocation4 + $0x68] sm:$0xff] }
0x2586   :  { %v8325_v4 = vmul.f32 %v8315_v40, %v16848_v8  ;;  %v8326_v52 = vmul.f32 %v8322_v11, %v16850_v19  ;;  %v13963_v8 = vld [vmem:[%s17605_s8 + $0x380] sm:$0xff]   ;;  %v13964_v19 = vld [vmem:[%s17605_s8 + $0x348] sm:$0xff]   ;;  %v8357_v40 = vrot.slane %v14330_v36, %v14773_v34  ;;  %v8365_v11 = vrot.slane %v7011_v17, %v14773_v34 }
0x2588   :  { %v8334_v18 = vmul.f32 %v8330_v47, %v8325_v4  ;;  %v8335_v24 = vmul.f32 %v8332_v31, %v8326_v52  ;;  %v8353_v47 = vrot.slane %v17045_v28, %v14773_v34 }
0x258a   :  { %v16947_v51 = vadd.f32 %v8339_v42, %v8334_v18  ;;  %v16949_v21 = vadd.f32 %v8341_v45, %v8335_v24  ;;  %v8361_v42 = vrot.slane %v16641_v63, %v14773_v34 }
0x258c   :  { %v8347_v49 = vcombine.low %v16947_v51, %v16949_v21 }
0x258e   :  { %v8349_v33 = vpack.c.bf16 %v8347_v49, %v8347_v49 }
0x2590   :  { %8559 = vmatmul.mubr.bf16.vlgmr.msra.gmra.mrb[200].mxu0 %v8349_v33  ;;  %8600 = vmatmul.mubr.bf16.vlgmr.msra.gmra.mrb[168].mxu1 %v8349_v33 }
0x2591   :  { %12591 = vmatpush3.bf16.msra.mxu0 %v13961_v25  ;;  %12613 = vmatpush3.bf16.msra.mxu1 %v13963_v8 }
0x2592   :  { %12592 = vmatprep.subr.bf16.mxu0 %v13964_v19  ;;  %12614 = vmatprep.subr.bf16.mxu1 %v13966_v54 }
0x2595   :  { %12593 = vmatpush3.bf16.msra.mxu0 %v13965_v44  ;;  %12615 = vmatpush3.bf16.msra.mxu1 %v13967_v50 }
0x2596   :  { %12594 = vmatprep.subr.bf16.mxu0 %v13968_v9  ;;  %12616 = vmatprep.subr.bf16.mxu1 %v13970_v46 }
0x2599   :  { %12595 = vmatpush3.bf16.msra.mxu0 %v13969_v10  ;;  %12617 = vmatpush3.bf16.msra.mxu1 %v13971_v22  ;;  %v13992_v22 = vld [vmem:[#allocation6] ss:$8 sps:$4 sm:$0xff]  }
0x259a   :  { %12596 = vmatprep.subr.bf16.mxu0 %v13972_v26  ;;  %12618 = vmatprep.subr.bf16.mxu1 %v13974_v37 }
0x259d   :  { %12597 = vmatpush3.bf16.msra.mxu0 %v13973_v14  ;;  %12619 = vmatpush3.bf16.msra.mxu1 %v13975_v39  ;;  %v13994_v14 = vld [vmem:[#allocation6 + $0x10] ss:$8 sps:$4 sm:$0xff]   ;;  %v13996_v39 = vld [vmem:[#allocation6 + $0x20] ss:$8 sps:$4 sm:$0xff]  }
0x259e   :  { %12598 = vmatprep.subr.bf16.mxu0 %v13976_v59  ;;  %12620 = vmatprep.subr.bf16.mxu1 %v13978_v38  ;;  %v13998_v59 = vld [vmem:[#allocation6 + $0x30] ss:$8 sps:$4 sm:$0xff]   ;;  %v14000_v38 = vld [vmem:[#allocation6 + $0x40] ss:$8 sps:$4 sm:$0xff]  }
0x25a1   :  { %12599 = vmatpush3.bf16.msra.mxu0 %v13977_v16  ;;  %12621 = vmatpush3.bf16.msra.mxu1 %v13979_v61  ;;  %v14002_v16 = vld [vmem:[#allocation6 + $0x50] ss:$8 sps:$4 sm:$0xff]   ;;  %v14004_v61 = vld [vmem:[#allocation6 + $0x60] ss:$8 sps:$4 sm:$0xff]  }
0x25a2   :  { %12600 = vmatprep.subr.bf16.mxu0 %v13980_v53  ;;  %12622 = vmatprep.subr.bf16.mxu1 %v13982_v60  ;;  %v14331_v53 = vld [vmem:[#allocation2] sm:$0xff] }
0x25a3   :  { %v17064_v60 = vrot.slane %v14331_v53, %v15330_v20 }
0x25a5   :  { %12601 = vmatpush3.bf16.msra.mxu0 %v13981_v62  ;;  %12623 = vmatpush3.bf16.msra.mxu1 %v13983_v48  ;;  %v14006_v62 = vld [vmem:[#allocation6 + $0x70] ss:$8 sps:$4 sm:$0xff]   ;;  %v9131_v48 = vpack.c.bf16 %v17064_v60, %v17064_v60 }
0x25a6   :  { %12602 = vmatprep.subr.bf16.mxu0 %v13984_v56  ;;  %12624 = vmatprep.subr.bf16.mxu1 %v13986_v55  ;;  %v14008_v56 = vld [vmem:[#allocation6 + $0x4] ss:$8 sps:$4 sm:$0xff]  }
0x25a7   :  { %v14010_v55 = vld [vmem:[#allocation6 + $0x24] ss:$8 sps:$4 sm:$0xff]  }
0x25a9   :  { %12603 = vmatpush3.bf16.msra.mxu0 %v13985_v2  ;;  %12625 = vmatpush3.bf16.msra.mxu1 %v13987_v13  ;;  %v14009_v2 = vld [vmem:[#allocation6 + $0x14] ss:$8 sps:$4 sm:$0xff]  }
0x25aa   :  { %12604 = vmatprep.subr.bf16.mxu0 %v13988_v6  ;;  %12626 = vmatprep.subr.bf16.mxu1 %v13990_v29  ;;  %v14011_v13 = vld [vmem:[#allocation6 + $0x34] ss:$8 sps:$4 sm:$0xff]   ;;  %v14012_v6 = vld [vmem:[#allocation6 + $0x44] ss:$8 sps:$4 sm:$0xff]  }
0x25ab   :  { %v14014_v29 = vld [vmem:[#allocation6 + $0x64] ss:$8 sps:$4 sm:$0xff]  }
0x25ad   :  { %12605 = vmatpush3.bf16.msra.mxu0 %v13989_v12  ;;  %12627 = vmatpush3.bf16.msra.mxu1 %v13991_v58  ;;  %v14013_v12 = vld [vmem:[#allocation6 + $0x54] ss:$8 sps:$4 sm:$0xff]  }
0x25ae   :  { %13273 = vmatprep.subr.bf16.mxu0 %v14489_v0  ;;  %13293 = vmatprep.subr.bf16.mxu1 %v14489_v0  ;;  %v14015_v58 = vld [vmem:[#allocation6 + $0x74] ss:$8 sps:$4 sm:$0xff]  }
0x2663   :  { %v8560_v31 = vpop.f32.mrb[200].mxu0  ;;  %v8601_v4 = vpop.f32.mrb[168].mxu1 }
0x2664   :  { %v8561_v52 = vadd.f32 %v8560_v31, %v8353_v47  ;;  %v8602_v45 = vadd.f32 %v8601_v4, %v8361_v42  ;;  %v8562_v18 = vpop.f32.mrb[201].mxu0  ;;  %v8603_v24 = vpop.f32.mrb[169].mxu1  ;;  %v8619_v42 = vrot.slane %v17045_v28, %v15242_v27 }
0x2665   :  { %v8563_v49 = vadd.f32 %v8562_v18, %v8357_v40  ;;  %v8604_v25 = vadd.f32 %v8603_v24, %v8365_v11  ;;  %v8564_v8 = vpop.f32.mrb[202].mxu0  ;;  %v8605_v33 = vpop.f32.mrb[170].mxu1 }
0x2666   :  { %v8608_v19 = vmax.f32 %v8561_v52, 0.0  ;;  %v8610_v54 = vmax.f32 %v8602_v45, 0.0  ;;  %v8565_v44 = vpop.f32.mrb[203].mxu0  ;;  %v8606_v50 = vpop.f32.mrb[171].mxu1 }
0x2667   :  { %v8609_v63 = vmax.f32 %v8563_v49, 0.0  ;;  %v8611_v9 = vmax.f32 %v8604_v25, 0.0  ;;  %v17088_v44 = vld [vmem:[%s17611_s14] sm:$0xff] }
0x2668   :  { %v8612_v26 = vpack.c.bf16 %v8608_v19, %v8608_v19  ;;  %v8614_v37 = vpack.c.bf16 %v8610_v54, %v8610_v54  ;;  %v4190_v54 = vadd.f32 %v16041_v5, %v15688_v57  ;;  %v9135_v50 = vrot.slane %v17088_v44, %v14787_v43  ;;  %v4195_v57 = vpop.xlane.xlu1 %4194 }
0x2669   :  { %v8613_v46 = vpack.c.bf16 %v8609_v63, %v8609_v63  ;;  %v8615_v10 = vpack.c.bf16 %v8611_v9, %v8611_v9 }
0x266b   :  { %8844 = vmatprep.mubr.bf16.mxu0 %v8613_v46  ;;  %8884 = vmatprep.mubr.bf16.mxu1 %v8615_v10 }
0x266c   :  { %8845 = vmatmul.mubr.bf16.vlgmr.msra.gmra.mrb[204].mxu0 %v8612_v26  ;;  %8885 = vmatmul.mubr.bf16.vlgmr.msra.gmra.mrb[172].mxu1 %v8614_v37  ;;  %v4197_v26 = vmul.f32 0.0078125, %v4195_v57 }
0x266d   :  { %13274 = vmatpush3.bf16.msra.mxu0 %v13992_v22  ;;  %13289 = vmatprep.mubr.msk.bf16.mxu0 %vm14490_vm0, %v14489_v0 }
0x266e   :  { %13275 = vmatprep.subr.bf16.mxu0 %v14489_v0  ;;  %13309 = vmatprep.mubr.msk.bf16.mxu1 %vm14490_vm0, %v14489_v0 }
0x266f   :  { %13294 = vmatpush3.bf16.msra.mxu1 %v14008_v56 }
0x2670   :  { %13295 = vmatprep.subr.bf16.mxu1 %v14489_v0 }
0x2671   :  { %13276 = vmatpush3.bf16.msra.mxu0 %v13994_v14 }
0x2672   :  { %13277 = vmatprep.subr.bf16.mxu0 %v14489_v0 }
0x2673   :  { %13296 = vmatpush3.bf16.msra.mxu1 %v14009_v2 }
0x2674   :  { %13297 = vmatprep.subr.bf16.mxu1 %v14489_v0 }
0x2675   :  { %13278 = vmatpush3.bf16.msra.mxu0 %v13996_v39  ;;  %v17096_v39 = vsub.f32 %v16858_v41, %v4197_v26 }
0x2676   :  { %13279 = vmatprep.subr.bf16.mxu0 %v14489_v0 }
0x2677   :  { %13298 = vmatpush3.bf16.msra.mxu1 %v14010_v55 }
0x2678   :  { %13299 = vmatprep.subr.bf16.mxu1 %v14489_v0 }
0x2679   :  { %13280 = vmatpush3.bf16.msra.mxu0 %v13998_v59 }
0x267a   :  { %13281 = vmatprep.subr.bf16.mxu0 %v14489_v0 }
0x267b   :  { %13300 = vmatpush3.bf16.msra.mxu1 %v14011_v13 }
0x267c   :  { %13301 = vmatprep.subr.bf16.mxu1 %v14489_v0 }
0x267d   :  { %13282 = vmatpush3.bf16.msra.mxu0 %v14000_v38  ;;  %v4201_v38 = vmul.f32 %v17096_v39, %v17096_v39 }
0x267e   :  { %13283 = vmatprep.subr.bf16.mxu0 %v14489_v0 }
0x267f   :  { %13302 = vmatpush3.bf16.msra.mxu1 %v14012_v6 }
0x2680   :  { %13303 = vmatprep.subr.bf16.mxu1 %v14489_v0 }
0x2681   :  { %13284 = vmatpush3.bf16.msra.mxu0 %v14002_v16  ;;  %v14016_v16 = vld [vmem:[#allocation7 + $0x8] ss:$16 sps:$4 sm:$0xff]  }
0x2682   :  { %13285 = vmatprep.subr.bf16.mxu0 %v14489_v0 }
0x2683   :  { %13304 = vmatpush3.bf16.msra.mxu1 %v14013_v12 }
0x2684   :  { %13305 = vmatprep.subr.bf16.mxu1 %v14489_v0 }
0x2685   :  { %13286 = vmatpush3.bf16.msra.mxu0 %v14004_v61 }
0x2686   :  { %13287 = vmatprep.subr.bf16.mxu0 %v14489_v0 }
0x2687   :  { %13306 = vmatpush3.bf16.msra.mxu1 %v14014_v29 }
0x2688   :  { %13307 = vmatprep.subr.bf16.mxu1 %v14489_v0 }
0x2689   :  { %13288 = vmatpush3.bf16.msra.mxu0 %v14006_v62 }
0x268a   :  { %13313 = vmatprep.subr.bf16.mxu0 %v14489_v0 }
0x268b   :  { %13308 = vmatpush3.bf16.msra.mxu1 %v14015_v58 }
0x268c   :  { %13290 = vmatmul.mubr.bf16.vlgmr.msra.gmra.mrb[208].mxu0 %v9131_v48  ;;  %9514 = vmatprep.subr.bf16.mxu1 %v14016_v16  ;;  %v9228_v48 = vrot.slane %v17088_v44, %v15005_v3 }
0x268d   :  { %13329 = vmatprep.mubr.msk.bf16.mxu0 %vm14490_vm0, %v14489_v0 }
0x273f   :  { %v12606_v17 = vpop.f32.mrb[204].mxu0  ;;  %v12628_v47 = vpop.f32.mrb[172].mxu1 }
0x2740   :  { %v12607_v36 = vpop.f32.mrb[205].mxu0  ;;  %v12629_v40 = vpop.f32.mrb[173].mxu1 }
0x2741   :  { %v12608_v11 = vadd.f32 %v12607_v36, %v12606_v17  ;;  %v12630_v31 = vadd.f32 %v12629_v40, %v12628_v47  ;;  %v12609_v4 = vpop.f32.mrb[206].mxu0  ;;  %v12631_v52 = vpop.f32.mrb[174].mxu1  ;;  %v14019_v36 = vld [vmem:[#allocation7 + $0x4] ss:$16 sps:$4 sm:$0xff]   ;;  %v14021_v40 = vld [vmem:[#allocation7 + $0x28] ss:$16 sps:$4 sm:$0xff]  }
0x2742   :  { %v12610_v45 = vpop.f32.mrb[207].mxu0  ;;  %v12632_v18 = vpop.f32.mrb[175].mxu1  ;;  %v14031_v4 = vld [vmem:[#allocation7 + $0x68] ss:$16 sps:$4 sm:$0xff]   ;;  %v14034_v52 = vld [vmem:[#allocation7 + $0x64] ss:$16 sps:$4 sm:$0xff]  }
0x2743   :  { %v8847_v24 = vadd.f32 %v12608_v11, %v8619_v42  ;;  %v14024_v11 = vld [vmem:[#allocation7 + $0x24] ss:$16 sps:$4 sm:$0xff]   ;;  %v14036_v45 = vld [vmem:[#allocation7 + $0x88] ss:$16 sps:$4 sm:$0xff]  }
0x2744   :  { %v14039_v18 = vld [vmem:[#allocation7 + $0x84] ss:$16 sps:$4 sm:$0xff]  }
0x2745   :  { %v8887_v49 = vadd.f32 %v12630_v31, %v8847_v24  ;;  %v14026_v31 = vld [vmem:[#allocation7 + $0x48] ss:$16 sps:$4 sm:$0xff]  }
0x2746   :  { %v14041_v24 = vld [vmem:[#allocation7 + $0xa8] ss:$16 sps:$4 sm:$0xff]  }
0x2747   :  { %v8893_v25 = vcombine.high %v8887_v49, %v8887_v49  ;;  %v8895_v8 = vadd.f32 %v8887_v49, %v16947_v51  ;;  %v14044_v49 = vld [vmem:[#allocation7 + $0xa4] ss:$16 sps:$4 sm:$0xff]  }
0x2749   :  { %v8896_v33 = vadd.f32 %v8893_v25, %v16949_v21  ;;  %v14046_v25 = vld [vmem:[#allocation7 + $0xc8] ss:$16 sps:$4 sm:$0xff]  }
0x274b   :  { %v8899_v19 = vcombine.low %v8895_v8, %v8896_v33 }
0x274d   :  { %8901 = vadd.xlane.f32.xlu0 %v8899_v19  ;;  %v14054_v19 = vld [vmem:[#allocation7 + $0xe4] ss:$16 sps:$4 sm:$0xff]  }
0x2751   :  { %4192 = vadd.xlane.f32.xlu0 %v4190_v54 }
0x275f   :  { %v9218_v63 = vpop.f32.mrb[208].mxu0 }
0x2760   :  { %v9219_v9 = vadd.f32 %v9218_v63, %v9135_v50  ;;  %v13291_v46 = vpop.f32.mrb[209].mxu0  ;;  %v14057_v50 = vld [vmem:[#allocation7 + $0x20] ss:$16 sps:$4 sm:$0xff]  }
0x2761   :  { %v9221_v51 = vpop.f32.mrb[210].mxu0 }
0x2762   :  { %v9224_v10 = vpack.c.bf16 %v9219_v9, %v9219_v9  ;;  %v13292_v21 = vpop.f32.mrb[211].mxu0 }
0x2764   :  { %13310 = vmatmul.mubr.bf16.vlgmr.msra.gmra.mrb[176].mxu1 %v9224_v10 }
0x2765   :  { %9546 = vmatprep.mubr.bf16.mxu1 %v14491_v30  ;;  %9515 = vmatpush1.bf16.msra.mxu1 %v14019_v36 }
0x2766   :  { %9516 = vmatprep.subr.bf16.mxu1 %v14021_v40 }
0x2769   :  { %9517 = vmatpush1.bf16.msra.mxu1 %v14024_v11 }
0x276a   :  { %9518 = vmatprep.subr.bf16.mxu1 %v14026_v31 }
0x27da   :  { %v8902_v22 = vpop.xlane.xlu0 %8901 }
0x27db   :  { %v8903_v61 = vmul.f32 0.0078125, %v8902_v22 }
0x27dd   :  { %v8911_v53 = vrot.slane %v8903_v61, %v16299_v15  ;;  %v8918_v62 = vrot.slane %v8903_v61, %v16302_v23 }
0x27de   :  { %v4193_v5 = vpop.xlane.xlu0 %4192 }
0x27df   :  { %v4196_v37 = vmul.f32 0.0078125, %v4193_v5  ;;  %v17106_v41 = vsub.f32 %v8895_v8, %v8911_v53  ;;  %v17108_v56 = vsub.f32 %v8896_v33, %v8918_v62  ;;  %v14049_v8 = vld [vmem:[#allocation7 + $0xc4] ss:$16 sps:$4 sm:$0xff]   ;;  %v14051_v33 = vld [vmem:[#allocation7 + $0xe8] ss:$16 sps:$4 sm:$0xff]  }
0x27e0   :  { %v14332_v62 = vld [vmem:[#allocation4 + $0x20] sm:$0xff] }
0x27e1   :  { %v17093_v14 = vsub.f32 %v4190_v54, %v4196_v37  ;;  %v8923_v58 = vmul.f32 %v17106_v41, %v17106_v41  ;;  %v8924_v17 = vmul.f32 %v17108_v56, %v17108_v56  ;;  %v14056_v54 = vld [vmem:[#allocation7] ss:$16 sps:$4 sm:$0xff]  }
0x27e2   :  { %13314 = vmatpush3.bf16.msra.mxu0 %v14056_v54  ;;  %v14063_v54 = vld [vmem:[#allocation7 + $0xe0] ss:$16 sps:$4 sm:$0xff]  }
0x27e3   :  { %v4200_v59 = vmul.f32 %v17093_v14, %v17093_v14  ;;  %v8927_v42 = vcombine.low %v8923_v58, %v8924_v17  ;;  %13315 = vmatprep.subr.bf16.mxu0 %v14489_v0 }
0x27e5   :  { %4202 = vadd.xlane.f32.xlu1 %v4200_v59 }
0x27e6   :  { %13316 = vmatpush3.bf16.msra.mxu0 %v14057_v50 }
0x27e7   :  { %13317 = vmatprep.subr.bf16.mxu0 %v14489_v0 }
0x27e9   :  { %4204 = vadd.xlane.f32.xlu1 %v4201_v38 }
0x2837   :  { %v9295_v2 = vpop.f32.mrb[176].mxu1 }
0x2838   :  { %v9296_v55 = vadd.f32 %v9295_v2, %v9228_v48  ;;  %v13311_v13 = vpop.f32.mrb[177].mxu1  ;;  %v4217_v48 = vrot.slane %v14332_v62, %v15330_v20 }
0x2839   :  { %v9298_v6 = vpop.f32.mrb[178].mxu1  ;;  %v4223_v13 = vrot.slane %v14332_v62, %v15335_v35  ;;  %v14053_v62 = vld [vmem:[#allocation7 + $0xec] ss:$16 sps:$4 sm:$0xff]  }
0x283a   :  { %v9301_v12 = vadd.f32 %v9296_v55, %v17064_v60  ;;  %v13312_v29 = vpop.f32.mrb[179].mxu1  ;;  %v14029_v60 = vld [vmem:[#allocation7 + $0x44] ss:$16 sps:$4 sm:$0xff]  }
0x283b   :  { %9519 = vmatpush1.bf16.msra.mxu1 %v14029_v60 }
0x283c   :  { %v9302_v47 = vsel %vm5661_vm10, %v9301_v12, 0.0  ;;  %9520 = vmatprep.subr.bf16.mxu1 %v14031_v4  ;;  %v14059_v4 = vld [vmem:[#allocation7 + $0x60] ss:$16 sps:$4 sm:$0xff]  }
0x283d   :  { %9303 = vadd.xlane.f32.xlu0 %v9302_v47 }
0x283f   :  { %9521 = vmatpush1.bf16.msra.mxu1 %v14034_v52 }
0x2840   :  { %9522 = vmatprep.subr.bf16.mxu1 %v14036_v45 }
0x2841   :  { %8929 = vadd.xlane.f32.xlu0 %v8927_v42  ;;  %v14058_v42 = vld [vmem:[#allocation7 + $0x40] ss:$16 sps:$4 sm:$0xff]  }
0x2842   :  { %13318 = vmatpush3.bf16.msra.mxu0 %v14058_v42 }
0x2843   :  { %9523 = vmatpush1.bf16.msra.mxu1 %v14039_v18  ;;  %13319 = vmatprep.subr.bf16.mxu0 %v14489_v0  ;;  %v14060_v18 = vld [vmem:[#allocation7 + $0x80] ss:$16 sps:$4 sm:$0xff]  }
0x2844   :  { %9524 = vmatprep.subr.bf16.mxu1 %v14041_v24 }
0x2846   :  { %13320 = vmatpush3.bf16.msra.mxu0 %v14059_v4 }
0x2847   :  { %9525 = vmatpush1.bf16.msra.mxu1 %v14044_v49  ;;  %13321 = vmatprep.subr.bf16.mxu0 %v14489_v0 }
0x2848   :  { %9526 = vmatprep.subr.bf16.mxu1 %v14046_v25 }
0x284a   :  { %13322 = vmatpush3.bf16.msra.mxu0 %v14060_v18 }
0x284b   :  { %9527 = vmatpush1.bf16.msra.mxu1 %v14049_v8  ;;  %13323 = vmatprep.subr.bf16.mxu0 %v14489_v0 }
0x284c   :  { %9528 = vmatprep.subr.bf16.mxu1 %v14051_v33  ;;  %v14062_v33 = vld [vmem:[#allocation7 + $0xc0] ss:$16 sps:$4 sm:$0xff]  }
0x284f   :  { %9529 = vmatpush1.bf16.msra.mxu1 %v14054_v19 }
0x2872   :  { %v4203_v63 = vpop.xlane.xlu1 %4202 }
0x2873   :  { %v4206_v9 = vmul.f32 0.0078125, %v4203_v63 }
0x2875   :  { %v4208_v51 = vadd.f32 1e-05, %v4206_v9 }
0x2876   :  { %v4205_v46 = vpop.xlane.xlu1 %4204 }
0x2877   :  { %v4207_v10 = vmul.f32 0.0078125, %v4205_v46  ;;  %14298 = vrsqrt.f32 %v4208_v51  ;;  %v9318_v46 = vrot.slane %v17088_v44, %v15122_v1 }
0x2879   :  { %v4209_v22 = vadd.f32 1e-05, %v4207_v10 }
0x287b   :  { %14300 = vrsqrt.f32 %v4209_v22 }
0x2881   :  { %v14299_v61 = vpop.eup %14298 }
0x2882   :  { %v4212_v53 = vmul.f32 %v14299_v61, %v17093_v14  ;;  %v8965_v14 = vrot.slane %v17045_v28, %v15335_v35  ;;  %v14043_v61 = vld [vmem:[#allocation7 + $0xac] ss:$16 sps:$4 sm:$0xff]  }
0x2884   :  { %v4218_v55 = vmul.f32 %v4217_v48, %v4212_v53  ;;  %v14048_v53 = vld [vmem:[#allocation7 + $0xcc] ss:$16 sps:$4 sm:$0xff]  }
0x2885   :  { %v14301_v2 = vpop.eup %14300 }
0x2886   :  { %v4213_v6 = vmul.f32 %v14301_v2, %v17096_v39  ;;  %v4224_v17 = vadd.f32 %v4223_v13, %v4218_v55 }
0x2888   :  { %v4219_v36 = vmul.f32 %v4217_v48, %v4213_v6  ;;  %v8975_v60 = vcombine.high %v4224_v17, %v4224_v17  ;;  %v8982_v48 = vld [vmem:[%s17611_s14 + $0x8] sm:$0xff] }
0x2889   :  { %v9433_v2 = vrot.slane %v8982_v48, %v15242_v27 }
0x28ca   :  { %v9304_v21 = vpop.xlane.xlu0 %9303 }
0x28cb   :  { %v9305_v57 = vmul.f32 0.0078125, %v9304_v21  ;;  %v9323_v21 = vrot.slane %v17088_v44, %v15127_v7 }
0x28cd   :  { %v17118_v5 = vsub.f32 %v9301_v12, %v9305_v57  ;;  %v8956_v12 = vrot.slane %v17045_v28, %v15330_v20  ;;  %v9418_v28 = vcombine.low %v4224_v17, %v8975_v60 }
0x28ce   :  { %v8930_v26 = vpop.xlane.xlu0 %8929 }
0x28cf   :  { %v8931_v37 = vmul.f32 0.0078125, %v8930_v26  ;;  %v9307_v59 = vmul.f32 %v17118_v5, %v17118_v5  ;;  %v8958_v31 = vcombine.high %v8956_v12, %v8956_v12  ;;  %v14018_v26 = vld [vmem:[#allocation7 + $0xc] ss:$16 sps:$4 sm:$0xff]  }
0x28d1   :  { %v8932_v38 = vadd.f32 1e-05, %v8931_v37  ;;  %v9308_v16 = vsel %vm5661_vm10, %v9307_v59, 0.0  ;;  %v14023_v59 = vld [vmem:[#allocation7 + $0x2c] ss:$16 sps:$4 sm:$0xff]  }
0x28d2   :  { %9309 = vadd.xlane.f32.xlu0 %v9308_v16  ;;  %v14038_v16 = vld [vmem:[#allocation7 + $0x8c] ss:$16 sps:$4 sm:$0xff]  }
0x28d3   :  { %14302 = vrsqrt.f32 %v8932_v38  ;;  %v14028_v38 = vld [vmem:[#allocation7 + $0x4c] ss:$16 sps:$4 sm:$0xff]  }
0x28dd   :  { %v14303_v29 = vpop.eup %14302 }
0x28de   :  { %v8941_v58 = vrot.slane %v14303_v29, %v16299_v15  ;;  %v8948_v47 = vrot.slane %v14303_v29, %v16302_v23  ;;  %v4225_v15 = vadd.f32 %v4223_v13, %v4219_v36  ;;  %v8967_v23 = vcombine.high %v8965_v14, %v8965_v14 }
0x28df   :  { %v9429_v13 = vrot.slane %v17088_v44, %v15242_v27 }
0x28e0   :  { %v8951_v40 = vmul.f32 %v8941_v58, %v17106_v41  ;;  %v8952_v11 = vmul.f32 %v8948_v47, %v17108_v56  ;;  %v14061_v56 = vld [vmem:[#allocation7 + $0xa0] ss:$16 sps:$4 sm:$0xff]   ;;  %v8976_v25 = vcombine.high %v4225_v15, %v4225_v15 }
0x28e1   :  { %13324 = vmatpush3.bf16.msra.mxu0 %v14061_v56 }
0x28e2   :  { %v8960_v39 = vmul.f32 %v8956_v12, %v8951_v40  ;;  %v8961_v45 = vmul.f32 %v8958_v31, %v8952_v11  ;;  %13325 = vmatprep.subr.bf16.mxu0 %v14489_v0 }
0x28e4   :  { %v8969_v52 = vadd.f32 %v8965_v14, %v8960_v39  ;;  %v8970_v49 = vadd.f32 %v8967_v23, %v8961_v45  ;;  %v14496_v45 = vmov 1966171168  }
0x28e5   :  { %13326 = vmatpush3.bf16.msra.mxu0 %v14062_v33  ;;  %v9581_v23 = vunpack.c.l.s4 %v14496_v45 }
0x28e6   :  { %v9419_v24 = vcombine.low %v8969_v52, %v4225_v15  ;;  %v9420_v8 = vcombine.low %v8976_v25, %v8970_v49  ;;  %13327 = vmatprep.subr.bf16.mxu0 %v14489_v0 }
0x28e7   :  { %v9582_v18 = vunpack.c.0.s8 %v9581_v23 }
0x28e8   :  { %v9424_v41 = vpack.c.bf16 %v9419_v24, %v9418_v28  ;;  %v9425_v19 = vpack.c.bf16 %v9420_v8, %v9420_v8  ;;  %v9329_v28 = vrot.slane %v17088_v44, %v14773_v34 }
0x28e9   :  { %13328 = vmatpush3.bf16.msra.mxu0 %v14063_v54  ;;  %v9585_v24 = vsub.s32 %v9582_v18, %v14770_v32 }
0x28ea   :  { %9547 = vmatmul.mubr.bf16.vlgmr.msra.gmra.mrb[180].mxu1 %v9424_v41  ;;  %13333 = vmatprep.subr.bf16.mxu0 %v14489_v0 }
0x28eb   :  { %9556 = vmatprep.mubr.bf16.mxu1 %v14491_v30 }
0x28f2   :  { %9557 = vmatmul.mubr.bf16.gmra.mrb[184].mxu1 %v9425_v19 }
0x28f3   :  { %10665 = vmatprep.mubr.bf16.mxu1 %v14491_v30 }
0x295f   :  { %v9310_v50 = vpop.xlane.xlu0 %9309 }
0x2960   :  { %v9311_v63 = vmul.f32 0.0078125, %v9310_v50 }
0x2962   :  { %v9312_v9 = vadd.f32 1e-05, %v9311_v63 }
0x2964   :  { %14304 = vrsqrt.f32 %v9312_v9 }
0x296e   :  { %v14305_v51 = vpop.eup %14304 }
0x296f   :  { %v9314_v10 = vmul.f32 %v14305_v51, %v17118_v5  ;;  %v14033_v5 = vld [vmem:[#allocation7 + $0x6c] ss:$16 sps:$4 sm:$0xff]  }
0x2971   :  { %v9319_v22 = vmul.f32 %v9318_v46, %v9314_v10 }
0x2973   :  { %v17148_v57 = vadd.f32 %v9323_v21, %v9319_v22 }
0x2975   :  { %v9325_v37 = vpack.c.bf16 %v17148_v57, %v17148_v57 }
0x2977   :  { %13330 = vmatmul.mubr.bf16.vlgmr.msra.gmra.mrb[212].mxu0 %v9325_v37 }
0x2978   :  { %13334 = vmatpush3.bf16.msra.mxu0 %v14018_v26  ;;  %13349 = vmatprep.mubr.msk.bf16.mxu0 %vm14490_vm0, %v14489_v0 }
0x2979   :  { %13335 = vmatprep.subr.bf16.mxu0 %v14489_v0 }
0x297c   :  { %13336 = vmatpush3.bf16.msra.mxu0 %v14023_v59 }
0x297d   :  { %13337 = vmatprep.subr.bf16.mxu0 %v14489_v0 }
0x2980   :  { %13338 = vmatpush3.bf16.msra.mxu0 %v14028_v38 }
0x2981   :  { %13339 = vmatprep.subr.bf16.mxu0 %v14489_v0 }
0x2984   :  { %13340 = vmatpush3.bf16.msra.mxu0 %v14033_v5 }
0x2985   :  { %13341 = vmatprep.subr.bf16.mxu0 %v14489_v0 }
0x2988   :  { %13342 = vmatpush3.bf16.msra.mxu0 %v14038_v16 }
0x2989   :  { %13343 = vmatprep.subr.bf16.mxu0 %v14489_v0 }
0x298c   :  { %13344 = vmatpush3.bf16.msra.mxu0 %v14043_v61 }
0x298d   :  { %13345 = vmatprep.subr.bf16.mxu0 %v14489_v0 }
0x2990   :  { %13346 = vmatpush3.bf16.msra.mxu0 %v14048_v53 }
0x2991   :  { %13347 = vmatprep.subr.bf16.mxu0 %v14489_v0 }
0x2994   :  { %13348 = vmatpush3.bf16.msra.mxu0 %v14053_v62 }
0x29bd   :  { %v9548_v55 = vpop.f32.mrb[180].mxu1 }
0x29be   :  { %v9550_v6 = vpop.f32.mrb[181].mxu1  ;;  %v9549_v50 = vadd.f32 %v9548_v55, %v9429_v13 }
0x29bf   :  { %v17167_v12 = vadd.f32 %v9550_v6, %v9433_v2  ;;  %v9552_v29 = vpop.f32.mrb[182].mxu1 }
0x29c0   :  { %v9553_v58 = vadd.f32 %v9552_v29, %v9429_v13  ;;  %v9554_v17 = vpop.f32.mrb[183].mxu1 }
0x29c1   :  { %v17169_v47 = vadd.f32 %v9554_v17, %v9433_v2  ;;  %9964 = vrot.lane.b32.xlu1 %v17167_v12, %s14495_s20 }
0x29c3   :  { %v9573_v42 = vcombine.low %v9553_v58, %v17169_v47  ;;  %v9574_v14 = vcombine.high %v9553_v58, %v17169_v47 }
0x29c5   :  { %v9558_v36 = vpop.f32.mrb[184].mxu1 }
0x29c6   :  { %v9559_v40 = vadd.f32 %v9558_v36, %v9429_v13  ;;  %v9560_v11 = vpop.f32.mrb[185].mxu1 }
0x29c7   :  { %v17175_v27 = vadd.f32 %v9560_v11, %v9433_v2  ;;  %v9562_v31 = vpop.f32.mrb[186].mxu1 }
0x29c8   :  { %v12127_v39 = vcombine.low %v9574_v14, %v9559_v40  ;;  %v9563_v60 = vpop.f32.mrb[187].mxu1 }
0x29c9   :  { %v9575_v4 = vcombine.low %v9559_v40, %v17175_v27  ;;  %v9576_v15 = vcombine.high %v9559_v40, %v17175_v27 }
0x29cb   :  { %v17180_v52 = vcombine.high %v17169_v47, %v9575_v4 }
0x2a33   :  { %v17217_v26 = vpop.permute.xlu1 %9964 }
0x2a4a   :  { %v9412_v41 = vpop.f32.mrb[212].mxu0 }
0x2a4b   :  { %v9413_v49 = vadd.f32 %v9412_v41, %v9329_v28  ;;  %v13331_v56 = vpop.f32.mrb[213].mxu0 }
0x2a4c   :  { %v9415_v25 = vpop.f32.mrb[214].mxu0 }
0x2a4d   :  { %v9586_v8 = vrot.slane %v9413_v49, %v9585_v24  ;;  %v13332_v33 = vpop.f32.mrb[215].mxu0 }
0x2a4f   :  { %v9587_v19 = vcombine.high %v9586_v8, %v9586_v8  ;;  %v9594_v54 = vrot.slane %v9586_v8, %v9585_v24 }
0x2a51   :  { %v9601_v63 = vrot.slane %v9587_v19, %v9585_v24  ;;  %v9605_v9 = vrot.slane %v9594_v54, %v14787_v43 }
0x2a53   :  { %v9609_v46 = vrot.slane %v9601_v63, %v14787_v43  ;;  %v9616_v51 = vmul.f32 %v9605_v9, %v9549_v50  ;;  %v9617_v10 = vmul.f32 %v9605_v9, %v9573_v42 }
0x2a55   :  { %v9618_v21 = vmul.f32 %v12127_v39, %v9609_v46  ;;  %v9619_v44 = vmul.f32 %v9609_v46, %v9576_v15  ;;  %9640 = vrot.lane.b32.xlu0 %v9617_v10, %s14495_s20  ;;  %9638 = vrot.lane.b32.xlu1 %v9616_v51, %s14495_s20  ;;  %v9621_v32 = vsel %vm9620_vm13, %v9616_v51, 0.0  ;;  %v9625_v22 = vsel %vm9624_vm14, %v9617_v10, 0.0 }
0x2a57   :  { %v9628_v5 = vsel %vm9620_vm13, %v9618_v21, 0.0  ;;  %v9631_v61 = vsel %vm9624_vm14, %v9619_v44, 0.0 }
0x2a59   :  { %9662 = vrot.lane.b32.xlu0 %v9616_v51, %s14492_s24  ;;  %9664 = vrot.lane.b32.xlu1 %v9617_v10, %s14492_s24 }
0x2a5d   :  { %9686 = vrot.lane.b32.xlu0 %v9616_v51, %s14497_s2  ;;  %9688 = vrot.lane.b32.xlu1 %v9617_v10, %s14497_s2 }
0x2a61   :  { %9710 = vrot.lane.b32.xlu0 %v9616_v51, %s14487_s12  ;;  %9712 = vrot.lane.b32.xlu1 %v9617_v10, %s14487_s12 }
0x2a65   :  { %9734 = vrot.lane.b32.xlu0 %v9616_v51, %s14498_s0  ;;  %9736 = vrot.lane.b32.xlu1 %v9617_v10, %s14498_s0 }
0x2a69   :  { %9758 = vrot.lane.b32.xlu0 %v9616_v51, %s17621_s17  ;;  %9760 = vrot.lane.b32.xlu1 %v9617_v10, %s17621_s17 }
0x2a6d   :  { %9782 = vrot.lane.b32.xlu0 %v9616_v51, %s14480_s22  ;;  %9784 = vrot.lane.b32.xlu1 %v9617_v10, %s14480_s22 }
0x2a8c   :  { %9622 = vadd.xlane.f32.xlu0 %v9621_v32 }
0x2a91   :  { %9626 = vadd.xlane.f32.xlu1 %v9625_v22 }
0x2aa2   :  { %9666 = vrot.lane.b32.xlu0 %v9618_v21, %s14492_s24  ;;  %9642 = vrot.lane.b32.xlu1 %v9618_v21, %s14495_s20 }
0x2aa6   :  { %9690 = vrot.lane.b32.xlu0 %v9618_v21, %s14497_s2  ;;  %9644 = vrot.lane.b32.xlu1 %v9619_v44, %s14495_s20 }
0x2aaa   :  { %9714 = vrot.lane.b32.xlu0 %v9618_v21, %s14487_s12  ;;  %9668 = vrot.lane.b32.xlu1 %v9619_v44, %s14492_s24 }
0x2aae   :  { %9738 = vrot.lane.b32.xlu0 %v9618_v21, %s14498_s0  ;;  %9692 = vrot.lane.b32.xlu1 %v9619_v44, %s14497_s2 }
0x2ab2   :  { %9762 = vrot.lane.b32.xlu0 %v9618_v21, %s17621_s17  ;;  %9716 = vrot.lane.b32.xlu1 %v9619_v44, %s14487_s12 }
0x2ab6   :  { %9786 = vrot.lane.b32.xlu0 %v9618_v21, %s14480_s22  ;;  %9740 = vrot.lane.b32.xlu1 %v9619_v44, %s14498_s0 }
0x2aba   :  { %9764 = vrot.lane.b32.xlu1 %v9619_v44, %s17621_s17 }
0x2abe   :  { %9788 = vrot.lane.b32.xlu1 %v9619_v44, %s14480_s22 }
0x2ac7   :  { %v9639_v37 = vpop.permute.xlu1 %9638  ;;  %v9641_v59 = vpop.permute.xlu0 %9640 }
0x2ac8   :  { %v9653_v62 = vsel %vm9624_vm14, %v9641_v59, 0.0  ;;  %v9650_v13 = vsel %vm9620_vm13, %v9639_v37, 0.0 }
0x2acb   :  { %v9665_v38 = vpop.permute.xlu1 %9664  ;;  %v9663_v16 = vpop.permute.xlu0 %9662 }
0x2acc   :  { %v9677_v55 = vsel %vm9624_vm14, %v9665_v38, 0.0  ;;  %v9674_v17 = vsel %vm9620_vm13, %v9663_v16, 0.0 }
0x2acf   :  { %v9689_v53 = vpop.permute.xlu1 %9688  ;;  %v9687_v48 = vpop.permute.xlu0 %9686 }
0x2ad0   :  { %v9701_v29 = vsel %vm9624_vm14, %v9689_v53, 0.0  ;;  %v9698_v14 = vsel %vm9620_vm13, %v9687_v48, 0.0 }
0x2ad3   :  { %v9713_v2 = vpop.permute.xlu1 %9712  ;;  %v9711_v6 = vpop.permute.xlu0 %9710 }
0x2ad4   :  { %v9725_v42 = vsel %vm9624_vm14, %v9713_v2, 0.0  ;;  %v9722_v31 = vsel %vm9620_vm13, %v9711_v6, 0.0  ;;  %v17261_v6 = vcombine.low %v17169_v47, %v17169_v47 }
0x2ad5   :  { %9629 = vadd.xlane.f32.xlu0 %v9628_v5 }
0x2ad7   :  { %v9737_v58 = vpop.permute.xlu1 %9736  ;;  %v9735_v36 = vpop.permute.xlu0 %9734 }
0x2ad8   :  { %v9749_v11 = vsel %vm9624_vm14, %v9737_v58, 0.0  ;;  %v9746_v15 = vsel %vm9620_vm13, %v9735_v36, 0.0 }
0x2ad9   :  { %9632 = vadd.xlane.f32.xlu0 %v9631_v61 }
0x2adb   :  { %v9761_v40 = vpop.permute.xlu1 %9760  ;;  %v9759_v39 = vpop.permute.xlu0 %9758 }
0x2adc   :  { %v9773_v60 = vsel %vm9624_vm14, %v9761_v40, 0.0  ;;  %v9770_v23 = vsel %vm9620_vm13, %v9759_v39, 0.0 }
0x2add   :  { %9654 = vadd.xlane.f32.xlu0 %v9653_v62 }
0x2adf   :  { %v9785_v4 = vpop.permute.xlu1 %9784  ;;  %v9783_v18 = vpop.permute.xlu0 %9782 }
0x2ae0   :  { %v9797_v45 = vsel %vm9624_vm14, %v9785_v4, 0.0  ;;  %v9794_v28 = vsel %vm9620_vm13, %v9783_v18, 0.0 }
0x2ae1   :  { %9678 = vadd.xlane.f32.xlu0 %v9677_v55 }
0x2ae2   :  { %9651 = vadd.xlane.f32.xlu1 %v9650_v13  ;;  %v14499_v13 = vmov 1  }
0x2ae3   :  { %13435 = vset.pattern.permute.xlu0 %v14499_v13  ;;  %13434 = vset.pattern.permute.xlu1 %v14499_v13 }
0x2ae5   :  { %9702 = vadd.xlane.f32.xlu0 %v9701_v29  ;;  %v17269_v29 = vcombine.high %v17175_v27, %v17175_v27 }
0x2ae6   :  { %9675 = vadd.xlane.f32.xlu1 %v9674_v17 }
0x2ae9   :  { %9726 = vadd.xlane.f32.xlu0 %v9725_v42 }
0x2aea   :  { %9699 = vadd.xlane.f32.xlu1 %v9698_v14 }
0x2aed   :  { %9750 = vadd.xlane.f32.xlu0 %v9749_v11 }
0x2aee   :  { %9723 = vadd.xlane.f32.xlu1 %v9722_v31 }
0x2af1   :  { %9774 = vadd.xlane.f32.xlu0 %v9773_v60 }
0x2af2   :  { %9747 = vadd.xlane.f32.xlu1 %v9746_v15 }
0x2af5   :  { %9798 = vadd.xlane.f32.xlu0 %v9797_v45 }
0x2af6   :  { %9771 = vadd.xlane.f32.xlu1 %v9770_v23 }
0x2afa   :  { %9795 = vadd.xlane.f32.xlu1 %v9794_v28 }
0x2b19   :  { %v17235_v24 = vpop.xlane.xlu0 %9622 }
0x2b1d   :  { %v9667_v41 = vpop.permute.xlu0 %9666 }
0x2b1e   :  { %v17237_v49 = vpop.xlane.xlu1 %9626  ;;  %v9680_v54 = vsel %vm9620_vm13, %v9667_v41, 0.0 }
0x2b21   :  { %v9691_v56 = vpop.permute.xlu0 %9690 }
0x2b22   :  { %v9643_v25 = vpop.permute.xlu1 %9642  ;;  %v9704_v9 = vsel %vm9620_vm13, %v9691_v56, 0.0 }
0x2b23   :  { %v9656_v8 = vsel %vm9620_vm13, %v9643_v25, 0.0 }
0x2b24   :  { %9657 = vadd.xlane.f32.xlu1 %v9656_v8 }
0x2b25   :  { %v9715_v33 = vpop.permute.xlu0 %9714 }
0x2b26   :  { %v9645_v19 = vpop.permute.xlu1 %9644  ;;  %v9728_v21 = vsel %vm9620_vm13, %v9715_v33, 0.0 }
0x2b27   :  { %v9659_v50 = vsel %vm9624_vm14, %v9645_v19, 0.0 }
0x2b28   :  { %9681 = vadd.xlane.f32.xlu1 %v9680_v54  ;;  %9660 = vadd.xlane.f32.xlu0 %v9659_v50 }
0x2b29   :  { %v9739_v51 = vpop.permute.xlu0 %9738 }
0x2b2a   :  { %v9669_v63 = vpop.permute.xlu1 %9668  ;;  %v9752_v37 = vsel %vm9620_vm13, %v9739_v51, 0.0 }
0x2b2b   :  { %v9683_v46 = vsel %vm9624_vm14, %v9669_v63, 0.0 }
0x2b2c   :  { %9705 = vadd.xlane.f32.xlu1 %v9704_v9  ;;  %9684 = vadd.xlane.f32.xlu0 %v9683_v46 }
0x2b2d   :  { %v9763_v32 = vpop.permute.xlu0 %9762 }
0x2b2e   :  { %v9693_v10 = vpop.permute.xlu1 %9692  ;;  %v9776_v5 = vsel %vm9620_vm13, %v9763_v32, 0.0 }
0x2b2f   :  { %v9707_v44 = vsel %vm9624_vm14, %v9693_v10, 0.0 }
0x2b30   :  { %9729 = vadd.xlane.f32.xlu1 %v9728_v21  ;;  %9708 = vadd.xlane.f32.xlu0 %v9707_v44 }
0x2b31   :  { %v9787_v61 = vpop.permute.xlu0 %9786 }
0x2b32   :  { %v9717_v22 = vpop.permute.xlu1 %9716  ;;  %v9800_v62 = vsel %vm9620_vm13, %v9787_v61, 0.0 }
0x2b33   :  { %v9731_v59 = vsel %vm9624_vm14, %v9717_v22, 0.0 }
0x2b34   :  { %9753 = vadd.xlane.f32.xlu1 %v9752_v37  ;;  %9732 = vadd.xlane.f32.xlu0 %v9731_v59 }
0x2b36   :  { %v9741_v38 = vpop.permute.xlu1 %9740 }
0x2b37   :  { %v9755_v16 = vsel %vm9624_vm14, %v9741_v38, 0.0 }
0x2b38   :  { %9777 = vadd.xlane.f32.xlu1 %v9776_v5  ;;  %9756 = vadd.xlane.f32.xlu0 %v9755_v16 }
0x2b3a   :  { %v9765_v53 = vpop.permute.xlu1 %9764 }
0x2b3b   :  { %v9779_v48 = vsel %vm9624_vm14, %v9765_v53, 0.0 }
0x2b3c   :  { %9801 = vadd.xlane.f32.xlu1 %v9800_v62  ;;  %9780 = vadd.xlane.f32.xlu0 %v9779_v48 }
0x2b3e   :  { %v9789_v2 = vpop.permute.xlu1 %9788 }
0x2b3f   :  { %v9803_v55 = vsel %vm9624_vm14, %v9789_v2, 0.0 }
0x2b40   :  { %9804 = vadd.xlane.f32.xlu0 %v9803_v55 }
0x2b4d   :  { %9968 = vrot.lane.b32.xlu1 %v17180_v52, %s14495_s20 }
0x2b51   :  { %10014 = vrot.lane.b32.xlu1 %v17167_v12, %s14492_s24 }
0x2b55   :  { %10018 = vrot.lane.b32.xlu1 %v17180_v52, %s14492_s24 }
0x2b56   :  { %9966 = vrot.lane.b32.xlu0 %v17261_v6, %s14495_s20 }
0x2b59   :  { %10064 = vrot.lane.b32.xlu1 %v17167_v12, %s14497_s2 }
0x2b5a   :  { %9970 = vrot.lane.b32.xlu0 %v17269_v29, %s14495_s20 }
0x2b5d   :  { %10068 = vrot.lane.b32.xlu1 %v17180_v52, %s14497_s2 }
0x2b5e   :  { %10016 = vrot.lane.b32.xlu0 %v17261_v6, %s14492_s24 }
0x2b61   :  { %10114 = vrot.lane.b32.xlu1 %v17167_v12, %s14487_s12 }
0x2b62   :  { %10020 = vrot.lane.b32.xlu0 %v17269_v29, %s14492_s24  ;;  %v17283_v47 = vpop.xlane.xlu0 %9629 }
0x2b65   :  { %10118 = vrot.lane.b32.xlu1 %v17180_v52, %s14487_s12 }
0x2b66   :  { %10066 = vrot.lane.b32.xlu0 %v17261_v6, %s14497_s2  ;;  %v17289_v27 = vpop.xlane.xlu0 %9632 }
0x2b69   :  { %10164 = vrot.lane.b32.xlu1 %v17167_v12, %s14498_s0 }
0x2b6a   :  { %10070 = vrot.lane.b32.xlu0 %v17269_v29, %s14497_s2  ;;  %v9655_v58 = vpop.xlane.xlu0 %9654 }
0x2b6b   :  { %v9808_v60 = vsel %vm9806_vm15, %v17237_v49, %v9655_v58 }
0x2b6d   :  { %10168 = vrot.lane.b32.xlu1 %v17180_v52, %s14498_s0 }
0x2b6e   :  { %10116 = vrot.lane.b32.xlu0 %v17261_v6, %s14487_s12  ;;  %v9679_v17 = vpop.xlane.xlu0 %9678 }
0x2b6f   :  { %v9652_v42 = vpop.xlane.xlu1 %9651  ;;  %v9813_v15 = vsel %vm9811_vm1, %v9808_v60, %v9679_v17 }
0x2b70   :  { %v9807_v28 = vsel %vm9806_vm15, %v17235_v24, %v9652_v42 }
0x2b71   :  { %10214 = vrot.lane.b32.xlu1 %v17167_v12, %s17621_s17 }
0x2b72   :  { %10120 = vrot.lane.b32.xlu0 %v17269_v29, %s14487_s12  ;;  %v9703_v14 = vpop.xlane.xlu0 %9702 }
0x2b73   :  { %v9676_v36 = vpop.xlane.xlu1 %9675  ;;  %v9818_v23 = vsel %vm9816_vm4, %v9813_v15, %v9703_v14 }
0x2b74   :  { %v9812_v56 = vsel %vm9811_vm1, %v9807_v28, %v9676_v36 }
0x2b75   :  { %10218 = vrot.lane.b32.xlu1 %v17180_v52, %s17621_s17 }
0x2b76   :  { %10166 = vrot.lane.b32.xlu0 %v17261_v6, %s14498_s0  ;;  %v9727_v40 = vpop.xlane.xlu0 %9726 }
0x2b77   :  { %v9700_v11 = vpop.xlane.xlu1 %9699  ;;  %v9822_v18 = vsel %vm5657_vm12, %v9818_v23, %v9727_v40 }
0x2b78   :  { %v9817_v33 = vsel %vm9816_vm4, %v9812_v56, %v9700_v11 }
0x2b7a   :  { %10170 = vrot.lane.b32.xlu0 %v17269_v29, %s14498_s0  ;;  %v9751_v31 = vpop.xlane.xlu0 %9750 }
0x2b7b   :  { %v9724_v39 = vpop.xlane.xlu1 %9723  ;;  %v9827_v41 = vsel %vm9825_vm8, %v9822_v18, %v9751_v31 }
0x2b7c   :  { %v9821_v54 = vsel %vm5657_vm12, %v9817_v33, %v9724_v39 }
0x2b7e   :  { %10216 = vrot.lane.b32.xlu0 %v17261_v6, %s17621_s17  ;;  %v9775_v4 = vpop.xlane.xlu0 %9774 }
0x2b7f   :  { %v9748_v45 = vpop.xlane.xlu1 %9747  ;;  %v9831_v25 = vsel %vm146_vm2, %v9827_v41, %v9775_v4 }
0x2b80   :  { %v9826_v50 = vsel %vm9825_vm8, %v9821_v54, %v9748_v45 }
0x2b82   :  { %10220 = vrot.lane.b32.xlu0 %v17269_v29, %s17621_s17  ;;  %v9799_v49 = vpop.xlane.xlu0 %9798 }
0x2b83   :  { %v9772_v8 = vpop.xlane.xlu1 %9771  ;;  %v9836_v19 = vsel %vm9834_vm9, %v9831_v25, %v9799_v49 }
0x2b84   :  { %v9840_v24 = vmul.f32 0.25, %v9836_v19  ;;  %v9830_v63 = vsel %vm146_vm2, %v9826_v50, %v9772_v8 }
0x2b86   :  { %v9845_v10 = vsel %vm9844_vm11, %v9840_v24, -inf }
0x2b87   :  { %v9796_v9 = vpop.xlane.xlu1 %9795 }
0x2b88   :  { %v9835_v46 = vsel %vm9834_vm9, %v9830_v63, %v9796_v9 }
0x2b89   :  { %v9839_v51 = vmul.f32 0.25, %v9835_v46 }
0x2b8b   :  { %v9843_v21 = vsel %vm993_vm5, %v9839_v51, -inf }
0x2b8c   :  { %v9846_v44 = vmax.f32 %v9843_v21, %v9845_v10 }
0x2b8e   :  { %v9847_v32 = vrot.slane %v9846_v44, 4 }
0x2b90   :  { %v9848_v22 = vmax.f32 %v9846_v44, %v9847_v32  ;;  %v14500_v32 = vmov 4  }
0x2b92   :  { %v9849_v37 = vrot.slane %v9848_v22, 2 }
0x2b94   :  { %v9850_v59 = vmax.f32 %v9848_v22, %v9849_v37  ;;  %v14501_v22 = vmov 2  }
0x2b96   :  { %v9851_v38 = vrot.slane %v9850_v59, 1 }
0x2b98   :  { %v9852_v5 = vmax.f32 %v9850_v59, %v9851_v38 }
0x2b9a   :  { %v9862_v16 = vsub.f32 %v9839_v51, %v9852_v5  ;;  %v9863_v61 = vsub.f32 %v9840_v24, %v9852_v5 }
0x2b9c   :  { %v9866_v53 = vmul.f32 1.442695, %v9862_v16  ;;  %v9868_v62 = vmul.f32 1.442695, %v9863_v61 }
0x2b9e   :  { %14306 = vpow2.f32 %v9866_v53  ;;  %v14502_v53 = vmov 5  }
0x2b9f   :  { %14308 = vpow2.f32 %v9868_v62 }
0x2ba8   :  { %v14307_v48 = vpop.eup %14306 }
0x2ba9   :  { %v14309_v2 = vpop.eup %14308  ;;  %v9874_v55 = vsel %vm993_vm5, %v14307_v48, 0.0 }
0x2baa   :  { %v9875_v58 = vsel %vm9844_vm11, %v14309_v2, 0.0 }
0x2bab   :  { %v9876_v17 = vadd.f32 %v9875_v58, %v9874_v55  ;;  %v14503_v55 = vmov 3  }
0x2bad   :  { %v9877_v42 = vrot.slane %v9876_v17, 4 }
0x2baf   :  { %v9878_v14 = vadd.f32 %v9877_v42, %v9876_v17  ;;  %v14504_v17 = vmov 6  }
0x2bb1   :  { %v9879_v36 = vrot.slane %v9878_v14, 2  ;;  %v9658_v40 = vpop.xlane.xlu1 %9657 }
0x2bb2   :  { %v9809_v8 = vsel %vm9806_vm15, %v17283_v47, %v9658_v40 }
0x2bb3   :  { %v9880_v11 = vadd.f32 %v9879_v36, %v9878_v14  ;;  %v14505_v36 = vmov 7  }
0x2bb5   :  { %v9881_v31 = vrot.slane %v9880_v11, 1  ;;  %v9682_v39 = vpop.xlane.xlu1 %9681  ;;  %v9661_v60 = vpop.xlane.xlu0 %9660 }
0x2bb6   :  { %v9814_v33 = vsel %vm9811_vm1, %v9809_v8, %v9682_v39  ;;  %v9810_v63 = vsel %vm9806_vm15, %v17289_v27, %v9661_v60 }
0x2bb7   :  { %v9882_v4 = vadd.f32 %v9881_v31, %v9880_v11 }
0x2bb9   :  { %14310 = vrcp.f32 %v9882_v4  ;;  %v9706_v15 = vpop.xlane.xlu1 %9705  ;;  %v9685_v45 = vpop.xlane.xlu0 %9684 }
0x2bba   :  { %v9819_v50 = vsel %vm9816_vm4, %v9814_v33, %v9706_v15  ;;  %v9815_v46 = vsel %vm9811_vm1, %v9810_v63, %v9685_v45 }
0x2bbd   :  { %v9730_v23 = vpop.xlane.xlu1 %9729  ;;  %v9709_v18 = vpop.xlane.xlu0 %9708 }
0x2bbe   :  { %v9823_v24 = vsel %vm5657_vm12, %v9819_v50, %v9730_v23  ;;  %v9820_v21 = vsel %vm9816_vm4, %v9815_v46, %v9709_v18 }
0x2bc1   :  { %v9754_v28 = vpop.xlane.xlu1 %9753  ;;  %v9733_v41 = vpop.xlane.xlu0 %9732 }
0x2bc2   :  { %v9828_v9 = vsel %vm9825_vm8, %v9823_v24, %v9754_v28  ;;  %v9824_v27 = vsel %vm5657_vm12, %v9820_v21, %v9733_v41  ;;  %vm10350_vm12 = vcmask 654336  }
0x2bc3   :  { %v14311_v49 = vpop.eup %14310 }
0x2bc4   :  { %v17333_v56 = vmul.f32 %v14311_v49, %v14307_v48  ;;  %v17335_v25 = vmul.f32 %v14311_v49, %v14309_v2 }
0x2bc5   :  { %v9778_v19 = vpop.xlane.xlu1 %9777  ;;  %v9757_v54 = vpop.xlane.xlu0 %9756 }
0x2bc6   :  { %9953 = vperm.xlu0 %13435, %v17335_v25   ;;  %9949 = vperm.xlu1 %13434, %v17333_v56   ;;  %v9832_v47 = vsel %vm146_vm2, %v9828_v9, %v9778_v19  ;;  %v9829_v37 = vsel %vm9825_vm8, %v9824_v27, %v9757_v54 }
0x2bc9   :  { %v9802_v51 = vpop.xlane.xlu1 %9801  ;;  %v9781_v10 = vpop.xlane.xlu0 %9780 }
0x2bca   :  { %v9837_v44 = vsel %vm9834_vm9, %v9832_v47, %v9802_v51  ;;  %13439 = vset.pattern.permute.xlu0 %v14500_v32  ;;  %13436 = vset.pattern.permute.xlu1 %v14501_v22  ;;  %v9833_v38 = vsel %vm146_vm2, %v9829_v37, %v9781_v10  ;;  %vm10300_vm2 = vcmask 1041409  }
0x2bcb   :  { %10103 = vperm.xlu0 %13439, %v17335_v25   ;;  %9999 = vperm.xlu1 %13436, %v17333_v56   ;;  %v9841_v59 = vmul.f32 0.25, %v9837_v44 }
0x2bcd   :  { %v9805_v5 = vpop.xlane.xlu0 %9804  ;;  %v9853_v62 = vsel %vm993_vm5, %v9841_v59, -inf }
0x2bce   :  { %v9838_v16 = vsel %vm9834_vm9, %v9833_v38, %v9805_v5 }
0x2bcf   :  { %v9842_v61 = vmul.f32 0.25, %v9838_v16  ;;  %13440 = vset.pattern.permute.xlu0 %v14502_v53  ;;  %10003 = vperm.xlu1 %13436, %v17335_v25  }
0x2bd0   :  { %10149 = vperm.xlu0 %13440, %v17333_v56  }
0x2bd1   :  { %v9854_v48 = vsel %vm9844_vm11, %v9842_v61, -inf }
0x2bd2   :  { %v9855_v2 = vmax.f32 %v9853_v62, %v9854_v48 }
0x2bd3   :  { %13437 = vset.pattern.permute.xlu1 %v14503_v55 }
0x2bd4   :  { %v9856_v58 = vrot.slane %v9855_v2, 4  ;;  %13443 = vset.pattern.permute.xlu0 %v14504_v17  ;;  %10049 = vperm.xlu1 %13437, %v17333_v56  }
0x2bd5   :  { %10203 = vperm.xlu0 %13443, %v17335_v25  }
0x2bd6   :  { %v9857_v42 = vmax.f32 %v9855_v2, %v9856_v58 }
0x2bd8   :  { %v9858_v14 = vrot.slane %v9857_v42, 2  ;;  %10053 = vperm.xlu1 %13437, %v17335_v25  }
0x2bd9   :  { %13444 = vset.pattern.permute.xlu0 %v14505_v36 }
0x2bda   :  { %v9859_v40 = vmax.f32 %v9857_v42, %v9858_v14  ;;  %10249 = vperm.xlu0 %13444, %v17333_v56  }
0x2bdc   :  { %v9860_v11 = vrot.slane %v9859_v40, 1  ;;  %13438 = vset.pattern.permute.xlu1 %v14500_v32 }
0x2bdd   :  { %10099 = vperm.xlu1 %13438, %v17333_v56  }
0x2bde   :  { %v9861_v31 = vmax.f32 %v9859_v40, %v9860_v11  ;;  %13448 = vset.pattern.permute.xlu0 %v14503_v55 }
0x2be0   :  { %v9864_v39 = vsub.f32 %v9841_v59, %v9861_v31  ;;  %v9865_v60 = vsub.f32 %v9842_v61, %v9861_v31 }
0x2be1   :  { %13441 = vset.pattern.permute.xlu1 %v14502_v53 }
0x2be2   :  { %v9870_v4 = vmul.f32 1.442695, %v9864_v39  ;;  %v9872_v15 = vmul.f32 1.442695, %v9865_v60  ;;  %10153 = vperm.xlu1 %13441, %v17335_v25  }
0x2be4   :  { %14312 = vpow2.f32 %v9870_v4 }
0x2be5   :  { %14314 = vpow2.f32 %v9872_v15 }
0x2be6   :  { %13442 = vset.pattern.permute.xlu1 %v14504_v17 }
0x2be7   :  { %10199 = vperm.xlu1 %13442, %v17333_v56  }
0x2beb   :  { %13445 = vset.pattern.permute.xlu1 %v14505_v36 }
0x2bec   :  { %10253 = vperm.xlu1 %13445, %v17335_v25  }
0x2bee   :  { %v14313_v45 = vpop.eup %14312 }
0x2bef   :  { %v14315_v23 = vpop.eup %14314  ;;  %v9883_v18 = vsel %vm993_vm5, %v14313_v45, 0.0  ;;  %vm10347_vm5 = vcmask 392192  }
0x2bf0   :  { %v9884_v28 = vsel %vm9844_vm11, %v14315_v23, 0.0  ;;  %13446 = vset.pattern.permute.xlu1 %v14499_v13  ;;  %v17386_v13 = vpop.permute.xlu1 %9968 }
0x2bf1   :  { %v9885_v41 = vadd.f32 %v9884_v28, %v9883_v18 }
0x2bf3   :  { %v9886_v49 = vrot.slane %v9885_v41, 4 }
0x2bf4   :  { %v10015_v46 = vpop.permute.xlu1 %10014 }
0x2bf5   :  { %v9887_v8 = vadd.f32 %v9886_v49, %v9885_v41 }
0x2bf7   :  { %v9888_v33 = vrot.slane %v9887_v8, 2 }
0x2bf8   :  { %v17393_v47 = vpop.permute.xlu1 %10018 }
0x2bf9   :  { %v9889_v19 = vadd.f32 %v9888_v33, %v9887_v8 }
0x2bfb   :  { %v9890_v54 = vrot.slane %v9889_v19, 1 }
0x2bfc   :  { %v10065_v51 = vpop.permute.xlu1 %10064 }
0x2bfd   :  { %v9891_v50 = vadd.f32 %v9890_v54, %v9889_v19 }
0x2bff   :  { %14316 = vrcp.f32 %v9891_v50 }
0x2c00   :  { %v17397_v10 = vpop.permute.xlu1 %10068 }
0x2c04   :  { %v17400_v21 = vpop.permute.xlu1 %10114 }
0x2c08   :  { %v17403_v44 = vpop.permute.xlu1 %10118 }
0x2c09   :  { %v14317_v24 = vpop.eup %14316 }
0x2c0a   :  { %v9896_v63 = vmul.f32 %v14317_v24, %v14313_v45  ;;  %v9897_v9 = vmul.f32 %v14317_v24, %v14315_v23 }
0x2c0c   :  { %10057 = vperm.xlu0 %13448, %v9896_v63   ;;  %9957 = vperm.xlu1 %13446, %v9896_v63  }
0x2c10   :  { %13452 = vset.pattern.permute.xlu0 %v14502_v53  ;;  %9961 = vperm.xlu1 %13446, %v9897_v9  }
0x2c11   :  { %10161 = vperm.xlu0 %13452, %v9897_v9  }
0x2c14   :  { %13447 = vset.pattern.permute.xlu1 %v14501_v22  ;;  %v17408_v22 = vpop.permute.xlu1 %10164 }
0x2c15   :  { %10266 = vrot.lane.b32.xlu0 %v17261_v6, %s14480_s22  ;;  %10007 = vperm.xlu1 %13447, %v9896_v63  }
0x2c16   :  { %13455 = vset.pattern.permute.xlu0 %v14505_v36 }
0x2c18   :  { %v17413_v37 = vpop.permute.xlu1 %10168 }
0x2c19   :  { %10261 = vperm.xlu0 %13455, %v9897_v9   ;;  %10011 = vperm.xlu1 %13447, %v9897_v9  }
0x2c1c   :  { %v17417_v38 = vpop.permute.xlu1 %10214 }
0x2c1d   :  { %10270 = vrot.lane.b32.xlu0 %v17269_v29, %s14480_s22  ;;  %13449 = vset.pattern.permute.xlu1 %v14503_v55 }
0x2c1e   :  { %10061 = vperm.xlu1 %13449, %v9897_v9   ;;  %13457 = vset.pattern.permute.xlu0 %v14491_v30 }
0x2c20   :  { %v17419_v16 = vpop.permute.xlu1 %10218 }
0x2c21   :  { %9905 = vperm.xlu0 %13457, %v17335_v25   ;;  %v9967_v25 = vpop.permute.xlu0 %9966 }
0x2c22   :  { %13450 = vset.pattern.permute.xlu1 %v14500_v32 }
0x2c23   :  { %10107 = vperm.xlu1 %13450, %v9896_v63  }
0x2c25   :  { %13458 = vset.pattern.permute.xlu0 %v14505_v36  ;;  %v9971_v32 = vpop.permute.xlu0 %9970 }
0x2c27   :  { %10111 = vperm.xlu1 %13450, %v9897_v9  }
0x2c29   :  { %v10017_v27 = vpop.permute.xlu0 %10016 }
0x2c2b   :  { %13451 = vset.pattern.permute.xlu1 %v14502_v53 }
0x2c2c   :  { %10157 = vperm.xlu1 %13451, %v9896_v63  }
0x2c2d   :  { %v17415_v59 = vpop.permute.xlu0 %10020 }
0x2c30   :  { %13453 = vset.pattern.permute.xlu1 %v14504_v17 }
0x2c31   :  { %10207 = vperm.xlu1 %13453, %v9896_v63   ;;  %v10067_v5 = vpop.permute.xlu0 %10066 }
0x2c35   :  { %10211 = vperm.xlu1 %13453, %v9897_v9   ;;  %v17421_v61 = vpop.permute.xlu0 %10070 }
0x2c39   :  { %13454 = vset.pattern.permute.xlu1 %v14505_v36  ;;  %v10117_v62 = vpop.permute.xlu0 %10116 }
0x2c3a   :  { %10257 = vperm.xlu1 %13454, %v9896_v63  }
0x2c3d   :  { %v17423_v2 = vpop.permute.xlu0 %10120 }
0x2c3e   :  { %10264 = vrot.lane.b32.xlu1 %v17167_v12, %s14480_s22 }
0x2c3f   :  { %13456 = vset.pattern.permute.xlu1 %v14491_v30 }
0x2c42   :  { %10268 = vrot.lane.b32.xlu1 %v17180_v52, %s14480_s22 }
0x2c45   :  { %v9950_v53 = vpop.permute.xlu1 %9949 }
0x2c46   :  { %9900 = vperm.xlu1 %13456, %v17333_v56   ;;  %v10167_v56 = vpop.permute.xlu0 %10166  ;;  %v9976_v39 = vmul.f32 %v17217_v26, %v9950_v53 }
0x2c48   :  { %v9980_v15 = vsel %vm9620_vm13, %v9976_v39, 0.0 }
0x2c4a   :  { %9910 = vperm.xlu1 %13456, %v9896_v63   ;;  %v10000_v48 = vpop.permute.xlu1 %9999  ;;  %v17425_v17 = vpop.permute.xlu0 %10170 }
0x2c4b   :  { %v10026_v49 = vmul.f32 %v10015_v46, %v10000_v48 }
0x2c4d   :  { %v10030_v26 = vsel %vm9620_vm13, %v10026_v49, 0.0 }
0x2c4e   :  { %9915 = vperm.xlu1 %13456, %v9897_v9   ;;  %v10004_v55 = vpop.permute.xlu1 %10003  ;;  %v17427_v14 = vpop.permute.xlu0 %10216 }
0x2c4f   :  { %v10027_v28 = vmul.f32 %v10017_v27, %v10004_v55 }
0x2c51   :  { %v10031_v19 = vsel %vm9624_vm14, %v10027_v28, 0.0 }
0x2c52   :  { %v17429_v40 = vpop.permute.xlu0 %10220  ;;  %v10032_v63 = vadd.f32 %v10031_v19, %v10030_v26 }
0x2c53   :  { %v10050_v58 = vpop.permute.xlu1 %10049 }
0x2c54   :  { %v10033_v46 = vrot.slane %v10032_v63, 4 }
0x2c56   :  { %v9954_v31 = vpop.permute.xlu0 %9953 }
0x2c57   :  { %v10054_v42 = vpop.permute.xlu1 %10053  ;;  %v9977_v60 = vmul.f32 %v9967_v25, %v9954_v31  ;;  %v10076_v25 = vmul.f32 %v10065_v51, %v10050_v58  ;;  %v10034_v58 = vadd.f32 %v10033_v46, %v10032_v63 }
0x2c58   :  { %v10077_v50 = vmul.f32 %v10067_v5, %v10054_v42 }
0x2c59   :  { %v9981_v45 = vsel %vm9624_vm14, %v9977_v60, 0.0 }
0x2c5a   :  { %v10104_v23 = vpop.permute.xlu0 %10103  ;;  %v9982_v18 = vadd.f32 %v9981_v45, %v9980_v15  ;;  %v10081_v27 = vsel %vm9624_vm14, %v10077_v50, 0.0  ;;  %v10080_v15 = vsel %vm9620_vm13, %v10076_v25, 0.0  ;;  %v10035_v25 = vrot.slane %v10034_v58, 2 }
0x2c5b   :  { %v10082_v5 = vadd.f32 %v10081_v27, %v10080_v15 }
0x2c5c   :  { %v10100_v36 = vpop.permute.xlu1 %10099  ;;  %v9983_v33 = vrot.slane %v9982_v18, 4 }
0x2c5d   :  { %v10083_v19 = vrot.slane %v10082_v5, 4 }
0x2c5e   :  { %v10150_v8 = vpop.permute.xlu0 %10149  ;;  %v9984_v24 = vadd.f32 %v9983_v33, %v9982_v18  ;;  %v10127_v33 = vmul.f32 %v10117_v62, %v10104_v23 }
0x2c5f   :  { %v10176_v63 = vmul.f32 %v17408_v22, %v10150_v8 }
0x2c60   :  { %v9985_v55 = vrot.slane %v9984_v24, 2 }
0x2c61   :  { %v10154_v11 = vpop.permute.xlu1 %10153  ;;  %v10180_v22 = vsel %vm9620_vm13, %v10176_v63, 0.0 }
0x2c62   :  { %v10204_v53 = vpop.permute.xlu0 %10203  ;;  %v9986_v51 = vadd.f32 %v9985_v55, %v9984_v24  ;;  %v10177_v27 = vmul.f32 %v10167_v56, %v10154_v11  ;;  %v10036_v56 = vadd.f32 %v10035_v25, %v10034_v58 }
0x2c64   :  { %v10181_v11 = vsel %vm9624_vm14, %v10177_v27, 0.0 }
0x2c66   :  { %v17432_v4 = vpop.permute.xlu1 %10199  ;;  %v17445_v18 = vpop.permute.xlu0 %10249 }
0x2c6b   :  { %v17436_v41 = vpop.permute.xlu1 %10253 }
0x2c8b   :  { %v9958_v54 = vpop.permute.xlu1 %9957  ;;  %v10058_v26 = vpop.permute.xlu0 %10057 }
0x2c8c   :  { %v9978_v9 = vmul.f32 %v17386_v13, %v9958_v54  ;;  %v10078_v62 = vmul.f32 %v17397_v10, %v10058_v26  ;;  %v10226_v26 = vmul.f32 %v17417_v38, %v17432_v4 }
0x2c8e   :  { %v9989_v48 = vsel %vm9620_vm13, %v9978_v9, 0.0 }
0x2c8f   :  { %v9962_v31 = vpop.permute.xlu1 %9961 }
0x2c90   :  { %v9979_v39 = vmul.f32 %v9971_v32, %v9962_v31  ;;  %v10126_v32 = vmul.f32 %v17400_v21, %v10100_v36  ;;  %v10131_v36 = vsel %vm9624_vm14, %v10127_v33, 0.0  ;;  %v10182_v33 = vadd.f32 %v10181_v11, %v10180_v22 }
0x2c92   :  { %v9990_v60 = vsel %vm9624_vm14, %v9979_v39, 0.0  ;;  %v10130_v31 = vsel %vm9620_vm13, %v10126_v32, 0.0  ;;  %v9987_v39 = vrot.slane %v9986_v51, 1  ;;  %v10183_v27 = vrot.slane %v10182_v33, 4 }
0x2c93   :  { %v9991_v45 = vadd.f32 %v9990_v60, %v9989_v48  ;;  %v10132_v55 = vadd.f32 %v10131_v36, %v10130_v31  ;;  %v10162_v36 = vpop.permute.xlu0 %10161 }
0x2c94   :  { %v10008_v42 = vpop.permute.xlu1 %10007 }
0x2c95   :  { %v9992_v13 = vrot.slane %v9991_v45, 4  ;;  %v10028_v49 = vmul.f32 %v17393_v47, %v10008_v42  ;;  %v10084_v47 = vadd.f32 %v10083_v19, %v10082_v5  ;;  %v10089_v5 = vsel %vm9620_vm13, %v10078_v62, 0.0 }
0x2c96   :  { %v10133_v8 = vrot.slane %v10132_v55, 4 }
0x2c97   :  { %v9993_v28 = vadd.f32 %v9992_v13, %v9991_v45  ;;  %v10039_v24 = vsel %vm9620_vm13, %v10028_v49, 0.0  ;;  %v9988_v45 = vadd.f32 %v9987_v39, %v9986_v51  ;;  %v10085_v13 = vrot.slane %v10084_v47, 2 }
0x2c98   :  { %v10012_v54 = vpop.permute.xlu1 %10011  ;;  %v10227_v51 = vmul.f32 %v17427_v14, %v10204_v53  ;;  %v10134_v25 = vadd.f32 %v10133_v8, %v10132_v55 }
0x2c99   :  { %v9994_v50 = vrot.slane %v9993_v28, 2  ;;  %v10029_v9 = vmul.f32 %v17415_v59, %v10012_v54  ;;  %v10086_v54 = vadd.f32 %v10085_v13, %v10084_v47  ;;  %v10230_v47 = vsel %vm9620_vm13, %v10226_v26, 0.0 }
0x2c9a   :  { %v10135_v4 = vrot.slane %v10134_v25, 2 }
0x2c9b   :  { %v9995_v48 = vadd.f32 %v9994_v50, %v9993_v28  ;;  %v10040_v21 = vsel %vm9624_vm14, %v10029_v9, 0.0  ;;  %v10037_v9 = vrot.slane %v10036_v56, 1  ;;  %v10087_v53 = vrot.slane %v10086_v54, 1 }
0x2c9c   :  { %v10041_v23 = vadd.f32 %v10040_v21, %v10039_v24  ;;  %v10231_v21 = vsel %vm9624_vm14, %v10227_v51, 0.0  ;;  %v10136_v13 = vadd.f32 %v10135_v4, %v10134_v25  ;;  %v10267_v51 = vpop.permute.xlu0 %10266 }
0x2c9d   :  { %v10062_v59 = vpop.permute.xlu1 %10061  ;;  %v9996_v46 = vrot.slane %v9995_v48, 1  ;;  %v10232_v11 = vadd.f32 %v10231_v21, %v10230_v47 }
0x2c9e   :  { %v10042_v60 = vrot.slane %v10041_v23, 4  ;;  %v10079_v15 = vmul.f32 %v17421_v61, %v10062_v59  ;;  %v10184_v59 = vadd.f32 %v10183_v27, %v10182_v33 }
0x2c9f   :  { %v9997_v42 = vadd.f32 %v9996_v46, %v9995_v48  ;;  %v10179_v46 = vmul.f32 %v17425_v17, %v10162_v36 }
0x2ca0   :  { %v10043_v32 = vadd.f32 %v10042_v60, %v10041_v23  ;;  %v10090_v10 = vsel %vm9624_vm14, %v10079_v15, 0.0  ;;  %v10038_v23 = vadd.f32 %v10037_v9, %v10036_v56 }
0x2ca1   :  { %v10091_v28 = vadd.f32 %v10090_v10, %v10089_v5  ;;  %v10305_v49 = vsel %vm10300_vm2, %v9997_v42, %v9988_v45  ;;  %v10088_v5 = vadd.f32 %v10087_v53, %v10086_v54  ;;  %v10185_v10 = vrot.slane %v10184_v59, 2 }
0x2ca2   :  { %v10044_v61 = vrot.slane %v10043_v32, 2  ;;  %v10108_v19 = vpop.permute.xlu1 %10107  ;;  %10306 = vrot.lane.b32.xlu0 %v10305_v49, %s14480_s22  ;;  %v10190_v22 = vsel %vm9624_vm14, %v10179_v46, 0.0  ;;  %v10137_v54 = vrot.slane %v10136_v13, 1  ;;  %v10277_v46 = vmul.f32 %v10267_v51, %v17436_v41 }
0x2ca3   :  { %v10092_v58 = vrot.slane %v10091_v28, 4  ;;  %v10128_v39 = vmul.f32 %v17403_v44, %v10108_v19 }
0x2ca4   :  { %v10045_v50 = vadd.f32 %v10044_v61, %v10043_v32  ;;  %v10138_v21 = vadd.f32 %v10137_v54, %v10136_v13  ;;  %v10281_v13 = vsel %vm9624_vm14, %v10277_v46, 0.0 }
0x2ca5   :  { %v10093_v31 = vadd.f32 %v10092_v58, %v10091_v28  ;;  %v10139_v55 = vsel %vm9620_vm13, %v10128_v39, 0.0  ;;  %v10233_v28 = vrot.slane %v10232_v11, 4 }
0x2ca6   :  { %v10112_v48 = vpop.permute.xlu1 %10111  ;;  %v10046_v24 = vrot.slane %v10045_v50, 1 }
0x2ca7   :  { %v10094_v62 = vrot.slane %v10093_v31, 2  ;;  %v10129_v14 = vmul.f32 %v17423_v2, %v10112_v48 }
0x2ca8   :  { %v10047_v38 = vadd.f32 %v10046_v24, %v10045_v50  ;;  %v10234_v50 = vadd.f32 %v10233_v28, %v10232_v11 }
0x2ca9   :  { %v10095_v63 = vadd.f32 %v10094_v62, %v10093_v31  ;;  %v10140_v44 = vsel %vm9624_vm14, %v10129_v14, 0.0  ;;  %v10262_v14 = vpop.permute.xlu0 %10261 }
0x2caa   :  { %v10141_v60 = vadd.f32 %v10140_v44, %v10139_v55  ;;  %v10311_v15 = vsel %vm10300_vm2, %v10047_v38, %v10038_v23  ;;  %v10235_v62 = vrot.slane %v10234_v50, 2 }
0x2cab   :  { %v10096_v45 = vrot.slane %v10095_v63, 1  ;;  %v10158_v2 = vpop.permute.xlu1 %10157  ;;  %10312 = vrot.lane.b32.xlu1 %v10311_v15, %s17621_s17 }
0x2cac   :  { %v10142_v42 = vrot.slane %v10141_v60, 4  ;;  %v10178_v56 = vmul.f32 %v17413_v37, %v10158_v2  ;;  %v10186_v37 = vadd.f32 %v10185_v10, %v10184_v59  ;;  %v10236_v44 = vadd.f32 %v10235_v62, %v10234_v50 }
0x2cad   :  { %v10097_v32 = vadd.f32 %v10096_v45, %v10095_v63  ;;  %v10271_v15 = vpop.permute.xlu0 %10270 }
0x2cae   :  { %v10143_v8 = vadd.f32 %v10142_v42, %v10141_v60  ;;  %v10189_v17 = vsel %vm9620_vm13, %v10178_v56, 0.0  ;;  %v10187_v24 = vrot.slane %v10186_v37, 1  ;;  %v10237_v56 = vrot.slane %v10236_v44, 1 }
0x2caf   :  { %v10191_v49 = vadd.f32 %v10190_v22, %v10189_v17  ;;  %v10317_v33 = vsel %vm10300_vm2, %v10097_v32, %v10088_v5  ;;  %v10279_v5 = vmul.f32 %v10271_v15, %v10262_v14 }
0x2cb0   :  { %v10144_v61 = vrot.slane %v10143_v8, 2  ;;  %v10208_v19 = vpop.permute.xlu1 %10207  ;;  %10318 = vrot.lane.b32.xlu0 %v10317_v33, %s14498_s0 }
0x2cb1   :  { %v10192_v58 = vrot.slane %v10191_v49, 4  ;;  %v10228_v25 = vmul.f32 %v17419_v16, %v10208_v19 }
0x2cb2   :  { %v10145_v26 = vadd.f32 %v10144_v61, %v10143_v8  ;;  %v10238_v61 = vadd.f32 %v10237_v56, %v10236_v44 }
0x2cb3   :  { %v10193_v9 = vadd.f32 %v10192_v58, %v10191_v49  ;;  %v10239_v47 = vsel %vm9620_vm13, %v10228_v25, 0.0  ;;  %v10290_v49 = vsel %vm9624_vm14, %v10279_v5, 0.0 }
0x2cb4   :  { %v10212_v31 = vpop.permute.xlu1 %10211  ;;  %v10146_v39 = vrot.slane %v10145_v26, 1 }
0x2cb5   :  { %v10194_v27 = vrot.slane %v10193_v9, 2  ;;  %v10229_v48 = vmul.f32 %v17429_v40, %v10212_v31  ;;  %v10188_v40 = vadd.f32 %v10187_v24, %v10186_v37 }
0x2cb6   :  { %v10147_v36 = vadd.f32 %v10146_v39, %v10145_v26 }
0x2cb7   :  { %v10195_v53 = vadd.f32 %v10194_v27, %v10193_v9  ;;  %v10240_v23 = vsel %vm9624_vm14, %v10229_v48, 0.0 }
0x2cb8   :  { %v10241_v38 = vadd.f32 %v10240_v23, %v10239_v47  ;;  %v10323_v4 = vsel %vm10300_vm2, %v10147_v36, %v10138_v21 }
0x2cb9   :  { %v10196_v63 = vrot.slane %v10195_v53, 1  ;;  %v10258_v16 = vpop.permute.xlu1 %10257  ;;  %10324 = vrot.lane.b32.xlu1 %v10323_v4, %s14487_s12 }
0x2cba   :  { %v10242_v55 = vrot.slane %v10241_v38, 4 }
0x2cbb   :  { %v10197_v59 = vadd.f32 %v10196_v63, %v10195_v53  ;;  %v9906_v53 = vpop.permute.xlu0 %9905 }
0x2cbc   :  { %v10243_v60 = vadd.f32 %v10242_v55, %v10241_v38  ;;  %v9927_v38 = vmul.f32 %v17261_v6, %v9906_v53  ;;  %v14076_v53 = vld [vmem:[#allocation9 + $0x40] ss:$16 sps:$4 sm:$0xff]  }
0x2cbd   :  { %v10265_v11 = vpop.permute.xlu1 %10264  ;;  %v10329_v45 = vsel %vm10300_vm2, %v10197_v59, %v10188_v40 }
0x2cbe   :  { %v10244_v2 = vrot.slane %v10243_v60, 2  ;;  %v10276_v42 = vmul.f32 %v10265_v11, %v17445_v18  ;;  %10330 = vrot.lane.b32.xlu0 %v10329_v45, %s14497_s2  ;;  %v9931_v44 = vsel %vm9624_vm14, %v9927_v38, 0.0 }
0x2cc0   :  { %v10245_v32 = vadd.f32 %v10244_v2, %v10243_v60  ;;  %v10280_v10 = vsel %vm9620_vm13, %v10276_v42, 0.0 }
0x2cc1   :  { %v10282_v22 = vadd.f32 %v10281_v13, %v10280_v10  ;;  %v10269_v8 = vpop.permute.xlu1 %10268 }
0x2cc2   :  { %v10246_v41 = vrot.slane %v10245_v32, 1  ;;  %v10278_v17 = vmul.f32 %v10269_v8, %v10258_v16 }
0x2cc3   :  { %v10283_v28 = vrot.slane %v10282_v22, 4 }
0x2cc4   :  { %v10289_v33 = vsel %vm9620_vm13, %v10278_v17, 0.0  ;;  %v10247_v18 = vadd.f32 %v10246_v41, %v10245_v32 }
0x2cc5   :  { %v10284_v19 = vadd.f32 %v10283_v28, %v10282_v22  ;;  %v10291_v51 = vadd.f32 %v10290_v49, %v10289_v33  ;;  %v9901_v21 = vpop.permute.xlu1 %9900 }
0x2cc6   :  { %v10335_v58 = vsel %vm10300_vm2, %v10247_v18, %v10238_v61  ;;  %v9926_v47 = vmul.f32 %v9901_v21, %v17167_v12  ;;  %v14072_v21 = vld [vmem:[#allocation9 + $0x24] ss:$16 sps:$4 sm:$0xff]  }
0x2cc7   :  { %v10285_v37 = vrot.slane %v10284_v19, 2  ;;  %v10292_v26 = vrot.slane %v10291_v51, 4  ;;  %10336 = vrot.lane.b32.xlu1 %v10335_v58, %s14492_s24  ;;  %v17515_v58 = vld [vmem:[%s17611_s14] sm:$0xff] }
0x2cc8   :  { %v9930_v63 = vsel %vm9620_vm13, %v9926_v47, 0.0  ;;  %v14079_v47 = vld [vmem:[#allocation9 + $0x48] ss:$16 sps:$4 sm:$0xff]  }
0x2cc9   :  { %v10286_v54 = vadd.f32 %v10285_v37, %v10284_v19  ;;  %v10293_v50 = vadd.f32 %v10292_v26, %v10291_v51  ;;  %v9911_v36 = vpop.permute.xlu1 %9910  ;;  %v9932_v40 = vadd.f32 %v9931_v44, %v9930_v63  ;;  %v10359_v37 = vrot.slane %v17515_v58, %v15330_v20  ;;  %v14070_v20 = vld [vmem:[#allocation9 + $0x20] ss:$16 sps:$4 sm:$0xff]   ;;  %v14087_v44 = vld [vmem:[#allocation9 + $0x6c] ss:$16 sps:$4 sm:$0xff]  }
0x2cca   :  { %v9928_v23 = vmul.f32 %v17180_v52, %v9911_v36  ;;  %v14075_v36 = vld [vmem:[#allocation9 + $0x2c] ss:$16 sps:$4 sm:$0xff]  }
0x2ccb   :  { %v10294_v9 = vrot.slane %v10293_v50, 2  ;;  %v10287_v25 = vrot.slane %v10286_v54, 1  ;;  %v9933_v46 = vrot.slane %v9932_v40, 4 }
0x2ccc   :  { %v9939_v16 = vsel %vm9620_vm13, %v9928_v23, 0.0 }
0x2ccd   :  { %v10295_v31 = vadd.f32 %v10294_v9, %v10293_v50  ;;  %v10288_v27 = vadd.f32 %v10287_v25, %v10286_v54  ;;  %v9916_v62 = vpop.permute.xlu1 %9915  ;;  %v9934_v60 = vadd.f32 %v9933_v46, %v9932_v40  ;;  %v14082_v40 = vld [vmem:[#allocation9 + $0x60] ss:$16 sps:$4 sm:$0xff]   ;;  %v14090_v46 = vld [vmem:[#allocation9 + $0x84] ss:$16 sps:$4 sm:$0xff]  }
0x2cce   :  { %v9929_v14 = vmul.f32 %v17269_v29, %v9916_v62  ;;  %v14073_v62 = vld [vmem:[#allocation9 + $0x28] ss:$16 sps:$4 sm:$0xff]  }
0x2ccf   :  { %v10296_v39 = vrot.slane %v10295_v31, 1  ;;  %v9935_v12 = vrot.slane %v9934_v60, 2 }
0x2cd0   :  { %v9940_v4 = vsel %vm9624_vm14, %v9929_v14, 0.0  ;;  %vm10353_vm14 = vcmask 916480   ;;  %v14078_v14 = vld [vmem:[#allocation9 + $0x44] ss:$16 sps:$4 sm:$0xff]  }
0x2cd1   :  { %v10297_v48 = vadd.f32 %v10296_v39, %v10295_v31  ;;  %v9941_v55 = vadd.f32 %v9940_v4, %v9939_v16  ;;  %v9936_v52 = vadd.f32 %v9935_v12, %v9934_v60  ;;  %v14088_v60 = vld [vmem:[#allocation9 + $0x80] ss:$16 sps:$4 sm:$0xff]   ;;  %v14096_v12 = vld [vmem:[#allocation9 + $0xa4] ss:$16 sps:$4 sm:$0xff]  }
0x2cd3   :  { %v10341_v24 = vsel %vm10300_vm2, %v10297_v48, %v10288_v27  ;;  %v9942_v59 = vrot.slane %v9941_v55, 4  ;;  %v9937_v6 = vrot.slane %v9936_v52, 1  ;;  %v14064_v27 = vld [vmem:[#allocation9] ss:$16 sps:$4 sm:$0xff]   ;;  %v14067_v48 = vld [vmem:[#allocation9 + $0x8] ss:$16 sps:$4 sm:$0xff]  }
0x2cd4   :  { %10342 = vrot.lane.b32.xlu0 %v10341_v24, %s14495_s20  ;;  %v14069_v24 = vld [vmem:[#allocation9 + $0xc] ss:$16 sps:$4 sm:$0xff]  }
0x2cd5   :  { %v9943_v29 = vadd.f32 %v9942_v59, %v9941_v55  ;;  %v9938_v13 = vadd.f32 %v9937_v6, %v9936_v52  ;;  %10674 = vmatprep.subr.bf16.mxu0 %v14069_v24  ;;  %v14084_v55 = vld [vmem:[#allocation9 + $0x64] ss:$16 sps:$4 sm:$0xff]   ;;  %v14085_v59 = vld [vmem:[#allocation9 + $0x68] ss:$16 sps:$4 sm:$0xff]   ;;  %v14094_v52 = vld [vmem:[#allocation9 + $0xa0] ss:$16 sps:$4 sm:$0xff]  }
0x2cd6   :  { %v14102_v6 = vld [vmem:[#allocation9 + $0xc4] ss:$16 sps:$4 sm:$0xff]   ;;  %v14125_v24 = vld [vmem:[#allocation10 + $0xd8] sm:$0xff]  }
0x2cd7   :  { %v9944_v15 = vrot.slane %v9943_v29, 2 }
0x2cd9   :  { %v9945_v11 = vadd.f32 %v9944_v15, %v9943_v29  ;;  %v14093_v29 = vld [vmem:[#allocation9 + $0x8c] ss:$16 sps:$4 sm:$0xff]   ;;  %v14091_v15 = vld [vmem:[#allocation9 + $0x88] ss:$16 sps:$4 sm:$0xff]  }
0x2cdb   :  { %v9946_v45 = vrot.slane %v9945_v11, 1 }
0x2cdd   :  { %v9947_v56 = vadd.f32 %v9946_v45, %v9945_v11  ;;  %v14099_v11 = vld [vmem:[#allocation9 + $0xac] ss:$16 sps:$4 sm:$0xff]   ;;  %v14097_v45 = vld [vmem:[#allocation9 + $0xa8] ss:$16 sps:$4 sm:$0xff]  }
0x2cdf   :  { %v10301_v10 = vsel %vm10300_vm2, %v9947_v56, %v9938_v13  ;;  %v14103_v56 = vld [vmem:[#allocation9 + $0xc8] ss:$16 sps:$4 sm:$0xff]   ;;  %v14106_v13 = vld [vmem:[#allocation9 + $0xe0] ss:$16 sps:$4 sm:$0xff]  }
0x2d14   :  { %v10307_v2 = vpop.permute.xlu0 %10306 }
0x2d15   :  { %v10345_v22 = vsel %vm9620_vm13, %v10301_v10, %v10307_v2  ;;  %v14105_v2 = vld [vmem:[#allocation9 + $0xcc] ss:$16 sps:$4 sm:$0xff]  }
0x2d16   :  { %v14111_v10 = vld [vmem:[#allocation9 + $0xec] ss:$16 sps:$4 sm:$0xff]  }
0x2d1d   :  { %v10313_v42 = vpop.permute.xlu1 %10312 }
0x2d1e   :  { %v10346_v8 = vsel %vm616_vm3, %v10345_v22, %v10313_v42  ;;  %v14100_v42 = vld [vmem:[#allocation9 + $0xc0] ss:$16 sps:$4 sm:$0xff]   ;;  %vm11147_vm3 = vcmask 1024  }
0x2d1f   :  { %v14112_v22 = vld [vmem:[#allocation10 + $0x40] sm:$0xff]  }
0x2d22   :  { %v10319_v5 = vpop.permute.xlu0 %10318 }
0x2d23   :  { %v10348_v17 = vsel %vm10347_vm5, %v10346_v8, %v10319_v5  ;;  %v14108_v5 = vld [vmem:[#allocation9 + $0xe4] ss:$16 sps:$4 sm:$0xff]  }
0x2d24   :  { %v14113_v8 = vld [vmem:[#allocation10 + $0xc0] sm:$0xff]  }
0x2d2b   :  { %v10325_v32 = vpop.permute.xlu1 %10324 }
0x2d2c   :  { %v10349_v49 = vsel %vm1485_vm6, %v10348_v17, %v10325_v32  ;;  %v14109_v32 = vld [vmem:[#allocation9 + $0xe8] ss:$16 sps:$4 sm:$0xff]  }
0x2d30   :  { %v10331_v41 = vpop.permute.xlu0 %10330 }
0x2d31   :  { %v10351_v33 = vsel %vm10350_vm12, %v10349_v49, %v10331_v41  ;;  %v17525_v49 = vld [vmem:[%s17611_s14 + $0x20] sm:$0x1f] }
0x2d39   :  { %v10337_v28 = vpop.permute.xlu1 %10336 }
0x2d3a   :  { %v10352_v61 = vsel %vm1488_vm7, %v10351_v33, %v10337_v28  ;;  %v10449_v33 = vrot.slane %v17515_v58, %v15335_v35  ;;  %v14118_v58 = vld [vmem:[#allocation10 + $0x8] sm:$0xff]  }
0x2d46   :  { %v10343_v18 = vpop.permute.xlu0 %10342 }
0x2d47   :  { %v10354_v19 = vsel %vm10353_vm14, %v10352_v61, %v10343_v18 }
0x2d48   :  { %v10355_v51 = vpack.c.bf16 %v10354_v19, %v10354_v19  ;;  %v10454_v19 = vrot.slane %v17525_v49, %v14787_v43  ;;  %v14121_v43 = vld [vmem:[#allocation10 + $0xd0] sm:$0xff]  }
0x2d4a   :  { %13350 = vmatmul.mubr.bf16.vlgmr.msra.gmra.mrb[216].mxu0 %v10355_v51 }
0x2d4b   :  { %10706 = vmatprep.mubr.bf16.mxu0 %v14491_v30  ;;  %v14066_v30 = vld [vmem:[#allocation9 + $0x4] ss:$16 sps:$4 sm:$0xff]   ;;  %10675 = vmatpush1.bf16.msra.mxu0 %v14067_v48  ;;  %v14124_v48 = vld [vmem:[#allocation10 + $0x58] sm:$0xff]  }
0x2d4c   :  { %10633 = vmatprep.subr.bf16.mxu1 %v14066_v30  ;;  %10676 = vmatprep.subr.bf16.mxu0 %v14075_v36  ;;  %v14123_v30 = vld [vmem:[#allocation10 + $0x90] sm:$0xff]   ;;  %v14127_v36 = vld [vmem:[#allocation10 + $0x98] sm:$0xff]  }
0x2d4d   :  { %10634 = vmatpush1.bf16.msra.mxu1 %v14064_v27  ;;  %v14122_v27 = vld [vmem:[#allocation10 + $0x10] sm:$0xff]  }
0x2d4e   :  { %10635 = vmatprep.subr.bf16.mxu1 %v14072_v21  ;;  %v14126_v21 = vld [vmem:[#allocation10 + $0x18] sm:$0xff]  }
0x2d4f   :  { %10677 = vmatpush1.bf16.msra.mxu0 %v14073_v62  ;;  %v14129_v62 = vld [vmem:[#allocation10 + $0xe0] sm:$0xff]  }
0x2d51   :  { %10636 = vmatpush1.bf16.msra.mxu1 %v14070_v20  ;;  %v14128_v20 = vld [vmem:[#allocation10 + $0x60] sm:$0xff]  }
0x2d52   :  { %10637 = vmatprep.subr.bf16.mxu1 %v14078_v14  ;;  %v14130_v14 = vld [vmem:[#allocation10 + $0x20] sm:$0xff]  }
0x2d55   :  { %10638 = vmatpush1.bf16.msra.mxu1 %v14076_v53  ;;  %v14132_v53 = vld [vmem:[#allocation10 + $0x68] sm:$0xff]  }
0x2d56   :  { %10639 = vmatprep.subr.bf16.mxu1 %v14084_v55  ;;  %v14139_v55 = vld [vmem:[#allocation10 + $0xb0] sm:$0xff]  }
0x2d59   :  { %10640 = vmatpush1.bf16.msra.mxu1 %v14082_v40  ;;  %v14141_v40 = vld [vmem:[#allocation10 + $0xf8] sm:$0xff]  }
0x2d5a   :  { %10641 = vmatprep.subr.bf16.mxu1 %v14090_v46  ;;  %v14143_v46 = vld [vmem:[#allocation10 + $0xb8] sm:$0xff]  }
0x2d5d   :  { %10642 = vmatpush1.bf16.msra.mxu1 %v14088_v60  ;;  %v8984_v60 = vld [vmem:[%s17611_s14 + $0x28] sm:$0x1f] }
0x2d5e   :  { %10643 = vmatprep.subr.bf16.mxu1 %v14096_v12  ;;  %v10460_v12 = vrot.slane %v17525_v49, %v15005_v3 }
0x2d61   :  { %10644 = vmatpush1.bf16.msra.mxu1 %v14094_v52  ;;  %v10464_v52 = vrot.slane %v8984_v60, %v15005_v3 }
0x2d62   :  { %10645 = vmatprep.subr.bf16.mxu1 %v14102_v6 }
0x2d65   :  { %10646 = vmatpush1.bf16.msra.mxu1 %v14100_v42 }
0x2d66   :  { %10647 = vmatprep.subr.bf16.mxu1 %v14108_v5 }
0x2d69   :  { %10648 = vmatpush1.bf16.msra.mxu1 %v14106_v13 }
0x2d6a   :  { %12670 = vmatprep.subr.bf16.mxu1 %v14112_v22 }
0x2e1d   :  { %v10426_v26 = vpop.f32.mrb[216].mxu0 }
0x2e1e   :  { %v10427_v54 = vadd.f32 %v10426_v26, %v10359_v37  ;;  %v13351_v50 = vpop.f32.mrb[217].mxu0  ;;  %v14114_v26 = vld [vmem:[#allocation10] sm:$0xff]  }
0x2e1f   :  { %v10429_v9 = vpop.f32.mrb[218].mxu0 }
0x2e20   :  { %v10432_v25 = vadd.f32 %v10427_v54, %v17148_v57  ;;  %v13352_v31 = vpop.f32.mrb[219].mxu0  ;;  %v14081_v57 = vld [vmem:[#allocation9 + $0x4c] ss:$16 sps:$4 sm:$0xff]   ;;  %v14115_v54 = vld [vmem:[#allocation10 + $0x80] sm:$0xff]  }
0x2e21   :  { %10678 = vmatprep.subr.bf16.mxu0 %v14081_v57  ;;  %v14116_v9 = vld [vmem:[#allocation10 + $0x48] sm:$0xff]   ;;  %v14131_v57 = vld [vmem:[#allocation10 + $0xa0] sm:$0xff]  }
0x2e22   :  { %v10433_v39 = vsel %vm5661_vm10, %v10432_v25, 0.0  ;;  %10679 = vmatpush1.bf16.msra.mxu0 %v14079_v47  ;;  %v14119_v31 = vld [vmem:[#allocation10 + $0x88] sm:$0xff]  }
0x2e23   :  { %10434 = vadd.xlane.f32.xlu1 %v10433_v39  ;;  %10680 = vmatprep.subr.bf16.mxu0 %v14087_v44  ;;  %v14120_v39 = vld [vmem:[#allocation10 + $0x50] sm:$0xff]   ;;  %v14133_v47 = vld [vmem:[#allocation10 + $0xe8] sm:$0xff]   ;;  %v14140_v44 = vld [vmem:[#allocation10 + $0x78] sm:$0xff]  }
0x2e26   :  { %10681 = vmatpush1.bf16.msra.mxu0 %v14085_v59  ;;  %v14142_v59 = vld [vmem:[#allocation10 + $0x38] sm:$0xff]  }
0x2e27   :  { %10682 = vmatprep.subr.bf16.mxu0 %v14093_v29  ;;  %v8985_v29 = vld [vmem:[%s17611_s14 + $0x30] sm:$0x1f] }
0x2e2a   :  { %10683 = vmatpush1.bf16.msra.mxu0 %v14091_v15  ;;  %v8986_v15 = vld [vmem:[%s17611_s14 + $0x38] sm:$0x1f] }
0x2e2b   :  { %10684 = vmatprep.subr.bf16.mxu0 %v14099_v11  ;;  %v10468_v11 = vrot.slane %v8985_v29, %v15005_v3 }
0x2e2e   :  { %10685 = vmatpush1.bf16.msra.mxu0 %v14097_v45  ;;  %v10472_v45 = vrot.slane %v8986_v15, %v15005_v3  ;;  %v11021_v15 = vrot.slane %v17525_v49, %v14773_v34 }
0x2e2f   :  { %10686 = vmatprep.subr.bf16.mxu0 %v14105_v2 }
0x2e32   :  { %10687 = vmatpush1.bf16.msra.mxu0 %v14103_v56 }
0x2e33   :  { %10688 = vmatprep.subr.bf16.mxu0 %v14111_v10 }
0x2e36   :  { %10689 = vmatpush1.bf16.msra.mxu0 %v14109_v32 }
0x2e37   :  { %12692 = vmatprep.subr.bf16.mxu0 %v14113_v8 }
0x2eb0   :  { %v10435_v23 = vpop.xlane.xlu1 %10434 }
0x2eb1   :  { %v10436_v38 = vmul.f32 0.0078125, %v10435_v23  ;;  %v14134_v23 = vld [vmem:[#allocation10 + $0x28] sm:$0xff]  }
0x2eb3   :  { %v10437_v4 = vsub.f32 %v10432_v25, %v10436_v38  ;;  %v14117_v25 = vld [vmem:[#allocation10 + $0xc8] sm:$0xff]  }
0x2eb4   :  { %v14135_v38 = vld [vmem:[#allocation10 + $0xa8] sm:$0xff]  }
0x2eb5   :  { %v10438_v63 = vmul.f32 %v10437_v4, %v10437_v4 }
0x2eb7   :  { %v10439_v16 = vsel %vm5661_vm10, %v10438_v63, 0.0  ;;  %v14137_v63 = vld [vmem:[#allocation10 + $0xf0] sm:$0xff]  }
0x2eb8   :  { %10440 = vadd.xlane.f32.xlu0 %v10439_v16  ;;  %v14138_v16 = vld [vmem:[#allocation10 + $0x30] sm:$0xff]  }
0x2f45   :  { %v10441_v41 = vpop.xlane.xlu0 %10440 }
0x2f46   :  { %v10442_v17 = vmul.f32 0.0078125, %v10441_v41 }
0x2f48   :  { %v10443_v28 = vadd.f32 1e-05, %v10442_v17 }
0x2f4a   :  { %14318 = vrsqrt.f32 %v10443_v28 }
0x2f54   :  { %v14319_v61 = vpop.eup %14318 }
0x2f55   :  { %v10445_v18 = vmul.f32 %v14319_v61, %v10437_v4  ;;  %v14136_v4 = vld [vmem:[#allocation10 + $0x70] sm:$0xff]  }
0x2f57   :  { %v10450_v51 = vmul.f32 %v10449_v33, %v10445_v18 }
0x2f59   :  { %v17531_v37 = vadd.f32 %v10454_v19, %v10450_v51 }
0x2f5b   :  { %v10456_v50 = vpack.c.bf16 %v17531_v37, %v17531_v37 }
0x2f5d   :  { %10666 = vmatmul.mubr.bf16.vlgmr.msra.gmra.mrb[188].mxu1 %v10456_v50  ;;  %10707 = vmatmul.mubr.bf16.vlgmr.msra.gmra.mrb[220].mxu0 %v10456_v50 }
0x2f5e   :  { %12671 = vmatpush3.bf16.msra.mxu1 %v14114_v26  ;;  %12693 = vmatpush3.bf16.msra.mxu0 %v14115_v54 }
0x2f5f   :  { %12672 = vmatprep.subr.bf16.mxu1 %v14116_v9  ;;  %12694 = vmatprep.subr.bf16.mxu0 %v14117_v25  ;;  %v10726_v9 = vrot.slane %v17525_v49, %v15122_v1  ;;  %v14145_v1 = vld [vmem:[%s17612_s15 + $0x8] sm:$0xff]  }
0x2f62   :  { %12673 = vmatpush3.bf16.msra.mxu1 %v14118_v58  ;;  %12695 = vmatpush3.bf16.msra.mxu0 %v14119_v31 }
0x2f63   :  { %12674 = vmatprep.subr.bf16.mxu1 %v14120_v39  ;;  %12696 = vmatprep.subr.bf16.mxu0 %v14121_v43 }
0x2f66   :  { %12675 = vmatpush3.bf16.msra.mxu1 %v14122_v27  ;;  %12697 = vmatpush3.bf16.msra.mxu0 %v14123_v30 }
0x2f67   :  { %12676 = vmatprep.subr.bf16.mxu1 %v14124_v48  ;;  %12698 = vmatprep.subr.bf16.mxu0 %v14125_v24 }
0x2f6a   :  { %12677 = vmatpush3.bf16.msra.mxu1 %v14126_v21  ;;  %12699 = vmatpush3.bf16.msra.mxu0 %v14127_v36 }
0x2f6b   :  { %12678 = vmatprep.subr.bf16.mxu1 %v14128_v20  ;;  %12700 = vmatprep.subr.bf16.mxu0 %v14129_v62  ;;  %v14144_v62 = vld [vmem:[%s17612_s15] sm:$0xff]  }
0x2f6e   :  { %12679 = vmatpush3.bf16.msra.mxu1 %v14130_v14  ;;  %12701 = vmatpush3.bf16.msra.mxu0 %v14131_v57 }
0x2f6f   :  { %12680 = vmatprep.subr.bf16.mxu1 %v14132_v53  ;;  %12702 = vmatprep.subr.bf16.mxu0 %v14133_v47 }
0x2f72   :  { %12681 = vmatpush3.bf16.msra.mxu1 %v14134_v23  ;;  %12703 = vmatpush3.bf16.msra.mxu0 %v14135_v38  ;;  %v14146_v23 = vld [vmem:[%s17612_s15 + $0x10] sm:$0xff]   ;;  %v14147_v38 = vld [vmem:[%s17612_s15 + $0x18] sm:$0xff]  }
0x2f73   :  { %12682 = vmatprep.subr.bf16.mxu1 %v14136_v4  ;;  %12704 = vmatprep.subr.bf16.mxu0 %v14137_v63  ;;  %v14148_v4 = vld [vmem:[%s17612_s15 + $0x20] sm:$0xff]   ;;  %v14149_v63 = vld [vmem:[%s17612_s15 + $0x28] sm:$0xff]  }
0x2f76   :  { %12683 = vmatpush3.bf16.msra.mxu1 %v14138_v16  ;;  %12705 = vmatpush3.bf16.msra.mxu0 %v14139_v55  ;;  %v14150_v16 = vld [vmem:[%s17612_s15 + $0x30] sm:$0xff]   ;;  %v14151_v55 = vld [vmem:[%s17612_s15 + $0x38] sm:$0xff]  }
0x2f77   :  { %12684 = vmatprep.subr.bf16.mxu1 %v14140_v44  ;;  %12706 = vmatprep.subr.bf16.mxu0 %v14141_v40 }
0x2f7a   :  { %12685 = vmatpush3.bf16.msra.mxu1 %v14142_v59  ;;  %12707 = vmatpush3.bf16.msra.mxu0 %v14143_v46  ;;  %v11016_v46 = vrot.slane %v17525_v49, %v15127_v7 }
0x2f7b   :  { %13353 = vmatprep.subr.bf16.mxu1 %v14489_v0 }
0x3030   :  { %v10667_v6 = vpop.f32.mrb[188].mxu1  ;;  %v10708_v2 = vpop.f32.mrb[220].mxu0 }
0x3031   :  { %v10668_v42 = vadd.f32 %v10667_v6, %v10460_v12  ;;  %v10709_v56 = vadd.f32 %v10708_v2, %v10468_v11  ;;  %v10669_v13 = vpop.f32.mrb[189].mxu1  ;;  %v10710_v5 = vpop.f32.mrb[221].mxu0 }
0x3032   :  { %v10670_v32 = vadd.f32 %v10669_v13, %v10464_v52  ;;  %v10711_v10 = vadd.f32 %v10710_v5, %v10472_v45  ;;  %v10671_v22 = vpop.f32.mrb[190].mxu1  ;;  %v10712_v8 = vpop.f32.mrb[222].mxu0  ;;  %v14334_v45 = vld [vmem:[#allocation2] sm:$0xff] }
0x3033   :  { %v10715_v41 = vmax.f32 %v10668_v42, 0.0  ;;  %v10717_v17 = vmax.f32 %v10709_v56, 0.0  ;;  %v10672_v28 = vpop.f32.mrb[191].mxu1  ;;  %v10713_v33 = vpop.f32.mrb[223].mxu0  ;;  %v12211_v56 = vld [vmem:[#allocation2 + $0x8] ss:$0 sm:$0xff] }
0x3034   :  { %v10716_v61 = vmax.f32 %v10670_v32, 0.0  ;;  %v10718_v18 = vmax.f32 %v10711_v10, 0.0 }
0x3035   :  { %v10719_v26 = vpack.c.bf16 %v10715_v41, %v10715_v41  ;;  %v10721_v3 = vpack.c.bf16 %v10717_v17, %v10717_v17 }
0x3036   :  { %v10720_v19 = vpack.c.bf16 %v10716_v61, %v10716_v61  ;;  %v10722_v51 = vpack.c.bf16 %v10718_v18, %v10718_v18 }
0x3038   :  { %10951 = vmatprep.mubr.bf16.mxu1 %v10720_v19  ;;  %10991 = vmatprep.mubr.bf16.mxu0 %v10722_v51 }
0x3039   :  { %10952 = vmatmul.mubr.bf16.vlgmr.msra.gmra.mrb[192].mxu1 %v10719_v26  ;;  %10992 = vmatmul.mubr.bf16.vlgmr.msra.gmra.mrb[224].mxu0 %v10721_v3 }
0x303a   :  { %13369 = vmatprep.mubr.msk.bf16.mxu1 %vm14490_vm0, %v14489_v0  ;;  %13354 = vmatpush3.bf16.msra.mxu1 %v14144_v62  ;;  %vm11138_vm0 = vcmask 517120  }
0x303b   :  { %13355 = vmatprep.subr.bf16.mxu1 %v14489_v0 }
0x303e   :  { %13356 = vmatpush3.bf16.msra.mxu1 %v14145_v1 }
0x303f   :  { %13357 = vmatprep.subr.bf16.mxu1 %v14489_v0 }
0x3042   :  { %13358 = vmatpush3.bf16.msra.mxu1 %v14146_v23 }
0x3043   :  { %13359 = vmatprep.subr.bf16.mxu1 %v14489_v0 }
0x3046   :  { %13360 = vmatpush3.bf16.msra.mxu1 %v14147_v38 }
0x3047   :  { %13361 = vmatprep.subr.bf16.mxu1 %v14489_v0 }
0x304a   :  { %13362 = vmatpush3.bf16.msra.mxu1 %v14148_v4 }
0x304b   :  { %13363 = vmatprep.subr.bf16.mxu1 %v14489_v0 }
0x304e   :  { %13364 = vmatpush3.bf16.msra.mxu1 %v14149_v63 }
0x304f   :  { %13365 = vmatprep.subr.bf16.mxu1 %v14489_v0 }
0x3052   :  { %13366 = vmatpush3.bf16.msra.mxu1 %v14150_v16 }
0x3053   :  { %13367 = vmatprep.subr.bf16.mxu1 %v14489_v0  ;;  %v11043_v0 = vrot.slane %v14334_v45, %v15335_v35 }
0x3056   :  { %13368 = vmatpush3.bf16.msra.mxu1 %v14151_v55 }
0x310c   :  { %v12686_v54 = vpop.f32.mrb[192].mxu1  ;;  %v12708_v50 = vpop.f32.mrb[224].mxu0 }
0x310d   :  { %v12687_v25 = vpop.f32.mrb[193].mxu1  ;;  %v12709_v58 = vpop.f32.mrb[225].mxu0 }
0x310e   :  { %v12688_v31 = vadd.f32 %v12687_v25, %v12686_v54  ;;  %v12710_v39 = vadd.f32 %v12709_v58, %v12708_v50  ;;  %v12689_v43 = vpop.f32.mrb[194].mxu1  ;;  %v12711_v27 = vpop.f32.mrb[226].mxu0 }
0x310f   :  { %v12690_v30 = vpop.f32.mrb[195].mxu1  ;;  %v12712_v48 = vpop.f32.mrb[227].mxu0 }
0x3110   :  { %v10954_v24 = vadd.f32 %v12688_v31, %v10726_v9 }
0x3112   :  { %v10994_v21 = vadd.f32 %v12710_v39, %v10954_v24 }
0x3114   :  { %v10999_v36 = vadd.f32 %v10994_v21, %v17531_v37 }
0x3116   :  { %v11000_v20 = vsel %vm5661_vm10, %v10999_v36, 0.0 }
0x3117   :  { %11001 = vadd.xlane.f32.xlu0 %v11000_v20 }
0x31a4   :  { %v11002_v14 = vpop.xlane.xlu0 %11001 }
0x31a5   :  { %v11003_v57 = vmul.f32 0.0078125, %v11002_v14 }
0x31a7   :  { %v11004_v37 = vsub.f32 %v10999_v36, %v11003_v57 }
0x31a9   :  { %v11005_v53 = vmul.f32 %v11004_v37, %v11004_v37 }
0x31ab   :  { %v11006_v47 = vsel %vm5661_vm10, %v11005_v53, 0.0 }
0x31ac   :  { %11007 = vadd.xlane.f32.xlu1 %v11006_v47 }
0x3239   :  { %v11008_v44 = vpop.xlane.xlu1 %11007 }
0x323a   :  { %v11009_v40 = vmul.f32 0.0078125, %v11008_v44 }
0x323c   :  { %v11010_v59 = vadd.f32 1e-05, %v11009_v40 }
0x323e   :  { %14320 = vrsqrt.f32 %v11010_v59 }
0x3248   :  { %v14321_v29 = vpop.eup %14320 }
0x3249   :  { %v11012_v60 = vmul.f32 %v14321_v29, %v11004_v37 }
0x324b   :  { %v11017_v12 = vmul.f32 %v11016_v46, %v11012_v60 }
0x324d   :  { %v11022_v11 = vadd.f32 %v11021_v15, %v11017_v12 }
0x324f   :  { %v11039_v52 = vpack.c.bf16 %v11022_v11, %v11022_v11 }
0x3251   :  { %13370 = vmatmul.mubr.bf16.vlgmr.msra.gmra.mrb[196].mxu1 %v11039_v52 }
0x3324   :  { %v11126_v6 = vpop.f32.mrb[196].mxu1 }
0x3325   :  { %v11127_v2 = vadd.f32 %v11126_v6, %v11043_v0  ;;  %v13371_v42 = vpop.f32.mrb[197].mxu1 }
0x3326   :  { %v11129_v13 = vpop.f32.mrb[198].mxu1 }
0x3327   :  { %v11132_v5 = vmax.f32 %v11127_v2, 0.0  ;;  %v13372_v32 = vpop.f32.mrb[199].mxu1 }
0x3329   :  { %v11137_v7 = vmul.f32 %v12211_v56, %v11132_v5 }
0x332b   :  { %v11139_v10 = vsel %vm11138_vm0, %v11137_v7, 0.0 }
0x332c   :  { %11140 = vadd.xlane.f32.xlu0 %v11139_v10 }
0x33b9   :  { %v11141_v22 = vpop.xlane.xlu0 %11140 }
0x33ba   :  { %v11142_v34 = vadd.f32 %v11141_v22, %v11043_v0 }
0x33bc   :  { %11144 = vrot.lane.b32.xlu1 %v11142_v34, %s14487_s12 }
0x342e   :  { %v11145_v49 = vpop.permute.xlu1 %11144 }
0x342f   :  { %11148 = vst.msk [vmem:[%s17613_s16] sm:$0x3] %vm11147_vm3, %v11145_v49 }
0x3430   :  { %11153 = vsyncpa [#allocation3], 1 }
0x3431   :  { %11154 = vsyncpa [#allocation5], 1 }
0x3432   :  { %11155 = vsyncpa [#allocation8], 1 }
0x3433   :  { %11156 = vsyncpa [#allocation11], 1 }

</bundles_post_ra>
